<compile_context>
chip_gen: v5e
topology: v5e:2x2
jax: 0.10.0
libtpu: 0.0.40
codegen_flags: <defaults>
</compile_context>

<pallas_src>
import functools

import jax
import jax.numpy as jnp
from jax.experimental import pallas as pl
from jax.experimental.pallas import tpu as pltpu

F_HID = 32                      # recurrent / conv filters
CONV_KERNELS = (5, 3)
CONV_DILATIONS = (1, 2)
FINAL_KERNEL, FINAL_DILATION = 3, 1
TIME_STEPS = 4                  # constructor arg (default 8); small for demo
SIGMA = 1.0


def _largest_tile(n, candidates=(1024, 512, 256, 128)):
    for t in candidates:
        if n % t == 0:
            return t
    return n


# ----------------------------------------------------------------------------
# Fused conv (implicit GEMM) + ConvGRUCell kernel  (one pallas_call per layer)
# ----------------------------------------------------------------------------
# Layout: activations are channels-first, spatially padded and row-flattened:
#   xp : (Cin, Hpad*Wp)  with  Hpad = H + 2p + 1,  Wp = W + 2p,  p = d*(K-1)/2
#   hx : (F,   H*Wp)     (columns x >= W of each row are ignored "junk")
# conv tap (kh, kw):  out += w[kh,kw] @ xp[:, off : off+H*Wp],
#   off = kh*d*Wp + kw*d   (valid columns reproduce the 'same' dilated conv).


def _conv_gru_kernel(xp_ref, hx_ref, wc_ref, bc_ref, wih_ref, bih_ref,
                     whh_ref, bhh_ref, out_ref, *, K, dil, Wp, M, F):
    hx = hx_ref[0].astype(jnp.float32)                       # (F, M)
    acc = jnp.zeros((F, M), jnp.float32)
    for kidx in range(K * K):                                # unrolled taps
        kh, kw = divmod(kidx, K)
        off = kh * dil * Wp + kw * dil
        x_tap = xp_ref[0, :, off:off + M]                    # (Cin, M)
        acc = acc + jnp.dot(wc_ref[kidx], x_tap,
                            preferred_element_type=jnp.float32)
    conv = jnp.maximum(acc + bc_ref[...], 0.0)               # bias + ReLU, (F, M)
    # ConvGRUCell (1x1 convs == per-pixel matmuls), gates on sublane rows.
    ih = jnp.dot(wih_ref[...], conv, preferred_element_type=jnp.float32) + bih_ref[...]
    hh = jnp.dot(whh_ref[...], hx, preferred_element_type=jnp.float32) + bhh_ref[...]
    r = jax.nn.sigmoid(ih[:F] + hh[:F])
    z = jax.nn.sigmoid(ih[F:2 * F] + hh[F:2 * F])
    n = jnp.tanh(ih[2 * F:] + r * hh[2 * F:])
    # h' = n + z*(hx - n) == (1-z)*n + z*hx
    out_ref[0] = (n + z * (hx - n)).astype(out_ref.dtype)


def fused_conv_gru(xp, hx, wc, bc, wih, bih, whh, bhh, *, K, dil, Wp, M):
    B, Cin, Mp = xp.shape
    F = hx.shape[1]
    kern = functools.partial(_conv_gru_kernel, K=K, dil=dil, Wp=Wp, M=M, F=F)
    return pl.pallas_call(
        kern,
        out_shape=jax.ShapeDtypeStruct((B, F, M), jnp.float32),
        grid=(B,),
        in_specs=[
            pl.BlockSpec((1, Cin, Mp), lambda b: (b, 0, 0)),
            pl.BlockSpec((1, F, M), lambda b: (b, 0, 0)),
            pl.BlockSpec((K * K, F, Cin), lambda b: (0, 0, 0)),
            pl.BlockSpec((F, 1), lambda b: (0, 0)),
            pl.BlockSpec((3 * F, F), lambda b: (0, 0)),
            pl.BlockSpec((3 * F, 1), lambda b: (0, 0)),
            pl.BlockSpec((3 * F, F), lambda b: (0, 0)),
            pl.BlockSpec((3 * F, 1), lambda b: (0, 0)),
        ],
        out_specs=pl.BlockSpec((1, F, M), lambda b: (b, 0, 0)),
        compiler_params=pltpu.CompilerParams(dimension_semantics=("parallel",)),
    )(xp, hx, wc, bc, wih, bih, whh, bhh)


# ----------------------------------------------------------------------------
# Fused final 3x3 conv (no bias/act) + prediction update kernel
# prediction is carried as a lane-dense (8, H*Wpf) slab; rows 0/1 = re/im,
# rows 2..7 / columns x >= W are unused padding.
# ----------------------------------------------------------------------------


def _final_pred_kernel(xp_ref, pred_ref, wf_ref, out_ref, *, K, Wp, M):
    acc = pred_ref[0].astype(jnp.float32)                    # (8, M)
    for kidx in range(K * K):
        kh, kw = divmod(kidx, K)
        off = kh * Wp + kw
        x_tap = xp_ref[0, :, off:off + M]                    # (F, M)
        acc = acc + jnp.dot(wf_ref[kidx], x_tap,
                            preferred_element_type=jnp.float32)
    out_ref[0] = acc.astype(out_ref.dtype)


def final_pred_update(xp, pred_grid, wf, *, K, Wp, M):
    B, F, Mp = xp.shape
    kern = functools.partial(_final_pred_kernel, K=K, Wp=Wp, M=M)
    return pl.pallas_call(
        kern,
        out_shape=jax.ShapeDtypeStruct((B, 8, M), jnp.float32),
        grid=(B,),
        in_specs=[
            pl.BlockSpec((1, F, Mp), lambda b: (b, 0, 0)),
            pl.BlockSpec((1, 8, M), lambda b: (b, 0, 0)),
            pl.BlockSpec((K * K, 8, F), lambda b: (0, 0, 0)),
        ],
        out_specs=pl.BlockSpec((1, 8, M), lambda b: (b, 0, 0)),
        compiler_params=pltpu.CompilerParams(dimension_semantics=("parallel",)),
    )(xp, pred_grid, wf)


# ----------------------------------------------------------------------------
# Coil expand / reduce / masked residual kernels (tiled, lane-dense HW axis)
# ----------------------------------------------------------------------------


def _coil_expand_kernel(p_ref, sr_ref, si_ref, er_ref, ei_ref):
    pr = p_ref[0, 0:1, :]                                    # (1, thw)
    pi = p_ref[0, 1:2, :]
    sr, si = sr_ref[0], si_ref[0]                            # (C, thw)
    er_ref[0] = pr * sr - pi * si
    ei_ref[0] = pr * si + pi * sr


def coil_expand(pred2, sr, si):
    B, C, HW = sr.shape
    thw = _largest_tile(HW)
    spec_c = pl.BlockSpec((1, C, thw), lambda b, t: (b, 0, t))
    return pl.pallas_call(
        _coil_expand_kernel,
        out_shape=(jax.ShapeDtypeStruct((B, C, HW), jnp.float32),
                   jax.ShapeDtypeStruct((B, C, HW), jnp.float32)),
        grid=(B, HW // thw),
        in_specs=[pl.BlockSpec((1, 2, thw), lambda b, t: (b, 0, t)),
                  spec_c, spec_c],
        out_specs=(spec_c, spec_c),
        compiler_params=pltpu.CompilerParams(
            dimension_semantics=("parallel", "parallel")),
    )(pred2, sr, si)


def _coil_reduce_kernel(ir_ref, ii_ref, sr_ref, si_ref, o_ref):
    ir, ii = ir_ref[0], ii_ref[0]                            # (C, thw)
    sr, si = sr_ref[0], si_ref[0]
    re = jnp.sum(ir * sr + ii * si, axis=0, keepdims=True)
    im = jnp.sum(ii * sr - ir * si, axis=0, keepdims=True)
    o_ref[0] = jnp.concatenate([re, im], axis=0)             # (2, thw)


def coil_reduce(ir, ii, sr, si):
    B, C, HW = sr.shape
    thw = _largest_tile(HW)
    spec_c = pl.BlockSpec((1, C, thw), lambda b, t: (b, 0, t))
    return pl.pallas_call(
        _coil_reduce_kernel,
        out_shape=jax.ShapeDtypeStruct((B, 2, HW), jnp.float32),
        grid=(B, HW // thw),
        in_specs=[spec_c, spec_c, spec_c, spec_c],
        out_specs=pl.BlockSpec((1, 2, thw), lambda b, t: (b, 0, t)),
        compiler_params=pltpu.CompilerParams(
            dimension_semantics=("parallel", "parallel")),
    )(ir, ii, sr, si)


def _masked_diff_kernel(m_ref, k_ref, y_ref, o_ref):
    o_ref[...] = m_ref[...] * (k_ref[...] - y_ref[...])


def masked_diff(m, k, y):
    R, N = m.shape
    tc = _largest_tile(N)
    spec = pl.BlockSpec((R, tc), lambda t: (0, t))
    return pl.pallas_call(
        _masked_diff_kernel,
        out_shape=jax.ShapeDtypeStruct((R, N), jnp.float32),
        grid=(N // tc,),
        in_specs=[spec, spec, spec],
        out_specs=spec,
        compiler_params=pltpu.CompilerParams(dimension_semantics=("parallel",)),
    )(m, k, y)


# ----------------------------------------------------------------------------
# Plain-JAX glue (FFTs, spatial padding, parameter preparation)
# ----------------------------------------------------------------------------


def fft2c(x):
    xc = x[..., 0] + 1j * x[..., 1]
    kc = jnp.fft.fft2(xc, axes=(-2, -1), norm="backward")
    return jnp.stack([kc.real, kc.imag], axis=-1).astype(x.dtype)


def ifft2c(x):
    xc = x[..., 0] + 1j * x[..., 1]
    ic = jnp.fft.ifft2(xc, axes=(-2, -1), norm="backward")
    return jnp.stack([ic.real, ic.imag], axis=-1).astype(x.dtype)


def _pad_rowgrid(x_bchw, p):
    """(B,C,H,W) -> (B, C, (H+2p+1)*(W+2p)) zero-padded, row-flattened."""
    B, C, H, W = x_bchw.shape
    xp = jnp.pad(x_bchw, ((0, 0), (0, 0), (p, p + 1), (p, p)))
    return xp.reshape(B, C, (H + 2 * p + 1) * (W + 2 * p))


def _prep_params(p):
    """Hoisted weight re-layouts: torch OIHW conv weights -> per-tap (KK,O,I)."""
    def conv_taps(w_oihw, pad_in=0, pad_out=0):
        O, I, K, _ = w_oihw.shape
        t = jnp.transpose(w_oihw, (2, 3, 0, 1)).reshape(K * K, O, I)
        if pad_in:
            t = jnp.pad(t, ((0, 0), (0, 0), (0, pad_in)))
        if pad_out:
            t = jnp.pad(t, ((0, 0), (0, pad_out), (0, 0)))
        return t

    F = F_HID
    return {
        "wc0": conv_taps(p["conv0_w"], pad_in=4),            # (25, 32, 8)
        "bc0": p["conv0_b"].reshape(F, 1),
        "wih0": p["gru0_wih"], "bih0": p["gru0_bih"].reshape(3 * F, 1),
        "whh0": p["gru0_whh"], "bhh0": p["gru0_bhh"].reshape(3 * F, 1),
        "wc1": conv_taps(p["conv1_w"]),                      # (9, 32, 32)
        "bc1": p["conv1_b"].reshape(F, 1),
        "wih1": p["gru1_wih"], "bih1": p["gru1_bih"].reshape(3 * F, 1),
        "whh1": p["gru1_whh"], "bhh1": p["gru1_bhh"].reshape(3 * F, 1),
        "wf": conv_taps(p["final_w"], pad_out=6),            # (9, 8, 32)
    }


def log_likelihood_gradient(pred_valid2, mk_flat, mask_flat, sr, si, shape, sigma):
    """rim_utils.log_likelihood_gradient -> (B, 4, H, W)."""
    B, C, H, W = shape
    HW = H * W
    er, ei = coil_expand(pred_valid2.reshape(B, 2, HW), sr, si)      # Pallas
    se = jnp.stack([er.reshape(B, C, H, W), ei.reshape(B, C, H, W)], axis=-1)
    ksp = fft2c(se)
    resid = masked_diff(mask_flat, ksp.reshape(B * C, HW * 2), mk_flat)  # Pallas
    img = ifft2c(resid.reshape(B, C, H, W, 2))
    grad2 = coil_reduce(img[..., 0].reshape(B, C, HW),
                        img[..., 1].reshape(B, C, HW), sr, si)       # Pallas
    llg = jnp.concatenate([pred_valid2.reshape(B, 2, HW), grad2], axis=1)
    return (llg / (sigma ** 2)).reshape(B, 4, H, W)


def rim_block_forward(y, masked_kspace, sens, mask, params):
    """RIMBlock.forward (no_dc=True, 2D, 1 slice) -> (predictions list, hx list)."""
    B, C, H, W, _ = y.shape
    HW = H * W
    sr = sens[..., 0].reshape(B, C, HW)
    si = sens[..., 1].reshape(B, C, HW)
    mask_flat = mask.reshape(B * C, HW * 2)
    mk_flat = masked_kspace.reshape(B * C, HW * 2)

    K0, d0 = CONV_KERNELS[0], CONV_DILATIONS[0]
    K1, d1 = CONV_KERNELS[1], CONV_DILATIONS[1]
    Kf, df = FINAL_KERNEL, FINAL_DILATION
    p0, p1, pf = d0 * (K0 - 1) // 2, d1 * (K1 - 1) // 2, df * (Kf - 1) // 2
    Wp0, Wp1, Wpf = W + 2 * p0, W + 2 * p1, W + 2 * pf
    M0, M1, Mf = H * Wp0, H * Wp1, H * Wpf

    pp = _prep_params(params)                                # hoisted out of loop

    # prediction = SENSE coil-combination of ifft2(y), stored as (B, 8, H*Wpf)
    img0 = ifft2c(y)
    pred2 = coil_reduce(img0[..., 0].reshape(B, C, HW),
                        img0[..., 1].reshape(B, C, HW), sr, si)      # (B,2,HW)
    pred_grid = jnp.pad(pred2.reshape(B, 2, H, W),
                        ((0, 0), (0, 6), (0, 0), (0, Wpf - W))).reshape(B, 8, Mf)

    # hx kept on each layer's row grid (B, F, H*Wp)
    hx = [jnp.zeros((B, F_HID, M0), jnp.float32),
          jnp.zeros((B, F_HID, M1), jnp.float32)]

    predictions = []
    for _ in range(TIME_STEPS):
        pred_valid2 = pred_grid.reshape(B, 8, H, Wpf)[:, :2, :, :W]  # (B,2,H,W)
        llg = log_likelihood_gradient(pred_valid2, mk_flat, mask_flat,
                                      sr, si, (B, C, H, W), SIGMA)   # (B,4,H,W)

        # layer 0: pad channels 4->8 (zeros) + spatial pad, then fused conv+GRU
        x0 = jnp.pad(llg, ((0, 0), (0, 4), (p0, p0 + 1), (p0, p0)))
        x0 = x0.reshape(B, 8, (H + 2 * p0 + 1) * Wp0)
        hx[0] = fused_conv_gru(x0, hx[0], pp["wc0"], pp["bc0"],
                               pp["wih0"], pp["bih0"], pp["whh0"], pp["bhh0"],
                               K=K0, dil=d0, Wp=Wp0, M=M0)

        # layer 1: de-junk hx0, re-pad for the dilated 3x3 conv, fused conv+GRU
        h0v = hx[0].reshape(B, F_HID, H, Wp0)[..., :W]
        x1 = jnp.pad(h0v, ((0, 0), (0, 0), (p1, p1 + 1), (p1, p1)))
        x1 = x1.reshape(B, F_HID, (H + 2 * p1 + 1) * Wp1)
        hx[1] = fused_conv_gru(x1, hx[1], pp["wc1"], pp["bc1"],
                               pp["wih1"], pp["bih1"], pp["whh1"], pp["bhh1"],
                               K=K1, dil=d1, Wp=Wp1, M=M1)

        # final 3x3 conv (no bias) + prediction update, fused and lane-dense
        h1v = hx[1].reshape(B, F_HID, H, Wp1)[..., :W]
        xf = jnp.pad(h1v, ((0, 0), (0, 0), (pf, pf + 1), (pf, pf)))
        xf = xf.reshape(B, F_HID, (H + 2 * pf + 1) * Wpf)
        pred_grid = final_pred_update(xf, pred_grid, pp["wf"], K=Kf, Wp=Wpf, M=Mf)

        pred_out = pred_grid.reshape(B, 8, H, Wpf)[:, :2, :, :W]     # (B,2,H,W)
        predictions.append(jnp.transpose(pred_out, (0, 2, 3, 1)))    # (B,H,W,2)

    hx_out = [h.reshape(B, F_HID, H, Wp)[..., :W]
              for h, Wp in zip(hx, (Wp0, Wp1))]                      # [B,F,H,W]
    return predictions, hx_out


def init_params(key):
    ks = jax.random.split(key, 13)
    F = F_HID

    def w(k, shape, scale):
        return jax.random.normal(k, shape, jnp.float32) * scale

    # Conv weights in torch OIHW layout; GRU 1x1-conv weights stored as
    # (3F, C_in) matrices applied channels-first (W @ x).
    return {
        "conv0_w": w(ks[0], (F, 4, CONV_KERNELS[0], CONV_KERNELS[0]), 0.05),
        "conv0_b": w(ks[1], (F,), 0.01),
        "gru0_wih": w(ks[2], (3 * F, F), 0.05),
        "gru0_bih": w(ks[3], (3 * F,), 0.01),
        "gru0_whh": w(ks[4], (3 * F, F), 0.05),
        "gru0_bhh": w(ks[5], (3 * F,), 0.01),
        "conv1_w": w(ks[6], (F, F, CONV_KERNELS[1], CONV_KERNELS[1]), 0.05),
        "conv1_b": w(ks[7], (F,), 0.01),
        "gru1_wih": w(ks[8], (3 * F, F), 0.05),
        "gru1_bih": w(ks[9], (3 * F,), 0.01),
        "gru1_whh": w(ks[10], (3 * F, F), 0.05),
        "gru1_bhh": w(ks[11], (3 * F,), 0.01),
        "final_w": w(ks[12], (2, F, FINAL_KERNEL, FINAL_KERNEL), 0.05),
    }


if __name__ == "__main__":
    key = jax.random.PRNGKey(0)
    B, C, H, W = 2, 4, 16, 16
    k1, k2, k3, k4 = jax.random.split(key, 4)

    y = jax.random.normal(k1, (B, C, H, W, 2), jnp.float32)
    sens = jax.random.normal(k2, (B, C, H, W, 2), jnp.float32) * 0.5
    # column undersampling mask, broadcast to [B, C, H, W, 2] (0/1 float)
    col_mask = (jax.random.uniform(k3, (1, 1, 1, W, 1)) > 0.5).astype(jnp.float32)
    mask = jnp.broadcast_to(col_mask, (B, C, H, W, 2))
    masked_kspace = y * mask

    params = init_params(k4)

    fwd = jax.jit(rim_block_forward)
    predictions, hx = fwd(y, masked_kspace, sens, mask, params)
    jax.block_until_ready(predictions[-1])
    jax.block_until_ready(hx[-1])

    assert predictions[-1].shape == (B, H, W, 2)
    assert hx[0].shape == (B, F_HID, H, W)
    assert hx[1].shape == (B, F_HID, H, W)
    print("KERNEL_OK")
</pallas_src>

<mosaic_0001>
module attributes {stable_mosaic.version = 11 : i64} {
  func.func @_coil_reduce_kernel(%arg0: i32, %arg1: i32, %arg2: memref<1x4x256xf32, #tpu.memory_space<vmem>>, %arg3: memref<1x4x256xf32, #tpu.memory_space<vmem>>, %arg4: memref<1x4x256xf32, #tpu.memory_space<vmem>>, %arg5: memref<1x4x256xf32, #tpu.memory_space<vmem>>, %arg6: memref<1x2x256xf32, #tpu.memory_space<vmem>>) attributes {dimension_semantics = [#tpu.dimension_semantics<parallel>, #tpu.dimension_semantics<parallel>], iteration_bounds = array<i64: 2, 1>, scalar_prefetch = 0 : i64, scratch_operands = 0 : i64, tpu.core_type = #tpu.core_type<tc>, window_params = [{transform_indices = @transform_0, window_bounds = array<i64: 1, 4, 256>}, {transform_indices = @transform_1, window_bounds = array<i64: 1, 4, 256>}, {transform_indices = @transform_2, window_bounds = array<i64: 1, 4, 256>}, {transform_indices = @transform_3, window_bounds = array<i64: 1, 4, 256>}, {transform_indices = @transform_4, window_bounds = array<i64: 1, 2, 256>}]} {
    %c0 = arith.constant 0 : index
    %c0_0 = arith.constant 0 : index
    %c0_1 = arith.constant 0 : index
    %0 = vector.load %arg2[%c0, %c0_0, %c0_1] : memref<1x4x256xf32, #tpu.memory_space<vmem>>, vector<1x4x256xf32>
    %1 = vector.shape_cast %0 : vector<1x4x256xf32> to vector<4x256xf32>
    %c0_2 = arith.constant 0 : index
    %c0_3 = arith.constant 0 : index
    %c0_4 = arith.constant 0 : index
    %2 = vector.load %arg3[%c0_2, %c0_3, %c0_4] : memref<1x4x256xf32, #tpu.memory_space<vmem>>, vector<1x4x256xf32>
    %3 = vector.shape_cast %2 : vector<1x4x256xf32> to vector<4x256xf32>
    %c0_5 = arith.constant 0 : index
    %c0_6 = arith.constant 0 : index
    %c0_7 = arith.constant 0 : index
    %4 = vector.load %arg4[%c0_5, %c0_6, %c0_7] : memref<1x4x256xf32, #tpu.memory_space<vmem>>, vector<1x4x256xf32>
    %5 = vector.shape_cast %4 : vector<1x4x256xf32> to vector<4x256xf32>
    %c0_8 = arith.constant 0 : index
    %c0_9 = arith.constant 0 : index
    %c0_10 = arith.constant 0 : index
    %6 = vector.load %arg5[%c0_8, %c0_9, %c0_10] : memref<1x4x256xf32, #tpu.memory_space<vmem>>, vector<1x4x256xf32>
    %7 = vector.shape_cast %6 : vector<1x4x256xf32> to vector<4x256xf32>
    %8 = arith.mulf %1, %5 : vector<4x256xf32>
    %9 = arith.mulf %3, %7 : vector<4x256xf32>
    %10 = arith.addf %8, %9 : vector<4x256xf32>
    %cst = arith.constant dense<0.000000e+00> : vector<256xf32>
    %11 = vector.multi_reduction <add>, %10, %cst [0] : vector<4x256xf32> to vector<256xf32>
    %12 = vector.shape_cast %11 : vector<256xf32> to vector<1x256xf32>
    %13 = arith.mulf %3, %5 : vector<4x256xf32>
    %14 = arith.mulf %1, %7 : vector<4x256xf32>
    %15 = arith.subf %13, %14 : vector<4x256xf32>
    %cst_11 = arith.constant dense<0.000000e+00> : vector<256xf32>
    %16 = vector.multi_reduction <add>, %15, %cst_11 [0] : vector<4x256xf32> to vector<256xf32>
    %17 = vector.shape_cast %16 : vector<256xf32> to vector<1x256xf32>
    %18 = tpu.concatenate %12, %17 in 0 : vector<1x256xf32>, vector<1x256xf32> -> vector<2x256xf32>
    %c0_12 = arith.constant 0 : index
    %c0_13 = arith.constant 0 : index
    %c0_14 = arith.constant 0 : index
    %19 = vector.load %arg6[%c0_12, %c0_13, %c0_14] : memref<1x2x256xf32, #tpu.memory_space<vmem>>, vector<1x2x256xf32>
    %20 = vector.shape_cast %19 : vector<1x2x256xf32> to vector<2x256xf32>
    %21 = vector.shape_cast %18 : vector<2x256xf32> to vector<1x2x256xf32>
    tpu.vector_store %arg6[%c0_12, %c0_13, %c0_14], %21 {strides = array<i32>} : memref<1x2x256xf32, #tpu.memory_space<vmem>>, vector<1x2x256xf32>,
    return
  }
  func.func @transform_0(%arg0: i32, %arg1: i32) -> (i32, i32, i32) {
    %c0_i32 = arith.constant 0 : i32
    %c0_i32_0 = arith.constant 0 : i32
    return %arg0, %c0_i32, %arg1 : i32, i32, i32
  }
  func.func @transform_1(%arg0: i32, %arg1: i32) -> (i32, i32, i32) {
    %c0_i32 = arith.constant 0 : i32
    %c0_i32_0 = arith.constant 0 : i32
    return %arg0, %c0_i32, %arg1 : i32, i32, i32
  }
  func.func @transform_2(%arg0: i32, %arg1: i32) -> (i32, i32, i32) {
    %c0_i32 = arith.constant 0 : i32
    %c0_i32_0 = arith.constant 0 : i32
    return %arg0, %c0_i32, %arg1 : i32, i32, i32
  }
  func.func @transform_3(%arg0: i32, %arg1: i32) -> (i32, i32, i32) {
    %c0_i32 = arith.constant 0 : i32
    %c0_i32_0 = arith.constant 0 : i32
    return %arg0, %c0_i32, %arg1 : i32, i32, i32
  }
  func.func @transform_4(%arg0: i32, %arg1: i32) -> (i32, i32, i32) {
    %c0_i32 = arith.constant 0 : i32
    %c0_i32_0 = arith.constant 0 : i32
    return %arg0, %c0_i32, %arg1 : i32, i32, i32
  }
}

module attributes {stable_mosaic.version = 11 : i64} {
  func.func @_coil_expand_kernel(%arg0: i32, %arg1: i32, %arg2: memref<1x2x256xf32, #tpu.memory_space<vmem>>, %arg3: memref<1x4x256xf32, #tpu.memory_space<vmem>>, %arg4: memref<1x4x256xf32, #tpu.memory_space<vmem>>, %arg5: memref<1x4x256xf32, #tpu.memory_space<vmem>>, %arg6: memref<1x4x256xf32, #tpu.memory_space<vmem>>) attributes {dimension_semantics = [#tpu.dimension_semantics<parallel>, #tpu.dimension_semantics<parallel>], iteration_bounds = array<i64: 2, 1>, scalar_prefetch = 0 : i64, scratch_operands = 0 : i64, tpu.core_type = #tpu.core_type<tc>, window_params = [{transform_indices = @transform_0, window_bounds = array<i64: 1, 2, 256>}, {transform_indices = @transform_1, window_bounds = array<i64: 1, 4, 256>}, {transform_indices = @transform_2, window_bounds = array<i64: 1, 4, 256>}, {transform_indices = @transform_3, window_bounds = array<i64: 1, 4, 256>}, {transform_indices = @transform_4, window_bounds = array<i64: 1, 4, 256>}]} {
    %c0 = arith.constant 0 : index
    %c0_0 = arith.constant 0 : index
    %c0_1 = arith.constant 0 : index
    %0 = vector.load %arg2[%c0, %c0_0, %c0_1] : memref<1x2x256xf32, #tpu.memory_space<vmem>>, vector<1x1x256xf32>
    %1 = vector.shape_cast %0 : vector<1x1x256xf32> to vector<1x256xf32>
    %c0_2 = arith.constant 0 : index
    %c1 = arith.constant 1 : index
    %c0_3 = arith.constant 0 : index
    %2 = vector.load %arg2[%c0_2, %c1, %c0_3] : memref<1x2x256xf32, #tpu.memory_space<vmem>>, vector<1x1x256xf32>
    %3 = vector.shape_cast %2 : vector<1x1x256xf32> to vector<1x256xf32>
    %c0_4 = arith.constant 0 : index
    %c0_5 = arith.constant 0 : index
    %c0_6 = arith.constant 0 : index
    %4 = vector.load %arg3[%c0_4, %c0_5, %c0_6] : memref<1x4x256xf32, #tpu.memory_space<vmem>>, vector<1x4x256xf32>
    %5 = vector.shape_cast %4 : vector<1x4x256xf32> to vector<4x256xf32>
    %c0_7 = arith.constant 0 : index
    %c0_8 = arith.constant 0 : index
    %c0_9 = arith.constant 0 : index
    %6 = vector.load %arg4[%c0_7, %c0_8, %c0_9] : memref<1x4x256xf32, #tpu.memory_space<vmem>>, vector<1x4x256xf32>
    %7 = vector.shape_cast %6 : vector<1x4x256xf32> to vector<4x256xf32>
    %8 = vector.broadcast %1 : vector<1x256xf32> to vector<4x256xf32>
    %9 = arith.mulf %8, %5 : vector<4x256xf32>
    %10 = vector.broadcast %3 : vector<1x256xf32> to vector<4x256xf32>
    %11 = arith.mulf %10, %7 : vector<4x256xf32>
    %12 = arith.subf %9, %11 : vector<4x256xf32>
    %c0_10 = arith.constant 0 : index
    %c0_11 = arith.constant 0 : index
    %c0_12 = arith.constant 0 : index
    %13 = vector.load %arg5[%c0_10, %c0_11, %c0_12] : memref<1x4x256xf32, #tpu.memory_space<vmem>>, vector<1x4x256xf32>
    %14 = vector.shape_cast %13 : vector<1x4x256xf32> to vector<4x256xf32>
    %15 = vector.shape_cast %12 : vector<4x256xf32> to vector<1x4x256xf32>
    tpu.vector_store %arg5[%c0_10, %c0_11, %c0_12], %15 {strides = array<i32>} : memref<1x4x256xf32, #tpu.memory_space<vmem>>, vector<1x4x256xf32>,
    %16 = vector.broadcast %1 : vector<1x256xf32> to vector<4x256xf32>
    %17 = arith.mulf %16, %7 : vector<4x256xf32>
    %18 = vector.broadcast %3 : vector<1x256xf32> to vector<4x256xf32>
    %19 = arith.mulf %18, %5 : vector<4x256xf32>
    %20 = arith.addf %17, %19 : vector<4x256xf32>
    %c0_13 = arith.constant 0 : index
    %c0_14 = arith.constant 0 : index
    %c0_15 = arith.constant 0 : index
    %21 = vector.load %arg6[%c0_13, %c0_14, %c0_15] : memref<1x4x256xf32, #tpu.memory_space<vmem>>, vector<1x4x256xf32>
    %22 = vector.shape_cast %21 : vector<1x4x256xf32> to vector<4x256xf32>
    %23 = vector.shape_cast %20 : vector<4x256xf32> to vector<1x4x256xf32>
    tpu.vector_store %arg6[%c0_13, %c0_14, %c0_15], %23 {strides = array<i32>} : memref<1x4x256xf32, #tpu.memory_space<vmem>>, vector<1x4x256xf32>,
    return
  }
  func.func @transform_0(%arg0: i32, %arg1: i32) -> (i32, i32, i32) {
    %c0_i32 = arith.constant 0 : i32
    %c0_i32_0 = arith.constant 0 : i32
    return %arg0, %c0_i32, %arg1 : i32, i32, i32
  }
  func.func @transform_1(%arg0: i32, %arg1: i32) -> (i32, i32, i32) {
    %c0_i32 = arith.constant 0 : i32
    %c0_i32_0 = arith.constant 0 : i32
    return %arg0, %c0_i32, %arg1 : i32, i32, i32
  }
  func.func @transform_2(%arg0: i32, %arg1: i32) -> (i32, i32, i32) {
    %c0_i32 = arith.constant 0 : i32
    %c0_i32_0 = arith.constant 0 : i32
    return %arg0, %c0_i32, %arg1 : i32, i32, i32
  }
  func.func @transform_3(%arg0: i32, %arg1: i32) -> (i32, i32, i32) {
    %c0_i32 = arith.constant 0 : i32
    %c0_i32_0 = arith.constant 0 : i32
    return %arg0, %c0_i32, %arg1 : i32, i32, i32
  }
  func.func @transform_4(%arg0: i32, %arg1: i32) -> (i32, i32, i32) {
    %c0_i32 = arith.constant 0 : i32
    %c0_i32_0 = arith.constant 0 : i32
    return %arg0, %c0_i32, %arg1 : i32, i32, i32
  }
}

module attributes {stable_mosaic.version = 11 : i64} {
  func.func @_masked_diff_kernel(%arg0: i32, %arg1: memref<8x512xf32, #tpu.memory_space<vmem>>, %arg2: memref<8x512xf32, #tpu.memory_space<vmem>>, %arg3: memref<8x512xf32, #tpu.memory_space<vmem>>, %arg4: memref<8x512xf32, #tpu.memory_space<vmem>>) attributes {dimension_semantics = [#tpu.dimension_semantics<parallel>], iteration_bounds = array<i64: 1>, scalar_prefetch = 0 : i64, scratch_operands = 0 : i64, tpu.core_type = #tpu.core_type<tc>, window_params = [{transform_indices = @transform_0, window_bounds = array<i64: 8, 512>}, {transform_indices = @transform_1, window_bounds = array<i64: 8, 512>}, {transform_indices = @transform_2, window_bounds = array<i64: 8, 512>}, {transform_indices = @transform_3, window_bounds = array<i64: 8, 512>}]} {
    %c0 = arith.constant 0 : index
    %c0_0 = arith.constant 0 : index
    %0 = vector.load %arg1[%c0, %c0_0] : memref<8x512xf32, #tpu.memory_space<vmem>>, vector<8x512xf32>
    %c0_1 = arith.constant 0 : index
    %c0_2 = arith.constant 0 : index
    %1 = vector.load %arg2[%c0_1, %c0_2] : memref<8x512xf32, #tpu.memory_space<vmem>>, vector<8x512xf32>
    %c0_3 = arith.constant 0 : index
    %c0_4 = arith.constant 0 : index
    %2 = vector.load %arg3[%c0_3, %c0_4] : memref<8x512xf32, #tpu.memory_space<vmem>>, vector<8x512xf32>
    %3 = arith.subf %1, %2 : vector<8x512xf32>
    %4 = arith.mulf %0, %3 : vector<8x512xf32>
    %c0_5 = arith.constant 0 : index
    %c0_6 = arith.constant 0 : index
    %5 = vector.load %arg4[%c0_5, %c0_6] : memref<8x512xf32, #tpu.memory_space<vmem>>, vector<8x512xf32>
    tpu.vector_store %arg4[%c0_5, %c0_6], %4 {strides = array<i32>} : memref<8x512xf32, #tpu.memory_space<vmem>>, vector<8x512xf32>,
    return
  }
  func.func @transform_0(%arg0: i32) -> (i32, i32) {
    %c0_i32 = arith.constant 0 : i32
    %c0_i32_0 = arith.constant 0 : i32
    return %c0_i32, %arg0 : i32, i32
  }
  func.func @transform_1(%arg0: i32) -> (i32, i32) {
    %c0_i32 = arith.constant 0 : i32
    %c0_i32_0 = arith.constant 0 : i32
    return %c0_i32, %arg0 : i32, i32
  }
  func.func @transform_2(%arg0: i32) -> (i32, i32) {
    %c0_i32 = arith.constant 0 : i32
    %c0_i32_0 = arith.constant 0 : i32
    return %c0_i32, %arg0 : i32, i32
  }
  func.func @transform_3(%arg0: i32) -> (i32, i32) {
    %c0_i32 = arith.constant 0 : i32
    %c0_i32_0 = arith.constant 0 : i32
    return %c0_i32, %arg0 : i32, i32
  }
}

module attributes {stable_mosaic.version = 11 : i64} {
  func.func @_conv_gru_kernel(%arg0: i32, %arg1: memref<1x8x420xf32, #tpu.memory_space<vmem>>, %arg2: memref<1x32x320xf32, #tpu.memory_space<vmem>>, %arg3: memref<25x32x8xf32, #tpu.memory_space<vmem>>, %arg4: memref<32x1xf32, #tpu.memory_space<vmem>>, %arg5: memref<96x32xf32, #tpu.memory_space<vmem>>, %arg6: memref<96x1xf32, #tpu.memory_space<vmem>>, %arg7: memref<96x32xf32, #tpu.memory_space<vmem>>, %arg8: memref<96x1xf32, #tpu.memory_space<vmem>>, %arg9: memref<1x32x320xf32, #tpu.memory_space<vmem>>) attributes {dimension_semantics = [#tpu.dimension_semantics<parallel>], iteration_bounds = array<i64: 2>, scalar_prefetch = 0 : i64, scratch_operands = 0 : i64, tpu.core_type = #tpu.core_type<tc>, window_params = [{transform_indices = @transform_0, window_bounds = array<i64: 1, 8, 420>}, {transform_indices = @transform_1, window_bounds = array<i64: 1, 32, 320>}, {pipeline_mode = #tpu.pipeline_mode<synchronous>, transform_indices = @transform_2, window_bounds = array<i64: 25, 32, 8>}, {pipeline_mode = #tpu.pipeline_mode<synchronous>, transform_indices = @transform_3, window_bounds = array<i64: 32, 1>}, {pipeline_mode = #tpu.pipeline_mode<synchronous>, transform_indices = @transform_4, window_bounds = array<i64: 96, 32>}, {pipeline_mode = #tpu.pipeline_mode<synchronous>, transform_indices = @transform_5, window_bounds = array<i64: 96, 1>}, {pipeline_mode = #tpu.pipeline_mode<synchronous>, transform_indices = @transform_6, window_bounds = array<i64: 96, 32>}, {pipeline_mode = #tpu.pipeline_mode<synchronous>, transform_indices = @transform_7, window_bounds = array<i64: 96, 1>}, {transform_indices = @transform_8, window_bounds = array<i64: 1, 32, 320>}]} {
    %c0 = arith.constant 0 : index
    %c0_0 = arith.constant 0 : index
    %c0_1 = arith.constant 0 : index
    %0 = vector.load %arg2[%c0, %c0_0, %c0_1] : memref<1x32x320xf32, #tpu.memory_space<vmem>>, vector<1x32x320xf32>
    %1 = vector.shape_cast %0 : vector<1x32x320xf32> to vector<32x320xf32>
    %cst = arith.constant 0.000000e+00 : f32
    %2 = vector.broadcast %cst : f32 to vector<32x320xf32>
    %c0_2 = arith.constant 0 : index
    %c0_3 = arith.constant 0 : index
    %c0_4 = arith.constant 0 : index
    %3 = vector.load %arg1[%c0_2, %c0_3, %c0_4] : memref<1x8x420xf32, #tpu.memory_space<vmem>>, vector<1x8x320xf32>
    %4 = vector.shape_cast %3 : vector<1x8x320xf32> to vector<8x320xf32>
    %c0_5 = arith.constant 0 : index
    %c0_6 = arith.constant 0 : index
    %c0_7 = arith.constant 0 : index
    %5 = vector.load %arg3[%c0_5, %c0_6, %c0_7] : memref<25x32x8xf32, #tpu.memory_space<vmem>>, vector<1x32x8xf32>
    %6 = vector.shape_cast %5 : vector<1x32x8xf32> to vector<32x8xf32>
    %cst_8 = arith.constant dense<0.000000e+00> : vector<32x320xf32>
    %7 = tpu.matmul %6, %4, %cst_8 {dimension_numbers = #tpu.dot_dimension_numbers<[1], [0], [0], [1], [0, 0, 1, 1], [], []>} : vector<32x8xf32>, vector<8x320xf32>, vector<32x320xf32> -> vector<32x320xf32>
    %8 = arith.addf %2, %7 : vector<32x320xf32>
    %c0_9 = arith.constant 0 : index
    %c0_10 = arith.constant 0 : index
    %c1 = arith.constant 1 : index
    %9 = vector.load %arg1[%c0_9, %c0_10, %c1] : memref<1x8x420xf32, #tpu.memory_space<vmem>>, vector<1x8x320xf32>
    %10 = vector.shape_cast %9 : vector<1x8x320xf32> to vector<8x320xf32>
    %c1_11 = arith.constant 1 : index
    %c0_12 = arith.constant 0 : index
    %c0_13 = arith.constant 0 : index
    %11 = vector.load %arg3[%c1_11, %c0_12, %c0_13] : memref<25x32x8xf32, #tpu.memory_space<vmem>>, vector<1x32x8xf32>
    %12 = vector.shape_cast %11 : vector<1x32x8xf32> to vector<32x8xf32>
    %cst_14 = arith.constant dense<0.000000e+00> : vector<32x320xf32>
    %13 = tpu.matmul %12, %10, %cst_14 {dimension_numbers = #tpu.dot_dimension_numbers<[1], [0], [0], [1], [0, 0, 1, 1], [], []>} : vector<32x8xf32>, vector<8x320xf32>, vector<32x320xf32> -> vector<32x320xf32>
    %14 = arith.addf %8, %13 : vector<32x320xf32>
    %c0_15 = arith.constant 0 : index
    %c0_16 = arith.constant 0 : index
    %c2 = arith.constant 2 : index
    %15 = vector.load %arg1[%c0_15, %c0_16, %c2] : memref<1x8x420xf32, #tpu.memory_space<vmem>>, vector<1x8x320xf32>
    %16 = vector.shape_cast %15 : vector<1x8x320xf32> to vector<8x320xf32>
    %c2_17 = arith.constant 2 : index
    %c0_18 = arith.constant 0 : index
    %c0_19 = arith.constant 0 : index
    %17 = vector.load %arg3[%c2_17, %c0_18, %c0_19] : memref<25x32x8xf32, #tpu.memory_space<vmem>>, vector<1x32x8xf32>
    %18 = vector.shape_cast %17 : vector<1x32x8xf32> to vector<32x8xf32>
    %cst_20 = arith.constant dense<0.000000e+00> : vector<32x320xf32>
    %19 = tpu.matmul %18, %16, %cst_20 {dimension_numbers = #tpu.dot_dimension_numbers<[1], [0], [0], [1], [0, 0, 1, 1], [], []>} : vector<32x8xf32>, vector<8x320xf32>, vector<32x320xf32> -> vector<32x320xf32>
    %20 = arith.addf %14, %19 : vector<32x320xf32>
    %c0_21 = arith.constant 0 : index
    %c0_22 = arith.constant 0 : index
    %c3 = arith.constant 3 : index
    %21 = vector.load %arg1[%c0_21, %c0_22, %c3] : memref<1x8x420xf32, #tpu.memory_space<vmem>>, vector<1x8x320xf32>
    %22 = vector.shape_cast %21 : vector<1x8x320xf32> to vector<8x320xf32>
    %c3_23 = arith.constant 3 : index
    %c0_24 = arith.constant 0 : index
    %c0_25 = arith.constant 0 : index
    %23 = vector.load %arg3[%c3_23, %c0_24, %c0_25] : memref<25x32x8xf32, #tpu.memory_space<vmem>>, vector<1x32x8xf32>
    %24 = vector.shape_cast %23 : vector<1x32x8xf32> to vector<32x8xf32>
    %cst_26 = arith.constant dense<0.000000e+00> : vector<32x320xf32>
    %25 = tpu.matmul %24, %22, %cst_26 {dimension_numbers = #tpu.dot_dimension_numbers<[1], [0], [0], [1], [0, 0, 1, 1], [], []>} : vector<32x8xf32>, vector<8x320xf32>, vector<32x320xf32> -> vector<32x320xf32>
    %26 = arith.addf %20, %25 : vector<32x320xf32>
    %c0_27 = arith.constant 0 : index
    %c0_28 = arith.constant 0 : index
    %c4 = arith.constant 4 : index
    %27 = vector.load %arg1[%c0_27, %c0_28, %c4] : memref<1x8x420xf32, #tpu.memory_space<vmem>>, vector<1x8x320xf32>
    %28 = vector.shape_cast %27 : vector<1x8x320xf32> to vector<8x320xf32>
    %c4_29 = arith.constant 4 : index
    %c0_30 = arith.constant 0 : index
    %c0_31 = arith.constant 0 : index
    %29 = vector.load %arg3[%c4_29, %c0_30, %c0_31] : memref<25x32x8xf32, #tpu.memory_space<vmem>>, vector<1x32x8xf32>
    %30 = vector.shape_cast %29 : vector<1x32x8xf32> to vector<32x8xf32>
    %cst_32 = arith.constant dense<0.000000e+00> : vector<32x320xf32>
    %31 = tpu.matmul %30, %28, %cst_32 {dimension_numbers = #tpu.dot_dimension_numbers<[1], [0], [0], [1], [0, 0, 1, 1], [], []>} : vector<32x8xf32>, vector<8x320xf32>, vector<32x320xf32> -> vector<32x320xf32>
    %32 = arith.addf %26, %31 : vector<32x320xf32>
    %c0_33 = arith.constant 0 : index
    %c0_34 = arith.constant 0 : index
    %c20 = arith.constant 20 : index
    %33 = vector.load %arg1[%c0_33, %c0_34, %c20] : memref<1x8x420xf32, #tpu.memory_space<vmem>>, vector<1x8x320xf32>
    %34 = vector.shape_cast %33 : vector<1x8x320xf32> to vector<8x320xf32>
    %c5 = arith.constant 5 : index
    %c0_35 = arith.constant 0 : index
    %c0_36 = arith.constant 0 : index
    %35 = vector.load %arg3[%c5, %c0_35, %c0_36] : memref<25x32x8xf32, #tpu.memory_space<vmem>>, vector<1x32x8xf32>
    %36 = vector.shape_cast %35 : vector<1x32x8xf32> to vector<32x8xf32>
    %cst_37 = arith.constant dense<0.000000e+00> : vector<32x320xf32>
    %37 = tpu.matmul %36, %34, %cst_37 {dimension_numbers = #tpu.dot_dimension_numbers<[1], [0], [0], [1], [0, 0, 1, 1], [], []>} : vector<32x8xf32>, vector<8x320xf32>, vector<32x320xf32> -> vector<32x320xf32>
    %38 = arith.addf %32, %37 : vector<32x320xf32>
    %c0_38 = arith.constant 0 : index
    %c0_39 = arith.constant 0 : index
    %c21 = arith.constant 21 : index
    %39 = vector.load %arg1[%c0_38, %c0_39, %c21] : memref<1x8x420xf32, #tpu.memory_space<vmem>>, vector<1x8x320xf32>
    %40 = vector.shape_cast %39 : vector<1x8x320xf32> to vector<8x320xf32>
    %c6 = arith.constant 6 : index
    %c0_40 = arith.constant 0 : index
    %c0_41 = arith.constant 0 : index
    %41 = vector.load %arg3[%c6, %c0_40, %c0_41] : memref<25x32x8xf32, #tpu.memory_space<vmem>>, vector<1x32x8xf32>
    %42 = vector.shape_cast %41 : vector<1x32x8xf32> to vector<32x8xf32>
    %cst_42 = arith.constant dense<0.000000e+00> : vector<32x320xf32>
    %43 = tpu.matmul %42, %40, %cst_42 {dimension_numbers = #tpu.dot_dimension_numbers<[1], [0], [0], [1], [0, 0, 1, 1], [], []>} : vector<32x8xf32>, vector<8x320xf32>, vector<32x320xf32> -> vector<32x320xf32>
    %44 = arith.addf %38, %43 : vector<32x320xf32>
    %c0_43 = arith.constant 0 : index
    %c0_44 = arith.constant 0 : index
    %c22 = arith.constant 22 : index
    %45 = vector.load %arg1[%c0_43, %c0_44, %c22] : memref<1x8x420xf32, #tpu.memory_space<vmem>>, vector<1x8x320xf32>
    %46 = vector.shape_cast %45 : vector<1x8x320xf32> to vector<8x320xf32>
    %c7 = arith.constant 7 : index
    %c0_45 = arith.constant 0 : index
    %c0_46 = arith.constant 0 : index
    %47 = vector.load %arg3[%c7, %c0_45, %c0_46] : memref<25x32x8xf32, #tpu.memory_space<vmem>>, vector<1x32x8xf32>
    %48 = vector.shape_cast %47 : vector<1x32x8xf32> to vector<32x8xf32>
    %cst_47 = arith.constant dense<0.000000e+00> : vector<32x320xf32>
    %49 = tpu.matmul %48, %46, %cst_47 {dimension_numbers = #tpu.dot_dimension_numbers<[1], [0], [0], [1], [0, 0, 1, 1], [], []>} : vector<32x8xf32>, vector<8x320xf32>, vector<32x320xf32> -> vector<32x320xf32>
    %50 = arith.addf %44, %49 : vector<32x320xf32>
    %c0_48 = arith.constant 0 : index
    %c0_49 = arith.constant 0 : index
    %c23 = arith.constant 23 : index
    %51 = vector.load %arg1[%c0_48, %c0_49, %c23] : memref<1x8x420xf32, #tpu.memory_space<vmem>>, vector<1x8x320xf32>
    %52 = vector.shape_cast %51 : vector<1x8x320xf32> to vector<8x320xf32>
    %c8 = arith.constant 8 : index
    %c0_50 = arith.constant 0 : index
    %c0_51 = arith.constant 0 : index
    %53 = vector.load %arg3[%c8, %c0_50, %c0_51] : memref<25x32x8xf32, #tpu.memory_space<vmem>>, vector<1x32x8xf32>
    %54 = vector.shape_cast %53 : vector<1x32x8xf32> to vector<32x8xf32>
    %cst_52 = arith.constant dense<0.000000e+00> : vector<32x320xf32>
    %55 = tpu.matmul %54, %52, %cst_52 {dimension_numbers = #tpu.dot_dimension_numbers<[1], [0], [0], [1], [0, 0, 1, 1], [], []>} : vector<32x8xf32>, vector<8x320xf32>, vector<32x320xf32> -> vector<32x320xf32>
    %56 = arith.addf %50, %55 : vector<32x320xf32>
    %c0_53 = arith.constant 0 : index
    %c0_54 = arith.constant 0 : index
    %c24 = arith.constant 24 : index
    %57 = vector.load %arg1[%c0_53, %c0_54, %c24] : memref<1x8x420xf32, #tpu.memory_space<vmem>>, vector<1x8x320xf32>
    %58 = vector.shape_cast %57 : vector<1x8x320xf32> to vector<8x320xf32>
    %c9 = arith.constant 9 : index
    %c0_55 = arith.constant 0 : index
    %c0_56 = arith.constant 0 : index
    %59 = vector.load %arg3[%c9, %c0_55, %c0_56] : memref<25x32x8xf32, #tpu.memory_space<vmem>>, vector<1x32x8xf32>
    %60 = vector.shape_cast %59 : vector<1x32x8xf32> to vector<32x8xf32>
    %cst_57 = arith.constant dense<0.000000e+00> : vector<32x320xf32>
    %61 = tpu.matmul %60, %58, %cst_57 {dimension_numbers = #tpu.dot_dimension_numbers<[1], [0], [0], [1], [0, 0, 1, 1], [], []>} : vector<32x8xf32>, vector<8x320xf32>, vector<32x320xf32> -> vector<32x320xf32>
    %62 = arith.addf %56, %61 : vector<32x320xf32>
    %c0_58 = arith.constant 0 : index
    %c0_59 = arith.constant 0 : index
    %c40 = arith.constant 40 : index
    %63 = vector.load %arg1[%c0_58, %c0_59, %c40] : memref<1x8x420xf32, #tpu.memory_space<vmem>>, vector<1x8x320xf32>
    %64 = vector.shape_cast %63 : vector<1x8x320xf32> to vector<8x320xf32>
    %c10 = arith.constant 10 : index
    %c0_60 = arith.constant 0 : index
    %c0_61 = arith.constant 0 : index
    %65 = vector.load %arg3[%c10, %c0_60, %c0_61] : memref<25x32x8xf32, #tpu.memory_space<vmem>>, vector<1x32x8xf32>
    %66 = vector.shape_cast %65 : vector<1x32x8xf32> to vector<32x8xf32>
    %cst_62 = arith.constant dense<0.000000e+00> : vector<32x320xf32>
    %67 = tpu.matmul %66, %64, %cst_62 {dimension_numbers = #tpu.dot_dimension_numbers<[1], [0], [0], [1], [0, 0, 1, 1], [], []>} : vector<32x8xf32>, vector<8x320xf32>, vector<32x320xf32> -> vector<32x320xf32>
    %68 = arith.addf %62, %67 : vector<32x320xf32>
    %c0_63 = arith.constant 0 : index
    %c0_64 = arith.constant 0 : index
    %c41 = arith.constant 41 : index
    %69 = vector.load %arg1[%c0_63, %c0_64, %c41] : memref<1x8x420xf32, #tpu.memory_space<vmem>>, vector<1x8x320xf32>
    %70 = vector.shape_cast %69 : vector<1x8x320xf32> to vector<8x320xf32>
    %c11 = arith.constant 11 : index
    %c0_65 = arith.constant 0 : index
    %c0_66 = arith.constant 0 : index
    %71 = vector.load %arg3[%c11, %c0_65, %c0_66] : memref<25x32x8xf32, #tpu.memory_space<vmem>>, vector<1x32x8xf32>
    %72 = vector.shape_cast %71 : vector<1x32x8xf32> to vector<32x8xf32>
    %cst_67 = arith.constant dense<0.000000e+00> : vector<32x320xf32>
    %73 = tpu.matmul %72, %70, %cst_67 {dimension_numbers = #tpu.dot_dimension_numbers<[1], [0], [0], [1], [0, 0, 1, 1], [], []>} : vector<32x8xf32>, vector<8x320xf32>, vector<32x320xf32> -> vector<32x320xf32>
    %74 = arith.addf %68, %73 : vector<32x320xf32>
    %c0_68 = arith.constant 0 : index
    %c0_69 = arith.constant 0 : index
    %c42 = arith.constant 42 : index
    %75 = vector.load %arg1[%c0_68, %c0_69, %c42] : memref<1x8x420xf32, #tpu.memory_space<vmem>>, vector<1x8x320xf32>
    %76 = vector.shape_cast %75 : vector<1x8x320xf32> to vector<8x320xf32>
    %c12 = arith.constant 12 : index
    %c0_70 = arith.constant 0 : index
    %c0_71 = arith.constant 0 : index
    %77 = vector.load %arg3[%c12, %c0_70, %c0_71] : memref<25x32x8xf32, #tpu.memory_space<vmem>>, vector<1x32x8xf32>
    %78 = vector.shape_cast %77 : vector<1x32x8xf32> to vector<32x8xf32>
    %cst_72 = arith.constant dense<0.000000e+00> : vector<32x320xf32>
    %79 = tpu.matmul %78, %76, %cst_72 {dimension_numbers = #tpu.dot_dimension_numbers<[1], [0], [0], [1], [0, 0, 1, 1], [], []>} : vector<32x8xf32>, vector<8x320xf32>, vector<32x320xf32> -> vector<32x320xf32>
    %80 = arith.addf %74, %79 : vector<32x320xf32>
    %c0_73 = arith.constant 0 : index
    %c0_74 = arith.constant 0 : index
    %c43 = arith.constant 43 : index
    %81 = vector.load %arg1[%c0_73, %c0_74, %c43] : memref<1x8x420xf32, #tpu.memory_space<vmem>>, vector<1x8x320xf32>
    %82 = vector.shape_cast %81 : vector<1x8x320xf32> to vector<8x320xf32>
    %c13 = arith.constant 13 : index
    %c0_75 = arith.constant 0 : index
    %c0_76 = arith.constant 0 : index
    %83 = vector.load %arg3[%c13, %c0_75, %c0_76] : memref<25x32x8xf32, #tpu.memory_space<vmem>>, vector<1x32x8xf32>
    %84 = vector.shape_cast %83 : vector<1x32x8xf32> to vector<32x8xf32>
    %cst_77 = arith.constant dense<0.000000e+00> : vector<32x320xf32>
    %85 = tpu.matmul %84, %82, %cst_77 {dimension_numbers = #tpu.dot_dimension_numbers<[1], [0], [0], [1], [0, 0, 1, 1], [], []>} : vector<32x8xf32>, vector<8x320xf32>, vector<32x320xf32> -> vector<32x320xf32>
    %86 = arith.addf %80, %85 : vector<32x320xf32>
    %c0_78 = arith.constant 0 : index
    %c0_79 = arith.constant 0 : index
    %c44 = arith.constant 44 : index
    %87 = vector.load %arg1[%c0_78, %c0_79, %c44] : memref<1x8x420xf32, #tpu.memory_space<vmem>>, vector<1x8x320xf32>
    %88 = vector.shape_cast %87 : vector<1x8x320xf32> to vector<8x320xf32>
    %c14 = arith.constant 14 : index
    %c0_80 = arith.constant 0 : index
    %c0_81 = arith.constant 0 : index
    %89 = vector.load %arg3[%c14, %c0_80, %c0_81] : memref<25x32x8xf32, #tpu.memory_space<vmem>>, vector<1x32x8xf32>
    %90 = vector.shape_cast %89 : vector<1x32x8xf32> to vector<32x8xf32>
    %cst_82 = arith.constant dense<0.000000e+00> : vector<32x320xf32>
    %91 = tpu.matmul %90, %88, %cst_82 {dimension_numbers = #tpu.dot_dimension_numbers<[1], [0], [0], [1], [0, 0, 1, 1], [], []>} : vector<32x8xf32>, vector<8x320xf32>, vector<32x320xf32> -> vector<32x320xf32>
    %92 = arith.addf %86, %91 : vector<32x320xf32>
    %c0_83 = arith.constant 0 : index
    %c0_84 = arith.constant 0 : index
    %c60 = arith.constant 60 : index
    %93 = vector.load %arg1[%c0_83, %c0_84, %c60] : memref<1x8x420xf32, #tpu.memory_space<vmem>>, vector<1x8x320xf32>
    %94 = vector.shape_cast %93 : vector<1x8x320xf32> to vector<8x320xf32>
    %c15 = arith.constant 15 : index
    %c0_85 = arith.constant 0 : index
    %c0_86 = arith.constant 0 : index
    %95 = vector.load %arg3[%c15, %c0_85, %c0_86] : memref<25x32x8xf32, #tpu.memory_space<vmem>>, vector<1x32x8xf32>
    %96 = vector.shape_cast %95 : vector<1x32x8xf32> to vector<32x8xf32>
    %cst_87 = arith.constant dense<0.000000e+00> : vector<32x320xf32>
    %97 = tpu.matmul %96, %94, %cst_87 {dimension_numbers = #tpu.dot_dimension_numbers<[1], [0], [0], [1], [0, 0, 1, 1], [], []>} : vector<32x8xf32>, vector<8x320xf32>, vector<32x320xf32> -> vector<32x320xf32>
    %98 = arith.addf %92, %97 : vector<32x320xf32>
    %c0_88 = arith.constant 0 : index
    %c0_89 = arith.constant 0 : index
    %c61 = arith.constant 61 : index
    %99 = vector.load %arg1[%c0_88, %c0_89, %c61] : memref<1x8x420xf32, #tpu.memory_space<vmem>>, vector<1x8x320xf32>
    %100 = vector.shape_cast %99 : vector<1x8x320xf32> to vector<8x320xf32>
    %c16 = arith.constant 16 : index
    %c0_90 = arith.constant 0 : index
    %c0_91 = arith.constant 0 : index
    %101 = vector.load %arg3[%c16, %c0_90, %c0_91] : memref<25x32x8xf32, #tpu.memory_space<vmem>>, vector<1x32x8xf32>
    %102 = vector.shape_cast %101 : vector<1x32x8xf32> to vector<32x8xf32>
    %cst_92 = arith.constant dense<0.000000e+00> : vector<32x320xf32>
    %103 = tpu.matmul %102, %100, %cst_92 {dimension_numbers = #tpu.dot_dimension_numbers<[1], [0], [0], [1], [0, 0, 1, 1], [], []>} : vector<32x8xf32>, vector<8x320xf32>, vector<32x320xf32> -> vector<32x320xf32>
    %104 = arith.addf %98, %103 : vector<32x320xf32>
    %c0_93 = arith.constant 0 : index
    %c0_94 = arith.constant 0 : index
    %c62 = arith.constant 62 : index
    %105 = vector.load %arg1[%c0_93, %c0_94, %c62] : memref<1x8x420xf32, #tpu.memory_space<vmem>>, vector<1x8x320xf32>
    %106 = vector.shape_cast %105 : vector<1x8x320xf32> to vector<8x320xf32>
    %c17 = arith.constant 17 : index
    %c0_95 = arith.constant 0 : index
    %c0_96 = arith.constant 0 : index
    %107 = vector.load %arg3[%c17, %c0_95, %c0_96] : memref<25x32x8xf32, #tpu.memory_space<vmem>>, vector<1x32x8xf32>
    %108 = vector.shape_cast %107 : vector<1x32x8xf32> to vector<32x8xf32>
    %cst_97 = arith.constant dense<0.000000e+00> : vector<32x320xf32>
    %109 = tpu.matmul %108, %106, %cst_97 {dimension_numbers = #tpu.dot_dimension_numbers<[1], [0], [0], [1], [0, 0, 1, 1], [], []>} : vector<32x8xf32>, vector<8x320xf32>, vector<32x320xf32> -> vector<32x320xf32>
    %110 = arith.addf %104, %109 : vector<32x320xf32>
    %c0_98 = arith.constant 0 : index
    %c0_99 = arith.constant 0 : index
    %c63 = arith.constant 63 : index
    %111 = vector.load %arg1[%c0_98, %c0_99, %c63] : memref<1x8x420xf32, #tpu.memory_space<vmem>>, vector<1x8x320xf32>
    %112 = vector.shape_cast %111 : vector<1x8x320xf32> to vector<8x320xf32>
    %c18 = arith.constant 18 : index
    %c0_100 = arith.constant 0 : index
    %c0_101 = arith.constant 0 : index
    %113 = vector.load %arg3[%c18, %c0_100, %c0_101] : memref<25x32x8xf32, #tpu.memory_space<vmem>>, vector<1x32x8xf32>
    %114 = vector.shape_cast %113 : vector<1x32x8xf32> to vector<32x8xf32>
    %cst_102 = arith.constant dense<0.000000e+00> : vector<32x320xf32>
    %115 = tpu.matmul %114, %112, %cst_102 {dimension_numbers = #tpu.dot_dimension_numbers<[1], [0], [0], [1], [0, 0, 1, 1], [], []>} : vector<32x8xf32>, vector<8x320xf32>, vector<32x320xf32> -> vector<32x320xf32>
    %116 = arith.addf %110, %115 : vector<32x320xf32>
    %c0_103 = arith.constant 0 : index
    %c0_104 = arith.constant 0 : index
    %c64 = arith.constant 64 : index
    %117 = vector.load %arg1[%c0_103, %c0_104, %c64] : memref<1x8x420xf32, #tpu.memory_space<vmem>>, vector<1x8x320xf32>
    %118 = vector.shape_cast %117 : vector<1x8x320xf32> to vector<8x320xf32>
    %c19 = arith.constant 19 : index
    %c0_105 = arith.constant 0 : index
    %c0_106 = arith.constant 0 : index
    %119 = vector.load %arg3[%c19, %c0_105, %c0_106] : memref<25x32x8xf32, #tpu.memory_space<vmem>>, vector<1x32x8xf32>
    %120 = vector.shape_cast %119 : vector<1x32x8xf32> to vector<32x8xf32>
    %cst_107 = arith.constant dense<0.000000e+00> : vector<32x320xf32>
    %121 = tpu.matmul %120, %118, %cst_107 {dimension_numbers = #tpu.dot_dimension_numbers<[1], [0], [0], [1], [0, 0, 1, 1], [], []>} : vector<32x8xf32>, vector<8x320xf32>, vector<32x320xf32> -> vector<32x320xf32>
    %122 = arith.addf %116, %121 : vector<32x320xf32>
    %c0_108 = arith.constant 0 : index
    %c0_109 = arith.constant 0 : index
    %c80 = arith.constant 80 : index
    %123 = vector.load %arg1[%c0_108, %c0_109, %c80] : memref<1x8x420xf32, #tpu.memory_space<vmem>>, vector<1x8x320xf32>
    %124 = vector.shape_cast %123 : vector<1x8x320xf32> to vector<8x320xf32>
    %c20_110 = arith.constant 20 : index
    %c0_111 = arith.constant 0 : index
    %c0_112 = arith.constant 0 : index
    %125 = vector.load %arg3[%c20_110, %c0_111, %c0_112] : memref<25x32x8xf32, #tpu.memory_space<vmem>>, vector<1x32x8xf32>
    %126 = vector.shape_cast %125 : vector<1x32x8xf32> to vector<32x8xf32>
    %cst_113 = arith.constant dense<0.000000e+00> : vector<32x320xf32>
    %127 = tpu.matmul %126, %124, %cst_113 {dimension_numbers = #tpu.dot_dimension_numbers<[1], [0], [0], [1], [0, 0, 1, 1], [], []>} : vector<32x8xf32>, vector<8x320xf32>, vector<32x320xf32> -> vector<32x320xf32>
    %128 = arith.addf %122, %127 : vector<32x320xf32>
    %c0_114 = arith.constant 0 : index
    %c0_115 = arith.constant 0 : index
    %c81 = arith.constant 81 : index
    %129 = vector.load %arg1[%c0_114, %c0_115, %c81] : memref<1x8x420xf32, #tpu.memory_space<vmem>>, vector<1x8x320xf32>
    %130 = vector.shape_cast %129 : vector<1x8x320xf32> to vector<8x320xf32>
    %c21_116 = arith.constant 21 : index
    %c0_117 = arith.constant 0 : index
    %c0_118 = arith.constant 0 : index
    %131 = vector.load %arg3[%c21_116, %c0_117, %c0_118] : memref<25x32x8xf32, #tpu.memory_space<vmem>>, vector<1x32x8xf32>
    %132 = vector.shape_cast %131 : vector<1x32x8xf32> to vector<32x8xf32>
    %cst_119 = arith.constant dense<0.000000e+00> : vector<32x320xf32>
    %133 = tpu.matmul %132, %130, %cst_119 {dimension_numbers = #tpu.dot_dimension_numbers<[1], [0], [0], [1], [0, 0, 1, 1], [], []>} : vector<32x8xf32>, vector<8x320xf32>, vector<32x320xf32> -> vector<32x320xf32>
    %134 = arith.addf %128, %133 : vector<32x320xf32>
    %c0_120 = arith.constant 0 : index
    %c0_121 = arith.constant 0 : index
    %c82 = arith.constant 82 : index
    %135 = vector.load %arg1[%c0_120, %c0_121, %c82] : memref<1x8x420xf32, #tpu.memory_space<vmem>>, vector<1x8x320xf32>
    %136 = vector.shape_cast %135 : vector<1x8x320xf32> to vector<8x320xf32>
    %c22_122 = arith.constant 22 : index
    %c0_123 = arith.constant 0 : index
    %c0_124 = arith.constant 0 : index
    %137 = vector.load %arg3[%c22_122, %c0_123, %c0_124] : memref<25x32x8xf32, #tpu.memory_space<vmem>>, vector<1x32x8xf32>
    %138 = vector.shape_cast %137 : vector<1x32x8xf32> to vector<32x8xf32>
    %cst_125 = arith.constant dense<0.000000e+00> : vector<32x320xf32>
    %139 = tpu.matmul %138, %136, %cst_125 {dimension_numbers = #tpu.dot_dimension_numbers<[1], [0], [0], [1], [0, 0, 1, 1], [], []>} : vector<32x8xf32>, vector<8x320xf32>, vector<32x320xf32> -> vector<32x320xf32>
    %140 = arith.addf %134, %139 : vector<32x320xf32>
    %c0_126 = arith.constant 0 : index
    %c0_127 = arith.constant 0 : index
    %c83 = arith.constant 83 : index
    %141 = vector.load %arg1[%c0_126, %c0_127, %c83] : memref<1x8x420xf32, #tpu.memory_space<vmem>>, vector<1x8x320xf32>
    %142 = vector.shape_cast %141 : vector<1x8x320xf32> to vector<8x320xf32>
    %c23_128 = arith.constant 23 : index
    %c0_129 = arith.constant 0 : index
    %c0_130 = arith.constant 0 : index
    %143 = vector.load %arg3[%c23_128, %c0_129, %c0_130] : memref<25x32x8xf32, #tpu.memory_space<vmem>>, vector<1x32x8xf32>
    %144 = vector.shape_cast %143 : vector<1x32x8xf32> to vector<32x8xf32>
    %cst_131 = arith.constant dense<0.000000e+00> : vector<32x320xf32>
    %145 = tpu.matmul %144, %142, %cst_131 {dimension_numbers = #tpu.dot_dimension_numbers<[1], [0], [0], [1], [0, 0, 1, 1], [], []>} : vector<32x8xf32>, vector<8x320xf32>, vector<32x320xf32> -> vector<32x320xf32>
    %146 = arith.addf %140, %145 : vector<32x320xf32>
    %c0_132 = arith.constant 0 : index
    %c0_133 = arith.constant 0 : index
    %c84 = arith.constant 84 : index
    %147 = vector.load %arg1[%c0_132, %c0_133, %c84] : memref<1x8x420xf32, #tpu.memory_space<vmem>>, vector<1x8x320xf32>
    %148 = vector.shape_cast %147 : vector<1x8x320xf32> to vector<8x320xf32>
    %c24_134 = arith.constant 24 : index
    %c0_135 = arith.constant 0 : index
    %c0_136 = arith.constant 0 : index
    %149 = vector.load %arg3[%c24_134, %c0_135, %c0_136] : memref<25x32x8xf32, #tpu.memory_space<vmem>>, vector<1x32x8xf32>
    %150 = vector.shape_cast %149 : vector<1x32x8xf32> to vector<32x8xf32>
    %cst_137 = arith.constant dense<0.000000e+00> : vector<32x320xf32>
    %151 = tpu.matmul %150, %148, %cst_137 {dimension_numbers = #tpu.dot_dimension_numbers<[1], [0], [0], [1], [0, 0, 1, 1], [], []>} : vector<32x8xf32>, vector<8x320xf32>, vector<32x320xf32> -> vector<32x320xf32>
    %152 = arith.addf %146, %151 : vector<32x320xf32>
    %c0_138 = arith.constant 0 : index
    %c0_139 = arith.constant 0 : index
    %153 = vector.load %arg4[%c0_138, %c0_139] : memref<32x1xf32, #tpu.memory_space<vmem>>, vector<32x1xf32>
    %154 = vector.broadcast %153 : vector<32x1xf32> to vector<32x320xf32>
    %155 = arith.addf %152, %154 : vector<32x320xf32>
    %cst_140 = arith.constant 0.000000e+00 : f32
    %156 = vector.broadcast %cst_140 : f32 to vector<32x320xf32>
    %157 = arith.maximumf %155, %156 : vector<32x320xf32>
    %c0_141 = arith.constant 0 : index
    %c0_142 = arith.constant 0 : index
    %158 = vector.load %arg5[%c0_141, %c0_142] : memref<96x32xf32, #tpu.memory_space<vmem>>, vector<96x32xf32>
    %cst_143 = arith.constant dense<0.000000e+00> : vector<96x320xf32>
    %159 = tpu.matmul %158, %157, %cst_143 {dimension_numbers = #tpu.dot_dimension_numbers<[1], [0], [0], [1], [0, 0, 1, 1], [], []>} : vector<96x32xf32>, vector<32x320xf32>, vector<96x320xf32> -> vector<96x320xf32>
    %c0_144 = arith.constant 0 : index
    %c0_145 = arith.constant 0 : index
    %160 = vector.load %arg6[%c0_144, %c0_145] : memref<96x1xf32, #tpu.memory_space<vmem>>, vector<96x1xf32>
    %161 = vector.broadcast %160 : vector<96x1xf32> to vector<96x320xf32>
    %162 = arith.addf %159, %161 : vector<96x320xf32>
    %c0_146 = arith.constant 0 : index
    %c0_147 = arith.constant 0 : index
    %163 = vector.load %arg7[%c0_146, %c0_147] : memref<96x32xf32, #tpu.memory_space<vmem>>, vector<96x32xf32>
    %cst_148 = arith.constant dense<0.000000e+00> : vector<96x320xf32>
    %164 = tpu.matmul %163, %1, %cst_148 {dimension_numbers = #tpu.dot_dimension_numbers<[1], [0], [0], [1], [0, 0, 1, 1], [], []>} : vector<96x32xf32>, vector<32x320xf32>, vector<96x320xf32> -> vector<96x320xf32>
    %c0_149 = arith.constant 0 : index
    %c0_150 = arith.constant 0 : index
    %165 = vector.load %arg8[%c0_149, %c0_150] : memref<96x1xf32, #tpu.memory_space<vmem>>, vector<96x1xf32>
    %166 = vector.broadcast %165 : vector<96x1xf32> to vector<96x320xf32>
    %167 = arith.addf %164, %166 : vector<96x320xf32>
    %168 = vector.extract_strided_slice %162 {offsets = [0, 0], sizes = [32, 320], strides = [1, 1]} : vector<96x320xf32> to vector<32x320xf32>
    %169 = vector.extract_strided_slice %167 {offsets = [0, 0], sizes = [32, 320], strides = [1, 1]} : vector<96x320xf32> to vector<32x320xf32>
    %170 = arith.addf %168, %169 : vector<32x320xf32>
    %171 = arith.negf %170 : vector<32x320xf32>
    %172 = math.exp %171 : vector<32x320xf32>
    %cst_151 = arith.constant 1.000000e+00 : f32
    %173 = vector.broadcast %cst_151 : f32 to vector<32x320xf32>
    %174 = arith.addf %173, %172 : vector<32x320xf32>
    %175 = arith.divf %173, %174 : vector<32x320xf32>
    %176 = vector.extract_strided_slice %162 {offsets = [32, 0], sizes = [32, 320], strides = [1, 1]} : vector<96x320xf32> to vector<32x320xf32>
    %177 = vector.extract_strided_slice %167 {offsets = [32, 0], sizes = [32, 320], strides = [1, 1]} : vector<96x320xf32> to vector<32x320xf32>
    %178 = arith.addf %176, %177 : vector<32x320xf32>
    %179 = arith.negf %178 : vector<32x320xf32>
    %180 = math.exp %179 : vector<32x320xf32>
    %cst_152 = arith.constant 1.000000e+00 : f32
    %181 = vector.broadcast %cst_152 : f32 to vector<32x320xf32>
    %182 = arith.addf %181, %180 : vector<32x320xf32>
    %183 = arith.divf %181, %182 : vector<32x320xf32>
    %184 = vector.extract_strided_slice %162 {offsets = [64, 0], sizes = [32, 320], strides = [1, 1]} : vector<96x320xf32> to vector<32x320xf32>
    %185 = vector.extract_strided_slice %167 {offsets = [64, 0], sizes = [32, 320], strides = [1, 1]} : vector<96x320xf32> to vector<32x320xf32>
    %186 = arith.mulf %175, %185 : vector<32x320xf32>
    %187 = arith.addf %184, %186 : vector<32x320xf32>
    %188 = math.tanh %187 : vector<32x320xf32>
    %189 = arith.subf %1, %188 : vector<32x320xf32>
    %190 = arith.mulf %183, %189 : vector<32x320xf32>
    %191 = arith.addf %188, %190 : vector<32x320xf32>
    %c0_153 = arith.constant 0 : index
    %c0_154 = arith.constant 0 : index
    %c0_155 = arith.constant 0 : index
    %192 = vector.load %arg9[%c0_153, %c0_154, %c0_155] : memref<1x32x320xf32, #tpu.memory_space<vmem>>, vector<1x32x320xf32>
    %193 = vector.shape_cast %192 : vector<1x32x320xf32> to vector<32x320xf32>
    %194 = vector.shape_cast %191 : vector<32x320xf32> to vector<1x32x320xf32>
    tpu.vector_store %arg9[%c0_153, %c0_154, %c0_155], %194 {strides = array<i32>} : memref<1x32x320xf32, #tpu.memory_space<vmem>>, vector<1x32x320xf32>,
    return
  }
  func.func @transform_0(%arg0: i32) -> (i32, i32, i32) {
    %c0_i32 = arith.constant 0 : i32
    %c0_i32_0 = arith.constant 0 : i32
    %c0_i32_1 = arith.constant 0 : i32
    return %arg0, %c0_i32, %c0_i32_0 : i32, i32, i32
  }
  func.func @transform_1(%arg0: i32) -> (i32, i32, i32) {
    %c0_i32 = arith.constant 0 : i32
    %c0_i32_0 = arith.constant 0 : i32
    %c0_i32_1 = arith.constant 0 : i32
    return %arg0, %c0_i32, %c0_i32_0 : i32, i32, i32
  }
  func.func @transform_2(%arg0: i32) -> (i32, i32, i32) {
    %c0_i32 = arith.constant 0 : i32
    %c0_i32_0 = arith.constant 0 : i32
    %c0_i32_1 = arith.constant 0 : i32
    %c0_i32_2 = arith.constant 0 : i32
    return %c0_i32, %c0_i32_0, %c0_i32_1 : i32, i32, i32
  }
  func.func @transform_3(%arg0: i32) -> (i32, i32) {
    %c0_i32 = arith.constant 0 : i32
    %c0_i32_0 = arith.constant 0 : i32
    %c0_i32_1 = arith.constant 0 : i32
    return %c0_i32, %c0_i32_0 : i32, i32
  }
  func.func @transform_4(%arg0: i32) -> (i32, i32) {
    %c0_i32 = arith.constant 0 : i32
    %c0_i32_0 = arith.constant 0 : i32
    %c0_i32_1 = arith.constant 0 : i32
    return %c0_i32, %c0_i32_0 : i32, i32
  }
  func.func @transform_5(%arg0: i32) -> (i32, i32) {
    %c0_i32 = arith.constant 0 : i32
    %c0_i32_0 = arith.constant 0 : i32
    %c0_i32_1 = arith.constant 0 : i32
    return %c0_i32, %c0_i32_0 : i32, i32
  }
  func.func @transform_6(%arg0: i32) -> (i32, i32) {
    %c0_i32 = arith.constant 0 : i32
    %c0_i32_0 = arith.constant 0 : i32
    %c0_i32_1 = arith.constant 0 : i32
    return %c0_i32, %c0_i32_0 : i32, i32
  }
  func.func @transform_7(%arg0: i32) -> (i32, i32) {
    %c0_i32 = arith.constant 0 : i32
    %c0_i32_0 = arith.constant 0 : i32
    %c0_i32_1 = arith.constant 0 : i32
    return %c0_i32, %c0_i32_0 : i32, i32
  }
  func.func @transform_8(%arg0: i32) -> (i32, i32, i32) {
    %c0_i32 = arith.constant 0 : i32
    %c0_i32_0 = arith.constant 0 : i32
    %c0_i32_1 = arith.constant 0 : i32
    return %arg0, %c0_i32, %c0_i32_0 : i32, i32, i32
  }
}

module attributes {stable_mosaic.version = 11 : i64} {
  func.func @_conv_gru_kernel(%arg0: i32, %arg1: memref<1x32x420xf32, #tpu.memory_space<vmem>>, %arg2: memref<1x32x320xf32, #tpu.memory_space<vmem>>, %arg3: memref<9x32x32xf32, #tpu.memory_space<vmem>>, %arg4: memref<32x1xf32, #tpu.memory_space<vmem>>, %arg5: memref<96x32xf32, #tpu.memory_space<vmem>>, %arg6: memref<96x1xf32, #tpu.memory_space<vmem>>, %arg7: memref<96x32xf32, #tpu.memory_space<vmem>>, %arg8: memref<96x1xf32, #tpu.memory_space<vmem>>, %arg9: memref<1x32x320xf32, #tpu.memory_space<vmem>>) attributes {dimension_semantics = [#tpu.dimension_semantics<parallel>], iteration_bounds = array<i64: 2>, scalar_prefetch = 0 : i64, scratch_operands = 0 : i64, tpu.core_type = #tpu.core_type<tc>, window_params = [{transform_indices = @transform_0, window_bounds = array<i64: 1, 32, 420>}, {transform_indices = @transform_1, window_bounds = array<i64: 1, 32, 320>}, {pipeline_mode = #tpu.pipeline_mode<synchronous>, transform_indices = @transform_2, window_bounds = array<i64: 9, 32, 32>}, {pipeline_mode = #tpu.pipeline_mode<synchronous>, transform_indices = @transform_3, window_bounds = array<i64: 32, 1>}, {pipeline_mode = #tpu.pipeline_mode<synchronous>, transform_indices = @transform_4, window_bounds = array<i64: 96, 32>}, {pipeline_mode = #tpu.pipeline_mode<synchronous>, transform_indices = @transform_5, window_bounds = array<i64: 96, 1>}, {pipeline_mode = #tpu.pipeline_mode<synchronous>, transform_indices = @transform_6, window_bounds = array<i64: 96, 32>}, {pipeline_mode = #tpu.pipeline_mode<synchronous>, transform_indices = @transform_7, window_bounds = array<i64: 96, 1>}, {transform_indices = @transform_8, window_bounds = array<i64: 1, 32, 320>}]} {
    %c0 = arith.constant 0 : index
    %c0_0 = arith.constant 0 : index
    %c0_1 = arith.constant 0 : index
    %0 = vector.load %arg2[%c0, %c0_0, %c0_1] : memref<1x32x320xf32, #tpu.memory_space<vmem>>, vector<1x32x320xf32>
    %1 = vector.shape_cast %0 : vector<1x32x320xf32> to vector<32x320xf32>
    %cst = arith.constant 0.000000e+00 : f32
    %2 = vector.broadcast %cst : f32 to vector<32x320xf32>
    %c0_2 = arith.constant 0 : index
    %c0_3 = arith.constant 0 : index
    %c0_4 = arith.constant 0 : index
    %3 = vector.load %arg1[%c0_2, %c0_3, %c0_4] : memref<1x32x420xf32, #tpu.memory_space<vmem>>, vector<1x32x320xf32>
    %4 = vector.shape_cast %3 : vector<1x32x320xf32> to vector<32x320xf32>
    %c0_5 = arith.constant 0 : index
    %c0_6 = arith.constant 0 : index
    %c0_7 = arith.constant 0 : index
    %5 = vector.load %arg3[%c0_5, %c0_6, %c0_7] : memref<9x32x32xf32, #tpu.memory_space<vmem>>, vector<1x32x32xf32>
    %6 = vector.shape_cast %5 : vector<1x32x32xf32> to vector<32x32xf32>
    %cst_8 = arith.constant dense<0.000000e+00> : vector<32x320xf32>
    %7 = tpu.matmul %6, %4, %cst_8 {dimension_numbers = #tpu.dot_dimension_numbers<[1], [0], [0], [1], [0, 0, 1, 1], [], []>} : vector<32x32xf32>, vector<32x320xf32>, vector<32x320xf32> -> vector<32x320xf32>
    %8 = arith.addf %2, %7 : vector<32x320xf32>
    %c0_9 = arith.constant 0 : index
    %c0_10 = arith.constant 0 : index
    %c2 = arith.constant 2 : index
    %9 = vector.load %arg1[%c0_9, %c0_10, %c2] : memref<1x32x420xf32, #tpu.memory_space<vmem>>, vector<1x32x320xf32>
    %10 = vector.shape_cast %9 : vector<1x32x320xf32> to vector<32x320xf32>
    %c1 = arith.constant 1 : index
    %c0_11 = arith.constant 0 : index
    %c0_12 = arith.constant 0 : index
    %11 = vector.load %arg3[%c1, %c0_11, %c0_12] : memref<9x32x32xf32, #tpu.memory_space<vmem>>, vector<1x32x32xf32>
    %12 = vector.shape_cast %11 : vector<1x32x32xf32> to vector<32x32xf32>
    %cst_13 = arith.constant dense<0.000000e+00> : vector<32x320xf32>
    %13 = tpu.matmul %12, %10, %cst_13 {dimension_numbers = #tpu.dot_dimension_numbers<[1], [0], [0], [1], [0, 0, 1, 1], [], []>} : vector<32x32xf32>, vector<32x320xf32>, vector<32x320xf32> -> vector<32x320xf32>
    %14 = arith.addf %8, %13 : vector<32x320xf32>
    %c0_14 = arith.constant 0 : index
    %c0_15 = arith.constant 0 : index
    %c4 = arith.constant 4 : index
    %15 = vector.load %arg1[%c0_14, %c0_15, %c4] : memref<1x32x420xf32, #tpu.memory_space<vmem>>, vector<1x32x320xf32>
    %16 = vector.shape_cast %15 : vector<1x32x320xf32> to vector<32x320xf32>
    %c2_16 = arith.constant 2 : index
    %c0_17 = arith.constant 0 : index
    %c0_18 = arith.constant 0 : index
    %17 = vector.load %arg3[%c2_16, %c0_17, %c0_18] : memref<9x32x32xf32, #tpu.memory_space<vmem>>, vector<1x32x32xf32>
    %18 = vector.shape_cast %17 : vector<1x32x32xf32> to vector<32x32xf32>
    %cst_19 = arith.constant dense<0.000000e+00> : vector<32x320xf32>
    %19 = tpu.matmul %18, %16, %cst_19 {dimension_numbers = #tpu.dot_dimension_numbers<[1], [0], [0], [1], [0, 0, 1, 1], [], []>} : vector<32x32xf32>, vector<32x320xf32>, vector<32x320xf32> -> vector<32x320xf32>
    %20 = arith.addf %14, %19 : vector<32x320xf32>
    %c0_20 = arith.constant 0 : index
    %c0_21 = arith.constant 0 : index
    %c40 = arith.constant 40 : index
    %21 = vector.load %arg1[%c0_20, %c0_21, %c40] : memref<1x32x420xf32, #tpu.memory_space<vmem>>, vector<1x32x320xf32>
    %22 = vector.shape_cast %21 : vector<1x32x320xf32> to vector<32x320xf32>
    %c3 = arith.constant 3 : index
    %c0_22 = arith.constant 0 : index
    %c0_23 = arith.constant 0 : index
    %23 = vector.load %arg3[%c3, %c0_22, %c0_23] : memref<9x32x32xf32, #tpu.memory_space<vmem>>, vector<1x32x32xf32>
    %24 = vector.shape_cast %23 : vector<1x32x32xf32> to vector<32x32xf32>
    %cst_24 = arith.constant dense<0.000000e+00> : vector<32x320xf32>
    %25 = tpu.matmul %24, %22, %cst_24 {dimension_numbers = #tpu.dot_dimension_numbers<[1], [0], [0], [1], [0, 0, 1, 1], [], []>} : vector<32x32xf32>, vector<32x320xf32>, vector<32x320xf32> -> vector<32x320xf32>
    %26 = arith.addf %20, %25 : vector<32x320xf32>
    %c0_25 = arith.constant 0 : index
    %c0_26 = arith.constant 0 : index
    %c42 = arith.constant 42 : index
    %27 = vector.load %arg1[%c0_25, %c0_26, %c42] : memref<1x32x420xf32, #tpu.memory_space<vmem>>, vector<1x32x320xf32>
    %28 = vector.shape_cast %27 : vector<1x32x320xf32> to vector<32x320xf32>
    %c4_27 = arith.constant 4 : index
    %c0_28 = arith.constant 0 : index
    %c0_29 = arith.constant 0 : index
    %29 = vector.load %arg3[%c4_27, %c0_28, %c0_29] : memref<9x32x32xf32, #tpu.memory_space<vmem>>, vector<1x32x32xf32>
    %30 = vector.shape_cast %29 : vector<1x32x32xf32> to vector<32x32xf32>
    %cst_30 = arith.constant dense<0.000000e+00> : vector<32x320xf32>
    %31 = tpu.matmul %30, %28, %cst_30 {dimension_numbers = #tpu.dot_dimension_numbers<[1], [0], [0], [1], [0, 0, 1, 1], [], []>} : vector<32x32xf32>, vector<32x320xf32>, vector<32x320xf32> -> vector<32x320xf32>
    %32 = arith.addf %26, %31 : vector<32x320xf32>
    %c0_31 = arith.constant 0 : index
    %c0_32 = arith.constant 0 : index
    %c44 = arith.constant 44 : index
    %33 = vector.load %arg1[%c0_31, %c0_32, %c44] : memref<1x32x420xf32, #tpu.memory_space<vmem>>, vector<1x32x320xf32>
    %34 = vector.shape_cast %33 : vector<1x32x320xf32> to vector<32x320xf32>
    %c5 = arith.constant 5 : index
    %c0_33 = arith.constant 0 : index
    %c0_34 = arith.constant 0 : index
    %35 = vector.load %arg3[%c5, %c0_33, %c0_34] : memref<9x32x32xf32, #tpu.memory_space<vmem>>, vector<1x32x32xf32>
    %36 = vector.shape_cast %35 : vector<1x32x32xf32> to vector<32x32xf32>
    %cst_35 = arith.constant dense<0.000000e+00> : vector<32x320xf32>
    %37 = tpu.matmul %36, %34, %cst_35 {dimension_numbers = #tpu.dot_dimension_numbers<[1], [0], [0], [1], [0, 0, 1, 1], [], []>} : vector<32x32xf32>, vector<32x320xf32>, vector<32x320xf32> -> vector<32x320xf32>
    %38 = arith.addf %32, %37 : vector<32x320xf32>
    %c0_36 = arith.constant 0 : index
    %c0_37 = arith.constant 0 : index
    %c80 = arith.constant 80 : index
    %39 = vector.load %arg1[%c0_36, %c0_37, %c80] : memref<1x32x420xf32, #tpu.memory_space<vmem>>, vector<1x32x320xf32>
    %40 = vector.shape_cast %39 : vector<1x32x320xf32> to vector<32x320xf32>
    %c6 = arith.constant 6 : index
    %c0_38 = arith.constant 0 : index
    %c0_39 = arith.constant 0 : index
    %41 = vector.load %arg3[%c6, %c0_38, %c0_39] : memref<9x32x32xf32, #tpu.memory_space<vmem>>, vector<1x32x32xf32>
    %42 = vector.shape_cast %41 : vector<1x32x32xf32> to vector<32x32xf32>
    %cst_40 = arith.constant dense<0.000000e+00> : vector<32x320xf32>
    %43 = tpu.matmul %42, %40, %cst_40 {dimension_numbers = #tpu.dot_dimension_numbers<[1], [0], [0], [1], [0, 0, 1, 1], [], []>} : vector<32x32xf32>, vector<32x320xf32>, vector<32x320xf32> -> vector<32x320xf32>
    %44 = arith.addf %38, %43 : vector<32x320xf32>
    %c0_41 = arith.constant 0 : index
    %c0_42 = arith.constant 0 : index
    %c82 = arith.constant 82 : index
    %45 = vector.load %arg1[%c0_41, %c0_42, %c82] : memref<1x32x420xf32, #tpu.memory_space<vmem>>, vector<1x32x320xf32>
    %46 = vector.shape_cast %45 : vector<1x32x320xf32> to vector<32x320xf32>
    %c7 = arith.constant 7 : index
    %c0_43 = arith.constant 0 : index
    %c0_44 = arith.constant 0 : index
    %47 = vector.load %arg3[%c7, %c0_43, %c0_44] : memref<9x32x32xf32, #tpu.memory_space<vmem>>, vector<1x32x32xf32>
    %48 = vector.shape_cast %47 : vector<1x32x32xf32> to vector<32x32xf32>
    %cst_45 = arith.constant dense<0.000000e+00> : vector<32x320xf32>
    %49 = tpu.matmul %48, %46, %cst_45 {dimension_numbers = #tpu.dot_dimension_numbers<[1], [0], [0], [1], [0, 0, 1, 1], [], []>} : vector<32x32xf32>, vector<32x320xf32>, vector<32x320xf32> -> vector<32x320xf32>
    %50 = arith.addf %44, %49 : vector<32x320xf32>
    %c0_46 = arith.constant 0 : index
    %c0_47 = arith.constant 0 : index
    %c84 = arith.constant 84 : index
    %51 = vector.load %arg1[%c0_46, %c0_47, %c84] : memref<1x32x420xf32, #tpu.memory_space<vmem>>, vector<1x32x320xf32>
    %52 = vector.shape_cast %51 : vector<1x32x320xf32> to vector<32x320xf32>
    %c8 = arith.constant 8 : index
    %c0_48 = arith.constant 0 : index
    %c0_49 = arith.constant 0 : index
    %53 = vector.load %arg3[%c8, %c0_48, %c0_49] : memref<9x32x32xf32, #tpu.memory_space<vmem>>, vector<1x32x32xf32>
    %54 = vector.shape_cast %53 : vector<1x32x32xf32> to vector<32x32xf32>
    %cst_50 = arith.constant dense<0.000000e+00> : vector<32x320xf32>
    %55 = tpu.matmul %54, %52, %cst_50 {dimension_numbers = #tpu.dot_dimension_numbers<[1], [0], [0], [1], [0, 0, 1, 1], [], []>} : vector<32x32xf32>, vector<32x320xf32>, vector<32x320xf32> -> vector<32x320xf32>
    %56 = arith.addf %50, %55 : vector<32x320xf32>
    %c0_51 = arith.constant 0 : index
    %c0_52 = arith.constant 0 : index
    %57 = vector.load %arg4[%c0_51, %c0_52] : memref<32x1xf32, #tpu.memory_space<vmem>>, vector<32x1xf32>
    %58 = vector.broadcast %57 : vector<32x1xf32> to vector<32x320xf32>
    %59 = arith.addf %56, %58 : vector<32x320xf32>
    %cst_53 = arith.constant 0.000000e+00 : f32
    %60 = vector.broadcast %cst_53 : f32 to vector<32x320xf32>
    %61 = arith.maximumf %59, %60 : vector<32x320xf32>
    %c0_54 = arith.constant 0 : index
    %c0_55 = arith.constant 0 : index
    %62 = vector.load %arg5[%c0_54, %c0_55] : memref<96x32xf32, #tpu.memory_space<vmem>>, vector<96x32xf32>
    %cst_56 = arith.constant dense<0.000000e+00> : vector<96x320xf32>
    %63 = tpu.matmul %62, %61, %cst_56 {dimension_numbers = #tpu.dot_dimension_numbers<[1], [0], [0], [1], [0, 0, 1, 1], [], []>} : vector<96x32xf32>, vector<32x320xf32>, vector<96x320xf32> -> vector<96x320xf32>
    %c0_57 = arith.constant 0 : index
    %c0_58 = arith.constant 0 : index
    %64 = vector.load %arg6[%c0_57, %c0_58] : memref<96x1xf32, #tpu.memory_space<vmem>>, vector<96x1xf32>
    %65 = vector.broadcast %64 : vector<96x1xf32> to vector<96x320xf32>
    %66 = arith.addf %63, %65 : vector<96x320xf32>
    %c0_59 = arith.constant 0 : index
    %c0_60 = arith.constant 0 : index
    %67 = vector.load %arg7[%c0_59, %c0_60] : memref<96x32xf32, #tpu.memory_space<vmem>>, vector<96x32xf32>
    %cst_61 = arith.constant dense<0.000000e+00> : vector<96x320xf32>
    %68 = tpu.matmul %67, %1, %cst_61 {dimension_numbers = #tpu.dot_dimension_numbers<[1], [0], [0], [1], [0, 0, 1, 1], [], []>} : vector<96x32xf32>, vector<32x320xf32>, vector<96x320xf32> -> vector<96x320xf32>
    %c0_62 = arith.constant 0 : index
    %c0_63 = arith.constant 0 : index
    %69 = vector.load %arg8[%c0_62, %c0_63] : memref<96x1xf32, #tpu.memory_space<vmem>>, vector<96x1xf32>
    %70 = vector.broadcast %69 : vector<96x1xf32> to vector<96x320xf32>
    %71 = arith.addf %68, %70 : vector<96x320xf32>
    %72 = vector.extract_strided_slice %66 {offsets = [0, 0], sizes = [32, 320], strides = [1, 1]} : vector<96x320xf32> to vector<32x320xf32>
    %73 = vector.extract_strided_slice %71 {offsets = [0, 0], sizes = [32, 320], strides = [1, 1]} : vector<96x320xf32> to vector<32x320xf32>
    %74 = arith.addf %72, %73 : vector<32x320xf32>
    %75 = arith.negf %74 : vector<32x320xf32>
    %76 = math.exp %75 : vector<32x320xf32>
    %cst_64 = arith.constant 1.000000e+00 : f32
    %77 = vector.broadcast %cst_64 : f32 to vector<32x320xf32>
    %78 = arith.addf %77, %76 : vector<32x320xf32>
    %79 = arith.divf %77, %78 : vector<32x320xf32>
    %80 = vector.extract_strided_slice %66 {offsets = [32, 0], sizes = [32, 320], strides = [1, 1]} : vector<96x320xf32> to vector<32x320xf32>
    %81 = vector.extract_strided_slice %71 {offsets = [32, 0], sizes = [32, 320], strides = [1, 1]} : vector<96x320xf32> to vector<32x320xf32>
    %82 = arith.addf %80, %81 : vector<32x320xf32>
    %83 = arith.negf %82 : vector<32x320xf32>
    %84 = math.exp %83 : vector<32x320xf32>
    %cst_65 = arith.constant 1.000000e+00 : f32
    %85 = vector.broadcast %cst_65 : f32 to vector<32x320xf32>
    %86 = arith.addf %85, %84 : vector<32x320xf32>
    %87 = arith.divf %85, %86 : vector<32x320xf32>
    %88 = vector.extract_strided_slice %66 {offsets = [64, 0], sizes = [32, 320], strides = [1, 1]} : vector<96x320xf32> to vector<32x320xf32>
    %89 = vector.extract_strided_slice %71 {offsets = [64, 0], sizes = [32, 320], strides = [1, 1]} : vector<96x320xf32> to vector<32x320xf32>
    %90 = arith.mulf %79, %89 : vector<32x320xf32>
    %91 = arith.addf %88, %90 : vector<32x320xf32>
    %92 = math.tanh %91 : vector<32x320xf32>
    %93 = arith.subf %1, %92 : vector<32x320xf32>
    %94 = arith.mulf %87, %93 : vector<32x320xf32>
    %95 = arith.addf %92, %94 : vector<32x320xf32>
    %c0_66 = arith.constant 0 : index
    %c0_67 = arith.constant 0 : index
    %c0_68 = arith.constant 0 : index
    %96 = vector.load %arg9[%c0_66, %c0_67, %c0_68] : memref<1x32x320xf32, #tpu.memory_space<vmem>>, vector<1x32x320xf32>
    %97 = vector.shape_cast %96 : vector<1x32x320xf32> to vector<32x320xf32>
    %98 = vector.shape_cast %95 : vector<32x320xf32> to vector<1x32x320xf32>
    tpu.vector_store %arg9[%c0_66, %c0_67, %c0_68], %98 {strides = array<i32>} : memref<1x32x320xf32, #tpu.memory_space<vmem>>, vector<1x32x320xf32>,
    return
  }
  func.func @transform_0(%arg0: i32) -> (i32, i32, i32) {
    %c0_i32 = arith.constant 0 : i32
    %c0_i32_0 = arith.constant 0 : i32
    %c0_i32_1 = arith.constant 0 : i32
    return %arg0, %c0_i32, %c0_i32_0 : i32, i32, i32
  }
  func.func @transform_1(%arg0: i32) -> (i32, i32, i32) {
    %c0_i32 = arith.constant 0 : i32
    %c0_i32_0 = arith.constant 0 : i32
    %c0_i32_1 = arith.constant 0 : i32
    return %arg0, %c0_i32, %c0_i32_0 : i32, i32, i32
  }
  func.func @transform_2(%arg0: i32) -> (i32, i32, i32) {
    %c0_i32 = arith.constant 0 : i32
    %c0_i32_0 = arith.constant 0 : i32
    %c0_i32_1 = arith.constant 0 : i32
    %c0_i32_2 = arith.constant 0 : i32
    return %c0_i32, %c0_i32_0, %c0_i32_1 : i32, i32, i32
  }
  func.func @transform_3(%arg0: i32) -> (i32, i32) {
    %c0_i32 = arith.constant 0 : i32
    %c0_i32_0 = arith.constant 0 : i32
    %c0_i32_1 = arith.constant 0 : i32
    return %c0_i32, %c0_i32_0 : i32, i32
  }
  func.func @transform_4(%arg0: i32) -> (i32, i32) {
    %c0_i32 = arith.constant 0 : i32
    %c0_i32_0 = arith.constant 0 : i32
    %c0_i32_1 = arith.constant 0 : i32
    return %c0_i32, %c0_i32_0 : i32, i32
  }
  func.func @transform_5(%arg0: i32) -> (i32, i32) {
    %c0_i32 = arith.constant 0 : i32
    %c0_i32_0 = arith.constant 0 : i32
    %c0_i32_1 = arith.constant 0 : i32
    return %c0_i32, %c0_i32_0 : i32, i32
  }
  func.func @transform_6(%arg0: i32) -> (i32, i32) {
    %c0_i32 = arith.constant 0 : i32
    %c0_i32_0 = arith.constant 0 : i32
    %c0_i32_1 = arith.constant 0 : i32
    return %c0_i32, %c0_i32_0 : i32, i32
  }
  func.func @transform_7(%arg0: i32) -> (i32, i32) {
    %c0_i32 = arith.constant 0 : i32
    %c0_i32_0 = arith.constant 0 : i32
    %c0_i32_1 = arith.constant 0 : i32
    return %c0_i32, %c0_i32_0 : i32, i32
  }
  func.func @transform_8(%arg0: i32) -> (i32, i32, i32) {
    %c0_i32 = arith.constant 0 : i32
    %c0_i32_0 = arith.constant 0 : i32
    %c0_i32_1 = arith.constant 0 : i32
    return %arg0, %c0_i32, %c0_i32_0 : i32, i32, i32
  }
}

module attributes {stable_mosaic.version = 11 : i64} {
  func.func @_final_pred_kernel(%arg0: i32, %arg1: memref<1x32x342xf32, #tpu.memory_space<vmem>>, %arg2: memref<1x8x288xf32, #tpu.memory_space<vmem>>, %arg3: memref<9x8x32xf32, #tpu.memory_space<vmem>>, %arg4: memref<1x8x288xf32, #tpu.memory_space<vmem>>) attributes {dimension_semantics = [#tpu.dimension_semantics<parallel>], iteration_bounds = array<i64: 2>, scalar_prefetch = 0 : i64, scratch_operands = 0 : i64, tpu.core_type = #tpu.core_type<tc>, window_params = [{transform_indices = @transform_0, window_bounds = array<i64: 1, 32, 342>}, {transform_indices = @transform_1, window_bounds = array<i64: 1, 8, 288>}, {pipeline_mode = #tpu.pipeline_mode<synchronous>, transform_indices = @transform_2, window_bounds = array<i64: 9, 8, 32>}, {transform_indices = @transform_3, window_bounds = array<i64: 1, 8, 288>}]} {
    %c0 = arith.constant 0 : index
    %c0_0 = arith.constant 0 : index
    %c0_1 = arith.constant 0 : index
    %0 = vector.load %arg2[%c0, %c0_0, %c0_1] : memref<1x8x288xf32, #tpu.memory_space<vmem>>, vector<1x8x288xf32>
    %1 = vector.shape_cast %0 : vector<1x8x288xf32> to vector<8x288xf32>
    %c0_2 = arith.constant 0 : index
    %c0_3 = arith.constant 0 : index
    %c0_4 = arith.constant 0 : index
    %2 = vector.load %arg1[%c0_2, %c0_3, %c0_4] : memref<1x32x342xf32, #tpu.memory_space<vmem>>, vector<1x32x288xf32>
    %3 = vector.shape_cast %2 : vector<1x32x288xf32> to vector<32x288xf32>
    %c0_5 = arith.constant 0 : index
    %c0_6 = arith.constant 0 : index
    %c0_7 = arith.constant 0 : index
    %4 = vector.load %arg3[%c0_5, %c0_6, %c0_7] : memref<9x8x32xf32, #tpu.memory_space<vmem>>, vector<1x8x32xf32>
    %5 = vector.shape_cast %4 : vector<1x8x32xf32> to vector<8x32xf32>
    %cst = arith.constant dense<0.000000e+00> : vector<8x288xf32>
    %6 = tpu.matmul %5, %3, %cst {dimension_numbers = #tpu.dot_dimension_numbers<[1], [0], [0], [1], [0, 0, 1, 1], [], []>} : vector<8x32xf32>, vector<32x288xf32>, vector<8x288xf32> -> vector<8x288xf32>
    %7 = arith.addf %1, %6 : vector<8x288xf32>
    %c0_8 = arith.constant 0 : index
    %c0_9 = arith.constant 0 : index
    %c1 = arith.constant 1 : index
    %8 = vector.load %arg1[%c0_8, %c0_9, %c1] : memref<1x32x342xf32, #tpu.memory_space<vmem>>, vector<1x32x288xf32>
    %9 = vector.shape_cast %8 : vector<1x32x288xf32> to vector<32x288xf32>
    %c1_10 = arith.constant 1 : index
    %c0_11 = arith.constant 0 : index
    %c0_12 = arith.constant 0 : index
    %10 = vector.load %arg3[%c1_10, %c0_11, %c0_12] : memref<9x8x32xf32, #tpu.memory_space<vmem>>, vector<1x8x32xf32>
    %11 = vector.shape_cast %10 : vector<1x8x32xf32> to vector<8x32xf32>
    %cst_13 = arith.constant dense<0.000000e+00> : vector<8x288xf32>
    %12 = tpu.matmul %11, %9, %cst_13 {dimension_numbers = #tpu.dot_dimension_numbers<[1], [0], [0], [1], [0, 0, 1, 1], [], []>} : vector<8x32xf32>, vector<32x288xf32>, vector<8x288xf32> -> vector<8x288xf32>
    %13 = arith.addf %7, %12 : vector<8x288xf32>
    %c0_14 = arith.constant 0 : index
    %c0_15 = arith.constant 0 : index
    %c2 = arith.constant 2 : index
    %14 = vector.load %arg1[%c0_14, %c0_15, %c2] : memref<1x32x342xf32, #tpu.memory_space<vmem>>, vector<1x32x288xf32>
    %15 = vector.shape_cast %14 : vector<1x32x288xf32> to vector<32x288xf32>
    %c2_16 = arith.constant 2 : index
    %c0_17 = arith.constant 0 : index
    %c0_18 = arith.constant 0 : index
    %16 = vector.load %arg3[%c2_16, %c0_17, %c0_18] : memref<9x8x32xf32, #tpu.memory_space<vmem>>, vector<1x8x32xf32>
    %17 = vector.shape_cast %16 : vector<1x8x32xf32> to vector<8x32xf32>
    %cst_19 = arith.constant dense<0.000000e+00> : vector<8x288xf32>
    %18 = tpu.matmul %17, %15, %cst_19 {dimension_numbers = #tpu.dot_dimension_numbers<[1], [0], [0], [1], [0, 0, 1, 1], [], []>} : vector<8x32xf32>, vector<32x288xf32>, vector<8x288xf32> -> vector<8x288xf32>
    %19 = arith.addf %13, %18 : vector<8x288xf32>
    %c0_20 = arith.constant 0 : index
    %c0_21 = arith.constant 0 : index
    %c18 = arith.constant 18 : index
    %20 = vector.load %arg1[%c0_20, %c0_21, %c18] : memref<1x32x342xf32, #tpu.memory_space<vmem>>, vector<1x32x288xf32>
    %21 = vector.shape_cast %20 : vector<1x32x288xf32> to vector<32x288xf32>
    %c3 = arith.constant 3 : index
    %c0_22 = arith.constant 0 : index
    %c0_23 = arith.constant 0 : index
    %22 = vector.load %arg3[%c3, %c0_22, %c0_23] : memref<9x8x32xf32, #tpu.memory_space<vmem>>, vector<1x8x32xf32>
    %23 = vector.shape_cast %22 : vector<1x8x32xf32> to vector<8x32xf32>
    %cst_24 = arith.constant dense<0.000000e+00> : vector<8x288xf32>
    %24 = tpu.matmul %23, %21, %cst_24 {dimension_numbers = #tpu.dot_dimension_numbers<[1], [0], [0], [1], [0, 0, 1, 1], [], []>} : vector<8x32xf32>, vector<32x288xf32>, vector<8x288xf32> -> vector<8x288xf32>
    %25 = arith.addf %19, %24 : vector<8x288xf32>
    %c0_25 = arith.constant 0 : index
    %c0_26 = arith.constant 0 : index
    %c19 = arith.constant 19 : index
    %26 = vector.load %arg1[%c0_25, %c0_26, %c19] : memref<1x32x342xf32, #tpu.memory_space<vmem>>, vector<1x32x288xf32>
    %27 = vector.shape_cast %26 : vector<1x32x288xf32> to vector<32x288xf32>
    %c4 = arith.constant 4 : index
    %c0_27 = arith.constant 0 : index
    %c0_28 = arith.constant 0 : index
    %28 = vector.load %arg3[%c4, %c0_27, %c0_28] : memref<9x8x32xf32, #tpu.memory_space<vmem>>, vector<1x8x32xf32>
    %29 = vector.shape_cast %28 : vector<1x8x32xf32> to vector<8x32xf32>
    %cst_29 = arith.constant dense<0.000000e+00> : vector<8x288xf32>
    %30 = tpu.matmul %29, %27, %cst_29 {dimension_numbers = #tpu.dot_dimension_numbers<[1], [0], [0], [1], [0, 0, 1, 1], [], []>} : vector<8x32xf32>, vector<32x288xf32>, vector<8x288xf32> -> vector<8x288xf32>
    %31 = arith.addf %25, %30 : vector<8x288xf32>
    %c0_30 = arith.constant 0 : index
    %c0_31 = arith.constant 0 : index
    %c20 = arith.constant 20 : index
    %32 = vector.load %arg1[%c0_30, %c0_31, %c20] : memref<1x32x342xf32, #tpu.memory_space<vmem>>, vector<1x32x288xf32>
    %33 = vector.shape_cast %32 : vector<1x32x288xf32> to vector<32x288xf32>
    %c5 = arith.constant 5 : index
    %c0_32 = arith.constant 0 : index
    %c0_33 = arith.constant 0 : index
    %34 = vector.load %arg3[%c5, %c0_32, %c0_33] : memref<9x8x32xf32, #tpu.memory_space<vmem>>, vector<1x8x32xf32>
    %35 = vector.shape_cast %34 : vector<1x8x32xf32> to vector<8x32xf32>
    %cst_34 = arith.constant dense<0.000000e+00> : vector<8x288xf32>
    %36 = tpu.matmul %35, %33, %cst_34 {dimension_numbers = #tpu.dot_dimension_numbers<[1], [0], [0], [1], [0, 0, 1, 1], [], []>} : vector<8x32xf32>, vector<32x288xf32>, vector<8x288xf32> -> vector<8x288xf32>
    %37 = arith.addf %31, %36 : vector<8x288xf32>
    %c0_35 = arith.constant 0 : index
    %c0_36 = arith.constant 0 : index
    %c36 = arith.constant 36 : index
    %38 = vector.load %arg1[%c0_35, %c0_36, %c36] : memref<1x32x342xf32, #tpu.memory_space<vmem>>, vector<1x32x288xf32>
    %39 = vector.shape_cast %38 : vector<1x32x288xf32> to vector<32x288xf32>
    %c6 = arith.constant 6 : index
    %c0_37 = arith.constant 0 : index
    %c0_38 = arith.constant 0 : index
    %40 = vector.load %arg3[%c6, %c0_37, %c0_38] : memref<9x8x32xf32, #tpu.memory_space<vmem>>, vector<1x8x32xf32>
    %41 = vector.shape_cast %40 : vector<1x8x32xf32> to vector<8x32xf32>
    %cst_39 = arith.constant dense<0.000000e+00> : vector<8x288xf32>
    %42 = tpu.matmul %41, %39, %cst_39 {dimension_numbers = #tpu.dot_dimension_numbers<[1], [0], [0], [1], [0, 0, 1, 1], [], []>} : vector<8x32xf32>, vector<32x288xf32>, vector<8x288xf32> -> vector<8x288xf32>
    %43 = arith.addf %37, %42 : vector<8x288xf32>
    %c0_40 = arith.constant 0 : index
    %c0_41 = arith.constant 0 : index
    %c37 = arith.constant 37 : index
    %44 = vector.load %arg1[%c0_40, %c0_41, %c37] : memref<1x32x342xf32, #tpu.memory_space<vmem>>, vector<1x32x288xf32>
    %45 = vector.shape_cast %44 : vector<1x32x288xf32> to vector<32x288xf32>
    %c7 = arith.constant 7 : index
    %c0_42 = arith.constant 0 : index
    %c0_43 = arith.constant 0 : index
    %46 = vector.load %arg3[%c7, %c0_42, %c0_43] : memref<9x8x32xf32, #tpu.memory_space<vmem>>, vector<1x8x32xf32>
    %47 = vector.shape_cast %46 : vector<1x8x32xf32> to vector<8x32xf32>
    %cst_44 = arith.constant dense<0.000000e+00> : vector<8x288xf32>
    %48 = tpu.matmul %47, %45, %cst_44 {dimension_numbers = #tpu.dot_dimension_numbers<[1], [0], [0], [1], [0, 0, 1, 1], [], []>} : vector<8x32xf32>, vector<32x288xf32>, vector<8x288xf32> -> vector<8x288xf32>
    %49 = arith.addf %43, %48 : vector<8x288xf32>
    %c0_45 = arith.constant 0 : index
    %c0_46 = arith.constant 0 : index
    %c38 = arith.constant 38 : index
    %50 = vector.load %arg1[%c0_45, %c0_46, %c38] : memref<1x32x342xf32, #tpu.memory_space<vmem>>, vector<1x32x288xf32>
    %51 = vector.shape_cast %50 : vector<1x32x288xf32> to vector<32x288xf32>
    %c8 = arith.constant 8 : index
    %c0_47 = arith.constant 0 : index
    %c0_48 = arith.constant 0 : index
    %52 = vector.load %arg3[%c8, %c0_47, %c0_48] : memref<9x8x32xf32, #tpu.memory_space<vmem>>, vector<1x8x32xf32>
    %53 = vector.shape_cast %52 : vector<1x8x32xf32> to vector<8x32xf32>
    %cst_49 = arith.constant dense<0.000000e+00> : vector<8x288xf32>
    %54 = tpu.matmul %53, %51, %cst_49 {dimension_numbers = #tpu.dot_dimension_numbers<[1], [0], [0], [1], [0, 0, 1, 1], [], []>} : vector<8x32xf32>, vector<32x288xf32>, vector<8x288xf32> -> vector<8x288xf32>
    %55 = arith.addf %49, %54 : vector<8x288xf32>
    %c0_50 = arith.constant 0 : index
    %c0_51 = arith.constant 0 : index
    %c0_52 = arith.constant 0 : index
    %56 = vector.load %arg4[%c0_50, %c0_51, %c0_52] : memref<1x8x288xf32, #tpu.memory_space<vmem>>, vector<1x8x288xf32>
    %57 = vector.shape_cast %56 : vector<1x8x288xf32> to vector<8x288xf32>
    %58 = vector.shape_cast %55 : vector<8x288xf32> to vector<1x8x288xf32>
    tpu.vector_store %arg4[%c0_50, %c0_51, %c0_52], %58 {strides = array<i32>} : memref<1x8x288xf32, #tpu.memory_space<vmem>>, vector<1x8x288xf32>,
    return
  }
  func.func @transform_0(%arg0: i32) -> (i32, i32, i32) {
    %c0_i32 = arith.constant 0 : i32
    %c0_i32_0 = arith.constant 0 : i32
    %c0_i32_1 = arith.constant 0 : i32
    return %arg0, %c0_i32, %c0_i32_0 : i32, i32, i32
  }
  func.func @transform_1(%arg0: i32) -> (i32, i32, i32) {
    %c0_i32 = arith.constant 0 : i32
    %c0_i32_0 = arith.constant 0 : i32
    %c0_i32_1 = arith.constant 0 : i32
    return %arg0, %c0_i32, %c0_i32_0 : i32, i32, i32
  }
  func.func @transform_2(%arg0: i32) -> (i32, i32, i32) {
    %c0_i32 = arith.constant 0 : i32
    %c0_i32_0 = arith.constant 0 : i32
    %c0_i32_1 = arith.constant 0 : i32
    %c0_i32_2 = arith.constant 0 : i32
    return %c0_i32, %c0_i32_0, %c0_i32_1 : i32, i32, i32
  }
  func.func @transform_3(%arg0: i32) -> (i32, i32, i32) {
    %c0_i32 = arith.constant 0 : i32
    %c0_i32_0 = arith.constant 0 : i32
    %c0_i32_1 = arith.constant 0 : i32
    return %arg0, %c0_i32, %c0_i32_0 : i32, i32, i32
  }
}

</mosaic_0001>

<bundles_post_ra>
// kernel: rim_block_forward.26
= control target key start
LH: loop header
LB: loop body
LE: loop exit
PB: predicated region body
PF: predicated region fallthrough
CT: control target
= control target key end

     0   :  { %s664_s15 = smov 0   ;;  %s666_s16 = smov 0   ;;  %s714_s0 = inlined_call_operand.vmem [shape: f32[2,2,256], index: 0, kind: input, shape index: {}]   ;;  %s715_s1 = inlined_call_operand.vmem [shape: f32[2,4,256], index: 1, kind: input, shape index: {}]   ;;  %s716_s2 = inlined_call_operand.vmem [shape: f32[2,4,256], index: 2, kind: input, shape index: {}]   ;;  %s717_s3 = inlined_call_operand.vmem [shape: f32[2,4,256], index: 3, kind: output, shape index: {0}]   ;;  %s718_s4 = inlined_call_operand.vmem [shape: f32[2,4,256], index: 4, kind: output, shape index: {1}]  }
   0x1   :  { %s668_s17 = smov 0  }
   0x2 LB: > { %s27_s18 = sadd.s32 1, %s633_s16  ;;  %p572_p0 = scmp.ge.s32.totalorder %s637_s17, 1  ;;  %s637_s17 = sphi %s668_s17, %s15_s17   ;;  %s633_s16 = sphi %s666_s16, %s720_s16   ;;  %s629_s15 = sphi %s664_s15, %s719_s15  }
   0x3   : > { %p29_p1 = scmp.ge.s32.totalorder %s27_s18, 2  ;;  %p222_p2 = scmp.lt.s32.totalorder %s637_s17, 3 }
   0x5   : > { %s722_s18 = smov (%p29_p1, %s27_s18), 0  ;;  %p223_p3 = pnand %p572_p0, %p222_p2 }
   0x6   : > { %p284_p4 = scmp.lt.s32.totalorder (!%p223_p3), %s629_s15, 1 }
   0x7   : > { %226 = sbr.rel (%p223_p3) target bundleno = 56 (0x38), region = 32 }
   0xc   : > { %s724_s15 = smov (!%p284_p4, %s629_s15), 1  ;;  %vm369_vm0 = vcmask 1043456  }
   0xd   : > { %s682_s19 = sshll.u32 %s724_s15, 3  ;;  %s586_s26 = sshll.u32 %s724_s15, 2 }
   0xe   : > { %s301_s22 = scalar_lea.vmem %s715_s1, %s682_s19  ;;  %s311_s25 = scalar_lea.vmem %s716_s2, %s682_s19 }
   0xf   : > { %v336_v0 = vld [vmem:[%s301_s22] sm:$0xff]  ;;  %s291_s29 = scalar_lea.vmem %s714_s0, %s586_s26  ;;  %s321_s6 = scalar_lea.vmem %s717_s3, %s682_s19 }
  0x10   : > { %344 = vst [vmem:[#allocation1] ss:$2 sm:$0xff] %v336_v0  ;;  %v337_v1 = vld [vmem:[%s311_s25] sm:$0xff]  ;;  %s331_s9 = scalar_lea.vmem %s718_s4, %s682_s19 }
  0x11   : > { %v333_v4 = vld [vmem:[%s291_s29] ss:$2 sm:$0x3]  ;;  %v583_v5 = vld [vmem:[%s291_s29 + $0x1] ss:$2 sm:$0x3] }
  0x12   : > { %v340_v6 = vperm.slane %v333_v4, 1  ;;  %v352_v7 = vperm.slane %v583_v5, 0  ;;  %v353_v8 = vperm.slane %v583_v5, 1  ;;  %v339_v9 = vperm.slane %v333_v4, 0 }
  0x17   : > { %v345_v2 = vld.sshfl [vmem:[#allocation1] sm:$0xff pattern:$0x75316420]  ;;  %v346_v3 = vld.sshfl [vmem:[#allocation1 + $0x8] sm:$0xff pattern:$0x75316420] }
  0x18   : > { %357 = vst [vmem:[#allocation1] ss:$2 sm:$0xff] %v337_v1  ;;  %v350_v12 = vmul.f32 %v346_v3, %v340_v6  ;;  %v349_v15 = vmul.f32 %v345_v2, %v339_v9 }
  0x1f   : > { %v358_v10 = vld.sshfl [vmem:[#allocation1] sm:$0xff pattern:$0x75316420]  ;;  %v359_v11 = vld.sshfl [vmem:[#allocation1 + $0x8] sm:$0xff pattern:$0x75316420] }
  0x20   : > { %373 = vst [vmem:[#allocation1] ss:$2 sm:$0xff] %v337_v1  ;;  %v362_v13 = vmul.f32 %v358_v10, %v352_v7  ;;  %v363_v14 = vmul.f32 %v359_v11, %v353_v8 }
  0x22   : > { %v365_v16 = vsub.f32 %v350_v12, %v363_v14  ;;  %v364_v17 = vsub.f32 %v349_v15, %v362_v13 }
  0x24   : > { %v368_v18 = vrot.slane %v365_v16, 4 }
  0x26   : > { %v370_v19 = vsel %vm369_vm0, %v364_v17, %v368_v18 }
  0x27   : > { %372 = vst [vmem:[%s321_s6] sm:$0xff] %v370_v19  ;;  %v374_v20 = vld.sshfl [vmem:[#allocation1] sm:$0xff pattern:$0x75316420]  ;;  %v375_v21 = vld.sshfl [vmem:[#allocation1 + $0x8] sm:$0xff pattern:$0x75316420] }
  0x28   : > { %380 = vst [vmem:[#allocation1] ss:$2 sm:$0xff] %v336_v0  ;;  %v379_v24 = vmul.f32 %v375_v21, %v340_v6  ;;  %v378_v27 = vmul.f32 %v374_v20, %v339_v9 }
  0x2f   : > { %v381_v22 = vld.sshfl [vmem:[#allocation1] sm:$0xff pattern:$0x75316420]  ;;  %v382_v23 = vld.sshfl [vmem:[#allocation1 + $0x8] sm:$0xff pattern:$0x75316420] }
  0x30   : > { %v385_v25 = vmul.f32 %v381_v22, %v352_v7  ;;  %v386_v26 = vmul.f32 %v382_v23, %v353_v8 }
  0x32   : > { %v388_v28 = vadd.f32 %v386_v26, %v379_v24  ;;  %v387_v29 = vadd.f32 %v385_v25, %v378_v27 }
  0x34   : > { %v391_v30 = vrot.slane %v388_v28, 4 }
  0x36   : > { %v392_v31 = vsel %vm369_vm0, %v387_v29, %v391_v30 }
  0x37   : > { %394 = vst [vmem:[%s331_s9] sm:$0xff] %v392_v31 }
  0x38 PF: > { %s15_s17 = sadd.s32 1, %s637_s17   ;;  %s719_s15 = smov %s633_s16 }
  0x39   : > { %p12_p5 = scmp.ge.s32.totalorder %s15_s17, 4   ;;  %s720_s16 = smov %s722_s18 }
  0x3b   :  { %14 = sbr.rel (!%p12_p5) target bundleno = 2 (0x2), region = 81 }

// kernel: rim_block_forward.25
= control target key start
LH: loop header
LB: loop body
LE: loop exit
PB: predicated region body
PF: predicated region fallthrough
CT: control target
= control target key end

     0   :  { %s642_s15 = smov 0   ;;  %s644_s16 = smov 0   ;;  %s688_s0 = inlined_call_operand.vmem [shape: f32[2,4,256], index: 0, kind: input, shape index: {}]   ;;  %s689_s1 = inlined_call_operand.vmem [shape: f32[2,4,256], index: 1, kind: input, shape index: {}]   ;;  %s690_s2 = inlined_call_operand.vmem [shape: f32[2,4,256], index: 2, kind: input, shape index: {}]   ;;  %s691_s3 = inlined_call_operand.vmem [shape: f32[2,4,256], index: 3, kind: input, shape index: {}]   ;;  %s692_s4 = inlined_call_operand.vmem [shape: f32[2,2,256], index: 4, kind: output, shape index: {}]  }
   0x1   :  { %s646_s17 = smov 0  }
   0x2 LB: > { %s26_s18 = sadd.s32 1, %s611_s16  ;;  %p551_p0 = scmp.ge.s32.totalorder %s615_s17, 1  ;;  %s615_s17 = sphi %s646_s17, %s14_s17   ;;  %s611_s16 = sphi %s644_s16, %s694_s16   ;;  %s607_s15 = sphi %s642_s15, %s693_s15  }
   0x3   : > { %p28_p1 = scmp.ge.s32.totalorder %s26_s18, 2  ;;  %p234_p2 = scmp.lt.s32.totalorder %s615_s17, 3 }
   0x5   : > { %s696_s18 = smov (%p28_p1, %s26_s18), 0  ;;  %p235_p3 = pnand %p551_p0, %p234_p2 }
   0x6   : > { %p296_p4 = scmp.lt.s32.totalorder (!%p235_p3), %s607_s15, 1 }
   0x7   : > { %238 = sbr.rel (%p235_p3) target bundleno = 57 (0x39), region = 36 }
   0xc   : > { %s698_s15 = smov (!%p296_p4, %s607_s15), 1  ;;  %vm358_vm0 = vcmask 1043456   ;;  %vm396_vm1 = vcmask 1040384   ;;  %vm402_vm2 = vcmask 1041408  }
   0xd   : > { %s564_s19 = sshll.u32 %s698_s15, 3  ;;  %s568_s6 = sshll.u32 %s698_s15, 2 }
   0xe   : > { %s303_s22 = scalar_lea.vmem %s688_s0, %s564_s19  ;;  %s313_s25 = scalar_lea.vmem %s689_s1, %s564_s19 }
   0xf   : > { %s323_s28 = scalar_lea.vmem %s690_s2, %s564_s19  ;;  %s333_s5 = scalar_lea.vmem %s691_s3, %s564_s19  ;;  %v345_v0 = vld [vmem:[%s303_s22] sm:$0xff] }
  0x10   : > { %v346_v1 = vld [vmem:[%s313_s25] sm:$0xff]  ;;  %s343_s9 = scalar_lea.vmem %s692_s4, %s568_s6 }
  0x11   : > { %v347_v2 = vld [vmem:[%s323_s28] sm:$0xff] }
  0x12   : > { %v348_v3 = vld [vmem:[%s333_s5] sm:$0xff]  ;;  %v349_v4 = vmul.f32 %v347_v2, %v345_v0  ;;  %v373_v7 = vmul.f32 %v347_v2, %v346_v1 }
  0x13   : > { %v350_v5 = vmul.f32 %v348_v3, %v346_v1  ;;  %v374_v8 = vmul.f32 %v348_v3, %v345_v0 }
  0x15   : > { %v351_v6 = vadd.f32 %v350_v5, %v349_v4  ;;  %v375_v9 = vsub.f32 %v373_v7, %v374_v8 }
  0x17   : > { %353 = vst [vmem:[#allocation1] ss:$2 sm:$0xff] %v351_v6 }
  0x1e   : > { %v354_v10 = vld.sshfl [vmem:[#allocation1] sm:$0xff pattern:$0x75316420]  ;;  %v355_v11 = vld.sshfl [vmem:[#allocation1 + $0x8] sm:$0xff pattern:$0x75316420] }
  0x1f   : > { %v359_v12 = vsel %vm358_vm0, %v354_v10, 0.0  ;;  %v366_v13 = vsel %vm358_vm0, %v355_v11, 0.0  ;;  %377 = vst [vmem:[#allocation1] ss:$2 sm:$0xff] %v375_v9 }
  0x20   : > { %v360_v14 = vrot.slane %v359_v12, 4  ;;  %v367_v15 = vrot.slane %v366_v13, 4 }
  0x22   : > { %v368_v16 = vadd.f32 %v367_v15, %v366_v13  ;;  %v361_v17 = vadd.f32 %v360_v14, %v359_v12 }
  0x24   : > { %v369_v18 = vrot.slane %v368_v16, 2  ;;  %v362_v23 = vrot.slane %v361_v17, 2 }
  0x26   : > { %v379_v19 = vld.sshfl [vmem:[#allocation1 + $0x8] sm:$0xff pattern:$0x75316420]  ;;  %v378_v20 = vld.sshfl [vmem:[#allocation1] sm:$0xff pattern:$0x75316420]  ;;  %v370_v26 = vadd.f32 %v369_v18, %v368_v16  ;;  %v363_v29 = vadd.f32 %v362_v23, %v361_v17 }
  0x27   : > { %v389_v21 = vsel %vm358_vm0, %v379_v19, 0.0  ;;  %v382_v22 = vsel %vm358_vm0, %v378_v20, 0.0 }
  0x28   : > { %v390_v24 = vrot.slane %v389_v21, 4  ;;  %v383_v25 = vrot.slane %v382_v22, 4  ;;  %v371_v32 = vrot.slane %v370_v26, 1  ;;  %v364_v35 = vrot.slane %v363_v29, 1 }
  0x2a   : > { %v391_v27 = vadd.f32 %v390_v24, %v389_v21  ;;  %v384_v28 = vadd.f32 %v383_v25, %v382_v22  ;;  %v372_v38 = vadd.f32 %v371_v32, %v370_v26  ;;  %v365_v41 = vadd.f32 %v364_v35, %v363_v29 }
  0x2c   : > { %v385_v30 = vrot.slane %v384_v28, 2  ;;  %v392_v31 = vrot.slane %v391_v27, 2 }
  0x2e   : > { %v386_v33 = vadd.f32 %v385_v30, %v384_v28  ;;  %v393_v34 = vadd.f32 %v392_v31, %v391_v27 }
  0x30   : > { %v387_v36 = vrot.slane %v386_v33, 1  ;;  %v394_v37 = vrot.slane %v393_v34, 1 }
  0x32   : > { %v388_v39 = vadd.f32 %v387_v36, %v386_v33  ;;  %v395_v40 = vadd.f32 %v394_v37, %v393_v34 }
  0x34   : > { %v398_v42 = vsel %vm396_vm1, %v372_v38, %v395_v40  ;;  %v397_v44 = vsel %vm396_vm1, %v365_v41, %v388_v39 }
  0x35   : > { %v401_v43 = vrot.slane %v398_v42, 6 }
  0x37   : > { %v403_v45 = vsel %vm402_vm2, %v397_v44, %v401_v43 }
  0x38   : > { %405 = vst [vmem:[%s343_s9] sm:$0xf] %v403_v45 }
  0x39 PF: > { %s14_s17 = sadd.s32 1, %s615_s17   ;;  %s693_s15 = smov %s611_s16 }
  0x3a   : > { %p11_p5 = scmp.ge.s32.totalorder %s14_s17, 4   ;;  %s694_s16 = smov %s696_s18 }
  0x3c   :  { %13 = sbr.rel (!%p11_p5) target bundleno = 2 (0x2), region = 75 }

// kernel: rim_block_forward.27
= control target key start
LH: loop header
LB: loop body
LE: loop exit
PB: predicated region body
PF: predicated region fallthrough
CT: control target
= control target key end

     0   :  { %s110_s0 = inlined_call_operand.vmem [shape: f32[8,512], index: 0, kind: input, shape index: {}]   ;;  %s111_s1 = inlined_call_operand.vmem [shape: f32[8,512], index: 1, kind: input, shape index: {}]   ;;  %s112_s2 = inlined_call_operand.vmem [shape: f32[8,512], index: 2, kind: input, shape index: {}]   ;;  %s113_s3 = inlined_call_operand.vmem [shape: f32[8,512], index: 3, kind: output, shape index: {}]  }
   0x1   :  { %v14_v0 = vld [vmem:[%s110_s0] sm:$0xff]  ;;  %v15_v4 = vld [vmem:[%s110_s0 + $0x8] sm:$0xff]  ;;  %v16_v8 = vld [vmem:[%s110_s0 + $0x10] sm:$0xff] }
   0x2   :  { %v18_v1 = vld [vmem:[%s111_s1] sm:$0xff]  ;;  %v19_v5 = vld [vmem:[%s111_s1 + $0x8] sm:$0xff]  ;;  %v20_v9 = vld [vmem:[%s111_s1 + $0x10] sm:$0xff] }
   0x3   :  { %v22_v2 = vld [vmem:[%s112_s2] sm:$0xff]  ;;  %v23_v6 = vld [vmem:[%s112_s2 + $0x8] sm:$0xff]  ;;  %v24_v10 = vld [vmem:[%s112_s2 + $0x10] sm:$0xff] }
   0x4   :  { %v26_v3 = vsub.f32 %v18_v1, %v22_v2  ;;  %v27_v7 = vsub.f32 %v19_v5, %v23_v6  ;;  %v28_v12 = vsub.f32 %v20_v9, %v24_v10  ;;  %v17_v13 = vld [vmem:[%s110_s0 + $0x18] sm:$0xff] }
   0x5   :  { %v21_v14 = vld [vmem:[%s111_s1 + $0x18] sm:$0xff] }
   0x6   :  { %v30_v11 = vmul.f32 %v26_v3, %v14_v0  ;;  %v25_v15 = vld [vmem:[%s112_s2 + $0x18] sm:$0xff]  ;;  %v31_v16 = vmul.f32 %v27_v7, %v15_v4  ;;  %v32_v18 = vmul.f32 %v28_v12, %v16_v8 }
   0x7   :  { %v29_v17 = vsub.f32 %v21_v14, %v25_v15 }
   0x8   :  { %34 = vst [vmem:[%s113_s3] sm:$0xff] %v30_v11 }
   0x9   :  { %35 = vst [vmem:[%s113_s3 + $0x8] sm:$0xff] %v31_v16  ;;  %v33_v19 = vmul.f32 %v29_v17, %v17_v13 }
   0xa   :  { %36 = vst [vmem:[%s113_s3 + $0x10] sm:$0xff] %v32_v18 }
   0xb   :  { %37 = vst [vmem:[%s113_s3 + $0x18] sm:$0xff] %v33_v19 }

// kernel: rim_block_forward.29
= control target key start
LH: loop header
LB: loop body
LE: loop exit
PB: predicated region body
PF: predicated region fallthrough
CT: control target
= control target key end

     0   :  { %s5653_s27 = smov 0   ;;  %s8696_s0 = inlined_call_operand.vmem [shape: f32[2,8,420], index: 0, kind: input, shape index: {}]   ;;  %s8697_s1 = inlined_call_operand.vmem [shape: f32[2,32,320], index: 1, kind: input, shape index: {}]   ;;  %s8698_s2 = inlined_call_operand.vmem [shape: f32[25,32,8], index: 2, kind: input, shape index: {}]   ;;  %s8699_s3 = inlined_call_operand.vmem [shape: f32[32,1], index: 3, kind: input, shape index: {}]   ;;  %s8700_s4 = inlined_call_operand.vmem [shape: f32[96,32], index: 4, kind: input, shape index: {}]   ;;  %s8701_s5 = inlined_call_operand.vmem [shape: f32[96,1], index: 5, kind: input, shape index: {}]   ;;  %s8702_s6 = inlined_call_operand.vmem [shape: f32[96,32], index: 6, kind: input, shape index: {}]   ;;  %s8703_s7 = inlined_call_operand.vmem [shape: f32[96,1], index: 7, kind: input, shape index: {}]   ;;  %s8704_s8 = inlined_call_operand.vmem [shape: f32[2,32,320], index: 8, kind: output, shape index: {}]  }
   0x1 LB: > { %s4769_s28 = sadd.s32 4294967295, %s5581_s27   ;;  %p4773_p0 = scmp.ge.s32.totalorder %s5581_s27, 1  ;;  %s5581_s27 = sphi %s5653_s27, %s18_s27  }
   0x2   : > { %p272_p1 = scmp.lt.s32.totalorder %s5581_s27, 3 }
   0x4   : > { %p273_p2 = pnand %p4773_p0, %p272_p1 }
   0x6   : > { %276 = sbr.rel (%p273_p2) target bundleno = 1213 (0x4bd), region = 52 }
   0xb   : > { %p311_p3 = scmp.lt.s32.totalorder %s4769_s28, 1  ;;  %s5583_s11 = smov 126   ;;  %vm359_vm0 = vcmask 1039360   ;;  %v4778_v9 = vld [vmem:[%s8698_s2 + $0x20] sm:$0xff]  ;;  %vm365_vm1 = vcmask 64512   ;;  %v4780_v14 = vld [vmem:[%s8698_s2 + $0x30] sm:$0xff] }
   0xc   : > { %s5584_s12 = smov 127   ;;  %s5585_s13 = smov 125   ;;  %vm575_vm2 = vcmask 1031168   ;;  %v4779_v16 = vld [vmem:[%s8698_s2 + $0x28] sm:$0xff]  ;;  %v4781_v17 = vld [vmem:[%s8698_s2 + $0x38] sm:$0xff]  ;;  %v5723_v19 = vld [vmem:[%s8698_s2 + $0x40] sm:$0xff] }
   0xd   : > { %s8784_s28 = smov (!%p311_p3, %s4769_s28), 1  ;;  %s5586_s14 = smov 124   ;;  %v341_v20 = vld [vmem:[%s8698_s2] sm:$0xff]  ;;  %v5736_v21 = vld [vmem:[%s8698_s2 + $0x48] sm:$0xff]  ;;  %v5752_v24 = vld [vmem:[%s8698_s2 + $0x50] sm:$0xff]  ;;  %vm831_vm3 = vcmask 1014784  }
   0xe   : > { %s5272_s29 = sshll.u32 %s8784_s28, 5  ;;  %s5587_s15 = smov 108   ;;  %v342_v23 = vld [vmem:[%s8698_s2 + $0x8] sm:$0xff]  ;;  %v343_v26 = vld [vmem:[%s8698_s2 + $0x10] sm:$0xff]  ;;  %v5767_v27 = vld [vmem:[%s8698_s2 + $0x58] sm:$0xff]  ;;  %vm703_vm4 = vcmask 1022976  }
   0xf   : > { %s5667_s10 = scalar_lea.vmem %s8696_s0, %s5272_s29  ;;  %s5588_s16 = smov 107   ;;  %v344_v30 = vld [vmem:[%s8698_s2 + $0x18] sm:$0xff]  ;;  %v5782_v31 = vld [vmem:[%s8698_s2 + $0x60] sm:$0xff]  ;;  %v5793_v41 = vld [vmem:[%s8698_s2 + $0x68] sm:$0xff]  ;;  %vm959_vm5 = vcmask 883712   ;;  %vm1087_vm6 = vcmask 875520  }
  0x10   : > { %v5670_v0 = vld [vmem:[%s5667_s10] sm:$0xff]  ;;  %v339_v1 = vld [vmem:[%s5667_s10 + $0x8] sm:$0xff]  ;;  %v5674_v2 = vld [vmem:[%s5667_s10 + $0x10] sm:$0xff]  ;;  %s5589_s19 = smov 106   ;;  %s5590_s26 = smov 88   ;;  %vm1343_vm7 = vcmask 859136  }
  0x11   : > { %v5677_v3 = vpack.i.bf16 %v339_v1, %v5670_v0  ;;  %573 = vrot.lane.b32.xlu1 %v5674_v2, %s5583_s11  ;;  %v5690_v4 = vpack.i.bf16 %v5674_v2, %v339_v1  ;;  %v5806_v48 = vld [vmem:[%s8698_s2 + $0x70] sm:$0xff]  ;;  %v5820_v49 = vld [vmem:[%s8698_s2 + $0x78] sm:$0xff]  ;;  %v4854_v50 = vld [vmem:[%s8698_s2 + $0xa0] sm:$0xff]  ;;  %s5594_s18 = smov 84   ;;  %s5595_s20 = smov 86   ;;  %vm1215_vm8 = vcmask 867328  }
  0x12   : > { %v4855_v51 = vld [vmem:[%s8698_s2 + $0xa8] sm:$0xff]  ;;  %v5851_v52 = vld [vmem:[%s8698_s2 + $0x80] sm:$0xff]  ;;  %v4856_v58 = vld [vmem:[%s8698_s2 + $0xb0] sm:$0xff]  ;;  %s5596_s23 = smov 85   ;;  %vm1471_vm9 = vcmask 850944   ;;  %s5598_s17 = smov 65  }
  0x13   : > { %5314 = vrot.lane.b32.xlu0 %v5677_v3, %s5584_s12  ;;  %5324 = vrot.lane.b32.xlu2 %v5677_v3, %s5585_s13  ;;  %v5871_v59 = vld [vmem:[%s8698_s2 + $0x88] sm:$0xff]  ;;  %v5881_v60 = vld [vmem:[%s8698_s2 + $0xb8] sm:$0xff]  ;;  %vm1599_vm10 = vcmask 719872   ;;  %s5600_s24 = smov 66   ;;  %vm1855_vm11 = vcmask 703488   ;;  %vm1727_vm12 = vcmask 711680  }
  0x14   : > { %v5888_v61 = vld [vmem:[%s8698_s2 + $0x90] sm:$0xff]  ;;  %v5899_v62 = vld [vmem:[%s8698_s2 + $0xc0] sm:$0xff]  ;;  %v5906_v63 = vld [vmem:[%s8698_s2 + $0x98] sm:$0xff]  ;;  %vm1983_vm13 = vcmask 695296   ;;  %vm2111_vm14 = vcmask 687104   ;;  %s5601_s29 = smov 64  }
  0x15   : > { %s5603_s22 = smov 47   ;;  %vm2367_vm15 = vcmask 547840  }
  0x19   : > { %5319 = vrot.lane.b32.xlu1 %v5677_v3, %s5583_s11  ;;  %s5604_s11 = smov 46  }
  0x1b   : > { %357 = vrot.lane.b32.xlu0 %v5674_v2, %s5584_s12  ;;  %5329 = vrot.lane.b32.xlu2 %v5677_v3, %s5586_s14 }
  0x21   : > { %829 = vrot.lane.b32.xlu1 %v5674_v2, %s5586_s14  ;;  %s5591_s14 = smov 105  }
  0x23   : > { %701 = vrot.lane.b32.xlu0 %v5674_v2, %s5585_s13  ;;  %5334 = vrot.lane.b32.xlu2 %v5690_v4, %s5587_s15  ;;  %s5605_s13 = smov 45  }
  0x29   : > { %953 = vrot.lane.b32.xlu1 %v5670_v0, %s5587_s15 }
  0x2b   : > { %1085 = vrot.lane.b32.xlu0 %v5674_v2, %s5588_s16  ;;  %5339 = vrot.lane.b32.xlu2 %v5677_v3, %s5588_s16  ;;  %s5593_s16 = smov 87  }
  0x31   : > { %5349 = vrot.lane.b32.xlu1 %v5677_v3, %s5591_s14 }
  0x33   : > { %1213 = vrot.lane.b32.xlu2 %v5674_v2, %s5589_s19  ;;  %5344 = vrot.lane.b32.xlu0 %v5677_v3, %s5589_s19  ;;  %s5592_s19 = smov 104  }
  0x39   : > { %5354 = vrot.lane.b32.xlu1 %v5690_v4, %s5592_s19 }
  0x3b   : > { %1597 = vrot.lane.b32.xlu2 %v5674_v2, %s5590_s26  ;;  %1341 = vrot.lane.b32.xlu0 %v5674_v2, %s5591_s14 }
  0x41   : > { %5359 = vrot.lane.b32.xlu1 %v5677_v3, %s5590_s26  ;;  %s5606_s26 = smov 44  }
  0x43   : > { %1465 = vrot.lane.b32.xlu0 %v5670_v0, %s5592_s19  ;;  %5364 = vrot.lane.b32.xlu2 %v5677_v3, %s5593_s16 }
  0x49   : > { %1725 = vrot.lane.b32.xlu1 %v5674_v2, %s5593_s16 }
  0x4b   : > { %5369 = vrot.lane.b32.xlu0 %v5677_v3, %s5595_s20  ;;  %1853 = vrot.lane.b32.xlu2 %v5674_v2, %s5595_s20  ;;  %s5602_s20 = smov 48  }
  0x51   : > { %2109 = vrot.lane.b32.xlu1 %v5674_v2, %s5594_s18 }
  0x53   : > { %5374 = vrot.lane.b32.xlu0 %v5690_v4, %s5596_s23  ;;  %1977 = vrot.lane.b32.xlu2 %v5670_v0, %s5596_s23 }
  0x5b   : > { %5379 = vrot.lane.b32.xlu0 %v5677_v3, %s5594_s18  ;;  %s5597_s18 = smov 68  }
  0x5c   : > { %5384 = vrot.lane.b32.xlu1 %v5677_v3, %s5597_s18 }
  0x63   : > { %2237 = vrot.lane.b32.xlu0 %v5674_v2, %s5597_s18  ;;  %s5599_s18 = smov 67  }
  0x64   : > { %2365 = vrot.lane.b32.xlu1 %v5674_v2, %s5599_s18  ;;  %5389 = vrot.lane.b32.xlu2 %v5677_v3, %s5599_s18 }
  0x6b   : > { %2621 = vrot.lane.b32.xlu0 %v5674_v2, %s5598_s17 }
  0x6c   : > { %2489 = vrot.lane.b32.xlu1 %v5670_v0, %s5600_s24  ;;  %5394 = vrot.lane.b32.xlu2 %v5690_v4, %s5600_s24 }
  0x6d   : > { %v5325_v28 = vpop.permute.xlu2 %5324 }
  0x6e   : > { %v5327_v32 = vunpack.i.h.bf16 %v5325_v28  ;;  %v5326_v33 = vunpack.i.l.bf16 %v5325_v28  ;;  %v5987_v28 = vld [vmem:[%s8698_s2 + $0xe8] sm:$0xff] }
  0x70   : > { %v704_v38 = vsel %vm703_vm4, %v5326_v33, %v5327_v32 }
  0x75   : > { %v5330_v34 = vpop.permute.xlu2 %5329 }
  0x76   : > { %v5332_v35 = vunpack.i.h.bf16 %v5330_v34  ;;  %v5331_v40 = vunpack.i.l.bf16 %v5330_v34 }
  0x78   : > { %v832_v46 = vsel %vm831_vm3, %v5331_v40, %v5332_v35 }
  0x7d   : > { %v5335_v42 = vpop.permute.xlu2 %5334 }
  0x7e   : > { %v5337_v43 = vunpack.i.h.bf16 %v5335_v42  ;;  %v5336_v44 = vunpack.i.l.bf16 %v5335_v42 }
  0x80   : > { %v961_v56 = vsel %vm959_vm5, %v5336_v44, %v5337_v43 }
  0x83   : > { %v574_v5 = vpop.permute.xlu1 %573 }
  0x85   : > { %v5315_v6 = vpop.permute.xlu0 %5314  ;;  %v5853_v53 = vpop.permute.xlu2 %5339 }
  0x86   : > { %v5317_v7 = vunpack.i.h.bf16 %v5315_v6  ;;  %v5316_v8 = vunpack.i.l.bf16 %v5315_v6  ;;  %v5342_v54 = vunpack.i.h.bf16 %v5853_v53 }
  0x88   : > { %v360_v10 = vsel %vm359_vm0, %v5316_v8, %v5317_v7 }
  0x89   : > { %393 = vmatpush.msra.mxu0 %v360_v10  ;;  %v5948_v10 = vld [vmem:[%s8698_s2 + $0xd8] sm:$0xff] }
  0x8a   : > { %4782 = vmatmul.msk.f32.vlgmr.msra.gmra.mxu0 %vm365_vm1, %v4778_v9 }
  0x8b   : > { %v5320_v11 = vpop.permute.xlu1 %5319  ;;  %521 = vmatpush.msrb.mxu0 %v339_v1  ;;  %v5917_v1 = vld [vmem:[%s8698_s2 + $0xc8] sm:$0xff] }
  0x8c   : > { %v5322_v12 = vunpack.i.h.bf16 %v5320_v11  ;;  %v5321_v25 = vunpack.i.l.bf16 %v5320_v11  ;;  %v5341_v11 = vunpack.i.l.bf16 %v5853_v53 }
  0x8d   : > { %666 = vmatpush.msra.mxu0 %v574_v5  ;;  %v358_v13 = vpop.permute.xlu0 %357 }
  0x8e   : > { %v361_v15 = vsel %vm359_vm0, %v5317_v7, %v358_v13  ;;  %v577_v18 = vsel %vm575_vm2, %v5322_v12, %v574_v5  ;;  %v576_v29 = vsel %vm575_vm2, %v5321_v25, %v5322_v12  ;;  %v1214_v5 = vpop.permute.xlu2 %1213  ;;  %v5933_v7 = vld [vmem:[%s8698_s2 + $0xd0] sm:$0xff]  ;;  %vm2239_vm0 = vcmask 556032  }
  0x8f   : > { %422 = vmatpush.msra.mxu1 %v361_v15  ;;  %5273 = vmatpush.msra.mxu2 %v361_v15  ;;  %vm2495_vm2 = vcmask 539648  }
  0x90   : > { %5274 = vmatpush.msra.mxu3 %v361_v15  ;;  %4788 = vmatmul.msk.f32.vlgmr.msra.gmra.mxu2 %vm365_vm1, %v4780_v14 }
  0x91   : > { %4786 = vmatmul.msk.f32.vlgmr.msra.gmra.mxu1 %vm365_vm1, %v4778_v9  ;;  %451 = vmatpush.msrb.mxu2 %v358_v13 }
  0x92   : > { %4783 = vmatmul.msk.f32.gmra.mxu0 %vm365_vm1, %v4779_v16  ;;  %4789 = vmatmul.msk.f32.vlgmr.msra.gmra.mxu3 %vm365_vm1, %v4781_v17 }
  0x93   : > { %550 = vmatpush.msrb.mxu1 %v5674_v2  ;;  %637 = vmatpush.msrb.mxu3 %v577_v18  ;;  %v830_v36 = vpop.permute.xlu1 %829  ;;  %v1088_v18 = vsel %vm1087_vm6, %v5341_v11, %v5342_v54 }
  0x94   : > { %492 = vmatpush.msra.mxu2 %v5670_v0  ;;  %v833_v37 = vsel %vm831_vm3, %v5332_v35, %v830_v36  ;;  %vm2623_vm3 = vcmask 531456  }
  0x95   : > { %v702_v22 = vpop.permute.xlu0 %701  ;;  %736 = vmatpush.msra.mxu1 %v704_v38 }
  0x96   : > { %794 = vmatpush.msra.mxu3 %v702_v22  ;;  %v705_v39 = vsel %vm703_vm4, %v5327_v32, %v702_v22  ;;  %vm2751_vm4 = vcmask 523264  }
  0x98   : > { %4790 = vmatmul.msk.f32.vlgmr.msrb.gmra.mxu2 %vm365_vm1, %v4778_v9 }
  0x99   : > { %4787 = vmatmul.msk.f32.gmra.mxu1 %vm365_vm1, %v4779_v16  ;;  %608 = vmatpush.msrb.mxu2 %v576_v29 }
  0x9a   : > { %4784 = vmatmul.msk.f32.gmra.mxu0 %vm365_vm1, %v4780_v14  ;;  %4814 = vmatmul.msk.f32.vlgmr.msrb.gmra.mxu3 %vm365_vm1, %v5723_v19 }
  0x9b   : > { %v954_v45 = vpop.permute.xlu1 %953 }
  0x9c   : > { %v960_v47 = vsel %vm959_vm5, %v954_v45, %v5336_v44  ;;  %vm2889_vm5 = vcmask 392192  }
  0x9d   : > { %992 = vmatpush.msrb.mxu3 %v960_v47  ;;  %v1086_v55 = vpop.permute.xlu0 %1085 }
  0x9e   : > { %v1089_v57 = vsel %vm1087_vm6, %v5342_v54, %v1086_v55  ;;  %vm3020_vm6 = vcmask 384000  }
  0xa0   : > { %4791 = vmatmul.msk.f32.gmra.mxu2 %vm365_vm1, %v4779_v16 }
  0xa1   : > { %4802 = vmatmul.msk.f32.vlgmr.msrb.gmra.mxu1 %vm365_vm1, %v341_v20 }
  0xa2   : > { %4785 = vmatmul.msk.f32.gmra.mxu0 %vm365_vm1, %v4781_v17  ;;  %4815 = vmatmul.msk.f32.gmra.mxu3 %vm365_vm1, %v5736_v21 }
  0xa3   : > { %893 = vmatpush.msrb.mxu1 %v833_v37 }
  0xa8   : > { %4792 = vmatmul.msk.f32.gmra.mxu2 %vm365_vm1, %v4780_v14  ;;  %v5345_v14 = vpop.permute.xlu0 %5344 }
  0xa9   : > { %4803 = vmatmul.msk.f32.gmra.mxu1 %vm365_vm1, %v342_v23  ;;  %v5346_v22 = vunpack.i.l.bf16 %v5345_v14 }
  0xaa   : > { %4798 = vmatmul.msk.f32.vlgmr.msrb.gmra.mxu0 %vm365_vm1, %v341_v20  ;;  %4816 = vmatmul.msk.f32.gmra.mxu3 %vm365_vm1, %v5752_v24 }
  0xab   : > { %864 = vmatpush.msrb.mxu0 %v832_v46 }
  0xb0   : > { %4793 = vmatmul.msk.f32.gmra.mxu2 %vm365_vm1, %v4781_v17  ;;  %v5966_v17 = vld [vmem:[%s8698_s2 + $0xe0] sm:$0xff]  ;;  %v1342_v25 = vpop.permute.xlu0 %1341 }
  0xb1   : > { %4804 = vmatmul.msk.f32.gmra.mxu1 %vm365_vm1, %v343_v26 }
  0xb2   : > { %4799 = vmatmul.msk.f32.gmra.mxu0 %vm365_vm1, %v342_v23  ;;  %4817 = vmatmul.msk.f32.gmra.mxu3 %vm365_vm1, %v5767_v27 }
  0xb8   : > { %4794 = vmatmul.msk.f32.vlgmr.msra.gmra.mxu2 %vm365_vm1, %v341_v20 }
  0xb9   : > { %4805 = vmatmul.msk.f32.gmra.mxu1 %vm365_vm1, %v344_v30  ;;  %765 = vmatpush.msra.mxu2 %v705_v39  ;;  %v1466_v39 = vpop.permute.xlu0 %1465 }
  0xba   : > { %4800 = vmatmul.msk.f32.gmra.mxu0 %vm365_vm1, %v343_v26  ;;  %4834 = vmatmul.msk.f32.vlgmr.msra.gmra.mxu3 %vm365_vm1, %v5782_v31 }
  0xbb   : > { %1149 = vmatpush.msra.mxu3 %v1089_v57  ;;  %v6061_v57 = vld [vmem:[%s8698_s2 + $0x120] sm:$0xff] }
  0xc0   : > { %4795 = vmatmul.msk.f32.gmra.mxu2 %vm365_vm1, %v342_v23 }
  0xc1   : > { %4826 = vmatmul.msk.f32.vlgmr.msra.gmra.mxu1 %vm365_vm1, %v5782_v31  ;;  %v5370_v0 = vpop.permute.xlu0 %5369 }
  0xc2   : > { %4801 = vmatmul.msk.f32.gmra.mxu0 %vm365_vm1, %v344_v30  ;;  %4835 = vmatmul.msk.f32.gmra.mxu3 %vm365_vm1, %v5793_v41 }
  0xc3   : > { %1050 = vmatpush.msra.mxu1 %v5337_v43  ;;  %v6017_v43 = vld [vmem:[%s8698_s2 + $0xf0] sm:$0xff] }
  0xc8   : > { %4796 = vmatmul.msk.f32.gmra.mxu2 %vm365_vm1, %v343_v26 }
  0xc9   : > { %4827 = vmatmul.msk.f32.gmra.mxu1 %vm365_vm1, %v5793_v41 }
  0xca   : > { %4818 = vmatmul.msk.f32.vlgmr.msra.gmra.mxu0 %vm365_vm1, %v5723_v19  ;;  %4836 = vmatmul.msk.f32.gmra.mxu3 %vm365_vm1, %v5806_v48 }
  0xcb   : > { %1021 = vmatpush.msra.mxu0 %v961_v56 }
  0xd0   : > { %4797 = vmatmul.msk.f32.gmra.mxu2 %vm365_vm1, %v344_v30 }
  0xd1   : > { %4828 = vmatmul.msk.f32.gmra.mxu1 %vm365_vm1, %v5806_v48 }
  0xd2   : > { %4819 = vmatmul.msk.f32.gmra.mxu0 %vm365_vm1, %v5736_v21  ;;  %4837 = vmatmul.msk.f32.gmra.mxu3 %vm365_vm1, %v5820_v49 }
  0xd8   : > { %4810 = vmatmul.msk.f32.vlgmr.msrb.gmra.mxu2 %vm365_vm1, %v5723_v19  ;;  %v5350_v19 = vpop.permute.xlu1 %5349 }
  0xd9   : > { %4829 = vmatmul.msk.f32.gmra.mxu1 %vm365_vm1, %v5820_v49  ;;  %922 = vmatpush.msrb.mxu2 %v830_v36  ;;  %v5351_v30 = vunpack.i.l.bf16 %v5350_v19 }
  0xda   : > { %4820 = vmatmul.msk.f32.gmra.mxu0 %vm365_vm1, %v5752_v24  ;;  %4858 = vmatmul.msk.f32.vlgmr.msrb.gmra.mxu3 %vm365_vm1, %v4854_v50 }
  0xdb   : > { %1306 = vmatpush.msrb.mxu3 %v1214_v5 }
  0xe0   : > { %4811 = vmatmul.msk.f32.gmra.mxu2 %vm365_vm1, %v5736_v21  ;;  %v5347_v21 = vunpack.i.h.bf16 %v5345_v14 }
  0xe1   : > { %4846 = vmatmul.msk.f32.vlgmr.msrb.gmra.mxu1 %vm365_vm1, %v5851_v52 }
  0xe2   : > { %4821 = vmatmul.msk.f32.gmra.mxu0 %vm365_vm1, %v5767_v27  ;;  %4859 = vmatmul.msk.f32.gmra.mxu3 %vm365_vm1, %v4855_v51  ;;  %v1216_v29 = vsel %vm1215_vm8, %v5346_v22, %v5347_v21  ;;  %v1217_v35 = vsel %vm1215_vm8, %v5347_v21, %v1214_v5  ;;  %vm3282_vm8 = vcmask 367616  }
  0xe3   : > { %1248 = vmatpush.msrb.mxu1 %v1216_v29  ;;  %v6119_v29 = vld [vmem:[%s8698_s2 + $0x130] sm:$0xff] }
  0xe8   : > { %4812 = vmatmul.msk.f32.gmra.mxu2 %vm365_vm1, %v5752_v24  ;;  %v5352_v24 = vunpack.i.h.bf16 %v5350_v19 }
  0xe9   : > { %4847 = vmatmul.msk.f32.gmra.mxu1 %vm365_vm1, %v5871_v59 }
  0xea   : > { %4842 = vmatmul.msk.f32.vlgmr.msrb.gmra.mxu0 %vm365_vm1, %v5851_v52  ;;  %4860 = vmatmul.msk.f32.gmra.mxu3 %vm365_vm1, %v4856_v58  ;;  %v1345_v32 = vsel %vm1343_vm7, %v5352_v24, %v1342_v25  ;;  %v1344_v37 = vsel %vm1343_vm7, %v5351_v30, %v5352_v24  ;;  %v6126_v30 = vld [vmem:[%s8698_s2 + $0x108] sm:$0xff]  ;;  %vm3151_vm7 = vcmask 375808  }
  0xeb   : > { %1178 = vmatpush.msrb.mxu0 %v1086_v55 }
  0xf0   : > { %4813 = vmatmul.msk.f32.gmra.mxu2 %vm365_vm1, %v5767_v27 }
  0xf1   : > { %4848 = vmatmul.msk.f32.gmra.mxu1 %vm365_vm1, %v5888_v61 }
  0xf2   : > { %4843 = vmatmul.msk.f32.gmra.mxu0 %vm365_vm1, %v5871_v59  ;;  %4861 = vmatmul.msk.f32.gmra.mxu3 %vm365_vm1, %v5881_v60 }
  0xf8   : > { %4830 = vmatmul.msk.f32.vlgmr.msra.gmra.mxu2 %vm365_vm1, %v5782_v31  ;;  %v5991_v31 = vpop.permute.xlu1 %5354 }
  0xf9   : > { %4849 = vmatmul.msk.f32.gmra.mxu1 %vm365_vm1, %v5906_v63  ;;  %1120 = vmatpush.msra.mxu2 %v1088_v18  ;;  %v5357_v33 = vunpack.i.h.bf16 %v5991_v31  ;;  %v5356_v34 = vunpack.i.l.bf16 %v5991_v31 }
  0xfa   : > { %4844 = vmatmul.msk.f32.gmra.mxu0 %vm365_vm1, %v5888_v61  ;;  %4878 = vmatmul.msk.f32.vlgmr.msra.gmra.mxu3 %vm365_vm1, %v5899_v62 }
  0xfb   : > { %v1473_v21 = vsel %vm1471_vm9, %v5356_v34, %v5357_v33 }
 0x100   : > { %4831 = vmatmul.msk.f32.gmra.mxu2 %vm365_vm1, %v5793_v41  ;;  %v1472_v41 = vsel %vm1471_vm9, %v1466_v39, %v5356_v34  ;;  %vm3413_vm9 = vcmask 359424  }
 0x101   : > { %4866 = vmatmul.msk.f32.vlgmr.msra.gmra.mxu1 %vm365_vm1, %v4854_v50  ;;  %1504 = vmatpush.msra.mxu3 %v1472_v41 }
 0x102   : > { %4845 = vmatmul.msk.f32.gmra.mxu0 %vm365_vm1, %v5906_v63  ;;  %4879 = vmatmul.msk.f32.gmra.mxu3 %vm365_vm1, %v5917_v1 }
 0x103   : > { %1405 = vmatpush.msra.mxu1 %v1345_v32 }
 0x107   : > { %v5928_v6 = vpop.f32.mrf.mxu0 }
 0x108   : > { %4832 = vmatmul.msk.f32.gmra.mxu2 %vm365_vm1, %v5806_v48 }
 0x109   : > { %4867 = vmatmul.msk.f32.gmra.mxu1 %vm365_vm1, %v4855_v51 }
 0x10a   : > { %4862 = vmatmul.msk.f32.vlgmr.msra.gmra.mxu0 %vm365_vm1, %v4854_v50  ;;  %4880 = vmatmul.msk.f32.gmra.mxu3 %vm365_vm1, %v5933_v7  ;;  %v6040_v50 = vld [vmem:[%s8698_s2 + $0xf8] sm:$0xff] }
 0x10b   : > { %1376 = vmatpush.msra.mxu0 %v1344_v37 }
 0x10e   : > { %v424_v8 = vpop.f32.mrf.mxu1 }
 0x10f   : > { %v5943_v9 = vpop.f32.mrf.mxu0 }
 0x110   : > { %4833 = vmatmul.msk.f32.gmra.mxu2 %vm365_vm1, %v5820_v49 }
 0x111   : > { %4868 = vmatmul.msk.f32.gmra.mxu1 %vm365_vm1, %v4856_v58 }
 0x112   : > { %4863 = vmatmul.msk.f32.gmra.mxu0 %vm365_vm1, %v4855_v51  ;;  %4881 = vmatmul.msk.f32.gmra.mxu3 %vm365_vm1, %v5948_v10 }
 0x113   : > { %v5957_v12 = vpop.f32.mrf.mxu2 }
 0x115   : > { %v5959_v13 = vpop.f32.mrf.mxu3 }
 0x116   : > { %v427_v15 = vpop.f32.mrf.mxu1 }
 0x117   : > { %v5961_v16 = vpop.f32.mrf.mxu0 }
 0x118   : > { %4850 = vmatmul.msk.f32.vlgmr.msrb.gmra.mxu2 %vm365_vm1, %v5851_v52 }
 0x119   : > { %4869 = vmatmul.msk.f32.gmra.mxu1 %vm365_vm1, %v5881_v60  ;;  %1277 = vmatpush.msrb.mxu2 %v1217_v35  ;;  %v6142_v35 = vld [vmem:[%s8698_s2 + $0x138] sm:$0xff] }
 0x11a   : > { %4864 = vmatmul.msk.f32.gmra.mxu0 %vm365_vm1, %v4856_v58  ;;  %4898 = vmatmul.msk.f32.vlgmr.msrb.gmra.mxu3 %vm365_vm1, %v5966_v17 }
 0x11b   : > { %v5976_v20 = vpop.f32.mrf.mxu2 }
 0x11d   : > { %v639_v23 = vpop.f32.mrf.mxu3 }
 0x11e   : > { %v5980_v26 = vpop.f32.mrf.mxu1 }
 0x11f   : > { %v5982_v27 = vpop.f32.mrf.mxu0 }
 0x120   : > { %4851 = vmatmul.msk.f32.gmra.mxu2 %vm365_vm1, %v5871_v59 }
 0x121   : > { %4890 = vmatmul.msk.f32.vlgmr.msrb.gmra.mxu1 %vm365_vm1, %v5966_v17 }
 0x122   : > { %4865 = vmatmul.msk.f32.gmra.mxu0 %vm365_vm1, %v5881_v60  ;;  %4899 = vmatmul.msk.f32.gmra.mxu3 %vm365_vm1, %v5987_v28 }
 0x123   : > { %v6002_v36 = vpop.f32.mrf.mxu2  ;;  %1562 = vmatpush.msrb.mxu1 %v5357_v33 }
 0x125   : > { %v642_v38 = vpop.f32.mrf.mxu3 }
 0x126   : > { %v6009_v40 = vpop.f32.mrf.mxu1 }
 0x127   : > { %v523_v42 = vpop.f32.mrf.mxu0  ;;  %v556_v32 = vadd.f32 %v6009_v40, %v6002_v36 }
 0x128   : > { %v524_v44 = vadd.f32 %v523_v42, %v424_v8  ;;  %4852 = vmatmul.msk.f32.gmra.mxu2 %vm365_vm1, %v5888_v61  ;;  %v6084_v8 = vld [vmem:[%s8698_s2 + $0x128] sm:$0xff] }
 0x129   : > { %4891 = vmatmul.msk.f32.gmra.mxu1 %vm365_vm1, %v5987_v28 }
 0x12a   : > { %v6023_v45 = vadd.f32 %v639_v23, %v524_v44  ;;  %4882 = vmatmul.msk.f32.vlgmr.msrb.gmra.mxu0 %vm365_vm1, %v5899_v62  ;;  %4900 = vmatmul.msk.f32.gmra.mxu3 %vm365_vm1, %v6017_v43  ;;  %v553_v23 = vadd.f32 %v5980_v26, %v5976_v20  ;;  %v6165_v44 = vld [vmem:[%s8698_s2 + $0x140] sm:$0xff] }
 0x12b   : > { %v6029_v46 = vpop.f32.mrf.mxu2  ;;  %1533 = vmatpush.msrb.mxu0 %v1473_v21 }
 0x12d   : > { %v645_v47 = vpop.f32.mrf.mxu3 }
 0x12e   : > { %v6033_v48 = vpop.f32.mrf.mxu1 }
 0x12f   : > { %v526_v49 = vpop.f32.mrf.mxu0  ;;  %v559_v40 = vadd.f32 %v6033_v48, %v6029_v46 }
 0x130   : > { %v527_v51 = vadd.f32 %v526_v49, %v427_v15  ;;  %4853 = vmatmul.msk.f32.gmra.mxu2 %vm365_vm1, %v5906_v63  ;;  %v6172_v49 = vld [vmem:[%s8698_s2 + $0x118] sm:$0xff] }
 0x131   : > { %4892 = vmatmul.msk.f32.gmra.mxu1 %vm365_vm1, %v6017_v43 }
 0x132   : > { %v6046_v52 = vadd.f32 %v642_v38, %v527_v51  ;;  %4883 = vmatmul.msk.f32.gmra.mxu0 %vm365_vm1, %v5917_v1  ;;  %4901 = vmatmul.msk.f32.gmra.mxu3 %vm365_vm1, %v6040_v50  ;;  %v6149_v38 = vld [vmem:[%s8698_s2 + $0x110] sm:$0xff] }
 0x133   : > { %v6052_v53 = vpop.f32.mrf.mxu2 }
 0x135   : > { %v648_v54 = vpop.f32.mrf.mxu3 }
 0x136   : > { %v6054_v55 = vpop.f32.mrf.mxu1 }
 0x137   : > { %v529_v56 = vpop.f32.mrf.mxu0  ;;  %v562_v51 = vadd.f32 %v6054_v55, %v6052_v53 }
 0x138   : > { %v530_v58 = vadd.f32 %v529_v56, %v5957_v12  ;;  %4874 = vmatmul.msk.f32.vlgmr.msra.gmra.mxu2 %vm365_vm1, %v5899_v62  ;;  %v6094_v12 = vpop.permute.xlu1 %5359 }
 0x139   : > { %4893 = vmatmul.msk.f32.gmra.mxu1 %vm365_vm1, %v6040_v50  ;;  %1434 = vmatpush.msra.mxu2 %v1342_v25  ;;  %v5362_v14 = vunpack.i.h.bf16 %v6094_v12  ;;  %v5361_v2 = vunpack.i.l.bf16 %v6094_v12 }
 0x13a   : > { %v6068_v59 = vadd.f32 %v645_v47, %v530_v58  ;;  %4884 = vmatmul.msk.f32.gmra.mxu0 %vm365_vm1, %v5933_v7  ;;  %4922 = vmatmul.msk.f32.vlgmr.msra.gmra.mxu3 %vm365_vm1, %v6061_v57 }
 0x13b   : > { %v494_v60 = vpop.f32.mrf.mxu2 }
 0x13c   : > { %v6075_v61 = vadd.f32 %v494_v60, %v5928_v6  ;;  %v6092_v6 = vld [vmem:[%s8698_s2 + $0x100] sm:$0xff]  ;;  %v6191_v60 = vld [vmem:[%s8698_s2 + $0x148] sm:$0xff] }
 0x13d   : > { %v796_v63 = vpop.f32.mrf.mxu3 }
 0x13e   : > { %v6077_v5 = vpop.f32.mrf.mxu1 }
 0x13f   : > { %v532_v62 = vpop.f32.mrf.mxu0 }
 0x140   : > { %v533_v11 = vadd.f32 %v532_v62, %v5959_v13  ;;  %4875 = vmatmul.msk.f32.gmra.mxu2 %vm365_vm1, %v5917_v1  ;;  %v1598_v1 = vpop.permute.xlu2 %1597 }
 0x141   : > { %4910 = vmatmul.msk.f32.vlgmr.msra.gmra.mxu1 %vm365_vm1, %v6092_v6  ;;  %v1601_v18 = vsel %vm1599_vm10, %v5362_v14, %v1598_v1 }
 0x142   : > { %v6099_v15 = vadd.f32 %v648_v54, %v533_v11  ;;  %4885 = vmatmul.msk.f32.gmra.mxu0 %vm365_vm1, %v5948_v10  ;;  %4923 = vmatmul.msk.f32.gmra.mxu3 %vm365_vm1, %v6084_v8 }
 0x143   : > { %v497_v13 = vpop.f32.mrf.mxu2  ;;  %1661 = vmatpush.msrb.mxu3 %v1601_v18 }
 0x144   : > { %v498_v19 = vadd.f32 %v497_v13, %v5943_v9  ;;  %v6213_v13 = vld [vmem:[%s8698_s2 + $0x150] sm:$0xff] }
 0x145   : > { %v799_v22 = vpop.f32.mrf.mxu3 }
 0x146   : > { %v741_v24 = vpop.f32.mrf.mxu1 }
 0x147   : > { %v668_v25 = vpop.f32.mrf.mxu0 }
 0x148   : > { %v682_v9 = vadd.f32 %v668_v25, %v553_v23  ;;  %4876 = vmatmul.msk.f32.gmra.mxu2 %vm365_vm1, %v5933_v7 }
 0x149   : > { %4911 = vmatmul.msk.f32.gmra.mxu1 %vm365_vm1, %v6126_v30 }
 0x14a   : > { %v6130_v20 = vadd.f32 %v796_v63, %v682_v9  ;;  %4906 = vmatmul.msk.f32.vlgmr.msra.gmra.mxu0 %vm365_vm1, %v6092_v6  ;;  %4924 = vmatmul.msk.f32.gmra.mxu3 %vm365_vm1, %v6119_v29  ;;  %v6232_v9 = vld [vmem:[%s8698_s2 + $0x158] sm:$0xff] }
 0x14b   : > { %v500_v26 = vpop.f32.mrf.mxu2  ;;  %1690 = vmatpush.msra.mxu0 %v1598_v1 }
 0x14c   : > { %v501_v7 = vadd.f32 %v500_v26, %v5961_v16 }
 0x14d   : > { %v802_v31 = vpop.f32.mrf.mxu3 }
 0x14e   : > { %v744_v33 = vpop.f32.mrf.mxu1 }
 0x14f   : > { %v671_v34 = vpop.f32.mrf.mxu0 }
 0x150   : > { %v685_v37 = vadd.f32 %v671_v34, %v556_v32  ;;  %4877 = vmatmul.msk.f32.gmra.mxu2 %vm365_vm1, %v5948_v10  ;;  %v5365_v32 = vpop.permute.xlu2 %5364 }
 0x151   : > { %4912 = vmatmul.msk.f32.gmra.mxu1 %vm365_vm1, %v6149_v38 }
 0x152   : > { %v6153_v16 = vadd.f32 %v799_v22, %v685_v37  ;;  %4907 = vmatmul.msk.f32.gmra.mxu0 %vm365_vm1, %v6126_v30  ;;  %4925 = vmatmul.msk.f32.gmra.mxu3 %vm365_vm1, %v6142_v35 }
 0x153   : > { %v503_v36 = vpop.f32.mrf.mxu2 }
 0x154   : > { %v504_v39 = vadd.f32 %v503_v36, %v5982_v27  ;;  %v1600_v36 = vsel %vm1599_vm10, %v5361_v2, %v5362_v14  ;;  %v5366_v14 = vunpack.i.l.bf16 %v5365_v32  ;;  %vm3663_vm10 = vcmask 261120  }
 0x155   : > { %v805_v10 = vpop.f32.mrf.mxu3 }
 0x156   : > { %v747_v41 = vpop.f32.mrf.mxu1 }
 0x157   : > { %v674_v42 = vpop.f32.mrf.mxu0 }
 0x158   : > { %v688_v47 = vadd.f32 %v674_v42, %v559_v40  ;;  %4894 = vmatmul.msk.f32.vlgmr.msrb.gmra.mxu2 %vm365_vm1, %v5966_v17  ;;  %v5367_v40 = vunpack.i.h.bf16 %v5365_v32 }
 0x159   : > { %4913 = vmatmul.msk.f32.gmra.mxu1 %vm365_vm1, %v6172_v49  ;;  %1632 = vmatpush.msrb.mxu2 %v1600_v36  ;;  %v6352_v36 = vld [vmem:[%s8698_s2 + $0x1a0] sm:$0xff] }
 0x15a   : > { %v6176_v27 = vadd.f32 %v802_v31, %v688_v47  ;;  %4908 = vmatmul.msk.f32.gmra.mxu0 %vm365_vm1, %v6149_v38  ;;  %4942 = vmatmul.msk.f32.vlgmr.msrb.gmra.mxu3 %vm365_vm1, %v6165_v44  ;;  %v6268_v47 = vpop.permute.xlu2 %1853 }
 0x15b   : > { %v610_v46 = vpop.f32.mrf.mxu2 }
 0x15c   : > { %v680_v48 = vadd.f32 %v610_v46, %v6075_v61 }
 0x15d   : > { %v994_v17 = vpop.f32.mrf.mxu3 }
 0x15e   : > { %v808_v54 = vadd.f32 %v6077_v5, %v680_v48  ;;  %v6186_v56 = vpop.f32.mrf.mxu1  ;;  %v6205_v5 = vpop.permute.xlu1 %1725 }
 0x15f   : > { %v677_v58 = vpop.f32.mrf.mxu0  ;;  %1818 = vmatpush.msra.mxu3 %v6205_v5  ;;  %v1729_v3 = vsel %vm1727_vm12, %v5367_v40, %v6205_v5 }
 0x160   : > { %v691_v63 = vadd.f32 %v677_v58, %v562_v51  ;;  %4895 = vmatmul.msk.f32.gmra.mxu2 %vm365_vm1, %v5987_v28  ;;  %v1728_v51 = vsel %vm1727_vm12, %v5366_v14, %v5367_v40 }
 0x161   : > { %4930 = vmatmul.msk.f32.vlgmr.msrb.gmra.mxu1 %vm365_vm1, %v6061_v57 }
 0x162   : > { %v6197_v61 = vadd.f32 %v805_v10, %v691_v63  ;;  %4909 = vmatmul.msk.f32.gmra.mxu0 %vm365_vm1, %v6172_v49  ;;  %4943 = vmatmul.msk.f32.gmra.mxu3 %vm365_vm1, %v6191_v60 }
 0x163   : > { %v613_v53 = vpop.f32.mrf.mxu2  ;;  %1760 = vmatpush.msra.mxu1 %v1728_v51 }
 0x164   : > { %v683_v55 = vadd.f32 %v613_v53, %v498_v19 }
 0x165   : > { %v997_v62 = vpop.f32.mrf.mxu3 }
 0x166   : > { %v811_v28 = vadd.f32 %v741_v24, %v683_v55  ;;  %v6208_v11 = vpop.f32.mrf.mxu1 }
 0x167   : > { %v866_v1 = vpop.f32.mrf.mxu0 }
 0x168   : > { %v936_v18 = vadd.f32 %v866_v1, %v808_v54  ;;  %4896 = vmatmul.msk.f32.gmra.mxu2 %vm365_vm1, %v6017_v43  ;;  %v1978_v1 = vpop.permute.xlu2 %1977 }
 0x169   : > { %4931 = vmatmul.msk.f32.gmra.mxu1 %vm365_vm1, %v6084_v8 }
 0x16a   : > { %v6219_v19 = vadd.f32 %v994_v17, %v936_v18  ;;  %4926 = vmatmul.msk.f32.vlgmr.msrb.gmra.mxu0 %vm365_vm1, %v6061_v57  ;;  %4944 = vmatmul.msk.f32.gmra.mxu3 %vm365_vm1, %v6213_v13 }
 0x16b   : > { %v616_v21 = vpop.f32.mrf.mxu2 }
 0x16c   : > { %v686_v22 = vadd.f32 %v616_v21, %v501_v7 }
 0x16d   : > { %v1000_v23 = vpop.f32.mrf.mxu3 }
 0x16e   : > { %v814_v24 = vadd.f32 %v744_v33, %v686_v22  ;;  %v6227_v43 = vpop.f32.mrf.mxu1 }
 0x16f   : > { %v869_v25 = vpop.f32.mrf.mxu0 }
 0x170   : > { %v939_v57 = vadd.f32 %v869_v25, %v811_v28  ;;  %4897 = vmatmul.msk.f32.gmra.mxu2 %vm365_vm1, %v6040_v50 }
 0x171   : > { %4932 = vmatmul.msk.f32.gmra.mxu1 %vm365_vm1, %v6119_v29 }
 0x172   : > { %v6238_v26 = vadd.f32 %v997_v62, %v939_v57  ;;  %4927 = vmatmul.msk.f32.gmra.mxu0 %vm365_vm1, %v6084_v8  ;;  %4945 = vmatmul.msk.f32.gmra.mxu3 %vm365_vm1, %v6232_v9  ;;  %v6252_v8 = vld [vmem:[%s8698_s2 + $0x160] sm:$0xff] }
 0x173   : > { %v619_v7 = vpop.f32.mrf.mxu2 }
 0x174   : > { %v689_v31 = vadd.f32 %v619_v7, %v504_v39  ;;  %v6333_v7 = vld [vmem:[%s8698_s2 + $0x178] sm:$0xff] }
 0x175   : > { %v1003_v50 = vpop.f32.mrf.mxu3 }
 0x176   : > { %v817_v33 = vadd.f32 %v747_v41, %v689_v31  ;;  %v6247_v34 = vpop.f32.mrf.mxu1 }
 0x177   : > { %v872_v37 = vpop.f32.mrf.mxu0 }
 0x178   : > { %v942_v10 = vadd.f32 %v872_v37, %v814_v24  ;;  %4914 = vmatmul.msk.f32.vlgmr.msra.gmra.mxu2 %vm365_vm1, %v6092_v6  ;;  %v5372_v6 = vunpack.i.h.bf16 %v5370_v0 }
 0x179   : > { %4933 = vmatmul.msk.f32.gmra.mxu1 %vm365_vm1, %v6142_v35  ;;  %1789 = vmatpush.msra.mxu2 %v1729_v3 }
 0x17a   : > { %v6261_v39 = vadd.f32 %v1000_v23, %v942_v10  ;;  %4928 = vmatmul.msk.f32.gmra.mxu0 %vm365_vm1, %v6119_v29  ;;  %4962 = vmatmul.msk.f32.vlgmr.msra.gmra.mxu3 %vm365_vm1, %v6252_v8  ;;  %v6276_v29 = vld [vmem:[%s8698_s2 + $0x168] sm:$0xff]  ;;  %v1857_v58 = vsel %vm1855_vm11, %v5372_v6, %v6268_v47 }
 0x17b   : > { %v767_v12 = vpop.f32.mrf.mxu2  ;;  %1917 = vmatpush.msrb.mxu1 %v1857_v58 }
 0x17c   : > { %v809_v41 = vadd.f32 %v767_v12, %v6023_v45  ;;  %v5371_v45 = vunpack.i.l.bf16 %v5370_v0 }
 0x17d   : > { %v1151_v42 = vpop.f32.mrf.mxu3 }
 0x17e   : > { %v937_v46 = vadd.f32 %v6186_v56, %v809_v41  ;;  %v6271_v48 = vpop.f32.mrf.mxu1  ;;  %v6283_v56 = vpop.permute.xlu0 %5374  ;;  %v1856_v28 = vsel %vm1855_vm11, %v5371_v45, %v5372_v6  ;;  %v6372_v41 = vld [vmem:[%s8698_s2 + $0x1a8] sm:$0xff] }
 0x17f   : > { %v875_v17 = vpop.f32.mrf.mxu0  ;;  %v5377_v63 = vunpack.i.h.bf16 %v6283_v56  ;;  %1888 = vmatpush.msrb.mxu0 %v1856_v28 }
 0x180   : > { %v945_v54 = vadd.f32 %v875_v17, %v817_v33  ;;  %4915 = vmatmul.msk.f32.gmra.mxu2 %vm365_vm1, %v6126_v30  ;;  %v5376_v30 = vunpack.i.l.bf16 %v6283_v56 }
 0x181   : > { %4954 = vmatmul.msk.f32.vlgmr.msra.gmra.mxu1 %vm365_vm1, %v6252_v8 }
 0x182   : > { %v6288_v53 = vadd.f32 %v1003_v50, %v945_v54  ;;  %4929 = vmatmul.msk.f32.gmra.mxu0 %vm365_vm1, %v6142_v35  ;;  %4963 = vmatmul.msk.f32.gmra.mxu3 %vm365_vm1, %v6276_v29  ;;  %v1984_v5 = vsel %vm1983_vm13, %v1978_v1, %v5376_v30  ;;  %v1985_v54 = vsel %vm1983_vm13, %v5376_v30, %v5377_v63  ;;  %v6424_v30 = vld [vmem:[%s8698_s2 + $0x188] sm:$0xff] }
 0x183   : > { %v770_v55 = vpop.f32.mrf.mxu2  ;;  %2074 = vmatpush.msra.mxu1 %v5377_v63  ;;  %2016 = vmatpush.msrb.mxu3 %v1984_v5 }
 0x184   : > { %v812_v62 = vadd.f32 %v770_v55, %v6046_v52  ;;  %v6312_v52 = vld [vmem:[%s8698_s2 + $0x170] sm:$0xff]  ;;  %v5561_v55 = vld [vmem:[%s5667_s10] sm:$0xff] }
 0x185   : > { %v1154_v35 = vpop.f32.mrf.mxu3 }
 0x186   : > { %v940_v18 = vadd.f32 %v6208_v11, %v812_v62  ;;  %v6307_v21 = vpop.f32.mrf.mxu1  ;;  %v6376_v6 = vpop.permute.xlu0 %5379  ;;  %v5562_v62 = vld [vmem:[%s5667_s10 + $0x8] sm:$0xff] }
 0x187   : > { %v1023_v22 = vpop.f32.mrf.mxu0  ;;  %v6406_v28 = vpack.i.bf16 %v5562_v62, %v5561_v55 }
 0x188   : > { %v1065_v23 = vadd.f32 %v1023_v22, %v937_v46  ;;  %4916 = vmatmul.msk.f32.gmra.mxu2 %vm365_vm1, %v6149_v38  ;;  %v6386_v46 = vld [vmem:[%s8698_s2 + $0x180] sm:$0xff] }
 0x189   : > { %4955 = vmatmul.msk.f32.gmra.mxu1 %vm365_vm1, %v6276_v29  ;;  %5399 = vrot.lane.b32.xlu2 %v6406_v28, %s5598_s17 }
 0x18a   : > { %v6318_v11 = vadd.f32 %v1151_v42, %v1065_v23  ;;  %4946 = vmatmul.msk.f32.vlgmr.msra.gmra.mxu0 %vm365_vm1, %v6165_v44  ;;  %4964 = vmatmul.msk.f32.gmra.mxu3 %vm365_vm1, %v6312_v52  ;;  %v6437_v23 = vld [vmem:[%s8698_s2 + $0x1b8] sm:$0xff] }
 0x18b   : > { %v773_v24 = vpop.f32.mrf.mxu2  ;;  %2045 = vmatpush.msra.mxu0 %v1985_v54  ;;  %5404 = vrot.lane.b32.xlu0 %v6406_v28, %s5601_s29 }
 0x18c   : > { %v815_v25 = vadd.f32 %v773_v24, %v6068_v59 }
 0x18d   : > { %v1157_v57 = vpop.f32.mrf.mxu3 }
 0x18e   : > { %v943_v38 = vadd.f32 %v6227_v43, %v815_v25  ;;  %v6328_v2 = vpop.f32.mrf.mxu1  ;;  %v5563_v25 = vld [vmem:[%s5667_s10 + $0x10] sm:$0xff] }
 0x18f   : > { %v1026_v4 = vpop.f32.mrf.mxu0 }
 0x190   : > { %v1068_v31 = vadd.f32 %v1026_v4, %v940_v18  ;;  %4917 = vmatmul.msk.f32.gmra.mxu2 %vm365_vm1, %v6172_v49 }
 0x191   : > { %4956 = vmatmul.msk.f32.gmra.mxu1 %vm365_vm1, %v6312_v52  ;;  %2749 = vrot.lane.b32.xlu2 %v5563_v25, %s5601_s29 }
 0x192   : > { %v6337_v50 = vadd.f32 %v1154_v35, %v1068_v31  ;;  %4947 = vmatmul.msk.f32.gmra.mxu0 %vm365_vm1, %v6191_v60  ;;  %4965 = vmatmul.msk.f32.gmra.mxu3 %vm365_vm1, %v6333_v7 }
 0x193   : > { %v776_v59 = vpop.f32.mrf.mxu2 }
 0x194   : > { %v818_v43 = vadd.f32 %v776_v59, %v6099_v15 }
 0x195   : > { %v1160_v32 = vpop.f32.mrf.mxu3 }
 0x196   : > { %v946_v33 = vadd.f32 %v6247_v34, %v818_v43  ;;  %v6347_v37 = vpop.f32.mrf.mxu1  ;;  %v6463_v43 = vld [vmem:[%s8698_s2 + $0x1c0] sm:$0xff] }
 0x197   : > { %v1029_v49 = vpop.f32.mrf.mxu0 }
 0x198   : > { %v1071_v10 = vadd.f32 %v1029_v49, %v943_v38  ;;  %4938 = vmatmul.msk.f32.vlgmr.msrb.gmra.mxu2 %vm365_vm1, %v6165_v44 }
 0x199   : > { %1946 = vmatpush.msrb.mxu2 %v6268_v47  ;;  %4957 = vmatmul.msk.f32.gmra.mxu1 %vm365_vm1, %v6333_v7  ;;  %v5382_v47 = vunpack.i.h.bf16 %v6376_v6 }
 0x19a   : > { %v6357_v0 = vadd.f32 %v1157_v57, %v1071_v10  ;;  %4948 = vmatmul.msk.f32.gmra.mxu0 %vm365_vm1, %v6213_v13  ;;  %4986 = vmatmul.msk.f32.vlgmr.msrb.gmra.mxu3 %vm365_vm1, %v6352_v36  ;;  %v6450_v57 = vld [vmem:[%s8698_s2 + $0x190] sm:$0xff] }
 0x19b   : > { %v924_v15 = vpop.f32.mrf.mxu2 }
 0x19c   : > { %v938_v34 = vadd.f32 %v924_v15, %v6130_v20 }
 0x19d   : > { %v1308_v12 = vpop.f32.mrf.mxu3 }
 0x19e   : > { %v1066_v40 = vadd.f32 %v6271_v48, %v938_v34  ;;  %v6367_v44 = vpop.f32.mrf.mxu1 }
 0x19f   : > { %v1032_v14 = vpop.f32.mrf.mxu0 }
 0x1a0   : > { %v1074_v42 = vadd.f32 %v1032_v14, %v946_v33  ;;  %4939 = vmatmul.msk.f32.gmra.mxu2 %vm365_vm1, %v6191_v60  ;;  %v2110_v60 = vpop.permute.xlu1 %2109 }
 0x1a1   : > { %4974 = vmatmul.msk.f32.vlgmr.msrb.gmra.mxu1 %vm365_vm1, %v6386_v46  ;;  %v2113_v17 = vsel %vm2111_vm14, %v5382_v47, %v2110_v60 }
 0x1a2   : > { %v6379_v20 = vadd.f32 %v1160_v32, %v1074_v42  ;;  %4949 = vmatmul.msk.f32.gmra.mxu0 %vm365_vm1, %v6232_v9  ;;  %4987 = vmatmul.msk.f32.gmra.mxu3 %vm365_vm1, %v6372_v41  ;;  %v6500_v42 = vpop.permute.xlu0 %2237 }
 0x1a3   : > { %v927_v48 = vpop.f32.mrf.mxu2  ;;  %2173 = vmatpush.msra.mxu3 %v2113_v17 }
 0x1a4   : > { %v941_v51 = vadd.f32 %v927_v48, %v6153_v16  ;;  %v6411_v16 = vld [vmem:[%s8698_s2 + $0x1b0] sm:$0xff]  ;;  %v2869_v48 = vld [vmem:[%s5667_s10 + $0x8] sm:$0xff] }
 0x1a5   : > { %v1311_v45 = vpop.f32.mrf.mxu3  ;;  %2330 = vmatpush.msrb.mxu3 %v6500_v42 }
 0x1a6   : > { %v1069_v58 = vadd.f32 %v6307_v21, %v941_v51  ;;  %v6402_v3 = vpop.f32.mrf.mxu1 }
 0x1a7   : > { %v1180_v35 = vpop.f32.mrf.mxu0 }
 0x1a8   : > { %v1194_v56 = vadd.f32 %v1180_v35, %v1066_v40  ;;  %4940 = vmatmul.msk.f32.gmra.mxu2 %vm365_vm1, %v6213_v13  ;;  %v6534_v35 = vld [vmem:[%s5667_s10 + $0x10] sm:$0xff] }
 0x1a9   : > { %4975 = vmatmul.msk.f32.gmra.mxu1 %vm365_vm1, %v6424_v30  ;;  %2885 = vrot.lane.b32.xlu0 %v6534_v35, %s5602_s20 }
 0x1aa   : > { %v6417_v63 = vadd.f32 %v1308_v12, %v1194_v56  ;;  %4970 = vmatmul.msk.f32.vlgmr.msrb.gmra.mxu0 %vm365_vm1, %v6386_v46  ;;  %4988 = vmatmul.msk.f32.gmra.mxu3 %vm365_vm1, %v6411_v16  ;;  %v6487_v12 = vld [vmem:[%s8698_s2 + $0x1c8] sm:$0xff] }
 0x1ab   : > { %v930_v1 = vpop.f32.mrf.mxu2  ;;  %2202 = vmatpush.msrb.mxu0 %v2110_v60 }
 0x1ac   : > { %v944_v13 = vadd.f32 %v930_v1, %v6176_v27  ;;  %v5413_v1 = vpack.i.bf16 %v6534_v35, %v2869_v48 }
 0x1ad   : > { %v1314_v18 = vpop.f32.mrf.mxu3 }
 0x1ae   : > { %v1072_v5 = vadd.f32 %v6328_v2, %v944_v13  ;;  %v6432_v21 = vpop.f32.mrf.mxu1 }
 0x1af   : > { %v1183_v22 = vpop.f32.mrf.mxu0 }
 0x1b0   : > { %v1197_v24 = vadd.f32 %v1183_v22, %v1069_v58  ;;  %4941 = vmatmul.msk.f32.gmra.mxu2 %vm365_vm1, %v6232_v9 }
 0x1b1   : > { %4976 = vmatmul.msk.f32.gmra.mxu1 %vm365_vm1, %v6450_v57 }
 0x1b2   : > { %v6443_v27 = vadd.f32 %v1311_v45, %v1197_v24  ;;  %4971 = vmatmul.msk.f32.gmra.mxu0 %vm365_vm1, %v6424_v30  ;;  %4989 = vmatmul.msk.f32.gmra.mxu3 %vm365_vm1, %v6437_v23  ;;  %v5385_v24 = vpop.permute.xlu1 %5384 }
 0x1b3   : > { %v933_v38 = vpop.f32.mrf.mxu2 }
 0x1b4   : > { %v947_v9 = vadd.f32 %v933_v38, %v6197_v61  ;;  %v6474_v61 = vld [vmem:[%s8698_s2 + $0x198] sm:$0xff] }
 0x1b5   : > { %v1317_v2 = vpop.f32.mrf.mxu3 }
 0x1b6   : > { %v1075_v4 = vadd.f32 %v6347_v37, %v947_v9  ;;  %v6458_v31 = vpop.f32.mrf.mxu1 }
 0x1b7   : > { %v1186_v59 = vpop.f32.mrf.mxu0 }
 0x1b8   : > { %v1200_v32 = vadd.f32 %v1186_v59, %v1072_v5  ;;  %4958 = vmatmul.msk.f32.vlgmr.msra.gmra.mxu2 %vm365_vm1, %v6252_v8  ;;  %v5381_v5 = vunpack.i.l.bf16 %v6376_v6 }
 0x1b9   : > { %4977 = vmatmul.msk.f32.gmra.mxu1 %vm365_vm1, %v6474_v61 }
 0x1ba   : > { %v6467_v33 = vadd.f32 %v1314_v18, %v1200_v32  ;;  %4972 = vmatmul.msk.f32.gmra.mxu0 %vm365_vm1, %v6450_v57  ;;  %5006 = vmatmul.msk.f32.vlgmr.msra.gmra.mxu3 %vm365_vm1, %v6463_v43  ;;  %v5387_v32 = vunpack.i.h.bf16 %v5385_v24 }
 0x1bb   : > { %v1122_v37 = vpop.f32.mrf.mxu2 }
 0x1bc   : > { %v1192_v49 = vadd.f32 %v1122_v37, %v6219_v19  ;;  %v5386_v37 = vunpack.i.l.bf16 %v5385_v24 }
 0x1bd   : > { %v1506_v8 = vpop.f32.mrf.mxu3 }
 0x1be   : > { %v1320_v10 = vadd.f32 %v6367_v44, %v1192_v49  ;;  %v6482_v15 = vpop.f32.mrf.mxu1  ;;  %v6582_v49 = vpop.permute.xlu1 %2365 }
 0x1bf   : > { %v1189_v34 = vpop.f32.mrf.mxu0 }
 0x1c0   : > { %v1203_v40 = vadd.f32 %v1189_v34, %v1075_v4  ;;  %4959 = vmatmul.msk.f32.gmra.mxu2 %vm365_vm1, %v6276_v29  ;;  %v6504_v29 = vld [vmem:[%s5667_s10] sm:$0xff] }
 0x1c1   : > { %4994 = vmatmul.msk.f32.vlgmr.msra.gmra.mxu1 %vm365_vm1, %v6352_v36  ;;  %v6511_v54 = vpack.i.bf16 %v2869_v48, %v6504_v29 }
 0x1c2   : > { %v6491_v14 = vadd.f32 %v1317_v2, %v1203_v40  ;;  %4973 = vmatmul.msk.f32.gmra.mxu0 %vm365_vm1, %v6474_v61  ;;  %5007 = vmatmul.msk.f32.gmra.mxu3 %vm365_vm1, %v6487_v12  ;;  %v2112_v2 = vsel %vm2111_vm14, %v5381_v5, %v5382_v47  ;;  %v6592_v40 = vld [vmem:[%s8698_s2 + $0x1e8] sm:$0xff] }
 0x1c3   : > { %v1125_v19 = vpop.f32.mrf.mxu2  ;;  %5409 = vrot.lane.b32.xlu1 %v6511_v54, %s5602_s20  ;;  %2144 = vmatpush.msra.mxu2 %v2112_v2 }
 0x1c4   : > { %v1195_v44 = vadd.f32 %v1125_v19, %v6238_v26  ;;  %v6516_v26 = vld [vmem:[%s8698_s2 + $0x1d0] sm:$0xff]  ;;  %v2240_v19 = vsel %vm2239_vm0, %v5386_v37, %v5387_v32 }
 0x1c5   : > { %v1509_v60 = vpop.f32.mrf.mxu3  ;;  %2272 = vmatpush.msrb.mxu1 %v2240_v19 }
 0x1c6   : > { %v1323_v17 = vadd.f32 %v6402_v3, %v1195_v44  ;;  %v6508_v51 = vpop.f32.mrf.mxu1 }
 0x1c7   : > { %v1378_v45 = vpop.f32.mrf.mxu0 }
 0x1c8   : > { %v1448_v58 = vadd.f32 %v1378_v45, %v1320_v10  ;;  %4960 = vmatmul.msk.f32.gmra.mxu2 %vm365_vm1, %v6312_v52 }
 0x1c9   : > { %4995 = vmatmul.msk.f32.gmra.mxu1 %vm365_vm1, %v6372_v41 }
 0x1ca   : > { %v6524_v3 = vadd.f32 %v1506_v8, %v1448_v58  ;;  %4990 = vmatmul.msk.f32.vlgmr.msra.gmra.mxu0 %vm365_vm1, %v6352_v36  ;;  %5008 = vmatmul.msk.f32.gmra.mxu3 %vm365_vm1, %v6516_v26  ;;  %v6543_v36 = vld [vmem:[%s8698_s2 + $0x1d8] sm:$0xff] }
 0x1cb   : > { %v1128_v55 = vpop.f32.mrf.mxu2  ;;  %5414 = vrot.lane.b32.xlu1 %v5413_v1, %s5603_s22 }
 0x1cc   : > { %v1198_v52 = vadd.f32 %v1128_v55, %v6261_v39 }
 0x1cd   : > { %v1512_v62 = vpop.f32.mrf.mxu3 }
 0x1ce   : > { %v1326_v56 = vadd.f32 %v6432_v21, %v1198_v52  ;;  %v6537_v28 = vpop.f32.mrf.mxu1 }
 0x1cf   : > { %v1381_v13 = vpop.f32.mrf.mxu0 }
 0x1d0   : > { %v1451_v18 = vadd.f32 %v1381_v13, %v1323_v17  ;;  %4961 = vmatmul.msk.f32.gmra.mxu2 %vm365_vm1, %v6333_v7  ;;  %v6629_v13 = vld [vmem:[%s8698_s2 + $0x1f0] sm:$0xff] }
 0x1d1   : > { %4996 = vmatmul.msk.f32.gmra.mxu1 %vm365_vm1, %v6411_v16 }
 0x1d2   : > { %v6550_v39 = vadd.f32 %v1509_v60, %v1451_v18  ;;  %4991 = vmatmul.msk.f32.gmra.mxu0 %vm365_vm1, %v6372_v41  ;;  %5009 = vmatmul.msk.f32.gmra.mxu3 %vm365_vm1, %v6543_v36  ;;  %v6566_v41 = vld [vmem:[%s8698_s2 + $0x1e0] sm:$0xff] }
 0x1d3   : > { %v1131_v21 = vpop.f32.mrf.mxu2 }
 0x1d4   : > { %v1201_v7 = vadd.f32 %v1131_v21, %v6288_v53 }
 0x1d5   : > { %v1515_v22 = vpop.f32.mrf.mxu3 }
 0x1d6   : > { %v1329_v25 = vadd.f32 %v6458_v31, %v1201_v7  ;;  %v6561_v38 = vpop.f32.mrf.mxu1  ;;  %v5390_v31 = vpop.permute.xlu2 %5389 }
 0x1d7   : > { %v1384_v9 = vpop.f32.mrf.mxu0  ;;  %v5392_v6 = vunpack.i.h.bf16 %v5390_v31 }
 0x1d8   : > { %v1454_v4 = vadd.f32 %v1384_v9, %v1326_v56  ;;  %4978 = vmatmul.msk.f32.vlgmr.msrb.gmra.mxu2 %vm365_vm1, %v6386_v46 }
 0x1d9   : > { %4997 = vmatmul.msk.f32.gmra.mxu1 %vm365_vm1, %v6437_v23  ;;  %v2369_v8 = vsel %vm2367_vm15, %v5392_v6, %v6582_v49 }
 0x1da   : > { %v6573_v53 = vadd.f32 %v1512_v62, %v1454_v4  ;;  %4992 = vmatmul.msk.f32.gmra.mxu0 %vm365_vm1, %v6411_v16  ;;  %5026 = vmatmul.msk.f32.vlgmr.msrb.gmra.mxu3 %vm365_vm1, %v6566_v41  ;;  %v2490_v62 = vpop.permute.xlu1 %2489 }
 0x1db   : > { %v1279_v59 = vpop.f32.mrf.mxu2  ;;  %2429 = vmatpush.msra.mxu1 %v2369_v8 }
 0x1dc   : > { %v1321_v47 = vadd.f32 %v1279_v59, %v6318_v11  ;;  %v5391_v11 = vunpack.i.l.bf16 %v5390_v31 }
 0x1dd   : > { %v1663_v46 = vpop.f32.mrf.mxu3 }
 0x1de   : > { %v1449_v16 = vadd.f32 %v6482_v15, %v1321_v47  ;;  %v6587_v10 = vpop.f32.mrf.mxu1  ;;  %v6597_v15 = vld [vmem:[%s5667_s10 + $0x18] sm:$0xff]  ;;  %v6607_v48 = vpop.permute.xlu2 %5394 }
 0x1df   : > { %v1387_v34 = vpop.f32.mrf.mxu0  ;;  %2887 = vrot.lane.b32.xlu2 %v6597_v15, %s5602_s20  ;;  %v5397_v45 = vunpack.i.h.bf16 %v6607_v48  ;;  %v5396_v58 = vunpack.i.l.bf16 %v6607_v48  ;;  %3018 = vrot.lane.b32.xlu0 %v6597_v15, %s5603_s22 }
 0x1e0   : > { %v1457_v44 = vadd.f32 %v1387_v34, %v1329_v25  ;;  %4979 = vmatmul.msk.f32.gmra.mxu2 %vm365_vm1, %v6424_v30  ;;  %v2241_v30 = vsel %vm2239_vm0, %v5387_v32, %v6500_v42  ;;  %v6652_v25 = vld [vmem:[%s8698_s2 + $0x1f8] sm:$0xff]  ;;  %v6672_v32 = vld [vmem:[%s8698_s2 + $0x220] sm:$0xff] }
 0x1e1   : > { %5018 = vmatmul.msk.f32.vlgmr.msrb.gmra.mxu1 %vm365_vm1, %v6566_v41  ;;  %2301 = vmatpush.msrb.mxu2 %v2241_v30  ;;  %v2496_v56 = vsel %vm2495_vm2, %v2490_v62, %v5396_v58  ;;  %v2497_v30 = vsel %vm2495_vm2, %v5396_v58, %v5397_v45  ;;  %v6738_v58 = vld [vmem:[%s8698_s2 + $0x208] sm:$0xff] }
 0x1e2   : > { %v6601_v60 = vadd.f32 %v1515_v22, %v1457_v44  ;;  %4993 = vmatmul.msk.f32.gmra.mxu0 %vm365_vm1, %v6437_v23  ;;  %5027 = vmatmul.msk.f32.gmra.mxu3 %vm365_vm1, %v6592_v40  ;;  %v2368_v23 = vsel %vm2367_vm15, %v5391_v11, %v5392_v6 }
 0x1e3   : > { %v1282_v17 = vpop.f32.mrf.mxu2  ;;  %2400 = vmatpush.msra.mxu0 %v2368_v23  ;;  %2586 = vmatpush.msrb.mxu1 %v5397_v45 }
 0x1e4   : > { %v1324_v55 = vadd.f32 %v1282_v17, %v6337_v50  ;;  %2528 = vmatpush.msra.mxu3 %v2496_v56 }
 0x1e5   : > { %v1666_v52 = vpop.f32.mrf.mxu3 }
 0x1e6   : > { %v1452_v42 = vadd.f32 %v6508_v51, %v1324_v55  ;;  %v6624_v1 = vpop.f32.mrf.mxu1 }
 0x1e7   : > { %v1535_v50 = vpop.f32.mrf.mxu0  ;;  %3012 = vrot.lane.b32.xlu2 %v6504_v29, %s5603_s22  ;;  %v5418_v29 = vpack.i.bf16 %v6597_v15, %v6534_v35  ;;  %5424 = vrot.lane.b32.xlu0 %v6511_v54, %s5604_s11  ;;  %s5279_s22 = smul.u32 96, %s8784_s28 }
 0x1e8   : > { %v1577_v18 = vadd.f32 %v1535_v50, %v1449_v16  ;;  %4980 = vmatmul.msk.f32.gmra.mxu2 %vm365_vm1, %v6450_v57 }
 0x1e9   : > { %5019 = vmatmul.msk.f32.gmra.mxu1 %vm365_vm1, %v6592_v40  ;;  %5419 = vrot.lane.b32.xlu1 %v5418_v29, %s5604_s11  ;;  %s7444_s17 = scalar_lea.vmem %s8697_s1, %s5279_s22  ;;  %s8077_s21 = scalar_lea.vmem %s8704_s8, %s5279_s22 }
 0x1ea   : > { %v6635_v51 = vadd.f32 %v1663_v46, %v1577_v18  ;;  %5010 = vmatmul.msk.f32.vlgmr.msrb.gmra.mxu0 %vm365_vm1, %v6463_v43  ;;  %5028 = vmatmul.msk.f32.gmra.mxu3 %vm365_vm1, %v6629_v13  ;;  %v6749_v18 = vld [vmem:[%s8698_s2 + $0x238] sm:$0xff] }
 0x1eb   : > { %v1285_v5 = vpop.f32.mrf.mxu2  ;;  %2557 = vmatpush.msrb.mxu0 %v2497_v30 }
 0x1ec   : > { %v1327_v21 = vadd.f32 %v1285_v5, %v6357_v0 }
 0x1ed   : > { %v1669_v7 = vpop.f32.mrf.mxu3 }
 0x1ee   : > { %v1455_v57 = vadd.f32 %v6537_v28, %v1327_v21  ;;  %v6645_v22 = vpop.f32.mrf.mxu1 }
 0x1ef   : > { %v1538_v24 = vpop.f32.mrf.mxu0  ;;  %3278 = vrot.lane.b32.xlu0 %v6534_v35, %s5605_s13  ;;  %5434 = vrot.lane.b32.xlu2 %v6511_v54, %s5606_s26 }
 0x1f0   : > { %v1580_v9 = vadd.f32 %v1538_v24, %v1452_v42  ;;  %4981 = vmatmul.msk.f32.gmra.mxu2 %vm365_vm1, %v6474_v61 }
 0x1f1   : > { %5020 = vmatmul.msk.f32.gmra.mxu1 %vm365_vm1, %v6629_v13  ;;  %5429 = vrot.lane.b32.xlu1 %v6511_v54, %s5605_s13 }
 0x1f2   : > { %v6657_v0 = vadd.f32 %v1666_v52, %v1580_v9  ;;  %5011 = vmatmul.msk.f32.gmra.mxu0 %vm365_vm1, %v6487_v12  ;;  %5029 = vmatmul.msk.f32.gmra.mxu3 %vm365_vm1, %v6652_v25  ;;  %v6771_v9 = vld [vmem:[%s8698_s2 + $0x240] sm:$0xff] }
 0x1f3   : > { %v1288_v28 = vpop.f32.mrf.mxu2 }
 0x1f4   : > { %v1330_v2 = vadd.f32 %v1288_v28, %v6379_v20 }
 0x1f5   : > { %v1672_v4 = vpop.f32.mrf.mxu3 }
 0x1f6   : > { %v1458_v61 = vadd.f32 %v6561_v38, %v1330_v2  ;;  %v6667_v31 = vpop.f32.mrf.mxu1 }
 0x1f7   : > { %v1541_v59 = vpop.f32.mrf.mxu0  ;;  %3411 = vrot.lane.b32.xlu0 %v6597_v15, %s5606_s26  ;;  %3280 = vrot.lane.b32.xlu2 %v6597_v15, %s5605_s13 }
 0x1f8   : > { %v1583_v37 = vadd.f32 %v1541_v59, %v1455_v57  ;;  %5002 = vmatmul.msk.f32.vlgmr.msra.gmra.mxu2 %vm365_vm1, %v6463_v43 }
 0x1f9   : > { %2458 = vmatpush.msra.mxu2 %v6582_v49  ;;  %5021 = vmatmul.msk.f32.gmra.mxu1 %vm365_vm1, %v6652_v25  ;;  %v6692_v49 = vld [vmem:[%s8698_s2 + $0x228] sm:$0xff] }
 0x1fa   : > { %v6679_v20 = vadd.f32 %v1669_v7, %v1583_v37  ;;  %5012 = vmatmul.msk.f32.gmra.mxu0 %vm365_vm1, %v6516_v26  ;;  %5050 = vmatmul.msk.f32.vlgmr.msra.gmra.mxu3 %vm365_vm1, %v6672_v32 }
 0x1fb   : > { %v1436_v38 = vpop.f32.mrf.mxu2  ;;  %3409 = vrot.lane.b32.xlu1 %v6534_v35, %s5606_s26  ;;  %v6856_v35 = vld [vmem:[%s8698_s2 + $0x260] sm:$0xff] }
 0x1fc   : > { %v1450_v43 = vadd.f32 %v1436_v38, %v6417_v63  ;;  %v6705_v63 = vld [vmem:[%s8698_s2 + $0x200] sm:$0xff]  ;;  %v6792_v38 = vld [vmem:[%s8698_s2 + $0x248] sm:$0xff] }
 0x1fd   : > { %v1820_v6 = vpop.f32.mrf.mxu3 }
 0x1fe   : > { %v1578_v47 = vadd.f32 %v6587_v10, %v1450_v43  ;;  %v1762_v8 = vpop.f32.mrf.mxu1  ;;  %v6709_v10 = vpop.permute.xlu2 %5399 }
 0x1ff   : > { %v1544_v46 = vpop.f32.mrf.mxu0  ;;  %v5402_v44 = vunpack.i.h.bf16 %v6709_v10 }
 0x200   : > { %v1586_v16 = vadd.f32 %v1544_v46, %v1458_v61  ;;  %5003 = vmatmul.msk.f32.gmra.mxu2 %vm365_vm1, %v6487_v12  ;;  %v2622_v12 = vpop.permute.xlu0 %2621 }
 0x201   : > { %5038 = vmatmul.msk.f32.vlgmr.msra.gmra.mxu1 %vm365_vm1, %v6705_v63  ;;  %v2625_v55 = vsel %vm2623_vm3, %v5402_v44, %v2622_v12 }
 0x202   : > { %v6698_v34 = vadd.f32 %v1672_v4, %v1586_v16  ;;  %5013 = vmatmul.msk.f32.gmra.mxu0 %vm365_vm1, %v6543_v36  ;;  %5051 = vmatmul.msk.f32.gmra.mxu3 %vm365_vm1, %v6692_v49 }
 0x203   : > { %v1439_v19 = vpop.f32.mrf.mxu2  ;;  %2685 = vmatpush.msrb.mxu3 %v2625_v55 }
 0x204   : > { %v1453_v11 = vadd.f32 %v1439_v19, %v6443_v27  ;;  %v6727_v27 = vld [vmem:[%s8698_s2 + $0x230] sm:$0xff] }
 0x205   : > { %v1823_v17 = vpop.f32.mrf.mxu3  ;;  %v6813_v19 = vld [vmem:[%s8698_s2 + $0x250] sm:$0xff] }
 0x206   : > { %v1581_v23 = vadd.f32 %v6624_v1, %v1453_v11  ;;  %v1765_v48 = vpop.f32.mrf.mxu1  ;;  %v6807_v16 = vpop.permute.xlu2 %2749 }
 0x207   : > { %v1692_v52 = vpop.f32.mrf.mxu0  ;;  %2842 = vmatpush.msra.mxu3 %v6807_v16 }
 0x208   : > { %v1706_v62 = vadd.f32 %v1692_v52, %v1578_v47  ;;  %5004 = vmatmul.msk.f32.gmra.mxu2 %vm365_vm1, %v6516_v26  ;;  %v6835_v52 = vld [vmem:[%s8698_s2 + $0x258] sm:$0xff] }
 0x209   : > { %5039 = vmatmul.msk.f32.gmra.mxu1 %vm365_vm1, %v6738_v58 }
 0x20a   : > { %v6731_v45 = vadd.f32 %v1820_v6, %v1706_v62  ;;  %5034 = vmatmul.msk.f32.vlgmr.msra.gmra.mxu0 %vm365_vm1, %v6705_v63  ;;  %5052 = vmatmul.msk.f32.gmra.mxu3 %vm365_vm1, %v6727_v27 }
 0x20b   : > { %v1442_v42 = vpop.f32.mrf.mxu2  ;;  %2714 = vmatpush.msra.mxu0 %v2622_v12 }
 0x20c   : > { %v1456_v26 = vadd.f32 %v1442_v42, %v6467_v33  ;;  %v6760_v33 = vld [vmem:[%s8698_s2 + $0x210] sm:$0xff] }
 0x20d   : > { %v1826_v56 = vpop.f32.mrf.mxu3 }
 0x20e   : > { %v1584_v1 = vadd.f32 %v6645_v22, %v1456_v26  ;;  %v1768_v21 = vpop.f32.mrf.mxu1 }
 0x20f   : > { %v1695_v50 = vpop.f32.mrf.mxu0 }
 0x210   : > { %v1709_v5 = vadd.f32 %v1695_v50, %v1581_v23  ;;  %5005 = vmatmul.msk.f32.gmra.mxu2 %vm365_vm1, %v6543_v36 }
 0x211   : > { %5040 = vmatmul.msk.f32.gmra.mxu1 %vm365_vm1, %v6760_v33 }
 0x212   : > { %v6753_v7 = vadd.f32 %v1823_v17, %v1709_v5  ;;  %5035 = vmatmul.msk.f32.gmra.mxu0 %vm365_vm1, %v6738_v58  ;;  %5053 = vmatmul.msk.f32.gmra.mxu3 %vm365_vm1, %v6749_v18 }
 0x213   : > { %v1445_v57 = vpop.f32.mrf.mxu2 }
 0x214   : > { %v1459_v36 = vadd.f32 %v1445_v57, %v6491_v14  ;;  %v6782_v14 = vld [vmem:[%s8698_s2 + $0x218] sm:$0xff] }
 0x215   : > { %v1829_v22 = vpop.f32.mrf.mxu3 }
 0x216   : > { %v1587_v29 = vadd.f32 %v6667_v31, %v1459_v36  ;;  %v1771_v2 = vpop.f32.mrf.mxu1 }
 0x217   : > { %v1698_v24 = vpop.f32.mrf.mxu0 }
 0x218   : > { %v1712_v28 = vadd.f32 %v1698_v24, %v1584_v1  ;;  %5022 = vmatmul.msk.f32.vlgmr.msrb.gmra.mxu2 %vm365_vm1, %v6566_v41 }
 0x219   : > { %5041 = vmatmul.msk.f32.gmra.mxu1 %vm365_vm1, %v6782_v14 }
 0x21a   : > { %v6775_v4 = vadd.f32 %v1826_v56, %v1712_v28  ;;  %5036 = vmatmul.msk.f32.gmra.mxu0 %vm365_vm1, %v6760_v33  ;;  %5070 = vmatmul.msk.f32.vlgmr.msrb.gmra.mxu3 %vm365_vm1, %v6771_v9 }
 0x21b   : > { %v1634_v61 = vpop.f32.mrf.mxu2 }
 0x21c   : > { %v1704_v41 = vadd.f32 %v1634_v61, %v6524_v3 }
 0x21d   : > { %v2018_v31 = vpop.f32.mrf.mxu3 }
 0x21e   : > { %v1832_v59 = vadd.f32 %v1762_v8, %v1704_v41  ;;  %v1919_v6 = vpop.f32.mrf.mxu1 }
 0x21f   : > { %v1701_v37 = vpop.f32.mrf.mxu0 }
 0x220   : > { %v1715_v43 = vadd.f32 %v1701_v37, %v1587_v29  ;;  %5023 = vmatmul.msk.f32.gmra.mxu2 %vm365_vm1, %v6592_v40 }
 0x221   : > { %5058 = vmatmul.msk.f32.vlgmr.msrb.gmra.mxu1 %vm365_vm1, %v6672_v32 }
 0x222   : > { %v6796_v47 = vadd.f32 %v1829_v22, %v1715_v43  ;;  %5037 = vmatmul.msk.f32.gmra.mxu0 %vm365_vm1, %v6782_v14  ;;  %5071 = vmatmul.msk.f32.gmra.mxu3 %vm365_vm1, %v6792_v38 }
 0x223   : > { %v1637_v3 = vpop.f32.mrf.mxu2 }
 0x224   : > { %v1707_v46 = vadd.f32 %v1637_v3, %v6550_v39 }
 0x225   : > { %v2021_v40 = vpop.f32.mrf.mxu3 }
 0x226   : > { %v1835_v8 = vadd.f32 %v1765_v48, %v1707_v46  ;;  %v6817_v30 = vpop.f32.mrf.mxu1 }
 0x227   : > { %v1890_v12 = vpop.f32.mrf.mxu0 }
 0x228   : > { %v1960_v11 = vadd.f32 %v1890_v12, %v1832_v59  ;;  %5024 = vmatmul.msk.f32.gmra.mxu2 %vm365_vm1, %v6629_v13 }
 0x229   : > { %5059 = vmatmul.msk.f32.gmra.mxu1 %vm365_vm1, %v6692_v49 }
 0x22a   : > { %v6821_v39 = vadd.f32 %v2018_v31, %v1960_v11  ;;  %5054 = vmatmul.msk.f32.vlgmr.msrb.gmra.mxu0 %vm365_vm1, %v6672_v32  ;;  %5072 = vmatmul.msk.f32.gmra.mxu3 %vm365_vm1, %v6813_v19 }
 0x22b   : > { %v1640_v17 = vpop.f32.mrf.mxu2 }
 0x22c   : > { %v1710_v13 = vadd.f32 %v1640_v17, %v6573_v53  ;;  %v5401_v53 = vunpack.i.l.bf16 %v6709_v10  ;;  %v5405_v10 = vpop.permute.xlu0 %5404 }
 0x22d   : > { %v2024_v55 = vpop.f32.mrf.mxu3  ;;  %v5406_v57 = vunpack.i.l.bf16 %v5405_v10 }
 0x22e   : > { %v1838_v23 = vadd.f32 %v1768_v21, %v1710_v13  ;;  %v6839_v62 = vpop.f32.mrf.mxu1 }
 0x22f   : > { %v1893_v54 = vpop.f32.mrf.mxu0 }
 0x230   : > { %v1963_v32 = vadd.f32 %v1893_v54, %v1835_v8  ;;  %5025 = vmatmul.msk.f32.gmra.mxu2 %vm365_vm1, %v6652_v25 }
 0x231   : > { %5060 = vmatmul.msk.f32.gmra.mxu1 %vm365_vm1, %v6727_v27 }
 0x232   : > { %v6843_v15 = vadd.f32 %v2021_v40, %v1963_v32  ;;  %5055 = vmatmul.msk.f32.gmra.mxu0 %vm365_vm1, %v6692_v49  ;;  %5073 = vmatmul.msk.f32.gmra.mxu3 %vm365_vm1, %v6835_v52  ;;  %v2624_v49 = vsel %vm2623_vm3, %v5401_v53, %v5402_v44 }
 0x233   : > { %v1643_v48 = vpop.f32.mrf.mxu2  ;;  %2656 = vmatpush.msrb.mxu2 %v2624_v49 }
 0x234   : > { %v1713_v25 = vadd.f32 %v1643_v48, %v6601_v60 }
 0x235   : > { %v2027_v42 = vpop.f32.mrf.mxu3  ;;  %v5410_v5 = vpop.permute.xlu1 %5409 }
 0x236   : > { %v1841_v26 = vadd.f32 %v1771_v2, %v1713_v25  ;;  %v6863_v50 = vpop.f32.mrf.mxu1  ;;  %v5412_v61 = vunpack.i.h.bf16 %v5410_v5 }
 0x237   : > { %v1896_v56 = vpop.f32.mrf.mxu0 }
 0x238   : > { %v1966_v1 = vadd.f32 %v1896_v56, %v1838_v23  ;;  %5042 = vmatmul.msk.f32.vlgmr.msra.gmra.mxu2 %vm365_vm1, %v6705_v63  ;;  %v5407_v63 = vunpack.i.h.bf16 %v5405_v10 }
 0x239   : > { %5061 = vmatmul.msk.f32.gmra.mxu1 %vm365_vm1, %v6749_v18  ;;  %v2888_v36 = vpop.permute.xlu2 %2887 }
 0x23a   : > { %v6865_v60 = vadd.f32 %v2024_v55, %v1966_v1  ;;  %5056 = vmatmul.msk.f32.gmra.mxu0 %vm365_vm1, %v6727_v27  ;;  %5090 = vmatmul.msk.f32.vlgmr.msra.gmra.mxu3 %vm365_vm1, %v6856_v35  ;;  %v6877_v27 = vld [vmem:[%s8698_s2 + $0x268] sm:$0xff]  ;;  %v2752_v28 = vsel %vm2751_vm4, %v5406_v57, %v5407_v63  ;;  %v2753_v37 = vsel %vm2751_vm4, %v5407_v63, %v6807_v16 }
 0x23b   : > { %v1791_v21 = vpop.f32.mrf.mxu2  ;;  %2784 = vmatpush.msra.mxu1 %v2752_v28  ;;  %2813 = vmatpush.msra.mxu2 %v2753_v37 }
 0x23c   : > { %v1833_v44 = vadd.f32 %v1791_v21, %v6635_v51  ;;  %v5411_v51 = vunpack.i.l.bf16 %v5410_v5  ;;  %v6945_v5 = vld [vmem:[%s8698_s2 + $0x2a0] sm:$0xff] }
 0x23d   : > { %v2175_v22 = vpop.f32.mrf.mxu3  ;;  %v6890_v59 = vpop.permute.xlu1 %5414 }
 0x23e   : > { %v1961_v29 = vadd.f32 %v1919_v6, %v1833_v44  ;;  %v6882_v41 = vpop.f32.mrf.mxu1  ;;  %v5416_v43 = vunpack.i.l.bf16 %v6890_v59  ;;  %v2886_v6 = vpop.permute.xlu0 %2885  ;;  %v2890_v40 = vsel %vm2889_vm5, %v5411_v51, %v5412_v61 }
 0x23f   : > { %v1899_v24 = vpop.f32.mrf.mxu0  ;;  %2923 = vmatpush.msrb.mxu0 %v2890_v40  ;;  %v2892_v56 = vsel %vm2889_vm5, %v2886_v6, %v2888_v36 }
 0x240   : > { %v1969_v2 = vadd.f32 %v1899_v24, %v1841_v26  ;;  %5043 = vmatmul.msk.f32.gmra.mxu2 %vm365_vm1, %v6738_v58  ;;  %v5417_v26 = vunpack.i.h.bf16 %v6890_v59 }
 0x241   : > { %5082 = vmatmul.msk.f32.vlgmr.msra.gmra.mxu1 %vm365_vm1, %v6856_v35  ;;  %v3013_v46 = vpop.permute.xlu2 %3012 }
 0x242   : > { %v6884_v31 = vadd.f32 %v2027_v42, %v1969_v2  ;;  %5057 = vmatmul.msk.f32.gmra.mxu0 %vm365_vm1, %v6749_v18  ;;  %5091 = vmatmul.msk.f32.gmra.mxu3 %vm365_vm1, %v6877_v27  ;;  %v2891_v18 = vsel %vm2889_vm5, %v5412_v61, %v2886_v6  ;;  %v3021_v16 = vsel %vm3020_vm6, %v3013_v46, %v5416_v43 }
 0x243   : > { %v1794_v58 = vpop.f32.mrf.mxu2  ;;  %2952 = vmatpush.msrb.mxu1 %v2891_v18  ;;  %3054 = vmatpush.msrb.mxu3 %v3021_v16  ;;  %v3022_v6 = vsel %vm3020_vm6, %v5416_v43, %v5417_v26 }
 0x244   : > { %v1836_v3 = vadd.f32 %v1794_v58, %v6657_v0  ;;  %v6907_v0 = vld [vmem:[%s8698_s2 + $0x270] sm:$0xff] }
 0x245   : > { %v2178_v8 = vpop.f32.mrf.mxu3 }
 0x246   : > { %v1964_v12 = vadd.f32 %v6817_v30, %v1836_v3  ;;  %v2079_v13 = vpop.f32.mrf.mxu1 }
 0x247   : > { %v2047_v11 = vpop.f32.mrf.mxu0 }
 0x248   : > { %v2089_v17 = vadd.f32 %v2047_v11, %v1961_v29  ;;  %5044 = vmatmul.msk.f32.gmra.mxu2 %vm365_vm1, %v6760_v33  ;;  %v6924_v33 = vld [vmem:[%s8698_s2 + $0x278] sm:$0xff] }
 0x249   : > { %5083 = vmatmul.msk.f32.gmra.mxu1 %vm365_vm1, %v6877_v27 }
 0x24a   : > { %v6911_v55 = vadd.f32 %v2175_v22, %v2089_v17  ;;  %5074 = vmatmul.msk.f32.vlgmr.msra.gmra.mxu0 %vm365_vm1, %v6771_v9  ;;  %5092 = vmatmul.msk.f32.gmra.mxu3 %vm365_vm1, %v6907_v0  ;;  %v6963_v22 = vld [vmem:[%s8698_s2 + $0x2a8] sm:$0xff] }
 0x24b   : > { %v1797_v30 = vpop.f32.mrf.mxu2  ;;  %3083 = vmatpush.msra.mxu0 %v3022_v6 }
 0x24c   : > { %v1839_v23 = vadd.f32 %v1797_v30, %v6679_v20 }
 0x24d   : > { %v2181_v54 = vpop.f32.mrf.mxu3 }
 0x24e   : > { %v1967_v32 = vadd.f32 %v6839_v62, %v1839_v23  ;;  %v6928_v25 = vpop.f32.mrf.mxu1 }
 0x24f   : > { %v2050_v53 = vpop.f32.mrf.mxu0 }
 0x250   : > { %v2092_v48 = vadd.f32 %v2050_v53, %v1964_v12  ;;  %5045 = vmatmul.msk.f32.gmra.mxu2 %vm365_vm1, %v6782_v14 }
 0x251   : > { %5084 = vmatmul.msk.f32.gmra.mxu1 %vm365_vm1, %v6907_v0  ;;  %v3019_v44 = vpop.permute.xlu0 %3018 }
 0x252   : > { %v6930_v42 = vadd.f32 %v2178_v8, %v2092_v48  ;;  %5075 = vmatmul.msk.f32.gmra.mxu0 %vm365_vm1, %v6792_v38  ;;  %5093 = vmatmul.msk.f32.gmra.mxu3 %vm365_vm1, %v6924_v33  ;;  %v7009_v8 = vld [vmem:[%s8698_s2 + $0x288] sm:$0xff] }
 0x253   : > { %v1800_v20 = vpop.f32.mrf.mxu2 }
 0x254   : > { %v1842_v62 = vadd.f32 %v1800_v20, %v6698_v34  ;;  %v3023_v34 = vsel %vm3020_vm6, %v5417_v26, %v3019_v44  ;;  %v7041_v20 = vld [vmem:[%s8698_s2 + $0x2c0] sm:$0xff]  ;;  %v7066_v44 = vld [vmem:[%s8698_s2 + $0x2c8] sm:$0xff] }
 0x255   : > { %v2184_v1 = vpop.f32.mrf.mxu3  ;;  %3112 = vmatpush.msra.mxu1 %v3023_v34 }
 0x256   : > { %v1970_v14 = vadd.f32 %v6863_v50, %v1842_v62  ;;  %v2085_v10 = vpop.f32.mrf.mxu1 }
 0x257   : > { %v2053_v49 = vpop.f32.mrf.mxu0 }
 0x258   : > { %v2095_v21 = vadd.f32 %v2053_v49, %v1967_v32  ;;  %5066 = vmatmul.msk.f32.vlgmr.msrb.gmra.mxu2 %vm365_vm1, %v6771_v9  ;;  %v7059_v49 = vpop.permute.xlu2 %5434 }
 0x259   : > { %2981 = vmatpush.msrb.mxu2 %v2892_v56  ;;  %5085 = vmatmul.msk.f32.gmra.mxu1 %vm365_vm1, %v6924_v33 }
 0x25a   : > { %v6950_v63 = vadd.f32 %v2181_v54, %v2095_v21  ;;  %5076 = vmatmul.msk.f32.gmra.mxu0 %vm365_vm1, %v6813_v19  ;;  %5114 = vmatmul.msk.f32.vlgmr.msrb.gmra.mxu3 %vm365_vm1, %v6945_v5 }
 0x25b   : > { %v1948_v50 = vpop.f32.mrf.mxu2  ;;  %v6978_v61 = vpop.permute.xlu1 %5419 }
 0x25c   : > { %v1962_v57 = vadd.f32 %v1948_v50, %v6731_v45  ;;  %v6974_v45 = vld [vmem:[%s8698_s2 + $0x280] sm:$0xff]  ;;  %v5422_v50 = vunpack.i.h.bf16 %v6978_v61 }
 0x25d   : > { %v2332_v28 = vpop.f32.mrf.mxu3 }
 0x25e   : > { %v2090_v9 = vadd.f32 %v6882_v41, %v1962_v57  ;;  %v2274_v24 = vpop.f32.mrf.mxu1  ;;  %v6983_v41 = vpop.permute.xlu0 %5424 }
 0x25f   : > { %v2056_v36 = vpop.f32.mrf.mxu0  ;;  %v5427_v58 = vunpack.i.h.bf16 %v6983_v41 }
 0x260   : > { %v2098_v29 = vadd.f32 %v2056_v36, %v1970_v14  ;;  %5067 = vmatmul.msk.f32.gmra.mxu2 %vm365_vm1, %v6792_v38  ;;  %v5421_v38 = vunpack.i.l.bf16 %v6978_v61  ;;  %v7099_v61 = vld [vmem:[%s8698_s2 + $0x2d0] sm:$0xff] }
 0x261   : > { %5102 = vmatmul.msk.f32.vlgmr.msrb.gmra.mxu1 %vm365_vm1, %v6974_v45 }
 0x262   : > { %v6967_v2 = vadd.f32 %v2184_v1, %v2098_v29  ;;  %5077 = vmatmul.msk.f32.gmra.mxu0 %vm365_vm1, %v6835_v52  ;;  %5115 = vmatmul.msk.f32.gmra.mxu3 %vm365_vm1, %v6963_v22  ;;  %v3153_v18 = vsel %vm3151_vm7, %v5427_v58, %v5421_v38  ;;  %v3154_v29 = vsel %vm3151_vm7, %v5421_v38, %v5422_v50  ;;  %v3598_v50 = vld [vmem:[%s8701_s5 + $0x38] sm:$0xff] }
 0x263   : > { %v1951_v51 = vpop.f32.mrf.mxu2  ;;  %3214 = vmatpush.msra.mxu3 %v3153_v18 }
 0x264   : > { %v1965_v37 = vadd.f32 %v1951_v51, %v6753_v7  ;;  %v6998_v7 = vld [vmem:[%s8698_s2 + $0x2b0] sm:$0xff]  ;;  %v3534_v51 = vld [vmem:[%s8699_s3 + $0x18] sm:$0xff] }
 0x265   : > { %v2335_v12 = vpop.f32.mrf.mxu3 }
 0x266   : > { %v2093_v3 = vadd.f32 %v2079_v13, %v1965_v37  ;;  %v2277_v59 = vpop.f32.mrf.mxu1  ;;  %v7020_v13 = vld [vmem:[%s8698_s2 + $0x2b8] sm:$0xff]  ;;  %v7081_v36 = vpop.permute.xlu0 %3278 }
 0x267   : > { %v2204_v46 = vpop.f32.mrf.mxu0 }
 0x268   : > { %v2218_v40 = vadd.f32 %v2204_v46, %v2090_v9  ;;  %5068 = vmatmul.msk.f32.gmra.mxu2 %vm365_vm1, %v6813_v19  ;;  %v3531_v46 = vld [vmem:[%s8699_s3] sm:$0xff] }
 0x269   : > { %5103 = vmatmul.msk.f32.gmra.mxu1 %vm365_vm1, %v7009_v8 }
 0x26a   : > { %v7002_v43 = vadd.f32 %v2332_v28, %v2218_v40  ;;  %5098 = vmatmul.msk.f32.vlgmr.msrb.gmra.mxu0 %vm365_vm1, %v6974_v45  ;;  %5116 = vmatmul.msk.f32.gmra.mxu3 %vm365_vm1, %v6998_v7  ;;  %v5607_v28 = vmov 0  }
 0x26b   : > { %v1954_v16 = vpop.f32.mrf.mxu2  ;;  %3243 = vmatpush.msrb.mxu0 %v3154_v29  ;;  %5438 = vset.pattern.permute.xlu1 %v5607_v28  ;;  %v3591_v29 = vld [vmem:[%s8701_s5] sm:$0xff] }
 0x26c   : > { %v1968_v19 = vadd.f32 %v1954_v16, %v6775_v4  ;;  %v7031_v4 = vld [vmem:[%s8698_s2 + $0x290] sm:$0xff]  ;;  %3552 = vperm.xlu1 %5438, %v3534_v51   ;;  %5440 = vset.pattern.permute.xlu0 %v5607_v28  ;;  %v3871_v51 = vld [vmem:[%s8703_s7] sm:$0xff] }
 0x26d   : > { %v2338_v53 = vpop.f32.mrf.mxu3  ;;  %5439 = vset.pattern.permute.xlu2 %v5607_v28 }
 0x26e   : > { %v2096_v11 = vadd.f32 %v6928_v25, %v1968_v19  ;;  %v2280_v23 = vpop.f32.mrf.mxu1 }
 0x26f   : > { %v2207_v17 = vpop.f32.mrf.mxu0 }
 0x270   : > { %v2221_v30 = vadd.f32 %v2207_v17, %v2093_v3  ;;  %5069 = vmatmul.msk.f32.gmra.mxu2 %vm365_vm1, %v6835_v52 }
 0x271   : > { %5104 = vmatmul.msk.f32.gmra.mxu1 %vm365_vm1, %v7031_v4 }
 0x272   : > { %v7024_v54 = vadd.f32 %v2335_v12, %v2221_v30  ;;  %5099 = vmatmul.msk.f32.gmra.mxu0 %vm365_vm1, %v7009_v8  ;;  %5117 = vmatmul.msk.f32.gmra.mxu3 %vm365_vm1, %v7020_v13  ;;  %v5430_v30 = vpop.permute.xlu1 %5429 }
 0x273   : > { %v1957_v32 = vpop.f32.mrf.mxu2 }
 0x274   : > { %v1971_v52 = vadd.f32 %v1957_v32, %v6796_v47  ;;  %v7052_v47 = vld [vmem:[%s8698_s2 + $0x298] sm:$0xff]  ;;  %3537 = vperm.xlu1 %5438, %v3531_v46   ;;  %v5431_v32 = vunpack.i.l.bf16 %v5430_v30 }
 0x276   : > { %v2099_v48 = vadd.f32 %v2085_v10, %v1971_v52  ;;  %v2283_v26 = vpop.f32.mrf.mxu1  ;;  %v2341_v10 = vpop.f32.mrf.mxu3 }
 0x277   : > { %v2210_v25 = vpop.f32.mrf.mxu0 }
 0x278   : > { %v2224_v62 = vadd.f32 %v2210_v25, %v2096_v11  ;;  %5086 = vmatmul.msk.f32.vlgmr.msra.gmra.mxu2 %vm365_vm1, %v6856_v35  ;;  %v7177_v25 = vld [vmem:[%s8698_s2 + $0x2e8] sm:$0xff] }
 0x279   : > { %5105 = vmatmul.msk.f32.gmra.mxu1 %vm365_vm1, %v7052_v47 }
 0x27a   : > { %v7045_v14 = vadd.f32 %v2338_v53, %v2224_v62  ;;  %5100 = vmatmul.msk.f32.gmra.mxu0 %vm365_vm1, %v7031_v4  ;;  %5134 = vmatmul.msk.f32.vlgmr.msra.gmra.mxu3 %vm365_vm1, %v7041_v20  ;;  %v5437_v53 = vunpack.i.h.bf16 %v7059_v49  ;;  %v5436_v62 = vunpack.i.l.bf16 %v7059_v49 }
 0x27b   : > { %v2146_v56 = vpop.f32.mrf.mxu2 }
 0x27c   : > { %v2216_v35 = vadd.f32 %v2146_v56, %v6821_v39  ;;  %v3533_v56 = vld [vmem:[%s8699_s3 + $0x10] sm:$0xff] }
 0x27d   : > { %3547 = vperm.xlu2 %5439, %v3533_v56  }
 0x27e   : > { %v7061_v1 = vadd.f32 %v2274_v24, %v2216_v35  ;;  %v7071_v57 = vpop.f32.mrf.mxu1  ;;  %v3281_v24 = vpop.permute.xlu2 %3280 }
 0x27f   : > { %v2213_v21 = vpop.f32.mrf.mxu0  ;;  %v3285_v6 = vsel %vm3282_vm8, %v7081_v36, %v3281_v24  ;;  %v7192_v35 = vpop.permute.xlu1 %3409 }
 0x280   : > { %v2227_v34 = vadd.f32 %v2213_v21, %v2099_v48  ;;  %5087 = vmatmul.msk.f32.gmra.mxu2 %vm365_vm1, %v6877_v27  ;;  %3374 = vmatpush.msrb.mxu3 %v3285_v6  ;;  %v3415_v21 = vsel %vm3413_vm9, %v5437_v53, %v7192_v35 }
 0x281   : > { %5122 = vmatmul.msk.f32.vlgmr.msra.gmra.mxu1 %vm365_vm1, %v6945_v5 }
 0x282   : > { %v7073_v39 = vadd.f32 %v2341_v10, %v2227_v34  ;;  %5101 = vmatmul.msk.f32.gmra.mxu0 %vm365_vm1, %v7052_v47  ;;  %5135 = vmatmul.msk.f32.gmra.mxu3 %vm365_vm1, %v7066_v44  ;;  %v3414_v34 = vsel %vm3413_vm9, %v5436_v62, %v5437_v53 }
 0x283   : > { %v2149_v9 = vpop.f32.mrf.mxu2 }
 0x284   : > { %v2219_v27 = vadd.f32 %v2149_v9, %v6843_v15 }
 0x285   : > { %3605 = vperm.xlu2 %5439, %v3591_v29   ;;  %v3412_v29 = vpop.permute.xlu0 %3411 }
 0x286   : > { %v7090_v37 = vadd.f32 %v2277_v59, %v2219_v27  ;;  %v7103_v38 = vpop.f32.mrf.mxu1  ;;  %v7222_v27 = vpop.f32.mrf.mxu3 }
 0x287   : > { %v7094_v15 = vpop.f32.mrf.mxu0 }
 0x288   : > { %5088 = vmatmul.msk.f32.gmra.mxu2 %vm365_vm1, %v6907_v0 }
 0x289   : > { %5123 = vmatmul.msk.f32.gmra.mxu1 %vm365_vm1, %v6963_v22 }
 0x28a   : > { %5118 = vmatmul.msk.f32.vlgmr.msra.gmra.mxu0 %vm365_vm1, %v6945_v5  ;;  %5136 = vmatmul.msk.f32.gmra.mxu3 %vm365_vm1, %v7099_v61  ;;  %v7122_v5 = vld [vmem:[%s8698_s2 + $0x2d8] sm:$0xff] }
 0x28b   : > { %v2152_v3 = vpop.f32.mrf.mxu2  ;;  %3447 = vmatpush.msra.mxu0 %v3414_v34 }
 0x28c   : > { %v2222_v18 = vadd.f32 %v2152_v3, %v6865_v60  ;;  %v5426_v60 = vunpack.i.l.bf16 %v6983_v41  ;;  %v5432_v41 = vunpack.i.h.bf16 %v5430_v30  ;;  %v7248_v3 = vld [vmem:[%s8698_s2 + $0x2f8] sm:$0xff] }
 0x28e   : > { %v7115_v40 = vadd.f32 %v2280_v23, %v2222_v18  ;;  %v7126_v59 = vpop.f32.mrf.mxu1  ;;  %v3152_v17 = vsel %vm3151_vm7, %v5426_v60, %v5427_v58  ;;  %v3284_v49 = vsel %vm3282_vm8, %v5432_v41, %v7081_v36  ;;  %v3593_v18 = vld [vmem:[%s8701_s5 + $0x10] sm:$0xff]  ;;  %v7261_v46 = vpop.f32.mrf.mxu3 }
 0x28f   : > { %v7117_v0 = vpop.f32.mrf.mxu0  ;;  %3185 = vmatpush.msra.mxu2 %v3152_v17  ;;  %3615 = vperm.xlu2 %5439, %v3593_v18   ;;  %v2472_v18 = vadd.f32 %v7094_v15, %v7061_v1  ;;  %v7400_v1 = vld [vmem:[%s8698_s2 + $0x318] sm:$0xff] }
 0x290   : > { %5089 = vmatmul.msk.f32.gmra.mxu2 %vm365_vm1, %v6924_v33  ;;  %v3592_v33 = vld [vmem:[%s8701_s5 + $0x8] sm:$0xff] }
 0x291   : > { %5124 = vmatmul.msk.f32.gmra.mxu1 %vm365_vm1, %v6998_v7  ;;  %3610 = vperm.xlu1 %5438, %v3592_v33  }
 0x292   : > { %5119 = vmatmul.msk.f32.gmra.mxu0 %vm365_vm1, %v6963_v22  ;;  %5137 = vmatmul.msk.f32.gmra.mxu3 %vm365_vm1, %v7122_v5  ;;  %v7146_v22 = vld [vmem:[%s8698_s2 + $0x2e0] sm:$0xff] }
 0x293   : > { %v2155_v16 = vpop.f32.mrf.mxu2 }
 0x294   : > { %v2225_v12 = vadd.f32 %v2155_v16, %v6884_v31  ;;  %v3874_v16 = vld [vmem:[%s8703_s7 + $0x18] sm:$0xff] }
 0x296   : > { %v7139_v19 = vadd.f32 %v2283_v26, %v2225_v12  ;;  %v7153_v31 = vpop.f32.mrf.mxu1 }
 0x297   : > { %v7141_v11 = vpop.f32.mrf.mxu0 }
 0x298   : > { %5106 = vmatmul.msk.f32.vlgmr.msrb.gmra.mxu2 %vm365_vm1, %v6974_v45  ;;  %v3532_v45 = vld [vmem:[%s8699_s3 + $0x8] sm:$0xff] }
 0x299   : > { %5125 = vmatmul.msk.f32.gmra.mxu1 %vm365_vm1, %v7020_v13  ;;  %3542 = vperm.xlu0 %5440, %v3532_v45  }
 0x29a   : > { %5120 = vmatmul.msk.f32.gmra.mxu0 %vm365_vm1, %v6998_v7  ;;  %5154 = vmatmul.msk.f32.vlgmr.msrb.gmra.mxu3 %vm365_vm1, %v7146_v22  ;;  %v3595_v7 = vld [vmem:[%s8701_s5 + $0x20] sm:$0xff] }
 0x29b   : > { %v2303_v23 = vpop.f32.mrf.mxu2  ;;  %3625 = vperm.xlu1 %5438, %v3595_v7   ;;  %3345 = vmatpush.msrb.mxu2 %v3284_v49 }
 0x29c   : > { %v2345_v58 = vadd.f32 %v2303_v23, %v6911_v55  ;;  %v3283_v55 = vsel %vm3282_vm8, %v5431_v32, %v5432_v41  ;;  %v3877_v41 = vld [vmem:[%s8703_s7 + $0x30] sm:$0xff] }
 0x29d   : > { %3316 = vmatpush.msrb.mxu1 %v3283_v55  ;;  %v3880_v55 = vld [vmem:[%s8703_s7 + $0x48] sm:$0xff] }
 0x29e   : > { %v7169_v52 = vadd.f32 %v7071_v57, %v2345_v58  ;;  %v7183_v26 = vpop.f32.mrf.mxu1  ;;  %v7313_v58 = vld [vmem:[%s8698_s2 + $0x300] sm:$0xff] }
 0x29f   : > { %v7172_v48 = vpop.f32.mrf.mxu0  ;;  %3476 = vmatpush.msra.mxu1 %v3415_v21 }
 0x2a0   : > { %5107 = vmatmul.msk.f32.gmra.mxu2 %vm365_vm1, %v7009_v8 }
 0x2a1   : > { %5146 = vmatmul.msk.f32.vlgmr.msrb.gmra.mxu1 %vm365_vm1, %v7146_v22 }
 0x2a2   : > { %5121 = vmatmul.msk.f32.gmra.mxu0 %vm365_vm1, %v7020_v13  ;;  %5155 = vmatmul.msk.f32.gmra.mxu3 %vm365_vm1, %v7177_v25  ;;  %v3594_v13 = vld [vmem:[%s8701_s5 + $0x18] sm:$0xff] }
 0x2a3   : > { %v2306_v8 = vpop.f32.mrf.mxu2  ;;  %3620 = vperm.xlu0 %5440, %v3594_v13   ;;  %3640 = vperm.xlu1 %5438, %v3598_v50  }
 0x2a4   : > { %v2348_v10 = vadd.f32 %v2306_v8, %v6930_v42  ;;  %v7216_v42 = vld [vmem:[%s8698_s2 + $0x2f0] sm:$0xff]  ;;  %v7342_v8 = vld [vmem:[%s8698_s2 + $0x308] sm:$0xff] }
 0x2a6   : > { %v7209_v57 = vadd.f32 %v7103_v38, %v2348_v10  ;;  %v7220_v36 = vpop.f32.mrf.mxu1  ;;  %v3601_v10 = vld [vmem:[%s8701_s5 + $0x50] sm:$0xff] }
 0x2a7   : > { %v7211_v9 = vpop.f32.mrf.mxu0 }
 0x2a8   : > { %5108 = vmatmul.msk.f32.gmra.mxu2 %vm365_vm1, %v7031_v4  ;;  %v3597_v4 = vld [vmem:[%s8701_s5 + $0x30] sm:$0xff] }
 0x2a9   : > { %5147 = vmatmul.msk.f32.gmra.mxu1 %vm365_vm1, %v7177_v25 }
 0x2aa   : > { %5138 = vmatmul.msk.f32.vlgmr.msrb.gmra.mxu0 %vm365_vm1, %v7041_v20  ;;  %5156 = vmatmul.msk.f32.gmra.mxu3 %vm365_vm1, %v7216_v42 }
 0x2ab   : > { %v2309_v24 = vpop.f32.mrf.mxu2  ;;  %3635 = vperm.xlu0 %5440, %v3597_v4   ;;  %3885 = vperm.xlu1 %5438, %v3871_v51   ;;  %v3875_v4 = vld [vmem:[%s8703_s7 + $0x20] sm:$0xff] }
 0x2ac   : > { %v2351_v28 = vadd.f32 %v2309_v24, %v6950_v63 }
 0x2ae   : > { %v7241_v6 = vadd.f32 %v7126_v59, %v2351_v28  ;;  %v7252_v63 = vpop.f32.mrf.mxu1  ;;  %v7373_v28 = vld [vmem:[%s8698_s2 + $0x310] sm:$0xff] }
 0x2af   : > { %v7243_v38 = vpop.f32.mrf.mxu0 }
 0x2b0   : > { %5109 = vmatmul.msk.f32.gmra.mxu2 %vm365_vm1, %v7052_v47  ;;  %v3600_v47 = vld [vmem:[%s8701_s5 + $0x48] sm:$0xff] }
 0x2b1   : > { %5148 = vmatmul.msk.f32.gmra.mxu1 %vm365_vm1, %v7216_v42 }
 0x2b2   : > { %5139 = vmatmul.msk.f32.gmra.mxu0 %vm365_vm1, %v7066_v44  ;;  %5157 = vmatmul.msk.f32.gmra.mxu3 %vm365_vm1, %v7248_v3 }
 0x2b3   : > { %v2312_v59 = vpop.f32.mrf.mxu2  ;;  %3650 = vperm.xlu0 %5440, %v3600_v47   ;;  %3900 = vperm.xlu1 %5438, %v3874_v16   ;;  %v2600_v16 = vadd.f32 %v7222_v27, %v2472_v18 }
 0x2b4   : > { %v2354_v60 = vadd.f32 %v2312_v59, %v6967_v2  ;;  %v3596_v2 = vld [vmem:[%s8701_s5 + $0x28] sm:$0xff] }
 0x2b5   : > { %3630 = vperm.xlu2 %5439, %v3596_v2   ;;  %v2475_v2 = vadd.f32 %v7117_v0, %v7090_v37 }
 0x2b6   : > { %v7273_v12 = vadd.f32 %v7153_v31, %v2354_v60  ;;  %v7279_v17 = vpop.f32.mrf.mxu1  ;;  %v3873_v31 = vld [vmem:[%s8703_s7 + $0x10] sm:$0xff]  ;;  %v3878_v60 = vld [vmem:[%s8703_s7 + $0x38] sm:$0xff] }
 0x2b7   : > { %v7275_v33 = vpop.f32.mrf.mxu0 }
 0x2b8   : > { %5130 = vmatmul.msk.f32.vlgmr.msra.gmra.mxu2 %vm365_vm1, %v7041_v20  ;;  %v7294_v20 = vpop.f32.mrf.mxu3 }
 0x2b9   : > { %5149 = vmatmul.msk.f32.gmra.mxu1 %vm365_vm1, %v7248_v3 }
 0x2ba   : > { %5140 = vmatmul.msk.f32.gmra.mxu0 %vm365_vm1, %v7099_v61 }
 0x2bb   : > { %v2460_v30 = vpop.f32.mrf.mxu2  ;;  %3895 = vperm.xlu0 %5440, %v3873_v31   ;;  %3915 = vperm.xlu1 %5438, %v3877_v41   ;;  %v3881_v31 = vld [vmem:[%s8703_s7 + $0x50] sm:$0xff]  ;;  %v2603_v41 = vadd.f32 %v7261_v46, %v2475_v2  ;;  %v3602_v46 = vld [vmem:[%s8701_s5 + $0x58] sm:$0xff] }
 0x2bc   : > { %v7292_v23 = vadd.f32 %v2460_v30, %v7002_v43  ;;  %v3599_v43 = vld [vmem:[%s8701_s5 + $0x40] sm:$0xff] }
 0x2bd   : > { %3645 = vperm.xlu2 %5439, %v3599_v43  }
 0x2be   : > { %v7303_v45 = vpop.f32.mrf.mxu1 }
 0x2bf   : > { %v7299_v32 = vpop.f32.mrf.mxu0 }
 0x2c0   : > { %5131 = vmatmul.msk.f32.gmra.mxu2 %vm365_vm1, %v7066_v44  ;;  %v3876_v44 = vld [vmem:[%s8703_s7 + $0x28] sm:$0xff]  ;;  %v7326_v62 = vpop.f32.mrf.mxu3 }
 0x2c1   : > { %5166 = vmatmul.msk.f32.vlgmr.msra.gmra.mxu1 %vm365_vm1, %v7313_v58 }
 0x2c2   : > { %5141 = vmatmul.msk.f32.gmra.mxu0 %vm365_vm1, %v7122_v5 }
 0x2c3   : > { %v2463_v7 = vpop.f32.mrf.mxu2  ;;  %3910 = vperm.xlu0 %5440, %v3876_v44   ;;  %3930 = vperm.xlu1 %5438, %v3880_v55  }
 0x2c4   : > { %v7321_v53 = vadd.f32 %v2463_v7, %v7024_v54  ;;  %v3872_v54 = vld [vmem:[%s8703_s7 + $0x8] sm:$0xff] }
 0x2c5   : > { %3890 = vperm.xlu2 %5439, %v3872_v54  }
 0x2c6   : > { %v7332_v49 = vpop.f32.mrf.mxu1 }
 0x2c7   : > { %v7328_v56 = vpop.f32.mrf.mxu0 }
 0x2c8   : > { %5132 = vmatmul.msk.f32.gmra.mxu2 %vm365_vm1, %v7099_v61  ;;  %v3879_v61 = vld [vmem:[%s8703_s7 + $0x40] sm:$0xff]  ;;  %v7361_v24 = vpop.f32.mrf.mxu3 }
 0x2c9   : > { %5167 = vmatmul.msk.f32.gmra.mxu1 %vm365_vm1, %v7342_v8 }
 0x2ca   : > { %5162 = vmatmul.msk.f32.vlgmr.msra.gmra.mxu0 %vm365_vm1, %v7313_v58 }
 0x2cb   : > { %v2466_v21 = vpop.f32.mrf.mxu2  ;;  %3925 = vperm.xlu0 %5440, %v3879_v61   ;;  %3655 = vperm.xlu1 %5438, %v3601_v10   ;;  %v335_v61 = vld [vmem:[%s7444_s17 + $0x48] sm:$0xff]  ;;  %v332_v10 = vld [vmem:[%s7444_s17 + $0x30] sm:$0xff] }
 0x2cc   : > { %v7350_v13 = vadd.f32 %v2466_v21, %v7045_v14  ;;  %v3416_v14 = vsel %vm3413_vm9, %v7192_v35, %v3412_v29  ;;  %v3882_v35 = vld [vmem:[%s8703_s7 + $0x58] sm:$0xff] }
 0x2cd   : > { %3505 = vmatpush.msra.mxu2 %v3416_v14  ;;  %3905 = vperm.xlu2 %5439, %v3875_v4   ;;  %v329_v14 = vld [vmem:[%s7444_s17 + $0x18] sm:$0xff]  ;;  %v2601_v4 = vadd.f32 %v7211_v9, %v7169_v52  ;;  %v2604_v52 = vadd.f32 %v7243_v38, %v7209_v57 }
 0x2ce   : > { %v7359_v50 = vpop.f32.mrf.mxu1 }
 0x2cf   : > { %v7355_v34 = vpop.f32.mrf.mxu0 }
 0x2d0   : > { %5133 = vmatmul.msk.f32.gmra.mxu2 %vm365_vm1, %v7122_v5 }
 0x2d1   : > { %5168 = vmatmul.msk.f32.gmra.mxu1 %vm365_vm1, %v7373_v28 }
 0x2d2   : > { %5163 = vmatmul.msk.f32.gmra.mxu0 %vm365_vm1, %v7342_v8 }
 0x2d3   : > { %v2469_v5 = vpop.f32.mrf.mxu2  ;;  %3940 = vperm.xlu0 %5440, %v3882_v35   ;;  %v7463_v35 = vld [vmem:[%s7444_s17] sm:$0xff] }
 0x2d4   : > { %v7381_v51 = vadd.f32 %v2469_v5, %v7073_v39  ;;  %v2690_v39 = vpop.f32.mrf.mxu3 }
 0x2d5   : > { %3920 = vperm.xlu2 %5439, %v3878_v60  }
 0x2d6   : > { %v7389_v47 = vpop.f32.mrf.mxu1 }
 0x2d7   : > { %v7385_v59 = vpop.f32.mrf.mxu0 }
 0x2d8   : > { %5150 = vmatmul.msk.f32.vlgmr.msrb.gmra.mxu2 %vm365_vm1, %v7146_v22 }
 0x2d9   : > { %5169 = vmatmul.msk.f32.gmra.mxu1 %vm365_vm1, %v7400_v1  ;;  %3991 = vmatpush.msrb.mxu2 %v335_v61 }
 0x2da   : > { %5164 = vmatmul.msk.f32.gmra.mxu0 %vm365_vm1, %v7373_v28 }
 0x2db   : > { %v2658_v15 = vpop.f32.mrf.mxu2  ;;  %3992 = vmatpush.msrb.mxu2 %v332_v10 }
 0x2dc   : > { %v7404_v22 = vadd.f32 %v2658_v15, %v2600_v16  ;;  %v2693_v0 = vpop.f32.mrf.mxu3  ;;  %v2732_v15 = vadd.f32 %v2690_v39, %v2604_v52  ;;  %v2610_v39 = vadd.f32 %v7299_v32, %v7273_v12 }
 0x2dd   : > { %3935 = vperm.xlu2 %5439, %v3881_v31   ;;  %3993 = vmatpush.msrb.mxu2 %v329_v14 }
 0x2de   : > { %v7412_v30 = vpop.f32.mrf.mxu1 }
 0x2df   : > { %v7408_v27 = vpop.f32.mrf.mxu0  ;;  %3994 = vmatpush.msrb.mxu2 %v7463_v35 }
 0x2e0   : > { %5151 = vmatmul.msk.f32.gmra.mxu2 %vm365_vm1, %v7177_v25  ;;  %v2478_v25 = vadd.f32 %v7141_v11, %v7115_v40  ;;  %v2481_v40 = vadd.f32 %v7172_v48, %v7139_v19 }
 0x2e2   : > { %5165 = vmatmul.msk.f32.gmra.mxu0 %vm365_vm1, %v7400_v1  ;;  %v2606_v55 = vadd.f32 %v7294_v20, %v2478_v25  ;;  %v2609_v19 = vadd.f32 %v7326_v62, %v2481_v40  ;;  %v2729_v62 = vadd.f32 %v7361_v24, %v2601_v4  ;;  %v2607_v24 = vadd.f32 %v7275_v33, %v7241_v6 }
 0x2e3   : > { %v2661_v43 = vpop.f32.mrf.mxu2 }
 0x2e4   : > { %v7420_v37 = vadd.f32 %v2661_v43, %v2603_v41  ;;  %v2696_v11 = vpop.f32.mrf.mxu3  ;;  %v2735_v57 = vadd.f32 %v2693_v0, %v2607_v24  ;;  %v7504_v0 = vld [vmem:[%s8702_s6] sm:$0xff] }
 0x2e5   : > { %3660 = vperm.xlu2 %5439, %v3602_v46   ;;  %v2738_v6 = vadd.f32 %v2696_v11, %v2610_v39 }
 0x2e6   : > { %v7428_v44 = vpop.f32.mrf.mxu1 }
 0x2e7   : > { %v7424_v7 = vpop.f32.mrf.mxu0 }
 0x2e8   : > { %5152 = vmatmul.msk.f32.gmra.mxu2 %vm365_vm1, %v7216_v42 }
 0x2eb   : > { %v2664_v54 = vpop.f32.mrf.mxu2 }
 0x2ec   : > { %v7435_v21 = vadd.f32 %v2664_v54, %v2606_v55  ;;  %v2602_v54 = vadd.f32 %v7183_v26, %v7292_v23  ;;  %v2605_v26 = vadd.f32 %v7220_v36, %v7321_v53  ;;  %v2608_v36 = vadd.f32 %v7252_v63, %v7350_v13  ;;  %v7544_v13 = vld [vmem:[%s8702_s6 + $0x18] sm:$0xff] }
 0x2ee   : > { %v7450_v20 = vpop.f32.mrf.mxu1  ;;  %v2730_v12 = vadd.f32 %v7328_v56, %v2602_v54  ;;  %v2733_v56 = vadd.f32 %v7355_v34, %v2605_v26  ;;  %v2736_v34 = vadd.f32 %v7385_v59, %v2608_v36  ;;  %v7574_v36 = vld [vmem:[%s8702_s6 + $0x30] sm:$0xff] }
 0x2ef   : > { %v7446_v42 = vpop.f32.mrf.mxu0 }
 0x2f0   : > { %5153 = vmatmul.msk.f32.gmra.mxu2 %vm365_vm1, %v7248_v3  ;;  %v2844_v3 = vpop.f32.mrf.mxu3 }
 0x2f1   : > { %v2858_v11 = vadd.f32 %v2844_v3, %v2730_v12 }
 0x2f3   : > { %v2667_v48 = vpop.f32.mrf.mxu2 }
 0x2f4   : > { %v7455_v29 = vadd.f32 %v2667_v48, %v2609_v19  ;;  %v7518_v19 = vld [vmem:[%s8702_s6 + $0x8] sm:$0xff] }
 0x2f6   : > { %v7469_v60 = vpop.f32.mrf.mxu1 }
 0x2f7   : > { %v7460_v5 = vpop.f32.mrf.mxu0 }
 0x2f8   : > { %5170 = vmatmul.msk.f32.vlgmr.msra.gmra.mxu2 %vm365_vm1, %v7313_v58  ;;  %v2847_v58 = vpop.f32.mrf.mxu3 }
 0x2f9   : > { %v2861_v14 = vadd.f32 %v2847_v58, %v2733_v56 }
 0x2fb   : > { %v2815_v18 = vpop.f32.mrf.mxu2 }
 0x2fc   : > { %v7471_v16 = vadd.f32 %v2815_v18, %v2729_v62  ;;  %v7532_v62 = vld [vmem:[%s8702_s6 + $0x10] sm:$0xff] }
 0x2fe   : > { %v7481_v41 = vpop.f32.mrf.mxu1 }
 0x2ff   : > { %v7475_v9 = vpop.f32.mrf.mxu0 }
 0x300   : > { %5171 = vmatmul.msk.f32.gmra.mxu2 %vm365_vm1, %v7342_v8  ;;  %v2850_v8 = vpop.f32.mrf.mxu3 }
 0x301   : > { %v2864_v52 = vadd.f32 %v2850_v8, %v2736_v34 }
 0x303   : > { %v2818_v2 = vpop.f32.mrf.mxu2 }
 0x304   : > { %v7479_v31 = vadd.f32 %v2818_v2, %v2732_v15  ;;  %v2611_v2 = vadd.f32 %v7279_v17, %v7381_v51 }
 0x306   : > { %v3117_v55 = vpop.f32.mrf.mxu1  ;;  %v2739_v59 = vadd.f32 %v7408_v27, %v2611_v2 }
 0x307   : > { %v7485_v43 = vpop.f32.mrf.mxu0 }
 0x308   : > { %5172 = vmatmul.msk.f32.gmra.mxu2 %vm365_vm1, %v7373_v28  ;;  %v2853_v32 = vpop.f32.mrf.mxu3 }
 0x309   : > { %v2867_v8 = vadd.f32 %v2853_v32, %v2739_v59  ;;  %v7565_v32 = vld [vmem:[%s8702_s6 + $0x28] sm:$0xff]  ;;  %v2859_v59 = vadd.f32 %v7332_v49, %v7420_v37 }
 0x30b   : > { %v2821_v38 = vpop.f32.mrf.mxu2 }
 0x30c   : > { %v7489_v25 = vadd.f32 %v2821_v38, %v2735_v57 }
 0x30f   : > { %v7493_v46 = vpop.f32.mrf.mxu0 }
 0x310   : > { %5173 = vmatmul.msk.f32.gmra.mxu2 %vm365_vm1, %v7400_v1  ;;  %v3120_v1 = vpop.f32.mrf.mxu1  ;;  %v7525_v10 = vpop.f32.mrf.mxu3 }
 0x313   : > { %v2824_v33 = vpop.f32.mrf.mxu2 }
 0x314   : > { %v7499_v28 = vadd.f32 %v2824_v33, %v2738_v6  ;;  %v7556_v33 = vld [vmem:[%s8702_s6 + $0x20] sm:$0xff] }
 0x317   : > { %v7507_v40 = vpop.f32.mrf.mxu0 }
 0x318   : > { %5210 = vmatmul.msk.f32.vlgmr.msrb.gmra.mxu2 %vm3663_vm10, %v7504_v0  ;;  %v3123_v3 = vpop.f32.mrf.mxu1  ;;  %v3059_v15 = vpop.f32.mrf.mxu3 }
 0x31b   : > { %v2983_v61 = vpop.f32.mrf.mxu2 }
 0x31c   : > { %v7513_v23 = vadd.f32 %v2983_v61, %v2858_v11 }
 0x31f   : > { %v7521_v48 = vpop.f32.mrf.mxu0 }
 0x320   : > { %5211 = vmatmul.msk.f32.gmra.mxu2 %vm3663_vm10, %v7518_v19  ;;  %v7546_v24 = vpop.f32.mrf.mxu1  ;;  %v3062_v51 = vpop.f32.mrf.mxu3 }
 0x323   : > { %v2986_v4 = vpop.f32.mrf.mxu2 }
 0x324   : > { %v3000_v53 = vadd.f32 %v2986_v4, %v2861_v14 }
 0x326   : > { %v3131_v57 = vadd.f32 %v3117_v55, %v3000_v53 }
 0x327   : > { %v7535_v18 = vpop.f32.mrf.mxu0 }
 0x328   : > { %5212 = vmatmul.msk.f32.gmra.mxu2 %vm3663_vm10, %v7532_v62  ;;  %v3321_v11 = vpop.f32.mrf.mxu1  ;;  %v3065_v26 = vpop.f32.mrf.mxu3 }
 0x32b   : > { %v2989_v58 = vpop.f32.mrf.mxu2 }
 0x32c   : > { %v3003_v63 = vadd.f32 %v2989_v58, %v2864_v52  ;;  %v7583_v58 = vld [vmem:[%s8702_s6 + $0x38] sm:$0xff] }
 0x32e   : > { %v3134_v54 = vadd.f32 %v3120_v1, %v3003_v63  ;;  %v2862_v63 = vadd.f32 %v7359_v50, %v7435_v21  ;;  %v7603_v21 = vld [vmem:[%s8702_s6 + $0x40] sm:$0xff] }
 0x32f   : > { %v3248_v38 = vpop.f32.mrf.mxu0 }
 0x330   : > { %v7549_v39 = vadd.f32 %v3248_v38, %v3131_v57  ;;  %5213 = vmatmul.msk.f32.gmra.mxu2 %vm3663_vm10, %v7544_v13  ;;  %v3324_v1 = vpop.f32.mrf.mxu1  ;;  %v7578_v34 = vpop.f32.mrf.mxu3  ;;  %v2865_v57 = vadd.f32 %v7389_v47, %v7455_v29  ;;  %v3001_v38 = vadd.f32 %v7460_v5, %v2862_v63 }
 0x332   : > { %v3004_v50 = vadd.f32 %v7475_v9, %v2865_v57  ;;  %v3132_v37 = vadd.f32 %v3062_v51, %v3001_v38  ;;  %v7611_v9 = vpop.permute.xlu1 %3552 }
 0x333   : > { %v2992_v6 = vpop.f32.mrf.mxu2 }
 0x334   : > { %v3006_v17 = vadd.f32 %v2992_v6, %v2867_v8 }
 0x336   : > { %v3137_v61 = vadd.f32 %v3123_v3, %v3006_v17  ;;  %v2856_v17 = vadd.f32 %v7303_v45, %v7404_v22 }
 0x337   : > { %v3251_v12 = vpop.f32.mrf.mxu0 }
 0x338   : > { %v7558_v27 = vadd.f32 %v3251_v12, %v3134_v54  ;;  %5214 = vmatmul.msk.f32.gmra.mxu2 %vm3663_vm10, %v7556_v33  ;;  %v3327_v52 = vpop.f32.mrf.mxu1  ;;  %v7594_v8 = vpop.f32.mrf.mxu3  ;;  %v2998_v54 = vadd.f32 %v7446_v42, %v2859_v59  ;;  %v2995_v47 = vadd.f32 %v7424_v7, %v2856_v17  ;;  %v3135_v12 = vadd.f32 %v3065_v26, %v3004_v50  ;;  %v7616_v7 = vld [vmem:[%s8702_s6 + $0x48] sm:$0xff] }
 0x339   : > { %v7625_v50 = vpop.permute.xlu0 %3542 }
 0x33a   : > { %v3129_v5 = vadd.f32 %v3059_v15, %v2998_v54  ;;  %v3126_v45 = vadd.f32 %v7525_v10, %v2995_v47 }
 0x33b   : > { %v3187_v55 = vpop.f32.mrf.mxu2 }
 0x33c   : > { %v3257_v63 = vadd.f32 %v3187_v55, %v3126_v45  ;;  %v7621_v55 = vpop.permute.xlu2 %3547  ;;  %v2999_v45 = vadd.f32 %v7428_v44, %v7479_v31  ;;  %v7659_v44 = vld [vmem:[%s8702_s6 + $0x58] sm:$0xff] }
 0x33e   : > { %v3388_v10 = vadd.f32 %v7546_v24, %v3257_v63  ;;  %v7633_v24 = vld [vmem:[%s8702_s6 + $0x50] sm:$0xff]  ;;  %v7646_v63 = vld [vmem:[%s8700_s4] sm:$0xff] }
 0x33f   : > { %v3254_v56 = vpop.f32.mrf.mxu0 }
 0x340   : > { %v7567_v14 = vadd.f32 %v3254_v56, %v3137_v61  ;;  %5215 = vmatmul.msk.f32.gmra.mxu2 %vm3663_vm10, %v7565_v32  ;;  %v7605_v49 = vpop.f32.mrf.mxu1  ;;  %v3222_v57 = vpop.f32.mrf.mxu3 }
 0x343   : > { %v3190_v4 = vpop.f32.mrf.mxu2 }
 0x344   : > { %v3260_v22 = vadd.f32 %v3190_v4, %v3129_v5  ;;  %v3002_v5 = vadd.f32 %v7450_v20, %v7489_v25  ;;  %v336_v20 = vld [vmem:[%s7444_s17 + $0x50] sm:$0xff]  ;;  %v2996_v25 = vadd.f32 %v7412_v30, %v7471_v16 }
 0x346   : > { %v3391_v15 = vadd.f32 %v3321_v11, %v3260_v22  ;;  %v3133_v22 = vadd.f32 %v7507_v40, %v3002_v5  ;;  %v3127_v31 = vadd.f32 %v7485_v43, %v2996_v25  ;;  %v7672_v43 = vld [vmem:[%s8700_s4 + $0x8] sm:$0xff]  ;;  %v7711_v25 = vld [vmem:[%s8700_s4 + $0x30] sm:$0xff] }
 0x347   : > { %v3449_v53 = vpop.f32.mrf.mxu0 }
 0x348   : > { %5216 = vmatmul.msk.f32.gmra.mxu2 %vm3663_vm10, %v7574_v36  ;;  %v3481_v38 = vpop.f32.mrf.mxu1  ;;  %v3264_v40 = vadd.f32 %v3222_v57, %v3133_v22  ;;  %v337_v22 = vld [vmem:[%s7444_s17 + $0x58] sm:$0xff] }
 0x34b   : > { %v3193_v3 = vpop.f32.mrf.mxu2 }
 0x34c   : > { %v3263_v61 = vadd.f32 %v3193_v3, %v3132_v37  ;;  %v7628_v37 = vpop.permute.xlu1 %3537 }
 0x34e   : > { %v3394_v59 = vadd.f32 %v3324_v1, %v3263_v61  ;;  %v3519_v1 = vadd.f32 %v3449_v53, %v3388_v10 }
 0x34f   : > { %v3452_v2 = vpop.f32.mrf.mxu0 }
 0x350   : > { %5217 = vmatmul.msk.f32.gmra.mxu2 %vm3663_vm10, %v7583_v58  ;;  %v3522_v4 = vadd.f32 %v3452_v2, %v3391_v15  ;;  %v3555_v53 = vadd.f32 %v7628_v37, %v3519_v1  ;;  %v3484_v61 = vpop.f32.mrf.mxu1  ;;  %v3130_v15 = vadd.f32 %v7493_v46, %v2999_v45  ;;  %v3258_v46 = vadd.f32 %v7578_v34, %v3127_v31 }
 0x352   : > { %v3261_v30 = vadd.f32 %v7594_v8, %v3130_v15  ;;  %v328_v15 = vld [vmem:[%s7444_s17 + $0x10] sm:$0xff] }
 0x353   : > { %v3196_v6 = vpop.f32.mrf.mxu2 }
 0x354   : > { %v3266_v42 = vadd.f32 %v3196_v6, %v3135_v12 }
 0x356   : > { %v3397_v51 = vadd.f32 %v3327_v52, %v3266_v42  ;;  %v3558_v52 = vadd.f32 %v7625_v50, %v3522_v4  ;;  %v3567_v42 = vmax.f32 %v3555_v53, 0.0 }
 0x357   : > { %v3455_v29 = vpop.f32.mrf.mxu0 }
 0x358   : > { %5218 = vmatmul.msk.f32.gmra.mxu2 %vm3663_vm10, %v7603_v21  ;;  %v3525_v26 = vadd.f32 %v3455_v29, %v3394_v59  ;;  %v3225_v29 = vpop.f32.mrf.mxu3  ;;  %v3570_v12 = vmax.f32 %v3558_v52, 0.0 }
 0x35a   : > { %v3561_v17 = vadd.f32 %v7621_v55, %v3525_v26 }
 0x35b   : > { %v3347_v56 = vpop.f32.mrf.mxu2 }
 0x35c   : > { %v3573_v2 = vmax.f32 %v3561_v17, 0.0  ;;  %v3389_v10 = vadd.f32 %v3347_v56, %v3258_v46  ;;  %v7683_v56 = vld [vmem:[%s8700_s4 + $0x10] sm:$0xff]  ;;  %v7732_v46 = vld [vmem:[%s8700_s4 + $0x38] sm:$0xff] }
 0x35e   : > { %v3520_v17 = vadd.f32 %v7605_v49, %v3389_v10 }
 0x35f   : > { %v3458_v3 = vpop.f32.mrf.mxu0 }
 0x360   : > { %v3528_v6 = vadd.f32 %v3458_v3, %v3397_v51  ;;  %5219 = vmatmul.msk.f32.gmra.mxu2 %vm3663_vm10, %v7616_v7  ;;  %v3005_v51 = vadd.f32 %v7469_v60, %v7499_v28  ;;  %v7666_v60 = vpop.f32.mrf.mxu3 }
 0x362   : > { %v3564_v54 = vadd.f32 %v7611_v9, %v3528_v6  ;;  %v3136_v26 = vadd.f32 %v7521_v48, %v3005_v51  ;;  %v3487_v48 = vpop.f32.mrf.mxu1  ;;  %v7717_v51 = vld [vmem:[%s8700_s4 + $0x20] sm:$0xff] }
 0x363   : > { %v3350_v11 = vpop.f32.mrf.mxu2 }
 0x364   : > { %v3576_v47 = vmax.f32 %v3564_v54, 0.0  ;;  %v3267_v28 = vadd.f32 %v3225_v29, %v3136_v26  ;;  %v3392_v3 = vadd.f32 %v3350_v11, %v3261_v30  ;;  %v333_v29 = vld [vmem:[%s7444_s17 + $0x38] sm:$0xff] }
 0x366   : > { %3712 = vmatpush.msra.mxu3 %v3576_v47  ;;  %v3523_v6 = vadd.f32 %v3481_v38, %v3392_v3  ;;  %v3556_v38 = vadd.f32 %v7628_v37, %v3520_v17  ;;  %v327_v17 = vld [vmem:[%s7444_s17 + $0x8] sm:$0xff] }
 0x368   : > { %3713 = vmatpush.msra.mxu3 %v3573_v2  ;;  %5220 = vmatmul.msk.f32.gmra.mxu2 %vm3663_vm10, %v7633_v24  ;;  %v3559_v11 = vadd.f32 %v7625_v50, %v3523_v6  ;;  %v3379_v47 = vpop.f32.mrf.mxu3  ;;  %v3568_v5 = vmax.f32 %v3556_v38, 0.0  ;;  %v7750_v6 = vld [vmem:[%s8700_s4 + $0x40] sm:$0xff] }
 0x36a   : > { %3714 = vmatpush.msra.mxu3 %v3570_v12  ;;  %v3571_v49 = vmax.f32 %v3559_v11, 0.0  ;;  %v7692_v12 = vld [vmem:[%s8700_s4 + $0x28] sm:$0xff] }
 0x36b   : > { %v3353_v59 = vpop.f32.mrf.mxu2 }
 0x36c   : > { %3715 = vmatpush.msra.mxu3 %v3567_v42  ;;  %v3395_v16 = vadd.f32 %v3353_v59, %v3264_v40  ;;  %v334_v59 = vld [vmem:[%s7444_s17 + $0x40] sm:$0xff]  ;;  %v3128_v40 = vadd.f32 %v7481_v41, %v7513_v23 }
 0x36d   : > { %5174 = vmatmul.msk.f32.vlgmr.msra.gmra.mxu3 %vm3663_vm10, %v7646_v63 }
 0x36e   : > { %4044 = vmatpush.msrb.mxu3 %v336_v20  ;;  %v3526_v4 = vadd.f32 %v3484_v61, %v3395_v16  ;;  %v7697_v61 = vld [vmem:[%s8700_s4 + $0x18] sm:$0xff]  ;;  %v331_v20 = vld [vmem:[%s7444_s17 + $0x28] sm:$0xff]  ;;  %v3259_v30 = vadd.f32 %v7535_v18, %v3128_v40 }
 0x370   : > { %5221 = vmatmul.msk.f32.gmra.mxu2 %vm3663_vm10, %v7659_v44  ;;  %v3562_v34 = vadd.f32 %v7621_v55, %v3526_v4  ;;  %4045 = vmatpush.msrb.mxu3 %v333_v29  ;;  %v3382_v42 = vpop.f32.mrf.mxu3  ;;  %v3390_v41 = vadd.f32 %v7666_v60, %v3259_v30 }
 0x371   : > { %v3396_v16 = vadd.f32 %v3382_v42, %v7558_v27  ;;  %v330_v27 = vld [vmem:[%s7444_s17 + $0x20] sm:$0xff] }
 0x372   : > { %v3574_v2 = vmax.f32 %v3562_v34, 0.0  ;;  %4046 = vmatpush.msrb.mxu3 %v330_v27  ;;  %v7785_v34 = vld [vmem:[%s8700_s4 + $0x58] sm:$0xff] }
 0x373   : > { %v3356_v57 = vpop.f32.mrf.mxu2 }
 0x374   : > { %v3398_v8 = vadd.f32 %v3356_v57, %v3267_v28  ;;  %v3393_v28 = vadd.f32 %v3379_v47, %v7549_v39  ;;  %4047 = vmatpush.msrb.mxu3 %v327_v17 }
 0x375   : > { %5175 = vmatmul.msk.f32.gmra.mxu3 %vm3663_vm10, %v7672_v43 }
 0x376   : > { %v3529_v1 = vadd.f32 %v3487_v48, %v3398_v8 }
 0x378   : > { %v3565_v54 = vadd.f32 %v7611_v9, %v3529_v1  ;;  %v3385_v26 = vpop.f32.mrf.mxu3 }
 0x379   : > { %v3399_v3 = vadd.f32 %v3385_v26, %v7567_v14 }
 0x37a   : > { %v3577_v52 = vmax.f32 %v3565_v54, 0.0 }
 0x37b   : > { %v3507_v53 = vpop.f32.mrf.mxu2 }
 0x37c   : > { %3765 = vmatpush.msrb.mxu0 %v3577_v52  ;;  %5275 = vmatpush.msrb.mxu1 %v3577_v52  ;;  %v3521_v10 = vadd.f32 %v3507_v53, %v3390_v41 }
 0x37d   : > { %5176 = vmatmul.msk.f32.gmra.mxu3 %vm3663_vm10, %v7683_v56 }
 0x37e   : > { %3766 = vmatpush.msrb.mxu0 %v3574_v2  ;;  %5276 = vmatpush.msrb.mxu1 %v3574_v2  ;;  %v3557_v60 = vadd.f32 %v7628_v37, %v3521_v10  ;;  %v7773_v37 = vld [vmem:[%s8700_s4 + $0x50] sm:$0xff] }
 0x380   : > { %3767 = vmatpush.msrb.mxu0 %v3571_v49  ;;  %5277 = vmatpush.msrb.mxu1 %v3571_v49 }
 0x382   : > { %3768 = vmatpush.msrb.mxu0 %v3568_v5  ;;  %5278 = vmatpush.msrb.mxu1 %v3568_v5 }
 0x383   : > { %v3510_v45 = vpop.f32.mrf.mxu2  ;;  %5186 = vmatmul.msk.f32.vlgmr.msrb.gmra.mxu0 %vm3663_vm10, %v7646_v63  ;;  %5191 = vmatmul.msk.f32.vlgmr.msrb.gmra.mxu1 %vm3663_vm10, %v7692_v12 }
 0x384   : > { %4097 = vmatpush.msra.mxu0 %v337_v22  ;;  %v3524_v23 = vadd.f32 %v3510_v45, %v3393_v28 }
 0x385   : > { %5177 = vmatmul.msk.f32.gmra.mxu3 %vm3663_vm10, %v7697_v61 }
 0x386   : > { %4098 = vmatpush.msra.mxu0 %v334_v59  ;;  %v3560_v4 = vadd.f32 %v7625_v50, %v3524_v23  ;;  %v7762_v50 = vld [vmem:[%s8700_s4 + $0x48] sm:$0xff] }
 0x388   : > { %4099 = vmatpush.msra.mxu0 %v331_v20 }
 0x38a   : > { %4100 = vmatpush.msra.mxu0 %v328_v15 }
 0x38b   : > { %v3513_v31 = vpop.f32.mrf.mxu2  ;;  %5187 = vmatmul.msk.f32.gmra.mxu0 %vm3663_vm10, %v7672_v43  ;;  %5192 = vmatmul.msk.f32.gmra.mxu1 %vm3663_vm10, %v7711_v25 }
 0x38c   : > { %v3527_v57 = vadd.f32 %v3513_v31, %v3396_v16 }
 0x38d   : > { %5178 = vmatmul.msk.f32.gmra.mxu3 %vm3663_vm10, %v7717_v51 }
 0x38e   : > { %v3563_v39 = vadd.f32 %v7621_v55, %v3527_v57  ;;  %v3569_v55 = vmax.f32 %v3557_v60, 0.0 }
 0x390   : > { %v3575_v1 = vmax.f32 %v3563_v39, 0.0 }
 0x393   : > { %v3516_v48 = vpop.f32.mrf.mxu2  ;;  %5188 = vmatmul.msk.f32.gmra.mxu0 %vm3663_vm10, %v7683_v56  ;;  %5193 = vmatmul.msk.f32.gmra.mxu1 %vm3663_vm10, %v7732_v46 }
 0x394   : > { %v3530_v18 = vadd.f32 %v3516_v48, %v3399_v3 }
 0x395   : > { %5179 = vmatmul.msk.f32.gmra.mxu3 %vm3663_vm10, %v7692_v12 }
 0x396   : > { %v3566_v14 = vadd.f32 %v7611_v9, %v3530_v18  ;;  %v3572_v9 = vmax.f32 %v3560_v4, 0.0 }
 0x398   : > { %v3578_v8 = vmax.f32 %v3566_v14, 0.0 }
 0x39a   : > { %3818 = vmatpush.msra.mxu1 %v3578_v8 }
 0x39b   : > { %5189 = vmatmul.msk.f32.gmra.mxu0 %vm3663_vm10, %v7697_v61  ;;  %5194 = vmatmul.msk.f32.gmra.mxu1 %vm3663_vm10, %v7750_v6 }
 0x39c   : > { %3819 = vmatpush.msra.mxu1 %v3575_v1 }
 0x39d   : > { %5180 = vmatmul.msk.f32.gmra.mxu3 %vm3663_vm10, %v7711_v25 }
 0x39e   : > { %3820 = vmatpush.msra.mxu1 %v3572_v9 }
 0x3a0   : > { %3821 = vmatpush.msra.mxu1 %v3569_v55 }
 0x3a3   : > { %5190 = vmatmul.msk.f32.gmra.mxu0 %vm3663_vm10, %v7717_v51  ;;  %5195 = vmatmul.msk.f32.gmra.mxu1 %vm3663_vm10, %v7762_v50 }
 0x3a5   : > { %5181 = vmatmul.msk.f32.gmra.mxu3 %vm3663_vm10, %v7732_v46 }
 0x3ab   : > { %5196 = vmatmul.msk.f32.gmra.mxu1 %vm3663_vm10, %v7773_v37  ;;  %5234 = vmatmul.msk.f32.vlgmr.msra.gmra.mxu0 %vm3663_vm10, %v7504_v0 }
 0x3ad   : > { %5182 = vmatmul.msk.f32.gmra.mxu3 %vm3663_vm10, %v7750_v6 }
 0x3b3   : > { %5197 = vmatmul.msk.f32.gmra.mxu1 %vm3663_vm10, %v7785_v34  ;;  %5235 = vmatmul.msk.f32.gmra.mxu0 %vm3663_vm10, %v7518_v19 }
 0x3b5   : > { %5183 = vmatmul.msk.f32.gmra.mxu3 %vm3663_vm10, %v7762_v50 }
 0x3bb   : > { %5198 = vmatmul.msk.f32.vlgmr.msra.gmra.mxu1 %vm3663_vm10, %v7646_v63  ;;  %5236 = vmatmul.msk.f32.gmra.mxu0 %vm3663_vm10, %v7532_v62  ;;  %v3996_v63 = vpop.f32.mrf.mxu2 }
 0x3bd   : > { %5184 = vmatmul.msk.f32.gmra.mxu3 %vm3663_vm10, %v7773_v37 }
 0x3c3   : > { %5199 = vmatmul.msk.f32.gmra.mxu1 %vm3663_vm10, %v7672_v43  ;;  %5237 = vmatmul.msk.f32.gmra.mxu0 %vm3663_vm10, %v7544_v13  ;;  %v7817_v43 = vpop.permute.xlu2 %3605  ;;  %v3999_v54 = vpop.f32.mrf.mxu2 }
 0x3c5   : > { %5185 = vmatmul.msk.f32.gmra.mxu3 %vm3663_vm10, %v7785_v34 }
 0x3cb   : > { %5200 = vmatmul.msk.f32.gmra.mxu1 %vm3663_vm10, %v7683_v56  ;;  %5238 = vmatmul.msk.f32.gmra.mxu0 %vm3663_vm10, %v7556_v33  ;;  %v7827_v11 = vpop.permute.xlu2 %3615  ;;  %v4002_v52 = vpop.f32.mrf.mxu2 }
 0x3cc   : > { %v7837_v56 = vpop.permute.xlu0 %3620 }
 0x3cd   : > { %5222 = vmatmul.msk.f32.vlgmr.msrb.gmra.mxu3 %vm3663_vm10, %v7504_v0  ;;  %v7823_v0 = vpop.permute.xlu1 %3610 }
 0x3d3   : > { %5201 = vmatmul.msk.f32.gmra.mxu1 %vm3663_vm10, %v7697_v61  ;;  %5239 = vmatmul.msk.f32.gmra.mxu0 %vm3663_vm10, %v7565_v32  ;;  %v7839_v47 = vpop.permute.xlu2 %3630 }
 0x3d5   : > { %5223 = vmatmul.msk.f32.gmra.mxu3 %vm3663_vm10, %v7518_v19  ;;  %v7835_v19 = vpop.permute.xlu1 %3625 }
 0x3db   : > { %5202 = vmatmul.msk.f32.gmra.mxu1 %vm3663_vm10, %v7717_v51  ;;  %5240 = vmatmul.msk.f32.gmra.mxu0 %vm3663_vm10, %v7574_v36  ;;  %v7855_v2 = vpop.permute.xlu2 %3645 }
 0x3dd   : > { %5224 = vmatmul.msk.f32.gmra.mxu3 %vm3663_vm10, %v7532_v62  ;;  %v4005_v62 = vpop.f32.mrf.mxu2  ;;  %v7847_v53 = vpop.permute.xlu1 %3640 }
 0x3e3   : > { %5203 = vmatmul.msk.f32.gmra.mxu1 %vm3663_vm10, %v7692_v12  ;;  %5241 = vmatmul.msk.f32.gmra.mxu0 %vm3663_vm10, %v7583_v58 }
 0x3e5   : > { %5225 = vmatmul.msk.f32.gmra.mxu3 %vm3663_vm10, %v7544_v13  ;;  %v7849_v13 = vpop.permute.xlu0 %3635  ;;  %v4008_v49 = vpop.f32.mrf.mxu2 }
 0x3e6   : > { %v7860_v5 = vpop.permute.xlu1 %3885 }
 0x3e7   : > { %v3997_v12 = vadd.f32 %v3996_v63, %v7860_v5 }
 0x3eb   : > { %5204 = vmatmul.msk.f32.gmra.mxu1 %vm3663_vm10, %v7711_v25  ;;  %5242 = vmatmul.msk.f32.gmra.mxu0 %vm3663_vm10, %v7603_v21 }
 0x3ed   : > { %5226 = vmatmul.msk.f32.gmra.mxu3 %vm3663_vm10, %v7556_v33  ;;  %v7867_v61 = vpop.permute.xlu0 %3650  ;;  %v4011_v20 = vpop.f32.mrf.mxu2 }
 0x3ee   : > { %v7899_v23 = vpop.permute.xlu1 %3900 }
 0x3ef   : > { %v4006_v14 = vadd.f32 %v4005_v62, %v7899_v23 }
 0x3f0   : > { %v3717_v38 = vpop.f32.mrf.mxu3 }
 0x3f1   : > { %v3718_v33 = vadd.f32 %v3717_v38, %v7817_v43 }
 0x3f3   : > { %5205 = vmatmul.msk.f32.gmra.mxu1 %vm3663_vm10, %v7732_v46  ;;  %5243 = vmatmul.msk.f32.gmra.mxu0 %vm3663_vm10, %v7616_v7  ;;  %v4138_v45 = vadd.f32 %v3997_v12, %v3718_v33 }
 0x3f5   : > { %5227 = vmatmul.msk.f32.gmra.mxu3 %vm3663_vm10, %v7565_v32  ;;  %v7871_v32 = vpop.permute.xlu2 %3890  ;;  %v5246_v25 = vmul.f32 -1.442695, %v4138_v45  ;;  %v7886_v40 = vpop.permute.xlu0 %3895 }
 0x3f6   : > { %v4000_v51 = vadd.f32 %v3999_v54, %v7871_v32  ;;  %v4003_v26 = vadd.f32 %v4002_v52, %v7886_v40  ;;  %v4014_v48 = vpop.f32.mrf.mxu2 }
 0x3f7   : > { %5441 = vpow2.f32 %v5246_v25 }
 0x3f8   : > { %v3720_v29 = vpop.f32.mrf.mxu3 }
 0x3f9   : > { %v3721_v22 = vadd.f32 %v3720_v29, %v7823_v0 }
 0x3fb   : > { %5206 = vmatmul.msk.f32.gmra.mxu1 %vm3663_vm10, %v7750_v6  ;;  %5244 = vmatmul.msk.f32.gmra.mxu0 %vm3663_vm10, %v7633_v24 }
 0x3fd   : > { %5228 = vmatmul.msk.f32.gmra.mxu3 %vm3663_vm10, %v7574_v36  ;;  %v4141_v36 = vadd.f32 %v4000_v51, %v3721_v22  ;;  %v5442_v57 = vpop.eup %5441  ;;  %v7901_v18 = vpop.permute.xlu2 %3905 }
 0x3fe   : > { %v4009_v4 = vadd.f32 %v4008_v49, %v7901_v18  ;;  %v4017_v9 = vpop.f32.mrf.mxu2  ;;  %v7918_v17 = vpop.permute.xlu0 %3910 }
 0x3ff   : > { %v5249_v30 = vmul.f32 -1.442695, %v4141_v36  ;;  %v4012_v38 = vadd.f32 %v4011_v20, %v7918_v17  ;;  %v7940_v20 = vpop.permute.xlu1 %3915 }
 0x400   : > { %v3723_v42 = vpop.f32.mrf.mxu3  ;;  %v7874_v59 = vpop.f32.mrf.mxu0 }
 0x401   : > { %v7876_v15 = vpop.f32.mrf.mxu1  ;;  %v3724_v31 = vadd.f32 %v3723_v42, %v7827_v11  ;;  %5443 = vpow2.f32 %v5249_v30  ;;  %v4015_v30 = vadd.f32 %v4014_v48, %v7940_v20 }
 0x403   : > { %5207 = vmatmul.msk.f32.gmra.mxu1 %vm3663_vm10, %v7762_v50  ;;  %5245 = vmatmul.msk.f32.gmra.mxu0 %vm3663_vm10, %v7659_v44  ;;  %v4144_v28 = vadd.f32 %v4003_v26, %v3724_v31 }
 0x405   : > { %5229 = vmatmul.msk.f32.gmra.mxu3 %vm3663_vm10, %v7583_v58  ;;  %v5252_v41 = vmul.f32 -1.442695, %v4144_v28  ;;  %v7897_v58 = vadd.f32 1.0, %v5442_v57 }
 0x406   : > { %v4020_v25 = vpop.f32.mrf.mxu2 }
 0x407   : > { %5445 = vpow2.f32 %v5252_v41  ;;  %vm4203_vm11 = vweird.f32 %v7897_v58 }
 0x408   : > { %v3726_v16 = vpop.f32.mrf.mxu3  ;;  %v7889_v46 = vpop.f32.mrf.mxu0  ;;  %5447 = vrcp.f32 %v7897_v58 }
 0x409   : > { %v7891_v3 = vpop.f32.mrf.mxu1  ;;  %v3727_v27 = vadd.f32 %v3726_v16, %v7837_v56 }
 0x40b   : > { %5208 = vmatmul.msk.f32.gmra.mxu1 %vm3663_vm10, %v7773_v37  ;;  %v4147_v60 = vadd.f32 %v4006_v14, %v3727_v27 }
 0x40d   : > { %5230 = vmatmul.msk.f32.gmra.mxu3 %vm3663_vm10, %v7603_v21  ;;  %v5444_v21 = vpop.eup %5443  ;;  %v5255_v63 = vmul.f32 -1.442695, %v4147_v60  ;;  %v7962_v60 = vpop.permute.xlu2 %3920 }
 0x40e   : > { %v7914_v55 = vadd.f32 1.0, %v5444_v21  ;;  %v5446_v37 = vpop.eup %5445  ;;  %8713 = vst [vmem:[#allocation2_spill] sm:$0xff] %v7962_v60 }
 0x40f   : > { %v7920_v54 = vpop.eup %5447  ;;  %v7929_v29 = vadd.f32 1.0, %v5446_v37 }
 0x410   : > { %v3729_v10 = vpop.f32.mrf.mxu3  ;;  %v7904_v39 = vpop.f32.mrf.mxu0  ;;  %v4199_v33 = vmul.f32 %v7920_v54, %v7897_v58  ;;  %vm4204_vm1 = vweird.f32 %v7920_v54  ;;  %vm4248_vm15 = vweird.f32 %v7914_v55 }
 0x411   : > { %v3730_v8 = vadd.f32 %v3729_v10, %v7835_v19  ;;  %v7909_v6 = vpop.f32.mrf.mxu1  ;;  %vm4205_vm12 = vmor %vm4203_vm11, %vm4204_vm1  ;;  %vm4293_vm5 = vweird.f32 %v7929_v29 }
 0x412   : > { %v4200_v51 = vsub.f32 1.0, %v4199_v33 }
 0x413   : > { %v4378_v1 = vadd.f32 %v4009_v4, %v3730_v8  ;;  %5209 = vmatmul.msk.f32.gmra.mxu1 %vm3663_vm10, %v7785_v34 }
 0x414   : > { %v4201_v41 = vmul.f32 %v7920_v54, %v4200_v51 }
 0x415   : > { %v5258_v50 = vmul.f32 -1.442695, %v4378_v1  ;;  %5231 = vmatmul.msk.f32.gmra.mxu3 %vm3663_vm10, %v7616_v7 }
 0x416   : > { %v4202_v1 = vadd.f32 %v7920_v54, %v4201_v41 }
 0x417   : > { %5449 = vpow2.f32 %v5258_v50  ;;  %v4018_v50 = vadd.f32 %v4017_v9, %v7962_v60  ;;  %v4207_v9 = vand.u32 2147483647, %v7897_v58 }
 0x418   : > { %v3732_v52 = vpop.f32.mrf.mxu3  ;;  %v7922_v62 = vpop.f32.mrf.mxu0  ;;  %5451 = vrcp.f32 %v7914_v55  ;;  %v4206_v51 = vsel %vm4205_vm12, %v7920_v54, %v4202_v1  ;;  %v4254_v1 = vand.u32 2147483648, %v7914_v55 }
 0x419   : > { %v3733_v34 = vadd.f32 %v3732_v52, %v7839_v47  ;;  %v7927_v49 = vpop.f32.mrf.mxu1  ;;  %5453 = vpow2.f32 %v5255_v63  ;;  %vm4208_vm13 = vcmp.eq.f32.partialorder %v4207_v9, 8.507059e+37 }
 0x41a   : > { %5455 = vrcp.f32 %v7929_v29 }
 0x41b   : > { %v4381_v7 = vadd.f32 %v4012_v38, %v3733_v34 }
 0x41d   : > { %v5450_v12 = vpop.eup %5449  ;;  %v5261_v45 = vmul.f32 -1.442695, %v4381_v7  ;;  %5232 = vmatmul.msk.f32.gmra.mxu3 %vm3663_vm10, %v7633_v24  ;;  %v4023_v7 = vpop.f32.mrf.mxu2 }
 0x41e   : > { %v7936_v22 = vadd.f32 1.0, %v5450_v12  ;;  %v7938_v42 = vpop.eup %5451 }
 0x41f   : > { %5457 = vpow2.f32 %v5261_v45  ;;  %v5454_v26 = vpop.eup %5453  ;;  %v4244_v28 = vmul.f32 %v7938_v42, %v7914_v55  ;;  %vm4249_vm14 = vweird.f32 %v7938_v42 }
 0x420   : > { %v3735_v36 = vpop.f32.mrf.mxu3  ;;  %v7942_v31 = vpop.f32.mrf.mxu0  ;;  %5459 = vrcp.f32 %v7936_v22  ;;  %v7954_v10 = vadd.f32 1.0, %v5454_v26  ;;  %vm8006_vm0 = vmor %vm4248_vm15, %vm4249_vm14  ;;  %vm4443_vm8 = vweird.f32 %v7936_v22 }
 0x421   : > { %v3736_v24 = vadd.f32 %v3735_v36, %v7849_v13  ;;  %v7947_v16 = vpop.f32.mrf.mxu1  ;;  %v7952_v27 = vpop.eup %5455  ;;  %v4245_v8 = vsub.f32 1.0, %v4244_v28 }
 0x422   : > { %v4289_v52 = vmul.f32 %v7952_v27, %v7929_v29  ;;  %vm4294_vm3 = vweird.f32 %v7952_v27 }
 0x423   : > { %v4384_v57 = vadd.f32 %v4015_v30, %v3736_v24  ;;  %v4246_v12 = vmul.f32 %v7938_v42, %v4245_v8  ;;  %vm8034_vm7 = vmor %vm4293_vm5, %vm4294_vm3 }
 0x424   : > { %v4290_v26 = vsub.f32 1.0, %v4289_v52 }
 0x425   : > { %v5458_v14 = vpop.eup %5457  ;;  %v5264_v4 = vmul.f32 -1.442695, %v4384_v57  ;;  %5233 = vmatmul.msk.f32.gmra.mxu3 %vm3663_vm10, %v7659_v44  ;;  %v4209_v44 = vand.u32 2147483648, %v7897_v58  ;;  %v7986_v58 = vpop.permute.xlu0 %3925 }
 0x426   : > { %v7958_v48 = vadd.f32 1.0, %v5458_v14  ;;  %v7960_v21 = vpop.eup %5459  ;;  %8714 = vst [vmem:[#allocation3_spill] sm:$0xff] %v7986_v58  ;;  %v4021_v54 = vadd.f32 %v4020_v25, %v7986_v58  ;;  %v4291_v52 = vmul.f32 %v7952_v27, %v4290_v26  ;;  %v8024_v25 = vpop.permute.xlu2 %3935 }
 0x427   : > { %5461 = vpow2.f32 %v5264_v4  ;;  %v4439_v33 = vmul.f32 %v7960_v21, %v7936_v22  ;;  %v4210_v36 = vor.u32 1.1754944e-38, %v4209_v44  ;;  %v4247_v4 = vadd.f32 %v7938_v42, %v4246_v12  ;;  %8719 = vst [vmem:[#allocation6_spill] sm:$0xff] %v8024_v25 }
 0x428   : > { %5463 = vrcp.f32 %v7954_v10  ;;  %v3738_v37 = vpop.f32.mrf.mxu3  ;;  %v7968_v63 = vpop.f32.mrf.mxu0  ;;  %v4252_v44 = vand.u32 2147483647, %v7914_v55  ;;  %vm4444_vm6 = vweird.f32 %v7960_v21  ;;  %vm4488_vm14 = vweird.f32 %v7958_v48 }
 0x429   : > { %5465 = vrcp.f32 %v7958_v48  ;;  %v3739_v38 = vadd.f32 %v3738_v37, %v7847_v53  ;;  %v7975_v34 = vpop.f32.mrf.mxu1  ;;  %v4440_v57 = vsub.f32 1.0, %v4439_v33  ;;  %v4211_v14 = vsel %vm4208_vm13, %v4210_v36, %v4206_v51  ;;  %v8018_v36 = vpop.permute.xlu1 %3930  ;;  %vm8052_vm9 = vmor %vm4443_vm8, %vm4444_vm6 }
 0x42a   : > { %v4618_v9 = vmul.f32 %v4211_v14, %v4021_v54  ;;  %v4251_v51 = vsel %vm8006_vm0, %v7938_v42, %v4247_v4  ;;  %8718 = vst [vmem:[#allocation5_spill] sm:$0xff] %v8018_v36  ;;  %v4026_v14 = vpop.f32.mrf.mxu2  ;;  %vm4253_vm2 = vcmp.eq.f32.partialorder %v4252_v44, 8.507059e+37  ;;  %v4292_v54 = vadd.f32 %v7952_v27, %v4291_v52 }
 0x42b   : > { %v4387_v45 = vadd.f32 %v4018_v50, %v3739_v38  ;;  %v4441_v55 = vmul.f32 %v7960_v21, %v4440_v57  ;;  %v4027_v44 = vadd.f32 %v4026_v14, %v8024_v25  ;;  %v4449_v52 = vand.u32 2147483648, %v7936_v22 }
 0x42c   : > { %v4103_v14 = vadd.f32 %v7968_v63, %v7860_v5  ;;  %vm4338_vm13 = vweird.f32 %v7954_v10 }
 0x42d   : > { %v5462_v30 = vpop.eup %5461  ;;  %v5267_v24 = vmul.f32 -1.442695, %v4387_v45  ;;  %v4450_v25 = vor.u32 1.1754944e-38, %v4449_v52 }
 0x42e   : > { %v7984_v28 = vpop.eup %5463  ;;  %v7988_v41 = vadd.f32 1.0, %v5462_v30  ;;  %v4255_v30 = vor.u32 1.1754944e-38, %v4254_v1  ;;  %v4442_v1 = vadd.f32 %v7960_v21, %v4441_v55  ;;  %v4447_v55 = vand.u32 2147483647, %v7936_v22 }
 0x42f   : > { %v7991_v8 = vpop.eup %5465  ;;  %5467 = vpow2.f32 %v5267_v24  ;;  %v4334_v12 = vmul.f32 %v7984_v28, %v7954_v10  ;;  %v4024_v24 = vadd.f32 %v4023_v7, %v8018_v36  ;;  %vm4339_vm11 = vweird.f32 %v7984_v28 }
 0x430   : > { %v3741_v50 = vpop.f32.mrf.mxu3  ;;  %v7995_v37 = vpop.f32.mrf.mxu0  ;;  %5469 = vrcp.f32 %v7988_v41  ;;  %v4484_v45 = vmul.f32 %v7991_v8, %v7958_v48  ;;  %v4446_v63 = vsel %vm8052_vm9, %v7960_v21, %v4442_v1  ;;  %vm4448_vm1 = vcmp.eq.f32.partialorder %v4447_v55, 8.507059e+37  ;;  %vm8091_vm15 = vmor %vm4338_vm13, %vm4339_vm11 }
 0x431   : > { %v3742_v38 = vadd.f32 %v3741_v50, %v7855_v2  ;;  %v8002_v33 = vpop.f32.mrf.mxu1  ;;  %v4256_v50 = vsel %vm4253_vm2, %v4255_v30, %v4251_v51  ;;  %v4296_v30 = vsel %vm8034_vm7, %v7952_v27, %v4292_v54  ;;  %vm4489_vm12 = vweird.f32 %v7991_v8 }
 0x432   : > { %8715 = vst [vmem:[#allocation4_spill] sm:$0xff] %v8002_v33  ;;  %v4335_v33 = vsub.f32 1.0, %v4334_v12  ;;  %v4485_v42 = vsub.f32 1.0, %v4484_v45  ;;  %v4299_v12 = vand.u32 2147483648, %v7929_v29  ;;  %v4621_v51 = vmul.f32 %v4256_v50, %v4024_v24  ;;  %vm8099_vm0 = vmor %vm4488_vm14, %vm4489_vm12 }
 0x433   : > { %v4630_v26 = vadd.f32 %v4618_v9, %v3742_v38  ;;  %v4297_v9 = vand.u32 2147483647, %v7929_v29  ;;  %v4492_v55 = vand.u32 2147483647, %v7958_v48  ;;  %vm4533_vm6 = vweird.f32 %v7988_v41 }
 0x434   : > { %v4486_v50 = vmul.f32 %v7991_v8, %v4485_v42  ;;  %v4451_v42 = vsel %vm4448_vm1, %v4450_v25, %v4446_v63  ;;  %v4342_v25 = vand.u32 2147483647, %v7954_v10 }
 0x435   : > { %v5468_v57 = vpop.eup %5467  ;;  %5471 = vtanh.f32 %v4630_v26  ;;  %vm4298_vm10 = vcmp.eq.f32.partialorder %v4297_v9, 8.507059e+37  ;;  %v4344_v9 = vand.u32 2147483648, %v7954_v10  ;;  %vm4493_vm3 = vcmp.eq.f32.partialorder %v4492_v55, 8.507059e+37 }
 0x436   : > { %v8026_v4 = vadd.f32 1.0, %v5468_v57  ;;  %v8030_v7 = vpop.eup %5469  ;;  %v4336_v57 = vmul.f32 %v7984_v28, %v4335_v33  ;;  %vm4343_vm2 = vcmp.eq.f32.partialorder %v4342_v25, 8.507059e+37  ;;  %v8120_v25 = vpop.permute.xlu2 %3660  ;;  %v4539_v55 = vand.u32 2147483648, %v7988_v41 }
 0x437   : > { %v4529_v27 = vmul.f32 %v8030_v7, %v7988_v41  ;;  %vm4534_vm5 = vweird.f32 %v8030_v7 }
 0x438   : > { %v3744_v45 = vpop.f32.mrf.mxu3  ;;  %v8042_v26 = vpop.f32.mrf.mxu0  ;;  %5473 = vrcp.f32 %v8026_v4  ;;  %v4337_v29 = vadd.f32 %v7984_v28, %v4336_v57  ;;  %v4106_v57 = vadd.f32 %v7995_v37, %v7871_v32  ;;  %vm8130_vm7 = vmor %vm4533_vm6, %vm4534_vm5 }
 0x439   : > { %v3745_v22 = vadd.f32 %v3744_v45, %v7867_v61  ;;  %v3823_v24 = vpop.f32.mrf.mxu1  ;;  %v4300_v45 = vor.u32 1.1754944e-38, %v4299_v12  ;;  %v4530_v21 = vsub.f32 1.0, %v4529_v27 }
 0x43a   : > { %v3824_v54 = vadd.f32 %v3823_v24, %v7817_v43  ;;  %v4487_v24 = vadd.f32 %v7991_v8, %v4486_v50  ;;  %v4341_v27 = vsel %vm8091_vm15, %v7984_v28, %v4337_v29  ;;  %v5564_v28 = vld [vmem:[%s7444_s17 + $0x18] sm:$0xff] }
 0x43b   : > { %v5472_v38 = vpop.eup %5471  ;;  %v4633_v36 = vadd.f32 %v4621_v51, %v3745_v22  ;;  %v4301_v60 = vsel %vm4298_vm10, %v4300_v45, %v4296_v30  ;;  %v4531_v63 = vmul.f32 %v8030_v7, %v4530_v21  ;;  %vm4578_vm10 = vweird.f32 %v8026_v4 }
 0x43c   : > { %v4654_v33 = vsub.f32 %v7463_v35, %v5472_v38  ;;  %v4140_v58 = vadd.f32 %v4103_v14, %v3824_v54  ;;  %v8079_v35 = vpop.permute.xlu1 %3655  ;;  %v4491_v54 = vsel %vm8099_vm0, %v7991_v8, %v4487_v24 }
 0x43d   : > { %5475 = vtanh.f32 %v4633_v36  ;;  %v4494_v36 = vand.u32 2147483648, %v7958_v48 }
 0x43e   : > { %v4666_v1 = vmul.f32 %v4654_v33, %v4451_v42  ;;  %v8070_v52 = vpop.eup %5473  ;;  %v5248_v51 = vmul.f32 -1.442695, %v4140_v58  ;;  %v4624_v58 = vmul.f32 %v4301_v60, %v4027_v44  ;;  %v4345_v44 = vor.u32 1.1754944e-38, %v4344_v9  ;;  %v4029_v42 = vpop.f32.mrf.mxu2 }
 0x43f   : > { %v4574_v37 = vmul.f32 %v8070_v52, %v8026_v4  ;;  %v4495_v33 = vor.u32 1.1754944e-38, %v4494_v36  ;;  %v4532_v36 = vadd.f32 %v8030_v7, %v4531_v63  ;;  %vm4579_vm9 = vweird.f32 %v8070_v52 }
 0x440   : > { %v4678_v12 = vadd.f32 %v5472_v38, %v4666_v1  ;;  %v3747_v30 = vpop.f32.mrf.mxu3  ;;  %v8087_v14 = vpop.f32.mrf.mxu0  ;;  %5477 = vpow2.f32 %v5248_v51  ;;  %vm8156_vm1 = vmor %vm4578_vm10, %vm4579_vm9 }
 0x441   : > { %v3748_v48 = vadd.f32 %v3747_v30, %v8079_v35  ;;  %v3826_v50 = vpop.f32.mrf.mxu1  ;;  %v4496_v1 = vsel %vm4493_vm3, %v4495_v33, %v4491_v54  ;;  %v8117_v30 = vpop.permute.xlu0 %3940  ;;  %v4575_v8 = vsub.f32 1.0, %v4574_v37 }
 0x442   : > { %4690 = vst [vmem:[%s8077_s21] sm:$0xff] %v4678_v12  ;;  %v3827_v38 = vadd.f32 %v3826_v50, %v7823_v0  ;;  %v4346_v12 = vsel %vm4343_vm2, %v4345_v44, %v4341_v27  ;;  %v4030_v9 = vadd.f32 %v4029_v42, %v8117_v30  ;;  %v5565_v42 = vld [vmem:[%s7444_s17 + $0x30] sm:$0xff] }
 0x443   : > { %v5476_v45 = vpop.eup %5475  ;;  %v4636_v60 = vadd.f32 %v4624_v58, %v3748_v48  ;;  %v4576_v54 = vmul.f32 %v8070_v52, %v4575_v8 }
 0x444   : > { %v4657_v29 = vsub.f32 %v5564_v28, %v5476_v45  ;;  %v4143_v21 = vadd.f32 %v4106_v57, %v3827_v38  ;;  %v4537_v57 = vand.u32 2147483647, %v7988_v41  ;;  %v4627_v27 = vmul.f32 %v4346_v12, %v4030_v9 }
 0x445   : > { %5479 = vtanh.f32 %v4636_v60  ;;  %v4109_v41 = vadd.f32 %v8042_v26, %v7886_v40  ;;  %v4536_v38 = vsel %vm8130_vm7, %v8030_v7, %v4532_v36  ;;  %v4540_v60 = vor.u32 1.1754944e-38, %v4539_v55 }
 0x446   : > { %v4669_v24 = vmul.f32 %v4657_v29, %v4496_v1  ;;  %v5251_v22 = vmul.f32 -1.442695, %v4143_v21  ;;  %v5478_v37 = vpop.eup %5477  ;;  %vm4538_vm8 = vcmp.eq.f32.partialorder %v4537_v57, 8.507059e+37  ;;  %v4577_v26 = vadd.f32 %v8070_v52, %v4576_v54  ;;  %v5566_v54 = vld [vmem:[%s7444_s17 + $0x48] sm:$0xff] }
 0x447   : > { %v8144_v21 = vadd.f32 1.0, %v5478_v37  ;;  %v4541_v1 = vsel %vm4538_vm8, %v4540_v60, %v4536_v38  ;;  %v4582_v9 = vand.u32 2147483647, %v8026_v4  ;;  %v3771_v57 = vadd.f32 %v7874_v59, %v7817_v43 }
 0x448   : > { %v4681_v51 = vadd.f32 %v5476_v45, %v4669_v24  ;;  %5481 = vpow2.f32 %v5251_v22  ;;  %v3750_v10 = vpop.f32.mrf.mxu3  ;;  %v8126_v48 = vpop.f32.mrf.mxu0  ;;  %v4584_v24 = vand.u32 2147483648, %v8026_v4  ;;  %v4112_v4 = vadd.f32 %v8087_v14, %v7899_v23 }
 0x449   : > { %v3751_v50 = vadd.f32 %v3750_v10, %v8120_v25  ;;  %v3829_v63 = vpop.f32.mrf.mxu1  ;;  %vm4583_vm11 = vcmp.eq.f32.partialorder %v4582_v9, 8.507059e+37  ;;  %v3774_v9 = vadd.f32 %v7889_v46, %v7823_v0  ;;  %v3777_v0 = vadd.f32 %v7904_v39, %v7827_v11 }
 0x44a   : > { %4693 = vst [vmem:[%s8077_s21 + $0x18] sm:$0xff] %v4681_v51  ;;  %v3830_v45 = vadd.f32 %v3829_v63, %v7827_v11  ;;  %v4585_v59 = vor.u32 1.1754944e-38, %v4584_v24  ;;  %v8213_v11 = vadd.f32 %v7922_v62, %v7837_v56  ;;  %v8217_v39 = vadd.f32 %v7927_v49, %v7855_v2 }
 0x44b   : > { %v5480_v33 = vpop.eup %5479  ;;  %v4639_v44 = vadd.f32 %v4627_v27, %v3751_v50  ;;  %v4581_v27 = vsel %vm8156_vm1, %v8070_v52, %v4577_v26  ;;  %vm4233_vm13 = vweird.f32 %v8144_v21 }
 0x44c   : > { %v4660_v28 = vsub.f32 %v5565_v42, %v5480_v33  ;;  %v4146_v29 = vadd.f32 %v4109_v41, %v3830_v45  ;;  %v4586_v38 = vsel %vm4583_vm11, %v4585_v59, %v4581_v27 }
 0x44d   : > { %5483 = vtanh.f32 %v4639_v44 }
 0x44e   : > { %v5482_v12 = vpop.eup %5481  ;;  %v4672_v8 = vmul.f32 %v4660_v28, %v4541_v1  ;;  %v5254_v7 = vmul.f32 -1.442695, %v4146_v29 }
 0x44f   : > { %v8150_v22 = vadd.f32 1.0, %v5482_v12 }
 0x450   : > { %v4684_v36 = vadd.f32 %v5480_v33, %v4672_v8  ;;  %5485 = vpow2.f32 %v5254_v7  ;;  %v4049_v55 = vpop.f32.mrf.mxu3  ;;  %v4117_v51 = vpop.f32.mrf.mxu0  ;;  %v4115_v8 = vadd.f32 %v8126_v48, %v7901_v18 }
 0x451   : > { %5487 = vrcp.f32 %v8144_v21  ;;  %v3832_v58 = vpop.f32.mrf.mxu1  ;;  %v4050_v50 = vadd.f32 %v4049_v55, %v7860_v5  ;;  %v4118_v59 = vadd.f32 %v4117_v51, %v7918_v17  ;;  %vm4278_vm0 = vweird.f32 %v8150_v22 }
 0x452   : > { %4696 = vst [vmem:[%s8077_s21 + $0x30] sm:$0xff] %v4684_v36  ;;  %v3833_v63 = vadd.f32 %v3832_v58, %v7837_v56  ;;  %5489 = vrcp.f32 %v8150_v22  ;;  %v8232_v56 = vadd.f32 %v7975_v34, %v8079_v35 }
 0x453   : > { %v5484_v43 = vpop.eup %5483  ;;  %v4139_v37 = vadd.f32 %v4050_v50, %v3771_v57  ;;  %v8192_v50 = vadd.f32 %v7876_v15, %v7839_v47 }
 0x454   : > { %v4663_v41 = vsub.f32 %v5566_v54, %v5484_v43  ;;  %v4149_v5 = vadd.f32 %v4112_v4, %v3833_v63 }
 0x455   : > { %v5247_v44 = vmul.f32 -1.442695, %v4139_v37 }
 0x456   : > { %v5486_v45 = vpop.eup %5485  ;;  %v4675_v33 = vmul.f32 %v4663_v41, %v4586_v38  ;;  %v5257_v14 = vmul.f32 -1.442695, %v4149_v5 }
 0x457   : > { %v8170_v60 = vpop.eup %5487  ;;  %v8174_v29 = vadd.f32 1.0, %v5486_v45 }
 0x458   : > { %v4687_v52 = vadd.f32 %v5484_v43, %v4675_v33  ;;  %5491 = vpow2.f32 %v5257_v14  ;;  %v4052_v42 = vpop.f32.mrf.mxu3  ;;  %v8172_v28 = vpop.f32.mrf.mxu0  ;;  %v4229_v7 = vmul.f32 %v8170_v60, %v8144_v21  ;;  %vm4234_vm12 = vweird.f32 %v8170_v60 }
 0x459   : > { %v3835_v1 = vpop.f32.mrf.mxu1  ;;  %v8176_v12 = vpop.eup %5489  ;;  %5493 = vpow2.f32 %v5247_v44  ;;  %v4053_v24 = vadd.f32 %v4052_v42, %v7871_v32  ;;  %v8196_v32 = vadd.f32 %v7891_v3, %v7849_v13  ;;  %v8209_v3 = vadd.f32 %v7909_v6, %v7847_v53  ;;  %vm8250_vm14 = vmor %vm4233_vm13, %vm4234_vm12 }
 0x45a   : > { %4699 = vst [vmem:[%s8077_s21 + $0x48] sm:$0xff] %v4687_v52  ;;  %v3836_v26 = vadd.f32 %v3835_v1, %v7835_v19  ;;  %5495 = vrcp.f32 %v8174_v29  ;;  %v4274_v55 = vmul.f32 %v8176_v12, %v8150_v22  ;;  %v4230_v48 = vsub.f32 1.0, %v4229_v7 }
 0x45b   : > { %v4142_v58 = vadd.f32 %v4053_v24, %v3774_v9  ;;  %v8228_v6 = vadd.f32 %v7947_v16, %v7867_v61  ;;  %v4239_v16 = vand.u32 2147483648, %v8144_v21  ;;  %v4282_v44 = vand.u32 2147483647, %v8150_v22 }
 0x45c   : > { %v4380_v36 = vadd.f32 %v4115_v8, %v3836_v26  ;;  %v4275_v43 = vsub.f32 1.0, %v4274_v55  ;;  %v4231_v54 = vmul.f32 %v8170_v60, %v4230_v48  ;;  %v4284_v52 = vand.u32 2147483648, %v8150_v22 }
 0x45d   : > { %v5250_v51 = vmul.f32 -1.442695, %v4142_v58  ;;  %vm4279_vm15 = vweird.f32 %v8176_v12  ;;  %v4121_v26 = vadd.f32 %v8172_v28, %v7940_v20  ;;  %v4240_v55 = vor.u32 1.1754944e-38, %v4239_v16 }
 0x45e   : > { %v5492_v57 = vpop.eup %5491  ;;  %v5260_v10 = vmul.f32 -1.442695, %v4380_v36  ;;  %v4276_v62 = vmul.f32 %v8176_v12, %v4275_v43  ;;  %vm8267_vm3 = vmor %vm4278_vm0, %vm4279_vm15  ;;  %vm8271_vm5 = vcmp.eq.f32.partialorder %v4282_v44, 8.507059e+37  ;;  %vm4323_vm6 = vweird.f32 %v8174_v29 }
 0x45f   : > { %v5494_v27 = vpop.eup %5493  ;;  %v8200_v46 = vadd.f32 1.0, %v5492_v57  ;;  %v4329_v57 = vand.u32 2147483648, %v8174_v29 }
 0x460   : > { %v4055_v4 = vpop.f32.mrf.mxu3  ;;  %5497 = vpow2.f32 %v5260_v10  ;;  %v4123_v15 = vpop.f32.mrf.mxu0  ;;  %v8223_v5 = vadd.f32 1.0, %v5494_v27  ;;  %v4285_v27 = vor.u32 1.1754944e-38, %v4284_v52 }
 0x461   : > { %v3838_v63 = vpop.f32.mrf.mxu1  ;;  %v8205_v41 = vpop.eup %5495  ;;  %v4056_v45 = vadd.f32 %v4055_v4, %v7886_v40  ;;  %5499 = vrcp.f32 %v8200_v46  ;;  %vm4368_vm9 = vweird.f32 %v8200_v46 }
 0x462   : > { %v3839_v37 = vadd.f32 %v3838_v63, %v7839_v47  ;;  %v8221_v47 = vadd.f32 %v7942_v31, %v7835_v19  ;;  %v4232_v19 = vadd.f32 %v8170_v60, %v4231_v54  ;;  %v4319_v40 = vmul.f32 %v8205_v41, %v8174_v29 }
 0x463   : > { %5501 = vpow2.f32 %v5250_v51  ;;  %v4237_v31 = vand.u32 2147483647, %v8144_v21  ;;  %v4145_v33 = vadd.f32 %v4056_v45, %v3777_v0  ;;  %v4277_v21 = vadd.f32 %v8176_v12, %v4276_v62 }
 0x464   : > { %v4383_v38 = vadd.f32 %v4118_v59, %v3839_v37  ;;  %5503 = vrcp.f32 %v8223_v5  ;;  %v4236_v24 = vsel %vm8250_vm14, %v8170_v60, %v4232_v19  ;;  %v4320_v36 = vsub.f32 1.0, %v4319_v40 }
 0x465   : > { %v5253_v10 = vmul.f32 -1.442695, %v4145_v33  ;;  %vm4238_vm2 = vcmp.eq.f32.partialorder %v4237_v31, 8.507059e+37  ;;  %v4281_v22 = vsel %vm8267_vm3, %v8176_v12, %v4277_v21  ;;  %v4327_v0 = vand.u32 2147483647, %v8174_v29 }
 0x466   : > { %v5263_v49 = vmul.f32 -1.442695, %v4383_v38  ;;  %v5498_v34 = vpop.eup %5497  ;;  %v8275_v4 = vsel %vm4238_vm2, %v4240_v55, %v4236_v24  ;;  %v4321_v37 = vmul.f32 %v8205_v41, %v4320_v36  ;;  %v8738_v38 = vld [vmem:[#allocation2_spill] sm:$0xff]  ;;  %vm4324_vm7 = vweird.f32 %v8205_v41 }
 0x467   : > { %v8246_v42 = vadd.f32 1.0, %v5498_v34  ;;  %v8262_v9 = vpop.eup %5499  ;;  %v4124_v45 = vadd.f32 %v4123_v15, %v8738_v38  ;;  %v8290_v12 = vor.u32 1.1754944e-38, %v4329_v57  ;;  %v4374_v19 = vand.u32 2147483648, %v8200_v46  ;;  %vm8327_vm10 = vmor %vm4323_vm6, %vm4324_vm7 }
 0x468   : > { %v4058_v14 = vpop.f32.mrf.mxu3  ;;  %5505 = vpow2.f32 %v5263_v49  ;;  %v4126_v58 = vpop.f32.mrf.mxu0  ;;  %v4364_v54 = vmul.f32 %v8262_v9, %v8200_v46  ;;  %v4224_v34 = vand.u32 2147483648, %v8223_v5  ;;  %v4322_v44 = vadd.f32 %v8205_v41, %v4321_v37 }
 0x469   : > { %v3841_v1 = vpop.f32.mrf.mxu1  ;;  %5507 = vrcp.f32 %v8246_v42  ;;  %v5502_v28 = vpop.eup %5501  ;;  %v4059_v59 = vadd.f32 %v4058_v14, %v7899_v23  ;;  %v8296_v23 = vsel %vm8271_vm5, %v4285_v27, %v4281_v22  ;;  %vm8309_vm8 = vcmp.eq.f32.partialorder %v4327_v0, 8.507059e+37 }
 0x46a   : > { %v3842_v7 = vadd.f32 %v3841_v1, %v7849_v13  ;;  %v8281_v63 = vpop.eup %5503  ;;  %5509 = vpow2.f32 %v5253_v10  ;;  %v8305_v33 = vadd.f32 1.0, %v5502_v28  ;;  %v4365_v1 = vsub.f32 1.0, %v4364_v54  ;;  %v8743_v10 = vld [vmem:[#allocation3_spill] sm:$0xff] }
 0x46b   : > { %v4214_v16 = vmul.f32 %v8281_v63, %v8223_v5  ;;  %v4148_v14 = vadd.f32 %v4059_v59, %v8213_v11  ;;  %v4372_v11 = vand.u32 2147483647, %v8200_v46  ;;  %v4326_v60 = vsel %vm8327_vm10, %v8205_v41, %v4322_v44 }
 0x46c   : > { %v4386_v48 = vadd.f32 %v4121_v26, %v3842_v7  ;;  %v8320_v26 = vor.u32 1.1754944e-38, %v4374_v19  ;;  %v4222_v7 = vand.u32 2147483647, %v8223_v5  ;;  %v4366_v28 = vmul.f32 %v8262_v9, %v4365_v1 }
 0x46d   : > { %vm4219_vm1 = vweird.f32 %v8281_v63  ;;  %v5256_v27 = vmul.f32 -1.442695, %v4148_v14  ;;  %vm4369_vm11 = vweird.f32 %v8262_v9  ;;  %vm8345_vm12 = vcmp.eq.f32.partialorder %v4372_v11, 8.507059e+37 }
 0x46e   : > { %v5266_v43 = vmul.f32 -1.442695, %v4386_v48  ;;  %v5506_v51 = vpop.eup %5505  ;;  %v4127_v48 = vadd.f32 %v4126_v58, %v8743_v10  ;;  %v4477_v58 = vand.u32 2147483647, %v8246_v42  ;;  %vm4218_vm13 = vweird.f32 %v8223_v5  ;;  %vm8381_vm0 = vmor %vm4368_vm9, %vm4369_vm11 }
 0x46f   : > { %v8292_v62 = vadd.f32 1.0, %v5506_v51  ;;  %v8299_v40 = vpop.eup %5507  ;;  %v8365_v44 = vsel %vm8309_vm8, %v8290_v12, %v4326_v60  ;;  %vm4473_vm14 = vweird.f32 %v8246_v42  ;;  %vm8386_vm2 = vcmp.eq.f32.partialorder %v4222_v7, 8.507059e+37  ;;  %vm8418_vm5 = vmor %vm4218_vm13, %vm4219_vm1 }
 0x470   : > { %v4061_v49 = vpop.f32.mrf.mxu3  ;;  %5511 = vpow2.f32 %v5266_v43  ;;  %v4469_v8 = vmul.f32 %v8299_v40, %v8246_v42  ;;  %v5510_v57 = vpop.eup %5509  ;;  %v4479_v43 = vand.u32 2147483648, %v8246_v42  ;;  %vm8373_vm15 = vcmp.eq.f32.partialorder %v4477_v58, 8.507059e+37 }
 0x471   : > { %v3844_v15 = vpop.f32.mrf.mxu1  ;;  %v4062_v31 = vadd.f32 %v4061_v49, %v7901_v18  ;;  %5513 = vrcp.f32 %v8292_v62  ;;  %v4129_v13 = vpop.f32.mrf.mxu0  ;;  %v8352_v51 = vadd.f32 1.0, %v5510_v57  ;;  %vm4474_vm3 = vweird.f32 %v8299_v40 }
 0x472   : > { %v3845_v18 = vadd.f32 %v3844_v15, %v7847_v53  ;;  %v4215_v53 = vsub.f32 1.0, %v4214_v16  ;;  %5515 = vrcp.f32 %v8305_v33  ;;  %v4470_v22 = vsub.f32 1.0, %v4469_v8  ;;  %vm8430_vm7 = vmor %vm4473_vm14, %vm4474_vm3 }
 0x473   : > { %v4379_v21 = vadd.f32 %v4062_v31, %v8221_v47  ;;  %v8331_v47 = vor.u32 1.1754944e-38, %v4224_v34  ;;  %v4620_v15 = vmul.f32 %v8275_v4, %v4127_v48  ;;  %v4367_v16 = vadd.f32 %v8262_v9, %v4366_v28 }
 0x474   : > { %v4389_v24 = vadd.f32 %v4124_v45, %v3845_v18  ;;  %v4216_v19 = vmul.f32 %v8281_v63, %v4215_v53  ;;  %v4471_v34 = vmul.f32 %v8299_v40, %v4470_v22  ;;  %v4524_v60 = vand.u32 2147483648, %v8292_v62 }
 0x475   : > { %v5259_v36 = vmul.f32 -1.442695, %v4379_v21  ;;  %v4371_v55 = vsel %vm8381_vm0, %v8262_v9, %v4367_v16  ;;  %vm4518_vm6 = vweird.f32 %v8292_v62  ;;  %v4522_v5 = vand.u32 2147483647, %v8292_v62 }
 0x476   : > { %v5512_v29 = vpop.eup %5511  ;;  %v5269_v0 = vmul.f32 -1.442695, %v4389_v24  ;;  %v4217_v52 = vadd.f32 %v8281_v63, %v4216_v19  ;;  %v8752_v24 = vld [vmem:[#allocation5_spill] sm:$0xff]  ;;  %v4472_v53 = vadd.f32 %v8299_v40, %v4471_v34  ;;  %v8757_v34 = vld [vmem:[#allocation6_spill] sm:$0xff]  ;;  %vm4263_vm10 = vweird.f32 %v8305_v33 }
 0x477   : > { %5517 = vpow2.f32 %v5259_v36  ;;  %v8341_v59 = vadd.f32 1.0, %v5512_v29  ;;  %v8350_v54 = vpop.eup %5513  ;;  %v4130_v36 = vadd.f32 %v4129_v13, %v8752_v24  ;;  %vm8457_vm9 = vcmp.eq.f32.partialorder %v4522_v5, 8.507059e+37 }
 0x478   : > { %v4064_v37 = vpop.f32.mrf.mxu3  ;;  %5519 = vpow2.f32 %v5269_v0  ;;  %v4514_v4 = vmul.f32 %v8350_v54, %v8292_v62  ;;  %v4221_v41 = vsel %vm8418_vm5, %v8281_v63, %v4217_v52  ;;  %v4269_v18 = vand.u32 2147483648, %v8305_v33 }
 0x479   : > { %v3847_v45 = vpop.f32.mrf.mxu1  ;;  %v4065_v49 = vadd.f32 %v4064_v37, %v7918_v17  ;;  %5521 = vrcp.f32 %v8341_v59  ;;  %v8367_v17 = vpop.eup %5515  ;;  %v4267_v37 = vand.u32 2147483647, %v8305_v33  ;;  %vm4519_vm1 = vweird.f32 %v8350_v54 }
 0x47a   : > { %v3848_v31 = vadd.f32 %v3847_v45, %v7855_v2  ;;  %5523 = vpow2.f32 %v5256_v27  ;;  %v4480_v2 = vor.u32 1.1754944e-38, %v4479_v43  ;;  %v4259_v7 = vmul.f32 %v8367_v17, %v8305_v33  ;;  %v4132_v28 = vpop.f32.mrf.mxu0 }
 0x47b   : > { %v4382_v14 = vadd.f32 %v4065_v49, %v8192_v50  ;;  %5525 = vrcp.f32 %v8352_v51  ;;  %v4515_v48 = vsub.f32 1.0, %v4514_v4  ;;  %v8412_v43 = vsel %vm8345_vm12, %v8320_v26, %v4371_v55  ;;  %vm8491_vm12 = vmor %vm4518_vm6, %vm4519_vm1 }
 0x47c   : > { %v4632_v1 = vadd.f32 %v4620_v15, %v3848_v31  ;;  %v4260_v19 = vsub.f32 1.0, %v4259_v7  ;;  %v4525_v4 = vor.u32 1.1754944e-38, %v4524_v60  ;;  %vm4264_vm8 = vweird.f32 %v8367_v17 }
 0x47d   : > { %v5518_v8 = vpop.eup %5517  ;;  %v5262_v50 = vmul.f32 -1.442695, %v4382_v14  ;;  %v4516_v31 = vmul.f32 %v8350_v54, %v4515_v48  ;;  %v4133_v14 = vadd.f32 %v4132_v28, %v8757_v34  ;;  %v8464_v55 = vsel %vm8386_vm2, %v8331_v47, %v4221_v41 }
 0x47e   : > { %v8390_v11 = vadd.f32 1.0, %v5518_v8  ;;  %5527 = vtanh.f32 %v4632_v1  ;;  %v5520_v46 = vpop.eup %5519  ;;  %v5567_v8 = vld [vmem:[%s7444_s17 + $0x10] sm:$0xff]  ;;  %vm4563_vm11 = vweird.f32 %v8341_v59  ;;  %vm8535_vm0 = vcmp.eq.f32.partialorder %v4267_v37, 8.507059e+37 }
 0x47f   : > { %5529 = vpow2.f32 %v5262_v50  ;;  %v8400_v57 = vpop.eup %5521  ;;  %v8403_v13 = vadd.f32 1.0, %v5520_v46  ;;  %v4626_v7 = vmul.f32 %v8365_v44, %v4133_v14  ;;  %v4517_v48 = vadd.f32 %v8350_v54, %v4516_v31  ;;  %v5568_v31 = vld [vmem:[%s7444_s17 + $0x28] sm:$0xff] }
 0x480   : > { %5531 = vrcp.f32 %v8390_v11  ;;  %v4067_v9 = vpop.f32.mrf.mxu3  ;;  %v5524_v29 = vpop.eup %5523  ;;  %v4559_v22 = vmul.f32 %v8400_v57, %v8341_v59  ;;  %vm4564_vm13 = vweird.f32 %v8400_v57  ;;  %vm4458_vm2 = vweird.f32 %v8390_v11 }
 0x481   : > { %v3850_v27 = vpop.f32.mrf.mxu1  ;;  %v4068_v0 = vadd.f32 %v4067_v9, %v7940_v20  ;;  %5533 = vrcp.f32 %v8403_v13  ;;  %v4623_v20 = vmul.f32 %v8296_v23, %v4130_v36  ;;  %v8438_v45 = vpop.eup %5525  ;;  %v4476_v23 = vsel %vm8430_vm7, %v8299_v40, %v4472_v53  ;;  %vm8545_vm3 = vmor %vm4563_vm11, %vm4564_vm13 }
 0x482   : > { %v3851_v49 = vadd.f32 %v3850_v27, %v7867_v61  ;;  %v8446_v16 = vadd.f32 1.0, %v5524_v29  ;;  %v4560_v1 = vsub.f32 1.0, %v4559_v22  ;;  %v4261_v53 = vmul.f32 %v8367_v17, %v4260_v19  ;;  %v4135_v44 = vpop.f32.mrf.mxu0 }
 0x483   : > { %v4385_v42 = vadd.f32 %v4068_v0, %v8196_v32  ;;  %v4481_v32 = vsel %vm8373_vm15, %v4480_v2, %v4476_v23  ;;  %v4569_v0 = vand.u32 2147483648, %v8341_v59  ;;  %vm8521_vm15 = vmor %vm4263_vm10, %vm4264_vm8  ;;  %vm4608_vm7 = vweird.f32 %v8403_v13 }
 0x484   : > { %v5528_v15 = vpop.eup %5527  ;;  %v4635_v40 = vadd.f32 %v4623_v20, %v3851_v49  ;;  %v4561_v21 = vmul.f32 %v8400_v57, %v4560_v1  ;;  %v4567_v20 = vand.u32 2147483647, %v8341_v59  ;;  %v8503_v41 = vadd.f32 %v8367_v17, %v4261_v53 }
 0x485   : > { %v5530_v63 = vpop.eup %5529  ;;  %v4656_v50 = vsub.f32 %v5567_v8, %v5528_v15  ;;  %v5265_v12 = vmul.f32 -1.442695, %v4385_v42  ;;  %v4136_v49 = vadd.f32 %v4135_v44, %v8117_v30  ;;  %v4570_v8 = vor.u32 1.1754944e-38, %v4569_v0 }
 0x486   : > { %v8451_v61 = vpop.eup %5531  ;;  %v8455_v52 = vadd.f32 1.0, %v5530_v63  ;;  %5535 = vtanh.f32 %v4635_v40  ;;  %v4562_v42 = vadd.f32 %v8400_v57, %v4561_v21  ;;  %vm8513_vm14 = vcmp.eq.f32.partialorder %v4567_v20, 8.507059e+37 }
 0x487   : > { %v4668_v46 = vmul.f32 %v4656_v50, %v4481_v32  ;;  %v8469_v2 = vpop.eup %5533  ;;  %5537 = vrcp.f32 %v8446_v16  ;;  %v4454_v60 = vmul.f32 %v8451_v61, %v8390_v11  ;;  %v4270_v40 = vor.u32 1.1754944e-38, %v4269_v18 }
 0x488   : > { %v4070_v47 = vpop.f32.mrf.mxu3  ;;  %5539 = vpow2.f32 %v5265_v12  ;;  %v4604_v29 = vmul.f32 %v8469_v2, %v8403_v13  ;;  %v4266_v36 = vsel %vm8521_vm15, %v8367_v17, %v8503_v41  ;;  %v4629_v18 = vmul.f32 %v8412_v43, %v4136_v49 }
 0x489   : > { %v4680_v28 = vadd.f32 %v5528_v15, %v4668_v46  ;;  %v3853_v9 = vpop.f32.mrf.mxu1  ;;  %5541 = vrcp.f32 %v8455_v52  ;;  %v4071_v27 = vadd.f32 %v4070_v47, %v8738_v38  ;;  %v4521_v38 = vsel %vm8491_vm12, %v8350_v54, %v4517_v48 }
 0x48a   : > { %v3854_v22 = vadd.f32 %v3853_v9, %v8079_v35  ;;  %v4304_v35 = vmul.f32 %v8438_v45, %v8352_v51  ;;  %v4455_v23 = vsub.f32 1.0, %v4454_v60  ;;  %v4605_v15 = vsub.f32 1.0, %v4604_v29 }
 0x48b   : > { %4692 = vst.msk [vmem:[%s8077_s21 + $0x10] sm:$0xff] %vm2751_vm4, %v4680_v28  ;;  %v4388_v5 = vadd.f32 %v4071_v27, %v8209_v3  ;;  %v4526_v3 = vsel %vm8457_vm9, %v4525_v4, %v4521_v38  ;;  %v4566_v43 = vsel %vm8545_vm3, %v8400_v57, %v4562_v42  ;;  %v4614_v9 = vand.u32 2147483648, %v8403_v13 }
 0x48c   : > { %v4638_v26 = vadd.f32 %v4626_v7, %v3854_v22  ;;  %v5536_v62 = vpop.eup %5535  ;;  %v4305_v37 = vsub.f32 1.0, %v4304_v35  ;;  %v4606_v48 = vmul.f32 %v8469_v2, %v4605_v15  ;;  %v4456_v47 = vmul.f32 %v8451_v61, %v4455_v23  ;;  %v5569_v22 = vld [vmem:[%s7444_s17 + $0x40] sm:$0xff] }
 0x48d   : > { %v8508_v19 = vpop.eup %5537  ;;  %v4659_v14 = vsub.f32 %v5568_v31, %v5536_v62  ;;  %v5268_v54 = vmul.f32 -1.442695, %v4388_v5  ;;  %vm4459_vm5 = vweird.f32 %v8451_v61  ;;  %v4464_v29 = vand.u32 2147483648, %v8390_v11 }
 0x48e   : > { %5543 = vtanh.f32 %v4638_v26  ;;  %v5540_v63 = vpop.eup %5539  ;;  %v4612_v57 = vand.u32 2147483647, %v8403_v13  ;;  %v4571_v44 = vsel %vm8513_vm14, %v4570_v8, %v4566_v43  ;;  %v4607_v20 = vadd.f32 %v8469_v2, %v4606_v48  ;;  %vm8581_vm8 = vmor %vm4458_vm2, %vm4459_vm5  ;;  %v5571_v48 = vld [vmem:[%s7444_s17 + $0x8] sm:$0xff] }
 0x48f   : > { %v8525_v12 = vpop.eup %5541  ;;  %v4671_v32 = vmul.f32 %v4659_v14, %v4526_v3  ;;  %v8527_v46 = vadd.f32 1.0, %v5540_v63  ;;  %5545 = vpow2.f32 %v5268_v54  ;;  %vm4609_vm6 = vweird.f32 %v8469_v2 }
 0x490   : > { %v4073_v4 = vpop.f32.mrf.mxu3  ;;  %v4499_v59 = vmul.f32 %v8525_v12, %v8455_v52  ;;  %v4457_v35 = vadd.f32 %v8451_v61, %v4456_v47  ;;  %v4306_v38 = vmul.f32 %v8438_v45, %v4305_v37  ;;  %v4615_v23 = vor.u32 1.1754944e-38, %v4614_v9  ;;  %vm8589_vm9 = vmor %vm4608_vm7, %vm4609_vm6  ;;  %v5574_v37 = vld [vmem:[%s7444_s17 + $0x50] sm:$0xff] }
 0x491   : > { %v3856_v17 = vpop.f32.mrf.mxu1  ;;  %v4074_v33 = vadd.f32 %v4073_v4, %v8743_v10  ;;  %v4683_v21 = vadd.f32 %v5536_v62, %v4671_v32  ;;  %5547 = vrcp.f32 %v8527_v46  ;;  %v4465_v62 = vor.u32 1.1754944e-38, %v4464_v29 }
 0x492   : > { %v3857_v60 = vadd.f32 %v3856_v17, %v8120_v25  ;;  %v4500_v26 = vsub.f32 1.0, %v4499_v59  ;;  %vm8593_vm10 = vcmp.eq.f32.partialorder %v4612_v57, 8.507059e+37  ;;  %v4462_v14 = vand.u32 2147483647, %v8390_v11 }
 0x493   : > { %v4619_v10 = vmul.f32 %v8464_v55, %v4074_v33  ;;  %4695 = vst.msk [vmem:[%s8077_s21 + $0x28] sm:$0xff] %vm2751_vm4, %v4683_v21  ;;  %v4271_v54 = vsel %vm8535_vm0, %v4270_v40, %v4266_v36  ;;  %v4611_v63 = vsel %vm8589_vm9, %v8469_v2, %v4607_v20  ;;  %v4461_v3 = vsel %vm8581_vm8, %v8451_v61, %v4457_v35 }
 0x494   : > { %v5544_v28 = vpop.eup %5543  ;;  %v4641_v0 = vadd.f32 %v4629_v18, %v3857_v60  ;;  %v4349_v8 = vmul.f32 %v8508_v19, %v8446_v16  ;;  %v4501_v50 = vmul.f32 %v8525_v12, %v4500_v26  ;;  %v4307_v11 = vadd.f32 %v8438_v45, %v4306_v38  ;;  %v5570_v18 = vld [vmem:[%s7444_s17 + $0x58] sm:$0xff] }
 0x495   : > { %v4662_v27 = vsub.f32 %v5569_v22, %v5544_v28  ;;  %v4631_v58 = vadd.f32 %v4619_v10, %v8217_v39  ;;  %v5546_v55 = vpop.eup %5545  ;;  %vm4309_vm1 = vweird.f32 %v8438_v45  ;;  %vm4504_vm11 = vweird.f32 %v8525_v12 }
 0x496   : > { %v8574_v41 = vadd.f32 1.0, %v5546_v55  ;;  %5549 = vtanh.f32 %v4641_v0  ;;  %v4350_v40 = vsub.f32 1.0, %v4349_v8  ;;  %vm4463_vm12 = vcmp.eq.f32.partialorder %v4462_v14, 8.507059e+37 }
 0x497   : > { %v4674_v5 = vmul.f32 %v4662_v27, %v4571_v44  ;;  %5551 = vtanh.f32 %v4631_v58  ;;  %v8585_v42 = vpop.eup %5547  ;;  %vm4308_vm13 = vweird.f32 %v8352_v51  ;;  %v4312_v4 = vand.u32 2147483647, %v8352_v51 }
 0x498   : > { %v4076_v49 = vpop.f32.mrf.mxu3  ;;  %5553 = vrcp.f32 %v8574_v41  ;;  %v4544_v2 = vmul.f32 %v8585_v42, %v8527_v46  ;;  %v4616_v53 = vsel %vm8593_vm10, %v4615_v23, %v4611_v63  ;;  %v4466_v17 = vsel %vm4463_vm12, %v4465_v62, %v4461_v3  ;;  %vm8627_vm14 = vmor %vm4308_vm13, %vm4309_vm1 }
 0x499   : > { %v4686_v15 = vadd.f32 %v5544_v28, %v4674_v5  ;;  %v4077_v1 = vadd.f32 %v4076_v49, %v8752_v24  ;;  %v4314_v24 = vand.u32 2147483648, %v8352_v51  ;;  %v4502_v21 = vadd.f32 %v8525_v12, %v4501_v50  ;;  %v5572_v49 = vld [vmem:[%s7444_s17 + $0x20] sm:$0xff] }
 0x49a   : > { %v4311_v51 = vsel %vm8627_vm14, %v8438_v45, %v4307_v11  ;;  %v4351_v43 = vmul.f32 %v8508_v19, %v4350_v40  ;;  %v4545_v59 = vsub.f32 1.0, %v4544_v2  ;;  %v4509_v9 = vand.u32 2147483648, %v8455_v52 }
 0x49b   : > { %4698 = vst.msk [vmem:[%s8077_s21 + $0x40] sm:$0xff] %vm2751_vm4, %v4686_v15  ;;  %v4622_v61 = vmul.f32 %v4271_v54, %v4077_v1  ;;  %v4315_v10 = vor.u32 1.1754944e-38, %v4314_v24  ;;  %vm4313_vm15 = vcmp.eq.f32.partialorder %v4312_v4, 8.507059e+37  ;;  %vm4503_vm0 = vweird.f32 %v8455_v52  ;;  %v8782_v1 = vld [vmem:[#allocation4_spill] sm:$0xff] }
 0x49c   : > { %v5550_v32 = vpop.eup %5549  ;;  %v4507_v44 = vand.u32 2147483647, %v8455_v52  ;;  %vm8645_vm2 = vmor %vm4503_vm0, %vm4504_vm11  ;;  %v4352_v55 = vadd.f32 %v8508_v19, %v4351_v43  ;;  %vm4354_vm3 = vweird.f32 %v8508_v19  ;;  %v4359_v35 = vand.u32 2147483648, %v8446_v16 }
 0x49d   : > { %v5552_v36 = vpop.eup %5551  ;;  %v4665_v7 = vsub.f32 %v5570_v18, %v5550_v32  ;;  %v4634_v33 = vadd.f32 %v4622_v61, %v8228_v6  ;;  %v4316_v22 = vsel %vm4313_vm15, %v4315_v10, %v4311_v51  ;;  %v4506_v52 = vsel %vm8645_vm2, %v8525_v12, %v4502_v21 }
 0x49e   : > { %v4655_v47 = vsub.f32 %v5571_v48, %v5552_v36  ;;  %v8637_v28 = vpop.eup %5553  ;;  %v4510_v38 = vor.u32 1.1754944e-38, %v4509_v9  ;;  %vm4353_vm5 = vweird.f32 %v8446_v16  ;;  %v4357_v5 = vand.u32 2147483647, %v8446_v16 }
 0x49f   : > { %v4677_v60 = vmul.f32 %v4665_v7, %v4616_v53  ;;  %5555 = vtanh.f32 %v4634_v33  ;;  %v4589_v20 = vmul.f32 %v8637_v28, %v8574_v41  ;;  %vm4508_vm6 = vcmp.eq.f32.partialorder %v4507_v44, 8.507059e+37  ;;  %vm8664_vm7 = vmor %vm4353_vm5, %vm4354_vm3 }
 0x4a0   : > { %v4079_v6 = vpop.f32.mrf.mxu3  ;;  %v4667_v29 = vmul.f32 %v4655_v47, %v4466_v17  ;;  %v4511_v23 = vsel %vm4508_vm6, %v4510_v38, %v4506_v52  ;;  %v4356_v12 = vsel %vm8664_vm7, %v8508_v19, %v4352_v55  ;;  %v4360_v31 = vor.u32 1.1754944e-38, %v4359_v35 }
 0x4a1   : > { %v4080_v57 = vadd.f32 %v4079_v6, %v8757_v34  ;;  %v4689_v45 = vadd.f32 %v5550_v32, %v4677_v60  ;;  %v4546_v34 = vmul.f32 %v8585_v42, %v4545_v59  ;;  %v4554_v14 = vand.u32 2147483648, %v8527_v46  ;;  %v5573_v32 = vld [vmem:[%s7444_s17 + $0x38] sm:$0xff] }
 0x4a2   : > { %v4679_v0 = vadd.f32 %v5552_v36, %v4667_v29  ;;  %vm4358_vm8 = vcmp.eq.f32.partialorder %v4357_v5, 8.507059e+37  ;;  %vm4548_vm9 = vweird.f32 %v8527_v46  ;;  %v4552_v3 = vand.u32 2147483647, %v8527_v46 }
 0x4a3   : > { %v4625_v58 = vmul.f32 %v4316_v22, %v4080_v57  ;;  %4701 = vst.msk [vmem:[%s8077_s21 + $0x58] sm:$0xff] %vm2751_vm4, %v4689_v45  ;;  %vm4549_vm4 = vweird.f32 %v8585_v42  ;;  %v4547_v13 = vadd.f32 %v8585_v42, %v4546_v34  ;;  %v4361_v19 = vsel %vm4358_vm8, %v4360_v31, %v4356_v12 }
 0x4a4   : > { %4691 = vst [vmem:[%s8077_s21 + $0x8] sm:$0xff] %v4679_v0  ;;  %v3804_v8 = vadd.f32 %v8782_v1, %v8120_v25  ;;  %vm4550_vm10 = vmor %vm4548_vm9, %vm4549_vm4  ;;  %v4555_v40 = vor.u32 1.1754944e-38, %v4554_v14  ;;  %vm4553_vm1 = vcmp.eq.f32.partialorder %v4552_v3, 8.507059e+37  ;;  %vm4594_vm11 = vweird.f32 %v8637_v28 }
 0x4a5   : > { %v4637_v26 = vadd.f32 %v4625_v58, %v8232_v56  ;;  %v5556_v39 = vpop.eup %5555  ;;  %v4590_v56 = vsub.f32 1.0, %v4589_v20  ;;  %v4551_v61 = vsel %vm4550_vm10, %v8585_v42, %v4547_v13  ;;  %v4599_v53 = vand.u32 2147483648, %v8574_v41 }
 0x4a6   : > { %v4658_v15 = vsub.f32 %v5572_v49, %v5556_v39  ;;  %v4556_v46 = vsel %vm4553_vm1, %v4555_v40, %v4551_v61  ;;  %vm4593_vm12 = vweird.f32 %v8574_v41  ;;  %v4597_v18 = vand.u32 2147483647, %v8574_v41 }
 0x4a7   : > { %5557 = vtanh.f32 %v4637_v26  ;;  %v4591_v2 = vmul.f32 %v8637_v28, %v4590_v56  ;;  %vm4595_vm13 = vmor %vm4593_vm12, %vm4594_vm11  ;;  %v4600_v33 = vor.u32 1.1754944e-38, %v4599_v53 }
 0x4a8   : > { %v4082_v16 = vpop.f32.mrf.mxu3  ;;  %v4670_v54 = vmul.f32 %v4658_v15, %v4511_v23  ;;  %vm4598_vm14 = vcmp.eq.f32.partialorder %v4597_v18, 8.507059e+37 }
 0x4a9   : > { %v4083_v63 = vadd.f32 %v4082_v16, %v8117_v30  ;;  %v4592_v36 = vadd.f32 %v8637_v28, %v4591_v2 }
 0x4aa   : > { %v4682_v50 = vadd.f32 %v5556_v39, %v4670_v54 }
 0x4ab   : > { %v4628_v11 = vmul.f32 %v4361_v19, %v4083_v63  ;;  %v4596_v7 = vsel %vm4595_vm13, %v8637_v28, %v4592_v36 }
 0x4ac   : > { %4694 = vst [vmem:[%s8077_s21 + $0x20] sm:$0xff] %v4682_v50  ;;  %v4601_v47 = vsel %vm4598_vm14, %v4600_v33, %v4596_v7 }
 0x4ad   : > { %v5558_v24 = vpop.eup %5557  ;;  %v4640_v30 = vadd.f32 %v4628_v11, %v3804_v8 }
 0x4ae   : > { %v4661_v4 = vsub.f32 %v5573_v32, %v5558_v24 }
 0x4af   : > { %5559 = vtanh.f32 %v4640_v30 }
 0x4b0   : > { %v4673_v25 = vmul.f32 %v4661_v4, %v4556_v46 }
 0x4b2   : > { %v4685_v42 = vadd.f32 %v5558_v24, %v4673_v25 }
 0x4b4   : > { %4697 = vst [vmem:[%s8077_s21 + $0x38] sm:$0xff] %v4685_v42 }
 0x4b5   : > { %v5560_v17 = vpop.eup %5559 }
 0x4b6   : > { %v4664_v48 = vsub.f32 %v5574_v37, %v5560_v17 }
 0x4b8   : > { %v4676_v21 = vmul.f32 %v4664_v48, %v4601_v47 }
 0x4ba   : > { %v4688_v51 = vadd.f32 %v5560_v17, %v4676_v21 }
 0x4bc   : > { %4700 = vst [vmem:[%s8077_s21 + $0x50] sm:$0xff] %v4688_v51 }
 0x4bd PF: > { %s18_s27 = sadd.s32 1, %s5581_s27  }
 0x4be   : > { %p15_p4 = scmp.ge.s32.totalorder %s18_s27, 4  }
 0x4c0   :  { %17 = sbr.rel (!%p15_p4) target bundleno = 1 (0x1), region = 109 }

// kernel: rim_block_forward.30
= control target key start
LH: loop header
LB: loop body
LE: loop exit
PB: predicated region body
PF: predicated region fallthrough
CT: control target
= control target key end

     0   :  { %s3793_s27 = smov 0   ;;  %s6150_s0 = inlined_call_operand.vmem [shape: f32[2,32,420], index: 0, kind: input, shape index: {}]   ;;  %s6151_s1 = inlined_call_operand.vmem [shape: f32[2,32,320], index: 1, kind: input, shape index: {}]   ;;  %s6152_s2 = inlined_call_operand.vmem [shape: f32[9,32,32], index: 2, kind: input, shape index: {}]   ;;  %s6153_s3 = inlined_call_operand.vmem [shape: f32[32,1], index: 3, kind: input, shape index: {}]   ;;  %s6154_s4 = inlined_call_operand.vmem [shape: f32[96,32], index: 4, kind: input, shape index: {}]   ;;  %s6155_s5 = inlined_call_operand.vmem [shape: f32[96,1], index: 5, kind: input, shape index: {}]   ;;  %s6156_s6 = inlined_call_operand.vmem [shape: f32[96,32], index: 6, kind: input, shape index: {}]   ;;  %s6157_s7 = inlined_call_operand.vmem [shape: f32[96,1], index: 7, kind: input, shape index: {}]   ;;  %s6158_s8 = inlined_call_operand.vmem [shape: f32[2,32,320], index: 8, kind: output, shape index: {}]  }
   0x1 LB: > { %s3048_s28 = sadd.s32 4294967295, %s3737_s27   ;;  %p3052_p0 = scmp.ge.s32.totalorder %s3737_s27, 1  ;;  %s3737_s27 = sphi %s3793_s27, %s18_s27  }
   0x2   : > { %p272_p1 = scmp.lt.s32.totalorder %s3737_s27, 3 }
   0x4   : > { %p273_p2 = pnand %p3052_p0, %p272_p1 }
   0x6   : > { %276 = sbr.rel (%p273_p2) target bundleno = 842 (0x34a), region = 52 }
   0xb   : > { %p311_p3 = scmp.lt.s32.totalorder %s3048_s28, 1  ;;  %s3739_s11 = smov 126   ;;  %vm395_vm0 = vcmask 1031168   ;;  %v3057_v60 = vld [vmem:[%s6152_s2 + $0x20] sm:$0xff]  ;;  %vm416_vm1 = vcmask 261120   ;;  %v3971_v61 = vld [vmem:[%s6152_s2 + $0x30] sm:$0xff] }
   0xc   : > { %s3740_s12 = smov 124   ;;  %s3741_s13 = smov 88   ;;  %vm644_vm2 = vcmask 1014784   ;;  %vm805_vm3 = vcmask 719872   ;;  %vm966_vm4 = vcmask 703488   ;;  %vm1127_vm5 = vcmask 687104  }
   0xd   : > { %s6260_s28 = smov (!%p311_p3, %s3048_s28), 1  ;;  %s3742_s14 = smov 86   ;;  %vm1328_vm6 = vcmask 392192   ;;  %vm1501_vm7 = vcmask 375808   ;;  %vm1674_vm8 = vcmask 359424  }
   0xe   : > { %s3295_s29 = sshll.u32 %s6260_s28, 7  ;;  %s3743_s15 = smov 84  }
   0xf   : > { %s3807_s10 = scalar_lea.vmem %s6150_s0, %s3295_s29  ;;  %s3744_s16 = smov 48  }
  0x10   : > { %v3810_v0 = vld [vmem:[%s3807_s10 + $0x60] sm:$0xff]  ;;  %v3813_v1 = vld [vmem:[%s3807_s10 + $0x68] sm:$0xff]  ;;  %v3830_v6 = vld [vmem:[%s3807_s10 + $0x50] sm:$0xff]  ;;  %s3745_s17 = smov 44   ;;  %s3746_s18 = smov 46  }
  0x11   : > { %v3816_v2 = vld [vmem:[%s3807_s10 + $0x20] sm:$0xff]  ;;  %v3820_v3 = vpack.i.bf16 %v3813_v1, %v3810_v0  ;;  %v3823_v4 = vld [vmem:[%s3807_s10 + $0x28] sm:$0xff]  ;;  %v3834_v7 = vld [vmem:[%s3807_s10 + $0x70] sm:$0xff]  ;;  %s3308_s25 = smul.u32 96, %s6260_s28 }
  0x12   : > { %v3827_v5 = vpack.i.bf16 %v3823_v4, %v3816_v2  ;;  %v3838_v8 = vld [vmem:[%s3807_s10 + $0x40] sm:$0xff]  ;;  %v3841_v9 = vld [vmem:[%s3807_s10 + $0x48] sm:$0xff]  ;;  %v3845_v10 = vpack.i.bf16 %v3830_v6, %v3834_v7  ;;  %v3859_v14 = vld [vmem:[%s3807_s10 + $0x10] sm:$0xff]  ;;  %v3441_v18 = vpack.i.bf16 %v3834_v7, %v3813_v1 }
  0x13   : > { %3327 = vrot.lane.b32.xlu0 %v3820_v3, %s3739_s11  ;;  %v3848_v11 = vld [vmem:[%s3807_s10] sm:$0xff]  ;;  %v3851_v12 = vld [vmem:[%s3807_s10 + $0x8] sm:$0xff]  ;;  %v3856_v13 = vpack.i.bf16 %v3841_v9, %v3838_v8  ;;  %v3862_v15 = vld [vmem:[%s3807_s10 + $0x30] sm:$0xff]  ;;  %v3451_v19 = vpack.i.bf16 %v3830_v6, %v3841_v9  ;;  %v3486_v31 = vpack.i.bf16 %v3838_v8, %v3810_v0  ;;  %s5553_s30 = scalar_lea.vmem %s6158_s8, %s3308_s25 }
  0x14   : > { %3337 = vrot.lane.b32.xlu1 %v3827_v5, %s3739_s11  ;;  %3347 = vrot.lane.b32.xlu2 %v3845_v10, %s3739_s11  ;;  %v3866_v16 = vpack.i.bf16 %v3851_v12, %v3848_v11  ;;  %v3870_v17 = vpack.i.bf16 %v3859_v14, %v3862_v15  ;;  %v3456_v20 = vpack.i.bf16 %v3862_v15, %v3823_v4  ;;  %v3900_v21 = vld [vmem:[%s3807_s10 + $0x78] sm:$0xff] }
  0x15   : > { %v3461_v22 = vpack.i.bf16 %v3859_v14, %v3851_v12  ;;  %v3466_v23 = vpack.i.bf16 %v3900_v21, %v3834_v7  ;;  %v3907_v24 = vld [vmem:[%s3807_s10 + $0x18] sm:$0xff]  ;;  %v3496_v29 = vpack.i.bf16 %v3848_v11, %v3816_v2 }
  0x16   : > { %v3481_v25 = vpack.i.bf16 %v3907_v24, %v3859_v14  ;;  %v3912_v26 = vld [vmem:[%s3807_s10 + $0x58] sm:$0xff] }
  0x17   : > { %v3471_v27 = vpack.i.bf16 %v3912_v26, %v3830_v6  ;;  %v3917_v28 = vld [vmem:[%s3807_s10 + $0x38] sm:$0xff]  ;;  %s4896_s10 = scalar_lea.vmem %s6151_s1, %s3308_s25 }
  0x18   : > { %v3476_v30 = vpack.i.bf16 %v3917_v28, %v3862_v15 }
  0x1b   : > { %3332 = vrot.lane.b32.xlu0 %v3856_v13, %s3739_s11 }
  0x1c   : > { %3342 = vrot.lane.b32.xlu1 %v3866_v16, %s3739_s11  ;;  %3352 = vrot.lane.b32.xlu2 %v3870_v17, %s3739_s11 }
  0x23   : > { %3357 = vrot.lane.b32.xlu0 %v3845_v10, %s3740_s12 }
  0x24   : > { %3362 = vrot.lane.b32.xlu1 %v3870_v17, %s3740_s12  ;;  %3367 = vrot.lane.b32.xlu2 %v3820_v3, %s3740_s12 }
  0x2b   : > { %3372 = vrot.lane.b32.xlu0 %v3856_v13, %s3740_s12 }
  0x2c   : > { %3377 = vrot.lane.b32.xlu1 %v3827_v5, %s3740_s12  ;;  %3382 = vrot.lane.b32.xlu2 %v3866_v16, %s3740_s12 }
  0x33   : > { %3387 = vrot.lane.b32.xlu0 %v3820_v3, %s3741_s13 }
  0x34   : > { %3392 = vrot.lane.b32.xlu1 %v3856_v13, %s3741_s13  ;;  %3397 = vrot.lane.b32.xlu2 %v3820_v3, %s3742_s14 }
  0x3b   : > { %3402 = vrot.lane.b32.xlu0 %v3827_v5, %s3741_s13 }
  0x3c   : > { %3407 = vrot.lane.b32.xlu1 %v3856_v13, %s3742_s14  ;;  %3412 = vrot.lane.b32.xlu2 %v3866_v16, %s3741_s13 }
  0x43   : > { %3417 = vrot.lane.b32.xlu0 %v3827_v5, %s3742_s14 }
  0x44   : > { %3422 = vrot.lane.b32.xlu1 %v3866_v16, %s3742_s14  ;;  %3427 = vrot.lane.b32.xlu2 %v3845_v10, %s3741_s13 }
  0x4b   : > { %3432 = vrot.lane.b32.xlu0 %v3870_v17, %s3741_s13 }
  0x4c   : > { %3437 = vrot.lane.b32.xlu1 %v3845_v10, %s3742_s14  ;;  %3442 = vrot.lane.b32.xlu2 %v3441_v18, %s3743_s15 }
  0x53   : > { %3447 = vrot.lane.b32.xlu0 %v3870_v17, %s3742_s14 }
  0x54   : > { %3452 = vrot.lane.b32.xlu1 %v3451_v19, %s3743_s15  ;;  %3457 = vrot.lane.b32.xlu2 %v3456_v20, %s3743_s15  ;;  %v3058_v20 = vld [vmem:[%s6152_s2 + $0x28] sm:$0xff] }
  0x5b   : > { %3462 = vrot.lane.b32.xlu0 %v3461_v22, %s3743_s15 }
  0x5c   : > { %3467 = vrot.lane.b32.xlu1 %v3466_v23, %s3744_s16  ;;  %3472 = vrot.lane.b32.xlu2 %v3471_v27, %s3744_s16 }
  0x63   : > { %3477 = vrot.lane.b32.xlu0 %v3476_v30, %s3744_s16  ;;  %v4028_v30 = vpack.i.bf16 %v3907_v24, %v3917_v28 }
  0x64   : > { %3482 = vrot.lane.b32.xlu1 %v3481_v25, %s3744_s16  ;;  %3487 = vrot.lane.b32.xlu2 %v3486_v31, %s3743_s15 }
  0x6b   : > { %3492 = vrot.lane.b32.xlu0 %v3820_v3, %s3744_s16 }
  0x6c   : > { %3497 = vrot.lane.b32.xlu1 %v3496_v29, %s3743_s15  ;;  %3502 = vrot.lane.b32.xlu2 %v3856_v13, %s3744_s16 }
  0x6e   : > { %v3926_v32 = vpop.permute.xlu2 %3347 }
  0x6f   : > { %v3349_v34 = vunpack.i.l.bf16 %v3926_v32  ;;  %v3350_v42 = vunpack.i.h.bf16 %v3926_v32 }
  0x73   : > { %3507 = vrot.lane.b32.xlu0 %v3827_v5, %s3744_s16 }
  0x74   : > { %3512 = vrot.lane.b32.xlu1 %v3866_v16, %s3744_s16  ;;  %3517 = vrot.lane.b32.xlu2 %v3820_v3, %s3746_s18 }
  0x76   : > { %v3933_v33 = vpop.permute.xlu2 %3352 }
  0x77   : > { %v3355_v46 = vunpack.i.h.bf16 %v3933_v33  ;;  %v3354_v47 = vunpack.i.l.bf16 %v3933_v33 }
  0x7b   : > { %3522 = vrot.lane.b32.xlu0 %v3856_v13, %s3746_s18 }
  0x7c   : > { %3527 = vrot.lane.b32.xlu1 %v3820_v3, %s3745_s17  ;;  %3532 = vrot.lane.b32.xlu2 %v3827_v5, %s3746_s18 }
  0x7e   : > { %v3942_v36 = vpop.permute.xlu2 %3367 }
  0x7f   : > { %v3370_v62 = vunpack.i.h.bf16 %v3942_v36  ;;  %v3369_v32 = vunpack.i.l.bf16 %v3942_v36 }
  0x83   : > { %3537 = vrot.lane.b32.xlu0 %v3856_v13, %s3745_s17  ;;  %v3982_v13 = vld [vmem:[%s6152_s2 + $0x38] sm:$0xff] }
  0x84   : > { %3542 = vrot.lane.b32.xlu1 %v3866_v16, %s3746_s18  ;;  %3547 = vrot.lane.b32.xlu2 %v3827_v5, %s3745_s17 }
  0x85   : > { %v3328_v35 = vpop.permute.xlu0 %3327 }
  0x86   : > { %v3330_v37 = vunpack.i.h.bf16 %v3328_v35  ;;  %v3329_v38 = vunpack.i.l.bf16 %v3328_v35  ;;  %v3338_v39 = vpop.permute.xlu1 %3337  ;;  %v3957_v53 = vpop.permute.xlu2 %3382 }
  0x87   : > { %v3340_v43 = vunpack.i.h.bf16 %v3338_v39  ;;  %v3339_v44 = vunpack.i.l.bf16 %v3338_v39  ;;  %v3385_v27 = vunpack.i.h.bf16 %v3957_v53 }
  0x88   : > { %v402_v40 = vsel %vm395_vm0, %v3329_v38, %v3330_v37  ;;  %v403_v41 = vsel %vm395_vm0, %v3330_v37, %v3349_v34  ;;  %v4118_v37 = vld [vmem:[%s6152_s2 + $0x10] sm:$0xff] }
  0x89   : > { %441 = vmatpush.msra.mxu0 %v402_v40  ;;  %470 = vmatpush.msra.mxu1 %v403_v41  ;;  %v398_v56 = vsel %vm395_vm0, %v3339_v44, %v3340_v43  ;;  %v399_v57 = vsel %vm395_vm0, %v3340_v43, %v3354_v47  ;;  %v3384_v40 = vunpack.i.l.bf16 %v3957_v53 }
  0x8a   : > { %3296 = vmatpush.msra.mxu2 %v403_v41  ;;  %3297 = vmatpush.msra.mxu3 %v403_v41 }
  0x8b   : > { %3552 = vrot.lane.b32.xlu0 %v3866_v16, %s3745_s17  ;;  %v4068_v16 = vpack.i.bf16 %v3912_v26, %v3900_v21  ;;  %v4082_v21 = vld [vmem:[%s6152_s2 + $0x48] sm:$0xff]  ;;  %v645_v36 = vsel %vm644_vm2, %v3384_v40, %v3385_v27 }
  0x8c   : > { %3557 = vrot.lane.b32.xlu1 %v3845_v10, %s3746_s18  ;;  %3562 = vrot.lane.b32.xlu2 %v3870_v17, %s3746_s18 }
  0x8d   : > { %v3333_v45 = vpop.permute.xlu0 %3332 }
  0x8e   : > { %v3335_v48 = vunpack.i.h.bf16 %v3333_v45  ;;  %v3334_v49 = vunpack.i.l.bf16 %v3333_v45  ;;  %v3343_v50 = vpop.permute.xlu1 %3342  ;;  %v3987_v18 = vpop.permute.xlu2 %3397  ;;  %v4147_v45 = vld [vmem:[%s6152_s2 + $0x58] sm:$0xff] }
  0x8f   : > { %v3345_v51 = vunpack.i.h.bf16 %v3343_v50  ;;  %v3344_v52 = vunpack.i.l.bf16 %v3343_v50  ;;  %v4159_v50 = vld [vmem:[%s6152_s2 + $0x18] sm:$0xff] }
  0x90   : > { %v400_v54 = vsel %vm395_vm0, %v3334_v49, %v3335_v48  ;;  %v401_v55 = vsel %vm395_vm0, %v3335_v48, %v3350_v42 }
  0x91   : > { %442 = vmatpush.msra.mxu0 %v400_v54  ;;  %471 = vmatpush.msra.mxu1 %v401_v55  ;;  %v396_v58 = vsel %vm395_vm0, %v3344_v52, %v3345_v51  ;;  %v397_v59 = vsel %vm395_vm0, %v3345_v51, %v3355_v46 }
  0x92   : > { %3298 = vmatpush.msra.mxu2 %v401_v55  ;;  %3299 = vmatpush.msra.mxu3 %v401_v55 }
  0x93   : > { %443 = vmatpush.msra.mxu0 %v398_v56  ;;  %472 = vmatpush.msra.mxu1 %v399_v57 }
  0x94   : > { %3300 = vmatpush.msra.mxu2 %v399_v57  ;;  %3301 = vmatpush.msra.mxu3 %v399_v57 }
  0x95   : > { %444 = vmatpush.msra.mxu0 %v396_v58  ;;  %473 = vmatpush.msra.mxu1 %v397_v59  ;;  %v3974_v63 = vpop.permute.xlu0 %3357 }
  0x96   : > { %3302 = vmatpush.msra.mxu2 %v397_v59  ;;  %3303 = vmatpush.msra.mxu3 %v397_v59  ;;  %v3359_v3 = vunpack.i.l.bf16 %v3974_v63  ;;  %v3977_v5 = vpop.permute.xlu1 %3362  ;;  %v3360_v22 = vunpack.i.h.bf16 %v3974_v63  ;;  %v4019_v29 = vpop.permute.xlu2 %3412 }
  0x97   : > { %3061 = vmatmul.msk.f32.vlgmr.msra.gmra.mxu0 %vm416_vm1, %v3057_v60  ;;  %3067 = vmatmul.msk.f32.vlgmr.msra.gmra.mxu2 %vm416_vm1, %v3971_v61  ;;  %v3364_v23 = vunpack.i.l.bf16 %v3977_v5 }
  0x98   : > { %499 = vmatpush.msrb.mxu2 %v3349_v34  ;;  %3065 = vmatmul.msk.f32.vlgmr.msra.gmra.mxu1 %vm416_vm1, %v3057_v60  ;;  %v652_v19 = vsel %vm644_vm2, %v3370_v62, %v3359_v3  ;;  %v4112_v34 = vld [vmem:[%s6152_s2 + $0x50] sm:$0xff] }
  0x99   : > { %3068 = vmatmul.msk.f32.vlgmr.msra.gmra.mxu3 %vm416_vm1, %v3982_v13  ;;  %598 = vmatpush.msrb.mxu1 %v3834_v7 }
  0x9a   : > { %500 = vmatpush.msrb.mxu2 %v3350_v42  ;;  %718 = vmatpush.msrb.mxu3 %v652_v19  ;;  %v651_v42 = vsel %vm644_vm2, %v3369_v32, %v3370_v62  ;;  %v3399_v19 = vunpack.i.l.bf16 %v3987_v18 }
  0x9b   : > { %599 = vmatpush.msrb.mxu1 %v3830_v6  ;;  %569 = vmatpush.msrb.mxu0 %v3813_v1  ;;  %v3365_v1 = vunpack.i.h.bf16 %v3977_v5  ;;  %v3400_v5 = vunpack.i.h.bf16 %v3987_v18 }
  0x9c   : > { %501 = vmatpush.msrb.mxu2 %v3354_v47  ;;  %3572 = vrot.lane.b32.xlu1 %v3870_v17, %s3745_s17 }
  0x9d   : > { %v4005_v25 = vpop.permute.xlu0 %3372  ;;  %600 = vmatpush.msrb.mxu1 %v3862_v15  ;;  %570 = vmatpush.msrb.mxu0 %v3841_v9  ;;  %v646_v31 = vsel %vm644_vm2, %v3385_v27, %v3365_v1 }
  0x9e   : > { %502 = vmatpush.msrb.mxu2 %v3355_v46  ;;  %v3375_v6 = vunpack.i.h.bf16 %v4005_v25  ;;  %v4011_v7 = vpop.permute.xlu1 %3377  ;;  %3577 = vrot.lane.b32.xlu2 %v4068_v16, %s3746_s18  ;;  %v3374_v33 = vunpack.i.l.bf16 %v4005_v25 }
  0x9f   : > { %3062 = vmatmul.msk.f32.gmra.mxu0 %vm416_vm1, %v3058_v20  ;;  %3069 = vmatmul.msk.f32.vlgmr.msrb.gmra.mxu2 %vm416_vm1, %v3057_v60  ;;  %v3380_v15 = vunpack.i.h.bf16 %v4011_v7  ;;  %v3379_v35 = vunpack.i.l.bf16 %v4011_v7  ;;  %v3415_v60 = vunpack.i.h.bf16 %v4019_v29 }
  0xa0   : > { %3066 = vmatmul.msk.f32.gmra.mxu1 %vm416_vm1, %v3058_v20  ;;  %v650_v9 = vsel %vm644_vm2, %v3375_v6, %v3360_v22  ;;  %571 = vmatpush.msrb.mxu0 %v3823_v4  ;;  %v4042_v4 = vld [vmem:[%s6152_s2 + $0x40] sm:$0xff]  ;;  %v649_v43 = vsel %vm644_vm2, %v3374_v33, %v3375_v6 }
  0xa1   : > { %719 = vmatpush.msrb.mxu3 %v650_v9  ;;  %v648_v17 = vsel %vm644_vm2, %v3380_v15, %v3364_v23  ;;  %601 = vmatpush.msrb.mxu1 %v3859_v14  ;;  %v647_v44 = vsel %vm644_vm2, %v3379_v35, %v3380_v15  ;;  %v973_v15 = vsel %vm966_vm4, %v3399_v19, %v3400_v5 }
  0xa2   : > { %572 = vmatpush.msrb.mxu0 %v3851_v12  ;;  %540 = vmatpush.msra.mxu2 %v3810_v0  ;;  %v4052_v12 = vld [vmem:[%s6152_s2] sm:$0xff] }
  0xa3   : > { %720 = vmatpush.msrb.mxu3 %v648_v17  ;;  %3567 = vrot.lane.b32.xlu0 %v3845_v10, %s3745_s17 }
  0xa4   : > { %3587 = vrot.lane.b32.xlu1 %v4028_v30, %s3746_s18  ;;  %541 = vmatpush.msra.mxu2 %v3838_v8  ;;  %v4064_v8 = vpop.permute.xlu2 %3427 }
  0xa5   : > { %721 = vmatpush.msrb.mxu3 %v646_v31  ;;  %v4054_v0 = vpop.permute.xlu0 %3387  ;;  %747 = vmatpush.msra.mxu0 %v3359_v3  ;;  %v3430_v24 = vunpack.i.h.bf16 %v4064_v8 }
  0xa6   : > { %3093 = vmatmul.msk.f32.vlgmr.msrb.gmra.mxu3 %vm416_vm1, %v4042_v4  ;;  %v4058_v14 = vpop.permute.xlu1 %3392  ;;  %542 = vmatpush.msra.mxu2 %v3816_v2  ;;  %v3429_v2 = vunpack.i.l.bf16 %v4064_v8  ;;  %v3390_v48 = vunpack.i.h.bf16 %v4054_v0  ;;  %v3389_v49 = vunpack.i.l.bf16 %v4054_v0 }
  0xa7   : > { %3063 = vmatmul.msk.f32.gmra.mxu0 %vm416_vm1, %v3971_v61  ;;  %3070 = vmatmul.msk.f32.gmra.mxu2 %vm416_vm1, %v3058_v20  ;;  %v3395_v46 = vunpack.i.h.bf16 %v4058_v14  ;;  %v3394_v47 = vunpack.i.l.bf16 %v4058_v14 }
  0xa8   : > { %3081 = vmatmul.msk.f32.vlgmr.msrb.gmra.mxu1 %vm416_vm1, %v4052_v12  ;;  %543 = vmatpush.msra.mxu2 %v3848_v11  ;;  %v4091_v11 = vld [vmem:[%s6152_s2 + $0x8] sm:$0xff]  ;;  %v812_v58 = vsel %vm805_vm3, %v3389_v49, %v3390_v48  ;;  %v813_v62 = vsel %vm805_vm3, %v3390_v48, %v3429_v2 }
  0xa9   : > { %748 = vmatpush.msra.mxu0 %v3360_v22  ;;  %908 = vmatpush.msra.mxu3 %v3429_v2  ;;  %v810_v59 = vsel %vm805_vm3, %v3394_v47, %v3395_v46  ;;  %v811_v63 = vsel %vm805_vm3, %v3395_v46, %v3430_v24  ;;  %v4232_v2 = vld [vmem:[%s6152_s2 + $0x68] sm:$0xff] }
  0xaa   : > { %689 = vmatpush.msrb.mxu2 %v651_v42  ;;  %850 = vmatpush.msra.mxu1 %v812_v58 }
  0xab   : > { %749 = vmatpush.msra.mxu0 %v3364_v23  ;;  %909 = vmatpush.msra.mxu3 %v3430_v24 }
  0xac   : > { %v4103_v10 = vpop.permute.xlu2 %3442  ;;  %690 = vmatpush.msrb.mxu2 %v649_v43  ;;  %851 = vmatpush.msra.mxu1 %v810_v59 }
  0xad   : > { %v4093_v26 = vpop.permute.xlu0 %3402  ;;  %750 = vmatpush.msra.mxu0 %v3365_v1  ;;  %v3444_v18 = vunpack.i.l.bf16 %v4103_v10  ;;  %3582 = vrot.lane.b32.xlu0 %v4068_v16, %s3745_s17 }
  0xae   : > { %3094 = vmatmul.msk.f32.gmra.mxu3 %vm416_vm1, %v4082_v21  ;;  %v4097_v28 = vpop.permute.xlu1 %3407  ;;  %691 = vmatpush.msrb.mxu2 %v647_v44  ;;  %v3405_v52 = vunpack.i.h.bf16 %v4093_v26  ;;  %v3404_v53 = vunpack.i.l.bf16 %v4093_v26  ;;  %v3445_v44 = vunpack.i.h.bf16 %v4103_v10 }
  0xaf   : > { %3064 = vmatmul.msk.f32.gmra.mxu0 %vm416_vm1, %v3982_v13  ;;  %3071 = vmatmul.msk.f32.gmra.mxu2 %vm416_vm1, %v3971_v61  ;;  %v3414_v61 = vunpack.i.l.bf16 %v4019_v29  ;;  %v3410_v20 = vunpack.i.h.bf16 %v4097_v28  ;;  %v3409_v22 = vunpack.i.l.bf16 %v4097_v28 }
  0xb0   : > { %3082 = vmatmul.msk.f32.gmra.mxu1 %vm416_vm1, %v4091_v11  ;;  %692 = vmatpush.msrb.mxu2 %v645_v36  ;;  %v808_v3 = vsel %vm805_vm3, %v3404_v53, %v3405_v52  ;;  %v4265_v36 = vld [vmem:[%s6152_s2 + $0x70] sm:$0xff] }
  0xb1   : > { %852 = vmatpush.msra.mxu1 %v808_v3  ;;  %v806_v1 = vsel %vm805_vm3, %v3414_v61, %v3415_v60  ;;  %v971_v9 = vsel %vm966_vm4, %v3409_v22, %v3410_v20  ;;  %v1135_v22 = vsel %vm1127_vm5, %v3444_v18, %v3445_v44  ;;  %3592 = vrot.lane.b32.xlu2 %v4028_v30, %s3745_s17  ;;  %v4450_v30 = vld [vmem:[%s6152_s2 + $0xc0] sm:$0xff] }
  0xb3   : > { %853 = vmatpush.msra.mxu1 %v806_v1 }
  0xb4   : > { %v4131_v41 = vpop.permute.xlu2 %3457 }
  0xb5   : > { %v4120_v38 = vpop.permute.xlu0 %3417  ;;  %v3460_v48 = vunpack.i.h.bf16 %v4131_v41  ;;  %v3459_v53 = vunpack.i.l.bf16 %v4131_v41  ;;  %v4419_v41 = vld [vmem:[%s6152_s2 + $0x90] sm:$0xff] }
  0xb6   : > { %3095 = vmatmul.msk.f32.gmra.mxu3 %vm416_vm1, %v4112_v34  ;;  %v4124_v39 = vpop.permute.xlu1 %3422  ;;  %v3420_v8 = vunpack.i.h.bf16 %v4120_v38  ;;  %v3419_v24 = vunpack.i.l.bf16 %v4120_v38 }
  0xb7   : > { %3072 = vmatmul.msk.f32.gmra.mxu2 %vm416_vm1, %v3982_v13  ;;  %3077 = vmatmul.msk.f32.vlgmr.msrb.gmra.mxu0 %vm416_vm1, %v4052_v12  ;;  %v4196_v13 = vld [vmem:[%s6152_s2 + $0x60] sm:$0xff]  ;;  %v3425_v26 = vunpack.i.h.bf16 %v4124_v39  ;;  %v3424_v28 = vunpack.i.l.bf16 %v4124_v39 }
  0xb8   : > { %3083 = vmatmul.msk.f32.gmra.mxu1 %vm416_vm1, %v4118_v37  ;;  %1011 = vmatpush.msrb.mxu0 %v973_v15  ;;  %v969_v40 = vsel %vm966_vm4, %v3419_v24, %v3420_v8 }
  0xb9   : > { %v967_v43 = vsel %vm966_vm4, %v3424_v28, %v3425_v26 }
  0xba   : > { %1012 = vmatpush.msrb.mxu0 %v971_v9 }
  0xbc   : > { %v4175_v57 = vpop.permute.xlu2 %3472  ;;  %1013 = vmatpush.msrb.mxu0 %v969_v40 }
  0xbd   : > { %v4161_v51 = vpop.permute.xlu0 %3432  ;;  %v3474_v3 = vunpack.i.l.bf16 %v4175_v57 }
  0xbe   : > { %3096 = vmatmul.msk.f32.gmra.mxu3 %vm416_vm1, %v4147_v45  ;;  %v4167_v54 = vpop.permute.xlu1 %3437  ;;  %v3435_v55 = vunpack.i.h.bf16 %v4161_v51  ;;  %v3434_v56 = vunpack.i.l.bf16 %v4161_v51  ;;  %1014 = vmatpush.msrb.mxu0 %v967_v43 }
  0xbf   : > { %3073 = vmatmul.msk.f32.vlgmr.msra.gmra.mxu2 %vm416_vm1, %v4052_v12  ;;  %3078 = vmatmul.msk.f32.gmra.mxu0 %vm416_vm1, %v4091_v11  ;;  %v3439_v23 = vunpack.i.l.bf16 %v4167_v54  ;;  %v3440_v25 = vunpack.i.h.bf16 %v4167_v54 }
  0xc0   : > { %3084 = vmatmul.msk.f32.gmra.mxu1 %vm416_vm1, %v4159_v50  ;;  %910 = vmatpush.msra.mxu3 %v3434_v56  ;;  %v809_v7 = vsel %vm805_vm3, %v3405_v52, %v3434_v56  ;;  %v807_v39 = vsel %vm805_vm3, %v3415_v60, %v3435_v55  ;;  %v4289_v52 = vld [vmem:[%s6152_s2 + $0x78] sm:$0xff] }
  0xc1   : > { %879 = vmatpush.msra.mxu2 %v813_v62  ;;  %v974_v29 = vsel %vm966_vm4, %v3400_v5, %v3439_v23  ;;  %v972_v0 = vsel %vm966_vm4, %v3410_v20, %v3440_v25 }
  0xc2   : > { %911 = vmatpush.msra.mxu3 %v3435_v55  ;;  %1040 = vmatpush.msrb.mxu1 %v974_v29 }
  0xc3   : > { %880 = vmatpush.msra.mxu2 %v811_v63 }
  0xc4   : > { %v3488_v27 = vpop.permute.xlu2 %3487  ;;  %1041 = vmatpush.msrb.mxu1 %v972_v0 }
  0xc5   : > { %881 = vmatpush.msra.mxu2 %v809_v7  ;;  %v3490_v31 = vunpack.i.h.bf16 %v3488_v27  ;;  %v3489_v12 = vunpack.i.l.bf16 %v3488_v27  ;;  %v4225_v14 = vpop.permute.xlu0 %3447 }
  0xc6   : > { %3113 = vmatmul.msk.f32.vlgmr.msra.gmra.mxu3 %vm416_vm1, %v4196_v13  ;;  %v4206_v6 = vpop.permute.xlu1 %3452  ;;  %v3449_v32 = vunpack.i.l.bf16 %v4225_v14  ;;  %v3450_v33 = vunpack.i.h.bf16 %v4225_v14 }
  0xc7   : > { %3074 = vmatmul.msk.f32.gmra.mxu2 %vm416_vm1, %v4091_v11  ;;  %3079 = vmatmul.msk.f32.gmra.mxu0 %vm416_vm1, %v4118_v37  ;;  %v3454_v17 = vunpack.i.l.bf16 %v4206_v6  ;;  %v1134_v11 = vsel %vm1127_vm5, %v3489_v12, %v3444_v18  ;;  %v3455_v46 = vunpack.i.h.bf16 %v4206_v6  ;;  %v4386_v12 = vld [vmem:[%s6152_s2 + $0x88] sm:$0xff]  ;;  %v4400_v6 = vld [vmem:[%s6152_s2 + $0xb0] sm:$0xff] }
  0xc8   : > { %3105 = vmatmul.msk.f32.vlgmr.msra.gmra.mxu1 %vm416_vm1, %v4196_v13  ;;  %1172 = vmatpush.msrb.mxu3 %v1134_v11  ;;  %v970_v42 = vsel %vm966_vm4, %v3420_v8, %v3449_v32 }
  0xc9   : > { %v1132_v35 = vsel %vm1127_vm5, %v3490_v31, %v3454_v17  ;;  %882 = vmatpush.msra.mxu2 %v807_v39  ;;  %1042 = vmatpush.msrb.mxu1 %v970_v42  ;;  %v1133_v31 = vsel %vm1127_vm5, %v3454_v17, %v3455_v46  ;;  %v1131_v17 = vsel %vm1127_vm5, %v3459_v53, %v3460_v48 }
  0xca   : > { %1173 = vmatpush.msrb.mxu3 %v1132_v35 }
  0xcc   : > { %v4303_v60 = vpop.permute.xlu2 %3502 }
  0xcd   : > { %v4268_v47 = vpop.permute.xlu0 %3462  ;;  %v3505_v5 = vunpack.i.h.bf16 %v4303_v60 }
  0xce   : > { %3114 = vmatmul.msk.f32.gmra.mxu3 %vm416_vm1, %v4232_v2  ;;  %v4246_v38 = vpop.permute.xlu1 %3467  ;;  %v3465_v51 = vunpack.i.h.bf16 %v4268_v47  ;;  %v3464_v55 = vunpack.i.l.bf16 %v4268_v47 }
  0xcf   : > { %3075 = vmatmul.msk.f32.gmra.mxu2 %vm416_vm1, %v4118_v37  ;;  %3080 = vmatmul.msk.f32.gmra.mxu0 %vm416_vm1, %v4159_v50  ;;  %v968_v37 = vsel %vm966_vm4, %v3425_v26, %v3450_v33  ;;  %v3469_v63 = vunpack.i.l.bf16 %v4246_v38  ;;  %v1336_v10 = vsel %vm1328_vm6, %v3505_v5, %v3474_v3  ;;  %v4443_v26 = vld [vmem:[%s6152_s2 + $0x98] sm:$0xff] }
  0xd0   : > { %3106 = vmatmul.msk.f32.gmra.mxu1 %vm416_vm1, %v4232_v2  ;;  %v1129_v14 = vsel %vm1127_vm5, %v3464_v55, %v3465_v51 }
  0xd1   : > { %1043 = vmatpush.msrb.mxu1 %v968_v37 }
  0xd3   : > { %1230 = vmatpush.msra.mxu1 %v3445_v44  ;;  %v4473_v44 = vld [vmem:[%s6152_s2 + $0xc8] sm:$0xff] }
  0xd4   : > { %v4334_v20 = vpop.permute.xlu2 %3517 }
  0xd5   : > { %1231 = vmatpush.msra.mxu1 %v3455_v46 }
  0xd6   : > { %3115 = vmatmul.msk.f32.gmra.mxu3 %vm416_vm1, %v4265_v36  ;;  %v4273_v49 = vpop.permute.xlu1 %3482 }
  0xd7   : > { %3076 = vmatmul.msk.f32.gmra.mxu2 %vm416_vm1, %v4159_v50  ;;  %3097 = vmatmul.msk.f32.vlgmr.msra.gmra.mxu0 %vm416_vm1, %v4042_v4  ;;  %v4291_v50 = vpop.permute.xlu0 %3477  ;;  %v3484_v18 = vunpack.i.l.bf16 %v4273_v49 }
  0xd8   : > { %3107 = vmatmul.msk.f32.gmra.mxu1 %vm416_vm1, %v4265_v36  ;;  %1201 = vmatpush.msra.mxu0 %v1135_v22  ;;  %v3479_v1 = vunpack.i.l.bf16 %v4291_v50  ;;  %v3480_v40 = vunpack.i.h.bf16 %v4291_v50 }
  0xd9   : > { %1232 = vmatpush.msra.mxu1 %v3460_v48 }
  0xda   : > { %1202 = vmatpush.msra.mxu0 %v1133_v31  ;;  %v1810_v31 = vld [vmem:[%s6153_s3] sm:$0xff] }
  0xdb   : > { %1233 = vmatpush.msra.mxu1 %v3465_v51  ;;  %v3485_v51 = vunpack.i.h.bf16 %v4273_v49 }
  0xdc   : > { %v4373_v29 = vpop.permute.xlu2 %3532  ;;  %1203 = vmatpush.msra.mxu0 %v1131_v17  ;;  %v3519_v17 = vunpack.i.l.bf16 %v4334_v20 }
  0xde   : > { %3116 = vmatmul.msk.f32.gmra.mxu3 %vm416_vm1, %v4289_v52  ;;  %v3498_v56 = vpop.permute.xlu1 %3497  ;;  %1204 = vmatpush.msra.mxu0 %v1129_v14  ;;  %v4554_v14 = vld [vmem:[%s6152_s2 + $0xd8] sm:$0xff] }
  0xdf   : > { %3089 = vmatmul.msk.f32.vlgmr.msrb.gmra.mxu2 %vm416_vm1, %v4042_v4  ;;  %3098 = vmatmul.msk.f32.gmra.mxu0 %vm416_vm1, %v4082_v21  ;;  %v3500_v58 = vunpack.i.h.bf16 %v3498_v56  ;;  %v3499_v59 = vunpack.i.l.bf16 %v3498_v56  ;;  %v4318_v4 = vld [vmem:[%s6152_s2 + $0xa0] sm:$0xff]  ;;  %v4323_v19 = vpop.permute.xlu0 %3492 }
  0xe0   : > { %1069 = vmatpush.msrb.mxu2 %v3439_v23  ;;  %3108 = vmatmul.msk.f32.gmra.mxu1 %vm416_vm1, %v4289_v52  ;;  %v3495_v16 = vunpack.i.h.bf16 %v4323_v19  ;;  %v4342_v23 = vld [vmem:[%s6152_s2 + $0x80] sm:$0xff]  ;;  %v3494_v50 = vunpack.i.l.bf16 %v4323_v19 }
  0xe1   : > { %v1130_v61 = vsel %vm1127_vm5, %v3499_v59, %v3459_v53  ;;  %v1128_v62 = vsel %vm1127_vm5, %v3500_v58, %v3464_v55  ;;  %v3747_v53 = vmov 0   ;;  %v4505_v55 = vld [vmem:[%s6152_s2 + $0xd0] sm:$0xff]  ;;  %v1331_v58 = vsel %vm1328_vm6, %v3484_v18, %v3485_v51 }
  0xe2   : > { %1174 = vmatpush.msrb.mxu3 %v1130_v61  ;;  %1070 = vmatpush.msrb.mxu2 %v3440_v25  ;;  %v4359_v25 = vld [vmem:[%s6152_s2 + $0xa8] sm:$0xff]  ;;  %v1338_v22 = vsel %vm1328_vm6, %v3494_v50, %v3495_v16 }
  0xe3   : > { %3597 = vset.pattern.permute.xlu1 %v3747_v53  ;;  %3596 = vset.pattern.permute.xlu0 %v3747_v53 }
  0xe4   : > { %1175 = vmatpush.msrb.mxu3 %v1128_v62  ;;  %1071 = vmatpush.msrb.mxu2 %v3449_v32  ;;  %v4414_v8 = vpop.permute.xlu2 %3547 }
  0xe5   : > { %3598 = vset.pattern.permute.xlu2 %v3747_v53 }
  0xe6   : > { %3137 = vmatmul.msk.f32.vlgmr.msrb.gmra.mxu3 %vm416_vm1, %v4318_v4  ;;  %v4328_v54 = vpop.permute.xlu1 %3512  ;;  %1072 = vmatpush.msrb.mxu2 %v3450_v33  ;;  %v3475_v33 = vunpack.i.h.bf16 %v4175_v57 }
  0xe7   : > { %3090 = vmatmul.msk.f32.gmra.mxu2 %vm416_vm1, %v4082_v21  ;;  %3099 = vmatmul.msk.f32.gmra.mxu0 %vm416_vm1, %v4112_v34  ;;  %v1339_v21 = vsel %vm1328_vm6, %v3495_v16, %v3469_v63  ;;  %v3515_v7 = vunpack.i.h.bf16 %v4328_v54  ;;  %v4364_v27 = vpop.permute.xlu0 %3507 }
  0xe8   : > { %3125 = vmatmul.msk.f32.vlgmr.msrb.gmra.mxu1 %vm416_vm1, %v4342_v23  ;;  %1406 = vmatpush.msra.mxu3 %v1339_v21  ;;  %v3510_v15 = vunpack.i.h.bf16 %v4364_v27  ;;  %v1337_v37 = vsel %vm1328_vm6, %v3474_v3, %v3475_v33 }
  0xe9   : > { %v1330_v0 = vsel %vm1328_vm6, %v3515_v7, %v3484_v18 }
  0xea   : > { %1407 = vmatpush.msra.mxu3 %v1336_v10  ;;  %v1333_v9 = vsel %vm1328_vm6, %v3510_v15, %v3479_v1 }
  0xec   : > { %1408 = vmatpush.msra.mxu3 %v1333_v9  ;;  %v4438_v11 = vpop.permute.xlu2 %3562  ;;  %v1813_v9 = vld [vmem:[%s6153_s3 + $0x18] sm:$0xff] }
  0xed   : > { %v3565_v59 = vunpack.i.h.bf16 %v4438_v11  ;;  %v3564_v61 = vunpack.i.l.bf16 %v4438_v11  ;;  %1831 = vperm.xlu0 %3596, %v1813_v9  }
  0xee   : > { %3138 = vmatmul.msk.f32.gmra.mxu3 %vm416_vm1, %v4359_v25 }
  0xef   : > { %3091 = vmatmul.msk.f32.gmra.mxu2 %vm416_vm1, %v4112_v34  ;;  %3100 = vmatmul.msk.f32.gmra.mxu0 %vm416_vm1, %v4147_v45  ;;  %v4388_v34 = vpop.permute.xlu1 %3527  ;;  %v4493_v57 = vpop.permute.xlu0 %3522 }
  0xf0   : > { %3126 = vmatmul.msk.f32.gmra.mxu1 %vm416_vm1, %v4386_v12  ;;  %1409 = vmatpush.msra.mxu3 %v1330_v0  ;;  %v3520_v0 = vunpack.i.h.bf16 %v4334_v20  ;;  %v3525_v20 = vunpack.i.h.bf16 %v4493_v57  ;;  %v3530_v50 = vunpack.i.h.bf16 %v4388_v34  ;;  %v3529_v53 = vunpack.i.l.bf16 %v4388_v34  ;;  %v4635_v34 = vld [vmem:[%s6152_s2 + $0xe8] sm:$0xff] }
  0xf6   : > { %3139 = vmatmul.msk.f32.gmra.mxu3 %vm416_vm1, %v4400_v6 }
  0xf7   : > { %3092 = vmatmul.msk.f32.gmra.mxu2 %vm416_vm1, %v4147_v45  ;;  %3121 = vmatmul.msk.f32.vlgmr.msrb.gmra.mxu0 %vm416_vm1, %v4342_v23  ;;  %v4423_v24 = vpop.permute.xlu1 %3542  ;;  %v4428_v45 = vld [vmem:[%s6152_s2 + $0xb8] sm:$0xff]  ;;  %v4526_v10 = vpop.permute.xlu0 %3537 }
  0xf8   : > { %3127 = vmatmul.msk.f32.gmra.mxu1 %vm416_vm1, %v4419_v41  ;;  %v3578_v32 = vpop.permute.xlu2 %3577 }
  0xf9   : > { %v3579_v39 = vunpack.i.l.bf16 %v3578_v32  ;;  %v3580_v43 = vunpack.i.h.bf16 %v3578_v32  ;;  %v3524_v32 = vunpack.i.l.bf16 %v4493_v57 }
  0xfe   : > { %3140 = vmatmul.msk.f32.gmra.mxu3 %vm416_vm1, %v4428_v45 }
  0xff   : > { %3109 = vmatmul.msk.f32.vlgmr.msra.gmra.mxu2 %vm416_vm1, %v4196_v13  ;;  %3122 = vmatmul.msk.f32.gmra.mxu0 %vm416_vm1, %v4386_v12  ;;  %v4452_v28 = vpop.permute.xlu1 %3557  ;;  %v3470_v13 = vunpack.i.h.bf16 %v4246_v38  ;;  %v1334_v38 = vsel %vm1328_vm6, %v3479_v1, %v3480_v40  ;;  %v3509_v1 = vunpack.i.l.bf16 %v4364_v27  ;;  %v4574_v27 = vpop.permute.xlu0 %3552  ;;  %v3534_v40 = vunpack.i.l.bf16 %v4373_v29 }
 0x100   : > { %3128 = vmatmul.msk.f32.gmra.mxu1 %vm416_vm1, %v4443_v26  ;;  %v3559_v35 = vunpack.i.l.bf16 %v4452_v28  ;;  %v3560_v42 = vunpack.i.h.bf16 %v4452_v28  ;;  %1377 = vmatpush.msra.mxu2 %v1338_v22 }
 0x102   : > { %v1513_v46 = vsel %vm1501_vm7, %v3559_v35, %v3579_v39  ;;  %v1510_v47 = vsel %vm1501_vm7, %v3560_v42, %v3580_v43  ;;  %v3535_v39 = vunpack.i.h.bf16 %v4373_v29  ;;  %v1872_v43 = vld [vmem:[%s6155_s5 + $0x10] sm:$0xff]  ;;  %v4592_v29 = vld [vmem:[%s6152_s2 + $0xe0] sm:$0xff]  ;;  %v1509_v51 = vsel %vm1501_vm7, %v3525_v20, %v3560_v42 }
 0x103   : > { %1608 = vmatpush.msrb.mxu3 %v1513_v46  ;;  %v3539_v42 = vunpack.i.l.bf16 %v4526_v10 }
 0x104   : > { %v1505_v46 = vsel %vm1501_vm7, %v3534_v40, %v3535_v39  ;;  %v1506_v22 = vsel %vm1501_vm7, %v3535_v39, %v3564_v61  ;;  %v2149_v39 = vld [vmem:[%s6157_s7] sm:$0xff] }
 0x105   : > { %1609 = vmatpush.msrb.mxu3 %v1510_v47 }
 0x106   : > { %3157 = vmatmul.msk.f32.vlgmr.msra.gmra.mxu3 %vm416_vm1, %v4450_v30 }
 0x107   : > { %3110 = vmatmul.msk.f32.gmra.mxu2 %vm416_vm1, %v4232_v2  ;;  %3123 = vmatmul.msk.f32.gmra.mxu0 %vm416_vm1, %v4419_v41  ;;  %v1340_v2 = vsel %vm1328_vm6, %v3469_v63, %v3470_v13  ;;  %v3504_v63 = vunpack.i.l.bf16 %v4303_v60 }
 0x108   : > { %3145 = vmatmul.msk.f32.vlgmr.msra.gmra.mxu1 %vm416_vm1, %v4318_v4  ;;  %1435 = vmatpush.msrb.mxu0 %v1340_v2  ;;  %v1871_v2 = vld [vmem:[%s6155_s5 + $0x8] sm:$0xff] }
 0x109   : > { %v1335_v16 = vsel %vm1328_vm6, %v3504_v63, %v3505_v5  ;;  %v1332_v5 = vsel %vm1328_vm6, %v3509_v1, %v3510_v15  ;;  %v1511_v15 = vsel %vm1501_vm7, %v3519_v17, %v3520_v0  ;;  %1889 = vperm.xlu0 %3596, %v1871_v2   ;;  %v1874_v63 = vld [vmem:[%s6155_s5 + $0x20] sm:$0xff] }
 0x10a   : > { %1436 = vmatpush.msrb.mxu0 %v1337_v37  ;;  %1378 = vmatpush.msra.mxu2 %v1335_v16 }
 0x10b   : > { %1550 = vmatpush.msrb.mxu1 %v1511_v15  ;;  %v2150_v15 = vld [vmem:[%s6157_s7 + $0x8] sm:$0xff] }
 0x10c   : > { %1437 = vmatpush.msrb.mxu0 %v1334_v38  ;;  %1379 = vmatpush.msra.mxu2 %v1332_v5  ;;  %v1512_v38 = vsel %vm1501_vm7, %v3520_v0, %v3559_v35  ;;  %v1877_v0 = vld [vmem:[%s6155_s5 + $0x38] sm:$0xff] }
 0x10e   : > { %3158 = vmatmul.msk.f32.gmra.mxu3 %vm416_vm1, %v4473_v44  ;;  %v4487_v48 = vpop.permute.xlu1 %3572  ;;  %1438 = vmatpush.msrb.mxu0 %v1331_v58  ;;  %v1875_v58 = vld [vmem:[%s6155_s5 + $0x28] sm:$0xff] }
 0x10f   : > { %3111 = vmatmul.msk.f32.gmra.mxu2 %vm416_vm1, %v4265_v36  ;;  %3124 = vmatmul.msk.f32.gmra.mxu0 %vm416_vm1, %v4443_v26  ;;  %v1812_v36 = vld [vmem:[%s6153_s3 + $0x10] sm:$0xff]  ;;  %v3575_v16 = vunpack.i.h.bf16 %v4487_v48 }
 0x110   : > { %3146 = vmatmul.msk.f32.gmra.mxu1 %vm416_vm1, %v4359_v25  ;;  %1826 = vperm.xlu1 %3597, %v1812_v36  }
 0x111   : > { %1904 = vperm.xlu0 %3596, %v1874_v63   ;;  %v1876_v63 = vld [vmem:[%s6155_s5 + $0x30] sm:$0xff] }
 0x114   : > { %v4507_v56 = vpop.f32.mrf.mxu0 }
 0x115   : > { %v4514_v62 = vpop.f32.mrf.mxu1  ;;  %v4617_v35 = vpop.permute.xlu0 %3567 }
 0x116   : > { %3159 = vmatmul.msk.f32.gmra.mxu3 %vm416_vm1, %v4505_v55  ;;  %v3588_v3 = vpop.permute.xlu1 %3587  ;;  %v3569_v36 = vunpack.i.l.bf16 %v4617_v35 }
 0x117   : > { %3112 = vmatmul.msk.f32.gmra.mxu2 %vm416_vm1, %v4289_v52  ;;  %3141 = vmatmul.msk.f32.vlgmr.msra.gmra.mxu0 %vm416_vm1, %v4318_v4  ;;  %v3590_v49 = vunpack.i.h.bf16 %v3588_v3  ;;  %v3589_v21 = vunpack.i.l.bf16 %v3588_v3  ;;  %v3514_v52 = vunpack.i.l.bf16 %v4328_v54  ;;  %v3545_v54 = vunpack.i.h.bf16 %v4423_v24 }
 0x118   : > { %3147 = vmatmul.msk.f32.gmra.mxu1 %vm416_vm1, %v4400_v6  ;;  %1816 = vperm.xlu1 %3597, %v1810_v31   ;;  %v3554_v31 = vunpack.i.l.bf16 %v4574_v27 }
 0x119   : > { %v1507_v18 = vsel %vm1501_vm7, %v3564_v61, %v3589_v21  ;;  %v1504_v19 = vsel %vm1501_vm7, %v3565_v59, %v3590_v49  ;;  %v1329_v33 = vsel %vm1328_vm6, %v3514_v52, %v3515_v7  ;;  %v1684_v49 = vsel %vm1674_vm8, %v3529_v53, %v3530_v50  ;;  %1919 = vperm.xlu0 %3596, %v1877_v0   ;;  %v2155_v53 = vld [vmem:[%s6157_s7 + $0x30] sm:$0xff]  ;;  %v3593_v0 = vpop.permute.xlu2 %3592 }
 0x11a   : > { %v4538_v4 = vpop.f32.mrf.mxu2  ;;  %1610 = vmatpush.msrb.mxu3 %v1507_v18  ;;  %1380 = vmatpush.msra.mxu2 %v1329_v33  ;;  %v1685_v21 = vsel %vm1674_vm8, %v3530_v50, %v3569_v36  ;;  %v3550_v18 = vunpack.i.h.bf16 %v4414_v8  ;;  %v3574_v52 = vunpack.i.l.bf16 %v4487_v48  ;;  %v1503_v5 = vsel %vm1501_vm7, %v3545_v54, %v3565_v59  ;;  %v1811_v59 = vld [vmem:[%s6153_s3 + $0x8] sm:$0xff] }
 0x11b   : > { %1723 = vmatpush.msra.mxu0 %v1684_v49  ;;  %1821 = vperm.xlu2 %3598, %v1811_v59   ;;  %v1880_v59 = vld [vmem:[%s6155_s5 + $0x50] sm:$0xff] }
 0x11c   : > { %v4556_v60 = vpop.f32.mrf.mxu0  ;;  %1611 = vmatpush.msrb.mxu3 %v1504_v19  ;;  %v3549_v19 = vunpack.i.l.bf16 %v4414_v8  ;;  %v4677_v8 = vld [vmem:[%s6152_s2 + $0xf0] sm:$0xff] }
 0x11d   : > { %v4561_v13 = vpop.f32.mrf.mxu1 }
 0x11e   : > { %3160 = vmatmul.msk.f32.gmra.mxu3 %vm416_vm1, %v4554_v14 }
 0x11f   : > { %3129 = vmatmul.msk.f32.vlgmr.msrb.gmra.mxu2 %vm416_vm1, %v4342_v23  ;;  %3142 = vmatmul.msk.f32.gmra.mxu0 %vm416_vm1, %v4359_v25  ;;  %v3544_v23 = vunpack.i.l.bf16 %v4423_v24  ;;  %v1508_v25 = vsel %vm1501_vm7, %v3524_v32, %v3525_v20  ;;  %v1678_v20 = vsel %vm1674_vm8, %v3549_v19, %v3550_v18  ;;  %v1679_v32 = vsel %vm1674_vm8, %v3550_v18, %v3574_v52 }
 0x120   : > { %3148 = vmatmul.msk.f32.gmra.mxu1 %vm416_vm1, %v4428_v45  ;;  %1894 = vperm.xlu1 %3597, %v1872_v43   ;;  %v2153_v43 = vld [vmem:[%s6157_s7 + $0x20] sm:$0xff] }
 0x121   : > { %1551 = vmatpush.msrb.mxu1 %v1508_v25  ;;  %1579 = vmatpush.msrb.mxu2 %v1512_v38  ;;  %v1502_v57 = vsel %vm1501_vm7, %v3544_v23, %v3545_v54  ;;  %v1870_v23 = vld [vmem:[%s6155_s5] sm:$0xff] }
 0x122   : > { %v4583_v7 = vpop.f32.mrf.mxu2  ;;  %2163 = vperm.xlu0 %3596, %v2149_v39   ;;  %v4851_v39 = vld [vmem:[%s6152_s2 + $0x118] sm:$0xff] }
 0x123   : > { %1552 = vmatpush.msrb.mxu1 %v1505_v46  ;;  %1580 = vmatpush.msrb.mxu2 %v1509_v51 }
 0x124   : > { %v4597_v37 = vpop.f32.mrf.mxu0  ;;  %1884 = vperm.xlu2 %3598, %v1870_v23  }
 0x125   : > { %v4603_v47 = vpop.f32.mrf.mxu1  ;;  %1553 = vmatpush.msrb.mxu1 %v1502_v57  ;;  %1581 = vmatpush.msrb.mxu2 %v1506_v22  ;;  %v1873_v57 = vld [vmem:[%s6155_s5 + $0x18] sm:$0xff] }
 0x126   : > { %3177 = vmatmul.msk.f32.vlgmr.msrb.gmra.mxu3 %vm416_vm1, %v4592_v29 }
 0x127   : > { %3130 = vmatmul.msk.f32.gmra.mxu2 %vm416_vm1, %v4386_v12  ;;  %3143 = vmatmul.msk.f32.gmra.mxu0 %vm416_vm1, %v4400_v6  ;;  %v3540_v12 = vunpack.i.h.bf16 %v4526_v10  ;;  %v3570_v6 = vunpack.i.h.bf16 %v4617_v35 }
 0x128   : > { %3169 = vmatmul.msk.f32.vlgmr.msrb.gmra.mxu1 %vm416_vm1, %v4592_v29  ;;  %1909 = vperm.xlu1 %3597, %v1875_v58  }
 0x129   : > { %1752 = vmatpush.msra.mxu1 %v1685_v21  ;;  %v1681_v1 = vsel %vm1674_vm8, %v3539_v42, %v3540_v12  ;;  %v1682_v61 = vsel %vm1674_vm8, %v3540_v12, %v3570_v6  ;;  %1582 = vmatpush.msrb.mxu2 %v1503_v5  ;;  %v4776_v42 = vpop.f32.mrf.mxu3  ;;  %v2158_v21 = vld [vmem:[%s6157_s7 + $0x48] sm:$0xff]  ;;  %v3594_v5 = vunpack.i.l.bf16 %v3593_v0 }
 0x12a   : > { %v4624_v28 = vpop.f32.mrf.mxu2  ;;  %1724 = vmatpush.msra.mxu0 %v1681_v1  ;;  %v3583_v1 = vpop.permute.xlu0 %3582 }
 0x12b   : > { %1753 = vmatpush.msra.mxu1 %v1682_v61  ;;  %v3584_v18 = vunpack.i.l.bf16 %v3583_v1  ;;  %v3585_v19 = vunpack.i.h.bf16 %v3583_v1  ;;  %v1680_v35 = vsel %vm1674_vm8, %v3574_v52, %v3594_v5  ;;  %v2151_v52 = vld [vmem:[%s6157_s7 + $0x10] sm:$0xff] }
 0x12c   : > { %v4640_v3 = vpop.f32.mrf.mxu0  ;;  %1725 = vmatpush.msra.mxu0 %v1678_v20  ;;  %1899 = vperm.xlu2 %3598, %v1873_v57   ;;  %v332_v1 = vld [vmem:[%s4896_s10 + $0x30] sm:$0xff] }
 0x12d   : > { %v4649_v10 = vpop.f32.mrf.mxu1  ;;  %1754 = vmatpush.msra.mxu1 %v1679_v32  ;;  %v1683_v32 = vsel %vm1674_vm8, %v3570_v6, %v3585_v19 }
 0x12e   : > { %3178 = vmatmul.msk.f32.gmra.mxu3 %vm416_vm1, %v4635_v34 }
 0x12f   : > { %3131 = vmatmul.msk.f32.gmra.mxu2 %vm416_vm1, %v4419_v41  ;;  %3144 = vmatmul.msk.f32.gmra.mxu0 %vm416_vm1, %v4428_v45  ;;  %v3555_v41 = vunpack.i.h.bf16 %v4574_v27  ;;  %v1878_v45 = vld [vmem:[%s6155_s5 + $0x40] sm:$0xff] }
 0x130   : > { %3170 = vmatmul.msk.f32.gmra.mxu1 %vm416_vm1, %v4635_v34  ;;  %1924 = vperm.xlu1 %3597, %v1878_v45   ;;  %v4817_v45 = vld [vmem:[%s6152_s2 + $0x110] sm:$0xff] }
 0x131   : > { %v1675_v11 = vsel %vm1674_vm8, %v3554_v31, %v3555_v41  ;;  %v1676_v24 = vsel %vm1674_vm8, %v3555_v41, %v3575_v16  ;;  %v4812_v31 = vpop.f32.mrf.mxu3 }
 0x132   : > { %v4667_v9 = vpop.f32.mrf.mxu2  ;;  %1726 = vmatpush.msra.mxu0 %v1675_v11  ;;  %1755 = vmatpush.msra.mxu1 %v1676_v24  ;;  %v1881_v11 = vld [vmem:[%s6155_s5 + $0x58] sm:$0xff] }
 0x134   : > { %v4682_v17 = vpop.f32.mrf.mxu0  ;;  %1914 = vperm.xlu2 %3598, %v1876_v63  }
 0x135   : > { %v4693_v33 = vpop.f32.mrf.mxu1 }
 0x136   : > { %3179 = vmatmul.msk.f32.gmra.mxu3 %vm416_vm1, %v4677_v8 }
 0x137   : > { %3132 = vmatmul.msk.f32.gmra.mxu2 %vm416_vm1, %v4443_v26  ;;  %3161 = vmatmul.msk.f32.vlgmr.msrb.gmra.mxu0 %vm416_vm1, %v4450_v30  ;;  %v4718_v26 = vld [vmem:[%s6152_s2 + $0xf8] sm:$0xff] }
 0x138   : > { %3171 = vmatmul.msk.f32.gmra.mxu1 %vm416_vm1, %v4677_v8  ;;  %2168 = vperm.xlu1 %3597, %v2150_v15  }
 0x139   : > { %v726_v48 = vpop.f32.mrf.mxu3 }
 0x13a   : > { %v4710_v27 = vpop.f32.mrf.mxu2 }
 0x13c   : > { %v4723_v40 = vpop.f32.mrf.mxu0 }
 0x13d   : > { %v4725_v54 = vpop.f32.mrf.mxu1 }
 0x13e   : > { %3180 = vmatmul.msk.f32.gmra.mxu3 %vm416_vm1, %v4718_v26 }
 0x13f   : > { %3153 = vmatmul.msk.f32.vlgmr.msra.gmra.mxu2 %vm416_vm1, %v4450_v30  ;;  %3162 = vmatmul.msk.f32.gmra.mxu0 %vm416_vm1, %v4473_v44  ;;  %v2152_v30 = vld [vmem:[%s6157_s7 + $0x18] sm:$0xff] }
 0x140   : > { %3172 = vmatmul.msk.f32.gmra.mxu1 %vm416_vm1, %v4718_v26  ;;  %2178 = vperm.xlu0 %3596, %v2152_v30  }
 0x141   : > { %2183 = vperm.xlu1 %3597, %v2153_v43   ;;  %v2154_v43 = vld [vmem:[%s6157_s7 + $0x28] sm:$0xff]  ;;  %v729_v57 = vpop.f32.mrf.mxu3 }
 0x142   : > { %v545_v25 = vpop.f32.mrf.mxu2 }
 0x143   : > { %v4742_v2 = vadd.f32 %v545_v25, %v4507_v56  ;;  %v4758_v56 = vld [vmem:[%s6152_s2 + $0x100] sm:$0xff] }
 0x144   : > { %v4747_v46 = vpop.f32.mrf.mxu0 }
 0x145   : > { %v4749_v38 = vpop.f32.mrf.mxu1 }
 0x147   : > { %3154 = vmatmul.msk.f32.gmra.mxu2 %vm416_vm1, %v4473_v44  ;;  %3163 = vmatmul.msk.f32.gmra.mxu0 %vm416_vm1, %v4505_v55  ;;  %v2156_v44 = vld [vmem:[%s6157_s7 + $0x38] sm:$0xff] }
 0x148   : > { %3189 = vmatmul.msk.f32.vlgmr.msra.gmra.mxu1 %vm416_vm1, %v4758_v56  ;;  %2193 = vperm.xlu0 %3596, %v2155_v53  }
 0x149   : > { %2198 = vperm.xlu1 %3597, %v2156_v44  }
 0x14a   : > { %v548_v51 = vpop.f32.mrf.mxu2 }
 0x14b   : > { %v4769_v50 = vadd.f32 %v548_v51, %v4556_v60  ;;  %v4787_v60 = vld [vmem:[%s6152_s2 + $0x108] sm:$0xff] }
 0x14c   : > { %v4774_v12 = vpop.f32.mrf.mxu0 }
 0x14d   : > { %v4778_v58 = vpop.f32.mrf.mxu1 }
 0x14f   : > { %3155 = vmatmul.msk.f32.gmra.mxu2 %vm416_vm1, %v4505_v55  ;;  %3164 = vmatmul.msk.f32.gmra.mxu0 %vm416_vm1, %v4554_v14  ;;  %v2159_v55 = vld [vmem:[%s6157_s7 + $0x50] sm:$0xff] }
 0x150   : > { %3190 = vmatmul.msk.f32.gmra.mxu1 %vm416_vm1, %v4787_v60  ;;  %2208 = vperm.xlu0 %3596, %v2158_v21  }
 0x151   : > { %2213 = vperm.xlu1 %3597, %v2159_v55  }
 0x152   : > { %v551_v22 = vpop.f32.mrf.mxu2 }
 0x153   : > { %v552_v49 = vadd.f32 %v551_v22, %v4597_v37  ;;  %v1686_v37 = vsel %vm1674_vm8, %v3569_v36, %v3584_v18  ;;  %v3595_v36 = vunpack.i.h.bf16 %v3593_v0  ;;  %v335_v22 = vld [vmem:[%s4896_s10 + $0x48] sm:$0xff]  ;;  %v326_v0 = vld [vmem:[%s4896_s10] sm:$0xff] }
 0x154   : > { %v4801_v61 = vpop.f32.mrf.mxu0  ;;  %1781 = vmatpush.msra.mxu2 %v1686_v37  ;;  %v329_v37 = vld [vmem:[%s4896_s10 + $0x18] sm:$0xff] }
 0x155   : > { %v4803_v41 = vpop.f32.mrf.mxu1 }
 0x156   : > { %1782 = vmatpush.msra.mxu2 %v1683_v32 }
 0x157   : > { %3156 = vmatmul.msk.f32.gmra.mxu2 %vm416_vm1, %v4554_v14  ;;  %3185 = vmatmul.msk.f32.vlgmr.msra.gmra.mxu0 %vm416_vm1, %v4758_v56  ;;  %v1879_v14 = vld [vmem:[%s6155_s5 + $0x48] sm:$0xff] }
 0x158   : > { %3191 = vmatmul.msk.f32.gmra.mxu1 %vm416_vm1, %v4817_v45  ;;  %1929 = vperm.xlu2 %3598, %v1879_v14  }
 0x159   : > { %1934 = vperm.xlu0 %3596, %v1880_v59   ;;  %1939 = vperm.xlu1 %3597, %v1881_v11  }
 0x15a   : > { %v554_v20 = vpop.f32.mrf.mxu2  ;;  %1783 = vmatpush.msra.mxu2 %v1680_v35 }
 0x15b   : > { %v555_v24 = vadd.f32 %v554_v20, %v4640_v3  ;;  %v1677_v3 = vsel %vm1674_vm8, %v3575_v16, %v3595_v36 }
 0x15c   : > { %v4834_v15 = vpop.f32.mrf.mxu0  ;;  %1784 = vmatpush.msra.mxu2 %v1677_v3  ;;  %v581_v3 = vadd.f32 %v4747_v46, %v4538_v4  ;;  %v4955_v46 = vld [vmem:[%s6156_s6] sm:$0xff] }
 0x15d   : > { %v4839_v6 = vpop.f32.mrf.mxu1 }
 0x15f   : > { %3173 = vmatmul.msk.f32.vlgmr.msrb.gmra.mxu2 %vm416_vm1, %v4592_v29  ;;  %3186 = vmatmul.msk.f32.gmra.mxu0 %vm416_vm1, %v4787_v60 }
 0x160   : > { %3192 = vmatmul.msk.f32.gmra.mxu1 %vm416_vm1, %v4851_v39  ;;  %2173 = vperm.xlu2 %3598, %v2151_v52   ;;  %v771_v52 = vadd.f32 %v729_v57, %v581_v3 }
 0x161   : > { %2269 = vmatpush.msrb.mxu2 %v335_v22  ;;  %v607_v22 = vadd.f32 %v4649_v10, %v4624_v28  ;;  %v610_v28 = vadd.f32 %v4693_v33, %v4667_v9 }
 0x162   : > { %v694_v29 = vpop.f32.mrf.mxu2 }
 0x163   : > { %v4859_v16 = vadd.f32 %v694_v29, %v4742_v2  ;;  %2270 = vmatpush.msrb.mxu2 %v332_v1 }
 0x164   : > { %v4861_v23 = vpop.f32.mrf.mxu0 }
 0x165   : > { %v4863_v25 = vpop.f32.mrf.mxu1  ;;  %2271 = vmatpush.msrb.mxu2 %v329_v37 }
 0x167   : > { %3174 = vmatmul.msk.f32.gmra.mxu2 %vm416_vm1, %v4635_v34  ;;  %3187 = vmatmul.msk.f32.gmra.mxu0 %vm416_vm1, %v4817_v45  ;;  %v2157_v34 = vld [vmem:[%s6157_s7 + $0x40] sm:$0xff] }
 0x168   : > { %2188 = vperm.xlu2 %3598, %v2154_v43   ;;  %2272 = vmatpush.msrb.mxu2 %v326_v0 }
 0x16a   : > { %v697_v30 = vpop.f32.mrf.mxu2 }
 0x16b   : > { %v4873_v2 = vadd.f32 %v697_v30, %v4769_v50  ;;  %v604_v30 = vadd.f32 %v4603_v47, %v4583_v7 }
 0x16c   : > { %v4875_v51 = vpop.f32.mrf.mxu0 }
 0x16d   : > { %v4877_v44 = vpop.f32.mrf.mxu1 }
 0x16f   : > { %3175 = vmatmul.msk.f32.gmra.mxu2 %vm416_vm1, %v4677_v8  ;;  %3188 = vmatmul.msk.f32.gmra.mxu0 %vm416_vm1, %v4851_v39  ;;  %v4898_v8 = vpop.f32.mrf.mxu3 }
 0x170   : > { %2203 = vperm.xlu2 %3598, %v2157_v34  }
 0x172   : > { %v700_v53 = vpop.f32.mrf.mxu2 }
 0x173   : > { %v4887_v50 = vadd.f32 %v700_v53, %v552_v49  ;;  %v2160_v49 = vld [vmem:[%s6157_s7 + $0x58] sm:$0xff] }
 0x174   : > { %v4889_v63 = vpop.f32.mrf.mxu0 }
 0x175   : > { %v4903_v55 = vpop.f32.mrf.mxu1 }
 0x177   : > { %3176 = vmatmul.msk.f32.gmra.mxu2 %vm416_vm1, %v4718_v26  ;;  %v575_v26 = vadd.f32 %v4682_v17, %v4514_v62  ;;  %v913_v14 = vpop.f32.mrf.mxu3 }
 0x178   : > { %2218 = vperm.xlu2 %3598, %v2160_v49   ;;  %v4969_v49 = vld [vmem:[%s6156_s6 + $0x8] sm:$0xff] }
 0x179   : > { %v765_v5 = vadd.f32 %v4812_v31, %v575_v26 }
 0x17a   : > { %v703_v21 = vpop.f32.mrf.mxu2 }
 0x17b   : > { %v4909_v18 = vadd.f32 %v703_v21, %v555_v24  ;;  %v578_v24 = vadd.f32 %v4723_v40, %v4561_v13 }
 0x17c   : > { %v4911_v19 = vpop.f32.mrf.mxu0 }
 0x17d   : > { %v4920_v36 = vpop.f32.mrf.mxu1  ;;  %v768_v62 = vadd.f32 %v726_v48, %v578_v24 }
 0x17f   : > { %3193 = vmatmul.msk.f32.vlgmr.msra.gmra.mxu2 %vm416_vm1, %v4758_v56  ;;  %v916_v17 = vpop.f32.mrf.mxu3 }
 0x182   : > { %v884_v20 = vpop.f32.mrf.mxu2 }
 0x183   : > { %v4922_v32 = vadd.f32 %v884_v20, %v765_v5 }
 0x184   : > { %v4924_v11 = vpop.f32.mrf.mxu0 }
 0x185   : > { %v4934_v31 = vpop.f32.mrf.mxu1 }
 0x187   : > { %3194 = vmatmul.msk.f32.gmra.mxu2 %vm416_vm1, %v4787_v60  ;;  %v919_v60 = vpop.f32.mrf.mxu3 }
 0x18a   : > { %v887_v56 = vpop.f32.mrf.mxu2 }
 0x18b   : > { %v4930_v59 = vadd.f32 %v887_v56, %v768_v62  ;;  %v613_v62 = vadd.f32 %v4725_v54, %v4710_v27 }
 0x18c   : > { %v4932_v35 = vpop.f32.mrf.mxu0 }
 0x18d   : > { %v1238_v29 = vpop.f32.mrf.mxu1 }
 0x18f   : > { %3195 = vmatmul.msk.f32.gmra.mxu2 %vm416_vm1, %v4817_v45  ;;  %v766_v45 = vadd.f32 %v4801_v61, %v604_v30  ;;  %v922_v57 = vpop.f32.mrf.mxu3  ;;  %v769_v61 = vadd.f32 %v4834_v15, %v607_v22  ;;  %v772_v15 = vadd.f32 %v4861_v23, %v610_v28  ;;  %v775_v23 = vadd.f32 %v4875_v51, %v613_v62  ;;  %v5005_v30 = vld [vmem:[%s6156_s6 + $0x20] sm:$0xff] }
 0x191   : > { %v930_v1 = vadd.f32 %v916_v17, %v769_v61  ;;  %v933_v5 = vadd.f32 %v919_v60, %v772_v15  ;;  %v4995_v17 = vld [vmem:[%s6156_s6 + $0x18] sm:$0xff]  ;;  %v936_v3 = vadd.f32 %v922_v57, %v775_v23 }
 0x192   : > { %v890_v13 = vpop.f32.mrf.mxu2 }
 0x193   : > { %v4940_v40 = vadd.f32 %v890_v13, %v771_v52 }
 0x194   : > { %v4942_v48 = vpop.f32.mrf.mxu0 }
 0x195   : > { %v1241_v34 = vpop.f32.mrf.mxu1 }
 0x197   : > { %3196 = vmatmul.msk.f32.gmra.mxu2 %vm416_vm1, %v4851_v39  ;;  %v927_v39 = vadd.f32 %v913_v14, %v766_v45  ;;  %v4974_v21 = vpop.f32.mrf.mxu3  ;;  %v4983_v14 = vld [vmem:[%s6156_s6 + $0x10] sm:$0xff] }
 0x19a   : > { %v4946_v43 = vpop.f32.mrf.mxu2 }
 0x19c   : > { %v4950_v4 = vpop.f32.mrf.mxu0 }
 0x19d   : > { %v1244_v26 = vpop.f32.mrf.mxu1 }
 0x19f   : > { %3233 = vmatmul.msk.f32.vlgmr.msrb.gmra.mxu2 %vm416_vm1, %v4955_v46  ;;  %v1180_v20 = vpop.f32.mrf.mxu3 }
 0x1a2   : > { %v1074_v53 = vpop.f32.mrf.mxu2 }
 0x1a3   : > { %v4962_v7 = vadd.f32 %v1074_v53, %v927_v39 }
 0x1a4   : > { %v4964_v47 = vpop.f32.mrf.mxu0 }
 0x1a5   : > { %v4997_v56 = vpop.f32.mrf.mxu1 }
 0x1a7   : > { %3234 = vmatmul.msk.f32.gmra.mxu2 %vm416_vm1, %v4969_v49  ;;  %v1183_v27 = vpop.f32.mrf.mxu3 }
 0x1aa   : > { %v1077_v37 = vpop.f32.mrf.mxu2 }
 0x1ab   : > { %v1091_v10 = vadd.f32 %v1077_v37, %v930_v1 }
 0x1ac   : > { %v4978_v0 = vpop.f32.mrf.mxu0 }
 0x1ad   : > { %v1252_v13 = vadd.f32 %v1238_v29, %v1091_v10  ;;  %v1558_v39 = vpop.f32.mrf.mxu1  ;;  %v5014_v29 = vld [vmem:[%s6156_s6 + $0x28] sm:$0xff] }
 0x1ae   : > { %6173 = vst [vmem:[#allocation2_spill] sm:$0xff] %v5014_v29 }
 0x1af   : > { %3235 = vmatmul.msk.f32.gmra.mxu2 %vm416_vm1, %v4983_v14  ;;  %v1186_v61 = vpop.f32.mrf.mxu3 }
 0x1b2   : > { %v1080_v24 = vpop.f32.mrf.mxu2 }
 0x1b3   : > { %v1094_v9 = vadd.f32 %v1080_v24, %v933_v5 }
 0x1b4   : > { %v4990_v33 = vpop.f32.mrf.mxu0 }
 0x1b5   : > { %v1255_v53 = vadd.f32 %v1241_v34, %v1094_v9  ;;  %v1561_v1 = vpop.f32.mrf.mxu1  ;;  %v5023_v34 = vld [vmem:[%s6156_s6 + $0x30] sm:$0xff] }
 0x1b6   : > { %6174 = vst [vmem:[#allocation3_spill] sm:$0xff] %v5023_v34 }
 0x1b7   : > { %3236 = vmatmul.msk.f32.gmra.mxu2 %vm416_vm1, %v4995_v17  ;;  %v5029_v5 = vpop.f32.mrf.mxu3 }
 0x1ba   : > { %v1083_v52 = vpop.f32.mrf.mxu2 }
 0x1bb   : > { %v1097_v60 = vadd.f32 %v1083_v52, %v936_v3 }
 0x1bc   : > { %v1443_v54 = vpop.f32.mrf.mxu0 }
 0x1bd   : > { %v5007_v45 = vadd.f32 %v1443_v54, %v1252_v13  ;;  %v1258_v28 = vadd.f32 %v1244_v26, %v1097_v60  ;;  %v1564_v62 = vpop.f32.mrf.mxu1  ;;  %v5034_v26 = vld [vmem:[%s6156_s6 + $0x38] sm:$0xff]  ;;  %v5043_v13 = vld [vmem:[%s6156_s6 + $0x40] sm:$0xff]  ;;  %v931_v54 = vadd.f32 %v4803_v41, %v4887_v50 }
 0x1be   : > { %6175 = vst [vmem:[#allocation4_spill] sm:$0xff] %v5034_v26 }
 0x1bf   : > { %3237 = vmatmul.msk.f32.gmra.mxu2 %vm416_vm1, %v5005_v30  ;;  %v5038_v23 = vpop.f32.mrf.mxu3 }
 0x1c2   : > { %v1382_v51 = vpop.f32.mrf.mxu2 }
 0x1c4   : > { %v1446_v22 = vpop.f32.mrf.mxu0 }
 0x1c5   : > { %v5016_v57 = vadd.f32 %v1446_v22, %v1255_v53  ;;  %v5045_v60 = vpop.f32.mrf.mxu1  ;;  %v928_v53 = vadd.f32 %v4778_v58, %v4873_v2  ;;  %v934_v22 = vadd.f32 %v4839_v6, %v4909_v18  ;;  %v5066_v6 = vld [vmem:[%s6156_s6 + $0x48] sm:$0xff] }
 0x1c7   : > { %3238 = vmatmul.msk.f32.gmra.mxu2 %vm416_vm1, %v5014_v29  ;;  %v1417_v2 = vpop.f32.mrf.mxu3 }
 0x1ca   : > { %v1385_v37 = vpop.f32.mrf.mxu2 }
 0x1cc   : > { %v1449_v10 = vpop.f32.mrf.mxu0 }
 0x1cd   : > { %v5025_v15 = vadd.f32 %v1449_v10, %v1258_v28  ;;  %v1092_v28 = vadd.f32 %v4924_v11, %v931_v54  ;;  %v925_v10 = vadd.f32 %v4749_v38, %v4859_v16  ;;  %v5068_v38 = vpop.f32.mrf.mxu1 }
 0x1cf   : > { %3239 = vmatmul.msk.f32.gmra.mxu2 %vm416_vm1, %v5023_v34  ;;  %v1095_v34 = vadd.f32 %v4932_v35, %v934_v22  ;;  %v1086_v41 = vadd.f32 %v4889_v63, %v925_v10  ;;  %v1253_v58 = vadd.f32 %v1183_v27, %v1092_v28  ;;  %v5073_v63 = vpop.permute.xlu1 %1826  ;;  %v584_v27 = vadd.f32 %v4774_v12, %v4776_v42  ;;  %v5086_v42 = vpop.permute.xlu0 %1831 }
 0x1d0   : > { %v1093_v12 = vadd.f32 %v4903_v55, %v4940_v40 }
 0x1d1   : > { %v1256_v11 = vadd.f32 %v1186_v61, %v1095_v34  ;;  %v1247_v16 = vadd.f32 %v4974_v21, %v1086_v41  ;;  %v5080_v21 = vld [vmem:[%s6156_s6 + $0x50] sm:$0xff] }
 0x1d2   : > { %v1388_v24 = vpop.f32.mrf.mxu2  ;;  %v1254_v55 = vadd.f32 %v4964_v47, %v1093_v12 }
 0x1d3   : > { %v1458_v54 = vadd.f32 %v1388_v24, %v1253_v58 }
 0x1d4   : > { %v1728_v9 = vpop.f32.mrf.mxu0 }
 0x1d5   : > { %v1631_v22 = vadd.f32 %v1561_v1, %v1458_v54 }
 0x1d7   : > { %3240 = vmatmul.msk.f32.gmra.mxu2 %vm416_vm1, %v5034_v26  ;;  %v1089_v26 = vadd.f32 %v4911_v19, %v928_v53  ;;  %v1452_v53 = vadd.f32 %v1382_v51, %v1247_v16 }
 0x1d9   : > { %v1250_v18 = vadd.f32 %v1180_v20, %v1089_v26  ;;  %v1625_v26 = vadd.f32 %v4997_v56, %v1452_v53  ;;  %v1763_v56 = vpop.f32.mrf.mxu1 }
 0x1da   : > { %v1391_v3 = vpop.f32.mrf.mxu2 }
 0x1db   : > { %v1455_v19 = vadd.f32 %v1385_v37, %v1250_v18  ;;  %v1461_v35 = vadd.f32 %v1391_v3, %v1256_v11  ;;  %v774_v37 = vadd.f32 %v4898_v8, %v584_v27  ;;  %v1798_v1 = vadd.f32 %v1728_v9, %v1625_v26  ;;  %v5093_v8 = vpop.permute.xlu2 %1821  ;;  %v5101_v9 = vpop.permute.xlu1 %1816 }
 0x1dc   : > { %v1731_v52 = vpop.f32.mrf.mxu0 }
 0x1dd   : > { %v1628_v20 = vadd.f32 %v1558_v39, %v1455_v19  ;;  %v1634_v61 = vadd.f32 %v1564_v62, %v1461_v35  ;;  %v1420_v39 = vpop.f32.mrf.mxu3  ;;  %v935_v51 = vadd.f32 %v4946_v43, %v774_v37  ;;  %v1087_v43 = vadd.f32 %v4863_v25, %v4922_v32  ;;  %v5119_v35 = vld [vmem:[%s6154_s4] sm:$0xff] }
 0x1de   : > { %v1834_v54 = vadd.f32 %v5101_v9, %v1798_v1  ;;  %v1459_v25 = vadd.f32 %v1417_v2, %v1254_v55  ;;  %v337_v55 = vld [vmem:[%s4896_s10 + $0x58] sm:$0xff] }
 0x1df   : > { %3241 = vmatmul.msk.f32.gmra.mxu2 %vm416_vm1, %v5043_v13  ;;  %v1801_v3 = vadd.f32 %v1731_v52, %v1628_v20  ;;  %v1090_v52 = vadd.f32 %v4877_v44, %v4930_v59  ;;  %v1096_v18 = vadd.f32 %v4920_v36, %v935_v51  ;;  %v5109_v44 = vld [vmem:[%s6156_s6 + $0x58] sm:$0xff]  ;;  %v1248_v59 = vadd.f32 %v4942_v48, %v1087_v43  ;;  %v336_v48 = vld [vmem:[%s4896_s10 + $0x50] sm:$0xff]  ;;  %v331_v43 = vld [vmem:[%s4896_s10 + $0x28] sm:$0xff] }
 0x1e1   : > { %v1837_v40 = vadd.f32 %v5093_v8, %v1801_v3  ;;  %v1251_v11 = vadd.f32 %v4950_v4, %v1090_v52  ;;  %v1257_v32 = vadd.f32 %v4978_v0, %v1096_v18  ;;  %v1846_v4 = vmax.f32 %v1834_v54, 0.0  ;;  %v5135_v3 = vld [vmem:[%s6154_s4 + $0x8] sm:$0xff]  ;;  %v333_v52 = vld [vmem:[%s4896_s10 + $0x38] sm:$0xff]  ;;  %v5169_v18 = vld [vmem:[%s6154_s4 + $0x30] sm:$0xff] }
 0x1e2   : > { %v5060_v29 = vpop.f32.mrf.mxu2  ;;  %v1453_v0 = vadd.f32 %v5029_v5, %v1248_v59 }
 0x1e3   : > { %v1849_v47 = vmax.f32 %v1837_v40, 0.0  ;;  %v1456_v36 = vadd.f32 %v5038_v23, %v1251_v11  ;;  %v1462_v2 = vadd.f32 %v1420_v39, %v1257_v32  ;;  %v334_v40 = vld [vmem:[%s4896_s10 + $0x40] sm:$0xff]  ;;  %v328_v11 = vld [vmem:[%s4896_s10 + $0x10] sm:$0xff] }
 0x1e4   : > { %v1734_v50 = vpop.f32.mrf.mxu0  ;;  %v1626_v20 = vadd.f32 %v5060_v29, %v1453_v0 }
 0x1e5   : > { %v1804_v34 = vadd.f32 %v1734_v50, %v1631_v22  ;;  %v5121_v27 = vpop.f32.mrf.mxu3  ;;  %v1766_v22 = vpop.f32.mrf.mxu1 }
 0x1e6   : > { %v1799_v26 = vadd.f32 %v5045_v60, %v1626_v20 }
 0x1e7   : > { %3242 = vmatmul.msk.f32.gmra.mxu2 %vm416_vm1, %v5066_v6  ;;  %v1840_v62 = vadd.f32 %v5073_v63, %v1804_v34 }
 0x1e9   : > { %v1852_v16 = vmax.f32 %v1840_v62, 0.0  ;;  %v5144_v62 = vld [vmem:[%s6154_s4 + $0x10] sm:$0xff] }
 0x1ea   : > { %v1587_v28 = vpop.f32.mrf.mxu2 }
 0x1eb   : > { %v1629_v53 = vadd.f32 %v1587_v28, %v1456_v36  ;;  %v5188_v36 = vld [vmem:[%s6154_s4 + $0x38] sm:$0xff] }
 0x1ec   : > { %v1737_v24 = vpop.f32.mrf.mxu0 }
 0x1ed   : > { %v1807_v10 = vadd.f32 %v1737_v24, %v1634_v61  ;;  %v1802_v24 = vadd.f32 %v5068_v38, %v1629_v53  ;;  %v1616_v12 = vpop.f32.mrf.mxu3  ;;  %v1835_v38 = vadd.f32 %v5101_v9, %v1799_v26  ;;  %v5276_v26 = vpop.permute.xlu0 %1889 }
 0x1ef   : > { %v1843_v41 = vadd.f32 %v5086_v42, %v1807_v10  ;;  %3243 = vmatmul.msk.f32.gmra.mxu2 %vm416_vm1, %v5080_v21  ;;  %v1838_v10 = vadd.f32 %v5093_v8, %v1802_v24  ;;  %v1847_v1 = vmax.f32 %v1835_v38, 0.0  ;;  %v6177_v24 = vld [vmem:[#allocation3_spill] sm:$0xff] }
 0x1f1   : > { %v1855_v58 = vmax.f32 %v1843_v41, 0.0  ;;  %v1850_v51 = vmax.f32 %v1838_v10, 0.0  ;;  %v5149_v41 = vld [vmem:[%s6154_s4 + $0x28] sm:$0xff] }
 0x1f2   : > { %v1590_v50 = vpop.f32.mrf.mxu2 }
 0x1f3   : > { %1990 = vmatpush.msra.mxu3 %v1855_v58  ;;  %v1632_v19 = vadd.f32 %v1590_v50, %v1459_v25  ;;  %v5164_v50 = vld [vmem:[%s6154_s4 + $0x18] sm:$0xff]  ;;  %v1862_v25 = vld [vmem:[%s6154_s4 + $0x20] sm:$0xff] }
 0x1f5   : > { %1991 = vmatpush.msra.mxu3 %v1852_v16  ;;  %v1805_v61 = vadd.f32 %v1763_v56, %v1632_v19  ;;  %v1619_v58 = vpop.f32.mrf.mxu3  ;;  %v1249_v16 = vadd.f32 %v4934_v31, %v4962_v7  ;;  %v1630_v19 = vadd.f32 %v1616_v12, %v5007_v45 }
 0x1f7   : > { %1992 = vmatpush.msra.mxu3 %v1849_v47  ;;  %3244 = vmatmul.msk.f32.gmra.mxu2 %vm416_vm1, %v5109_v44  ;;  %v1841_v5 = vadd.f32 %v5073_v63, %v1805_v61  ;;  %v1454_v32 = vadd.f32 %v4990_v33, %v1249_v16  ;;  %v1633_v47 = vadd.f32 %v1619_v58, %v5016_v57  ;;  %v327_v61 = vld [vmem:[%s4896_s10 + $0x8] sm:$0xff] }
 0x1f9   : > { %1993 = vmatpush.msra.mxu3 %v1846_v4  ;;  %v1853_v60 = vmax.f32 %v1841_v5, 0.0  ;;  %v1627_v33 = vadd.f32 %v5121_v27, %v1454_v32  ;;  %v5227_v27 = vld [vmem:[%s6154_s4 + $0x50] sm:$0xff]  ;;  %v5284_v5 = vpop.permute.xlu2 %1884 }
 0x1fa   : > { %v1593_v23 = vpop.f32.mrf.mxu2  ;;  %3197 = vmatmul.msk.f32.vlgmr.msra.gmra.mxu3 %vm416_vm1, %v5119_v35 }
 0x1fb   : > { %v1635_v34 = vadd.f32 %v1593_v23, %v1462_v2  ;;  %2322 = vmatpush.msrb.mxu3 %v336_v48  ;;  %v5204_v23 = vld [vmem:[%s6154_s4 + $0x40] sm:$0xff] }
 0x1fd   : > { %v1808_v37 = vadd.f32 %v1766_v22, %v1635_v34  ;;  %2323 = vmatpush.msrb.mxu3 %v333_v52  ;;  %v1622_v59 = vpop.f32.mrf.mxu3  ;;  %v5239_v34 = vld [vmem:[%s6154_s4 + $0x58] sm:$0xff] }
 0x1fe   : > { %v1636_v4 = vadd.f32 %v1622_v59, %v5025_v15 }
 0x1ff   : > { %v1844_v28 = vadd.f32 %v5086_v42, %v1808_v37 }
 0x201   : > { %v1856_v29 = vmax.f32 %v1844_v28, 0.0  ;;  %v5286_v28 = vpop.permute.xlu1 %1894 }
 0x202   : > { %v1786_v39 = vpop.f32.mrf.mxu2  ;;  %3198 = vmatmul.msk.f32.gmra.mxu3 %vm416_vm1, %v5135_v3 }
 0x203   : > { %2043 = vmatpush.msrb.mxu0 %v1856_v29  ;;  %3304 = vmatpush.msrb.mxu1 %v1856_v29  ;;  %v1800_v15 = vadd.f32 %v1786_v39, %v1627_v33 }
 0x205   : > { %2044 = vmatpush.msrb.mxu0 %v1853_v60  ;;  %3305 = vmatpush.msrb.mxu1 %v1853_v60  ;;  %v1836_v22 = vadd.f32 %v5101_v9, %v1800_v15  ;;  %v5217_v9 = vld [vmem:[%s6154_s4 + $0x48] sm:$0xff] }
 0x207   : > { %2045 = vmatpush.msrb.mxu0 %v1850_v51  ;;  %3306 = vmatpush.msrb.mxu1 %v1850_v51 }
 0x209   : > { %2046 = vmatpush.msrb.mxu0 %v1847_v1  ;;  %3307 = vmatpush.msrb.mxu1 %v1847_v1  ;;  %v5298_v29 = vpop.permute.xlu1 %1909 }
 0x20a   : > { %v1789_v56 = vpop.f32.mrf.mxu2  ;;  %3199 = vmatmul.msk.f32.gmra.mxu3 %vm416_vm1, %v5144_v62  ;;  %3209 = vmatmul.msk.f32.vlgmr.msrb.gmra.mxu0 %vm416_vm1, %v5119_v35 }
 0x20b   : > { %3214 = vmatmul.msk.f32.vlgmr.msrb.gmra.mxu1 %vm416_vm1, %v5149_v41  ;;  %2375 = vmatpush.msra.mxu0 %v337_v55  ;;  %v1803_v57 = vadd.f32 %v1789_v56, %v1630_v19 }
 0x20d   : > { %2376 = vmatpush.msra.mxu0 %v334_v40  ;;  %v1839_v53 = vadd.f32 %v5093_v8, %v1803_v57  ;;  %v1848_v8 = vmax.f32 %v1836_v22, 0.0 }
 0x20f   : > { %2377 = vmatpush.msra.mxu0 %v331_v43 }
 0x211   : > { %2378 = vmatpush.msra.mxu0 %v328_v11  ;;  %v5314_v60 = vpop.permute.xlu1 %1924 }
 0x212   : > { %v1792_v54 = vpop.f32.mrf.mxu2  ;;  %3200 = vmatmul.msk.f32.gmra.mxu3 %vm416_vm1, %v5164_v50  ;;  %3210 = vmatmul.msk.f32.gmra.mxu0 %vm416_vm1, %v5135_v3 }
 0x213   : > { %3215 = vmatmul.msk.f32.gmra.mxu1 %vm416_vm1, %v5169_v18  ;;  %v1806_v48 = vadd.f32 %v1792_v54, %v1633_v47 }
 0x215   : > { %v1842_v45 = vadd.f32 %v5073_v63, %v1806_v48  ;;  %v330_v63 = vld [vmem:[%s4896_s10 + $0x20] sm:$0xff] }
 0x216   : > { %2324 = vmatpush.msrb.mxu3 %v330_v63 }
 0x217   : > { %v1854_v20 = vmax.f32 %v1842_v45, 0.0 }
 0x218   : > { %2325 = vmatpush.msrb.mxu3 %v327_v61 }
 0x219   : > { %v5335_v43 = vpop.permute.xlu1 %2168 }
 0x21a   : > { %v1795_v31 = vpop.f32.mrf.mxu2  ;;  %3201 = vmatmul.msk.f32.gmra.mxu3 %vm416_vm1, %v1862_v25  ;;  %3211 = vmatmul.msk.f32.gmra.mxu0 %vm416_vm1, %v5144_v62 }
 0x21b   : > { %v1809_v7 = vadd.f32 %v1795_v31, %v1636_v4  ;;  %3216 = vmatmul.msk.f32.gmra.mxu1 %vm416_vm1, %v5188_v36 }
 0x21d   : > { %v1845_v0 = vadd.f32 %v5086_v42, %v1809_v7  ;;  %v1851_v42 = vmax.f32 %v1839_v53, 0.0 }
 0x21f   : > { %v1857_v2 = vmax.f32 %v1845_v0, 0.0 }
 0x221   : > { %2096 = vmatpush.msra.mxu1 %v1857_v2  ;;  %v5364_v53 = vpop.permute.xlu1 %2183 }
 0x222   : > { %3202 = vmatmul.msk.f32.gmra.mxu3 %vm416_vm1, %v5149_v41  ;;  %3212 = vmatmul.msk.f32.gmra.mxu0 %vm416_vm1, %v5164_v50  ;;  %v2274_v37 = vpop.f32.mrf.mxu2 }
 0x223   : > { %3217 = vmatmul.msk.f32.gmra.mxu1 %vm416_vm1, %v5204_v23 }
 0x224   : > { %2097 = vmatpush.msra.mxu1 %v1854_v20 }
 0x226   : > { %2098 = vmatpush.msra.mxu1 %v1851_v42 }
 0x228   : > { %2099 = vmatpush.msra.mxu1 %v1848_v8 }
 0x22a   : > { %3203 = vmatmul.msk.f32.gmra.mxu3 %vm416_vm1, %v5169_v18  ;;  %3213 = vmatmul.msk.f32.gmra.mxu0 %vm416_vm1, %v1862_v25 }
 0x22b   : > { %3218 = vmatmul.msk.f32.gmra.mxu1 %vm416_vm1, %v5217_v9 }
 0x232   : > { %3204 = vmatmul.msk.f32.gmra.mxu3 %vm416_vm1, %v5188_v36  ;;  %3257 = vmatmul.msk.f32.vlgmr.msra.gmra.mxu0 %vm416_vm1, %v4955_v46 }
 0x233   : > { %3219 = vmatmul.msk.f32.gmra.mxu1 %vm416_vm1, %v5227_v27 }
 0x23a   : > { %3205 = vmatmul.msk.f32.gmra.mxu3 %vm416_vm1, %v5204_v23  ;;  %3258 = vmatmul.msk.f32.gmra.mxu0 %vm416_vm1, %v4969_v49 }
 0x23b   : > { %3220 = vmatmul.msk.f32.gmra.mxu1 %vm416_vm1, %v5239_v34 }
 0x242   : > { %3206 = vmatmul.msk.f32.gmra.mxu3 %vm416_vm1, %v5217_v9  ;;  %3259 = vmatmul.msk.f32.gmra.mxu0 %vm416_vm1, %v4983_v14 }
 0x243   : > { %3221 = vmatmul.msk.f32.vlgmr.msra.gmra.mxu1 %vm416_vm1, %v5119_v35  ;;  %v6176_v35 = vld [vmem:[#allocation2_spill] sm:$0xff] }
 0x24a   : > { %3207 = vmatmul.msk.f32.gmra.mxu3 %vm416_vm1, %v5227_v27  ;;  %3260 = vmatmul.msk.f32.gmra.mxu0 %vm416_vm1, %v4995_v17 }
 0x24b   : > { %3222 = vmatmul.msk.f32.gmra.mxu1 %vm416_vm1, %v5135_v3  ;;  %v5292_v3 = vpop.permute.xlu0 %1904 }
 0x252   : > { %3208 = vmatmul.msk.f32.gmra.mxu3 %vm416_vm1, %v5239_v34  ;;  %3261 = vmatmul.msk.f32.gmra.mxu0 %vm416_vm1, %v5005_v30 }
 0x253   : > { %3223 = vmatmul.msk.f32.gmra.mxu1 %vm416_vm1, %v5144_v62 }
 0x25a   : > { %3245 = vmatmul.msk.f32.vlgmr.msrb.gmra.mxu3 %vm416_vm1, %v4955_v46  ;;  %3262 = vmatmul.msk.f32.gmra.mxu0 %vm416_vm1, %v6176_v35  ;;  %v6178_v46 = vld [vmem:[#allocation4_spill] sm:$0xff] }
 0x25b   : > { %3224 = vmatmul.msk.f32.gmra.mxu1 %vm416_vm1, %v5164_v50 }
 0x262   : > { %3246 = vmatmul.msk.f32.gmra.mxu3 %vm416_vm1, %v4969_v49  ;;  %3263 = vmatmul.msk.f32.gmra.mxu0 %vm416_vm1, %v6177_v24  ;;  %v2277_v49 = vpop.f32.mrf.mxu2 }
 0x263   : > { %3225 = vmatmul.msk.f32.gmra.mxu1 %vm416_vm1, %v1862_v25 }
 0x26a   : > { %3247 = vmatmul.msk.f32.gmra.mxu3 %vm416_vm1, %v4983_v14  ;;  %3264 = vmatmul.msk.f32.gmra.mxu0 %vm416_vm1, %v6178_v46  ;;  %v5296_v14 = vpop.permute.xlu2 %1899  ;;  %v2280_v10 = vpop.f32.mrf.mxu2 }
 0x26b   : > { %3226 = vmatmul.msk.f32.gmra.mxu1 %vm416_vm1, %v5149_v41 }
 0x272   : > { %3248 = vmatmul.msk.f32.gmra.mxu3 %vm416_vm1, %v4995_v17  ;;  %3265 = vmatmul.msk.f32.gmra.mxu0 %vm416_vm1, %v5043_v13  ;;  %v5306_v17 = vpop.permute.xlu0 %1919  ;;  %v5308_v39 = vpop.permute.xlu2 %1914 }
 0x273   : > { %3227 = vmatmul.msk.f32.gmra.mxu1 %vm416_vm1, %v5169_v18  ;;  %v2283_v38 = vpop.f32.mrf.mxu2  ;;  %v2278_v18 = vadd.f32 %v2277_v49, %v5335_v43 }
 0x27a   : > { %3249 = vmatmul.msk.f32.gmra.mxu3 %vm416_vm1, %v5005_v30  ;;  %3266 = vmatmul.msk.f32.gmra.mxu0 %vm416_vm1, %v5066_v6  ;;  %v5319_v1 = vpop.permute.xlu0 %2163  ;;  %v5326_v52 = vpop.permute.xlu2 %1929 }
 0x27b   : > { %3228 = vmatmul.msk.f32.gmra.mxu1 %vm416_vm1, %v5188_v36  ;;  %v2275_v41 = vadd.f32 %v2274_v37, %v5319_v1  ;;  %v2286_v40 = vpop.f32.mrf.mxu2 }
 0x27c   : > { %v2287_v20 = vadd.f32 %v2286_v40, %v5364_v53 }
 0x27d   : > { %v1995_v12 = vpop.f32.mrf.mxu3 }
 0x27e   : > { %v1996_v51 = vadd.f32 %v1995_v12, %v5284_v5 }
 0x280   : > { %v2416_v55 = vadd.f32 %v2275_v41, %v1996_v51 }
 0x282   : > { %3250 = vmatmul.msk.f32.gmra.mxu3 %vm416_vm1, %v6176_v35  ;;  %3267 = vmatmul.msk.f32.gmra.mxu0 %vm416_vm1, %v5080_v21  ;;  %v3269_v11 = vmul.f32 -1.442695, %v2416_v55  ;;  %v5346_v25 = vpop.permute.xlu2 %2173  ;;  %v5357_v0 = vpop.permute.xlu0 %2178 }
 0x283   : > { %3229 = vmatmul.msk.f32.gmra.mxu1 %vm416_vm1, %v5204_v23  ;;  %v2289_v36 = vpop.f32.mrf.mxu2  ;;  %v2281_v19 = vadd.f32 %v2280_v10, %v5346_v25  ;;  %v2284_v45 = vadd.f32 %v2283_v38, %v5357_v0 }
 0x284   : > { %3599 = vpow2.f32 %v3269_v11 }
 0x285   : > { %v1998_v30 = vpop.f32.mrf.mxu3 }
 0x286   : > { %v1999_v58 = vadd.f32 %v1998_v30, %v5276_v26 }
 0x287   : > { %v5321_v62 = vpop.f32.mrf.mxu0 }
 0x288   : > { %v5324_v56 = vpop.f32.mrf.mxu1  ;;  %v2419_v16 = vadd.f32 %v2278_v18, %v1999_v58 }
 0x28a   : > { %3251 = vmatmul.msk.f32.gmra.mxu3 %vm416_vm1, %v6177_v24  ;;  %3268 = vmatmul.msk.f32.gmra.mxu0 %vm416_vm1, %v5109_v44  ;;  %v3272_v32 = vmul.f32 -1.442695, %v2419_v16  ;;  %v3600_v31 = vpop.eup %3599  ;;  %v5379_v37 = vpop.permute.xlu2 %2188 }
 0x28b   : > { %3230 = vmatmul.msk.f32.gmra.mxu1 %vm416_vm1, %v5217_v9  ;;  %v5359_v15 = vadd.f32 1.0, %v3600_v31  ;;  %v2290_v10 = vadd.f32 %v2289_v36, %v5379_v37 }
 0x28c   : > { %3601 = vpow2.f32 %v3272_v32  ;;  %v5398_v32 = vpop.permute.xlu0 %2193 }
 0x28d   : > { %v2001_v50 = vpop.f32.mrf.mxu3  ;;  %3603 = vrcp.f32 %v5359_v15  ;;  %6180 = vst [vmem:[#allocation3_spill] sm:$0xff] %v5398_v32  ;;  %vm2481_vm10 = vweird.f32 %v5359_v15 }
 0x28e   : > { %v2002_v47 = vadd.f32 %v2001_v50, %v5286_v28 }
 0x28f   : > { %v5338_v54 = vpop.f32.mrf.mxu0 }
 0x290   : > { %v5340_v59 = vpop.f32.mrf.mxu1  ;;  %v2422_v7 = vadd.f32 %v2281_v19, %v2002_v47 }
 0x292   : > { %3252 = vmatmul.msk.f32.gmra.mxu3 %vm416_vm1, %v6178_v46  ;;  %v3275_v2 = vmul.f32 -1.442695, %v2422_v7  ;;  %v3602_v22 = vpop.eup %3601 }
 0x293   : > { %3231 = vmatmul.msk.f32.gmra.mxu1 %vm416_vm1, %v5227_v27  ;;  %v5373_v61 = vadd.f32 1.0, %v3602_v22  ;;  %v5377_v24 = vpop.eup %3603 }
 0x294   : > { %3605 = vpow2.f32 %v3275_v2  ;;  %vm2482_vm9 = vweird.f32 %v5377_v24 }
 0x295   : > { %v2004_v4 = vpop.f32.mrf.mxu3  ;;  %vm5438_vm11 = vmor %vm2481_vm10, %vm2482_vm9  ;;  %vm2526_vm14 = vweird.f32 %v5373_v61 }
 0x296   : > { %v2005_v57 = vadd.f32 %v2004_v4, %v5296_v14 }
 0x297   : > { %v5350_v48 = vpop.f32.mrf.mxu0 }
 0x298   : > { %v5352_v33 = vpop.f32.mrf.mxu1  ;;  %v2425_v63 = vadd.f32 %v2284_v45, %v2005_v57 }
 0x29a   : > { %3253 = vmatmul.msk.f32.gmra.mxu3 %vm416_vm1, %v5043_v13  ;;  %v2292_v13 = vpop.f32.mrf.mxu2  ;;  %v3606_v49 = vpop.eup %3605 }
 0x29b   : > { %3232 = vmatmul.msk.f32.gmra.mxu1 %vm416_vm1, %v5239_v34  ;;  %v3278_v34 = vmul.f32 -1.442695, %v2425_v63  ;;  %v5390_v55 = vadd.f32 1.0, %v3606_v49  ;;  %v2293_v36 = vadd.f32 %v2292_v13, %v5398_v32 }
 0x29d   : > { %v2007_v23 = vpop.f32.mrf.mxu3 }
 0x29e   : > { %v2008_v42 = vadd.f32 %v2007_v23, %v5292_v3 }
 0x29f   : > { %v5369_v8 = vpop.f32.mrf.mxu0 }
 0x2a0   : > { %v2656_v9 = vadd.f32 %v2287_v20, %v2008_v42  ;;  %v5371_v27 = vpop.f32.mrf.mxu1 }
 0x2a2   : > { %v3281_v35 = vmul.f32 -1.442695, %v2656_v9  ;;  %3254 = vmatmul.msk.f32.gmra.mxu3 %vm416_vm1, %v5066_v6  ;;  %v2477_v6 = vmul.f32 %v5377_v24, %v5359_v15  ;;  %v2295_v41 = vpop.f32.mrf.mxu2  ;;  %v5422_v9 = vpop.permute.xlu1 %2198 }
 0x2a3   : > { %6182 = vst [vmem:[#allocation5_spill] sm:$0xff] %v5422_v9 }
 0x2a4   : > { %3607 = vpow2.f32 %v3281_v35  ;;  %v2478_v16 = vsub.f32 1.0, %v2477_v6  ;;  %v2296_v35 = vadd.f32 %v2295_v41, %v5422_v9 }
 0x2a5   : > { %3609 = vrcp.f32 %v5373_v61  ;;  %v2010_v46 = vpop.f32.mrf.mxu3 }
 0x2a6   : > { %3611 = vpow2.f32 %v3278_v34  ;;  %v2011_v12 = vadd.f32 %v2010_v46, %v5298_v29  ;;  %v2479_v45 = vmul.f32 %v5377_v24, %v2478_v16  ;;  %v2487_v46 = vand.u32 2147483648, %v5359_v15 }
 0x2a7   : > { %v5384_v38 = vpop.f32.mrf.mxu0 }
 0x2a8   : > { %v2659_v30 = vadd.f32 %v2290_v10, %v2011_v12  ;;  %v5386_v51 = vpop.f32.mrf.mxu1  ;;  %v2480_v34 = vadd.f32 %v5377_v24, %v2479_v45  ;;  %v2485_v10 = vand.u32 2147483647, %v5359_v15 }
 0x2a9   : > { %6179 = vst [vmem:[#allocation2_spill] sm:$0xff] %v5386_v51 }
 0x2aa   : > { %v3608_v40 = vpop.eup %3607  ;;  %v3284_v58 = vmul.f32 -1.442695, %v2659_v30  ;;  %3255 = vmatmul.msk.f32.gmra.mxu3 %vm416_vm1, %v5080_v21  ;;  %v2298_v20 = vpop.f32.mrf.mxu2  ;;  %v2484_v15 = vsel %vm5438_vm11, %v5377_v24, %v2480_v34  ;;  %vm2486_vm12 = vcmp.eq.f32.partialorder %v2485_v10, 8.507059e+37  ;;  %v2530_v24 = vand.u32 2147483647, %v5373_v61 }
 0x2ab   : > { %v5394_v50 = vpop.eup %3609  ;;  %v5396_v18 = vadd.f32 1.0, %v3608_v40  ;;  %v2577_v10 = vand.u32 2147483648, %v5390_v55 }
 0x2ac   : > { %v3612_v11 = vpop.eup %3611  ;;  %3613 = vpow2.f32 %v3284_v58  ;;  %v2522_v31 = vmul.f32 %v5394_v50, %v5373_v61  ;;  %v5443_v58 = vpop.permute.xlu2 %2203  ;;  %vm2527_vm13 = vweird.f32 %v5394_v50  ;;  %vm2531_vm0 = vcmp.eq.f32.partialorder %v2530_v24, 8.507059e+37 }
 0x2ad   : > { %3615 = vrcp.f32 %v5390_v55  ;;  %v2013_v47 = vpop.f32.mrf.mxu3  ;;  %v5404_v19 = vadd.f32 1.0, %v3612_v11  ;;  %6185 = vst [vmem:[#allocation6_spill] sm:$0xff] %v5443_v58  ;;  %vm5470_vm15 = vmor %vm2526_vm14, %vm2527_vm13  ;;  %vm2721_vm6 = vweird.f32 %v5396_v18 }
 0x2ae   : > { %3617 = vrcp.f32 %v5396_v18  ;;  %v2014_v4 = vadd.f32 %v2013_v47, %v5308_v39  ;;  %v2523_v42 = vsub.f32 1.0, %v2522_v31 }
 0x2af   : > { %v5406_v21 = vpop.f32.mrf.mxu0  ;;  %3619 = vrcp.f32 %v5404_v19  ;;  %vm2616_vm5 = vweird.f32 %v5404_v19 }
 0x2b0   : > { %v2662_v7 = vadd.f32 %v2293_v36, %v2014_v4  ;;  %v5410_v57 = vpop.f32.mrf.mxu1  ;;  %v2524_v40 = vmul.f32 %v5394_v50, %v2523_v42  ;;  %v2299_v36 = vadd.f32 %v2298_v20, %v5443_v58  ;;  %v2488_v4 = vor.u32 1.1754944e-38, %v2487_v46 }
 0x2b1   : > { %6181 = vst [vmem:[#allocation4_spill] sm:$0xff] %v5410_v57  ;;  %v2532_v20 = vand.u32 2147483648, %v5373_v61 }
 0x2b2   : > { %v3614_v2 = vpop.eup %3613  ;;  %v3287_v23 = vmul.f32 -1.442695, %v2662_v7  ;;  %3256 = vmatmul.msk.f32.gmra.mxu3 %vm416_vm1, %v5109_v44  ;;  %v2489_v42 = vsel %vm2486_vm12, %v2488_v4, %v2484_v15  ;;  %v2301_v34 = vpop.f32.mrf.mxu2  ;;  %vm2571_vm1 = vweird.f32 %v5390_v55 }
 0x2b3   : > { %v5415_v22 = vpop.eup %3615  ;;  %v5418_v63 = vadd.f32 1.0, %v3614_v2  ;;  %v2896_v41 = vmul.f32 %v2489_v42, %v2299_v36 }
 0x2b4   : > { %v5420_v13 = vpop.eup %3617  ;;  %3621 = vpow2.f32 %v3287_v23  ;;  %v2567_v12 = vmul.f32 %v5415_v22, %v5390_v55  ;;  %vm2572_vm3 = vweird.f32 %v5415_v22 }
 0x2b5   : > { %v2016_v44 = vpop.f32.mrf.mxu3  ;;  %3623 = vrcp.f32 %v5418_v63  ;;  %v2717_v30 = vmul.f32 %v5420_v13, %v5396_v18  ;;  %v5450_v47 = vpop.eup %3619  ;;  %vm2722_vm4 = vweird.f32 %v5420_v13  ;;  %vm5507_vm7 = vmor %vm2571_vm1, %vm2572_vm3  ;;  %vm2766_vm13 = vweird.f32 %v5418_v63 }
 0x2b6   : > { %v2017_v49 = vadd.f32 %v2016_v44, %v5306_v17  ;;  %v2568_v45 = vsub.f32 1.0, %v2567_v12  ;;  %v2612_v12 = vmul.f32 %v5450_v47, %v5404_v19  ;;  %vm5520_vm8 = vmor %vm2721_vm6, %vm2722_vm4  ;;  %vm2617_vm9 = vweird.f32 %v5450_v47 }
 0x2b7   : > { %v5436_v6 = vpop.f32.mrf.mxu0  ;;  %v2718_v2 = vsub.f32 1.0, %v2717_v30  ;;  %vm5561_vm12 = vmor %vm2616_vm5, %vm2617_vm9 }
 0x2b8   : > { %v2665_v11 = vadd.f32 %v2296_v35, %v2017_v49  ;;  %v5445_v16 = vpop.f32.mrf.mxu1  ;;  %v2525_v35 = vadd.f32 %v5394_v50, %v2524_v40  ;;  %v2575_v49 = vand.u32 2147483647, %v5390_v55  ;;  %v2569_v61 = vmul.f32 %v5415_v22, %v2568_v45  ;;  %v3719_v55 = vld [vmem:[%s4896_s10] sm:$0xff] }
 0x2b9   : > { %6186 = vst [vmem:[#allocation7_spill] sm:$0xff] %v5445_v16  ;;  %v2719_v15 = vmul.f32 %v5420_v13, %v2718_v2  ;;  %v2533_v16 = vor.u32 1.1754944e-38, %v2532_v20  ;;  %v2578_v2 = vor.u32 1.1754944e-38, %v2577_v10  ;;  %v2613_v57 = vsub.f32 1.0, %v2612_v12 }
 0x2ba   : > { %v3622_v31 = vpop.eup %3621  ;;  %v3290_v7 = vmul.f32 -1.442695, %v2665_v11  ;;  %v5475_v11 = vpop.permute.xlu0 %2208  ;;  %v2529_v36 = vsel %vm5470_vm15, %v5394_v50, %v2525_v35  ;;  %vm5487_vm2 = vcmp.eq.f32.partialorder %v2575_v49, 8.507059e+37  ;;  %v2570_v40 = vadd.f32 %v5415_v22, %v2569_v61 }
 0x2bb   : > { %v5454_v23 = vadd.f32 1.0, %v3622_v31  ;;  %v5457_v44 = vpop.eup %3623  ;;  %6189 = vst [vmem:[#allocation8_spill] sm:$0xff] %v5475_v11  ;;  %v2534_v9 = vsel %vm2531_vm0, %v2533_v16, %v2529_v36  ;;  %v2720_v20 = vadd.f32 %v5420_v13, %v2719_v15  ;;  %v2725_v49 = vand.u32 2147483647, %v5396_v18 }
 0x2bc   : > { %3625 = vpow2.f32 %v3290_v7  ;;  %v2762_v4 = vmul.f32 %v5457_v44, %v5418_v63  ;;  %v2302_v7 = vadd.f32 %v2301_v34, %v5475_v11  ;;  %v2727_v34 = vand.u32 2147483648, %v5396_v18 }
 0x2bd   : > { %3627 = vrcp.f32 %v5454_v23  ;;  %v2019_v46 = vpop.f32.mrf.mxu3  ;;  %v2620_v10 = vand.u32 2147483647, %v5404_v19  ;;  %v2622_v61 = vand.u32 2147483648, %v5404_v19  ;;  %v2724_v36 = vsel %vm5520_vm8, %v5420_v13, %v2720_v20 }
 0x2be   : > { %v2020_v30 = vadd.f32 %v2019_v46, %v5314_v60  ;;  %v2763_v35 = vsub.f32 1.0, %v2762_v4  ;;  %v2381_v4 = vadd.f32 %v5406_v21, %v5319_v1  ;;  %v2574_v21 = vsel %vm5507_vm7, %v5415_v22, %v2570_v40 }
 0x2bf   : > { %v5480_v31 = vpop.f32.mrf.mxu0  ;;  %vm2726_vm10 = vcmp.eq.f32.partialorder %v2725_v49, 8.507059e+37  ;;  %v2579_v40 = vsel %vm5487_vm2, %v2578_v2, %v2574_v21  ;;  %vm2767_vm11 = vweird.f32 %v5457_v44  ;;  %v2772_v45 = vand.u32 2147483648, %v5418_v63 }
 0x2c0   : > { %v2908_v42 = vadd.f32 %v2896_v41, %v2020_v30  ;;  %v2101_v46 = vpop.f32.mrf.mxu1  ;;  %v2899_v30 = vmul.f32 %v2534_v9, %v2302_v7  ;;  %v2614_v41 = vmul.f32 %v5450_v47, %v2613_v57  ;;  %v2304_v57 = vpop.f32.mrf.mxu2  ;;  %v2764_v9 = vmul.f32 %v5457_v44, %v2763_v35  ;;  %vm5575_vm14 = vmor %vm2766_vm13, %vm2767_vm11 }
 0x2c1   : > { %v2102_v16 = vadd.f32 %v2101_v46, %v5284_v5  ;;  %v2728_v46 = vor.u32 1.1754944e-38, %v2727_v34  ;;  %v2384_v35 = vadd.f32 %v5436_v6, %v5335_v43  ;;  %v5542_v34 = vpop.permute.xlu1 %2213  ;;  %vm2621_vm15 = vcmp.eq.f32.partialorder %v2620_v10, 8.507059e+37  ;;  %v5594_v10 = vpop.permute.xlu2 %2218 }
 0x2c2   : > { %v3626_v58 = vpop.eup %3625  ;;  %3629 = vtanh.f32 %v2908_v42  ;;  %v2615_v51 = vadd.f32 %v5450_v47, %v2614_v41  ;;  %v2815_v41 = vand.u32 2147483647, %v5454_v23  ;;  %vm2811_vm2 = vweird.f32 %v5454_v23 }
 0x2c3   : > { %v5493_v50 = vpop.eup %3627  ;;  %v5495_v24 = vadd.f32 1.0, %v3626_v58  ;;  %v2418_v11 = vadd.f32 %v2381_v4, %v2102_v16  ;;  %v2729_v22 = vsel %vm2726_vm10, %v2728_v46, %v2724_v36  ;;  %v2765_v16 = vadd.f32 %v5457_v44, %v2764_v9 }
 0x2c4   : > { %v2807_v15 = vmul.f32 %v5493_v50, %v5454_v23  ;;  %v2623_v46 = vor.u32 1.1754944e-38, %v2622_v61  ;;  %vm2812_vm1 = vweird.f32 %v5493_v50  ;;  %vm2816_vm4 = vcmp.eq.f32.partialorder %v2815_v41, 8.507059e+37 }
 0x2c5   : > { %v2022_v12 = vpop.f32.mrf.mxu3  ;;  %3631 = vrcp.f32 %v5495_v24  ;;  %v3271_v2 = vmul.f32 -1.442695, %v2418_v11  ;;  %v2619_v11 = vsel %vm5561_vm12, %v5450_v47, %v2615_v51  ;;  %v2769_v51 = vsel %vm5575_vm14, %v5457_v44, %v2765_v16  ;;  %vm5604_vm3 = vmor %vm2811_vm2, %vm2812_vm1 }
 0x2c6   : > { %v2023_v18 = vadd.f32 %v2022_v12, %v5326_v52  ;;  %v2808_v58 = vsub.f32 1.0, %v2807_v15  ;;  %v5565_v15 = vpop.permute.xlu0 %1934  ;;  %vm2856_vm6 = vweird.f32 %v5495_v24 }
 0x2c7   : > { %v5529_v7 = vpop.f32.mrf.mxu0 }
 0x2c8   : > { %v3630_v42 = vpop.eup %3629  ;;  %v2911_v12 = vadd.f32 %v2899_v30, %v2023_v18  ;;  %v2104_v32 = vpop.f32.mrf.mxu1  ;;  %v2770_v18 = vand.u32 2147483647, %v5418_v63  ;;  %v2809_v9 = vmul.f32 %v5493_v50, %v2808_v58  ;;  %v2387_v58 = vadd.f32 %v5480_v31, %v5346_v25 }
 0x2c9   : > { %v2932_v13 = vsub.f32 %v3719_v55, %v3630_v42  ;;  %v2105_v20 = vadd.f32 %v2104_v32, %v5276_v26  ;;  %v2305_v32 = vadd.f32 %v2304_v57, %v5542_v34  ;;  %v2307_v61 = vpop.f32.mrf.mxu2 }
 0x2ca   : > { %3633 = vtanh.f32 %v2911_v12  ;;  %vm2771_vm0 = vcmp.eq.f32.partialorder %v2770_v18, 8.507059e+37  ;;  %v2810_v16 = vadd.f32 %v5493_v50, %v2809_v9  ;;  %v2308_v31 = vadd.f32 %v2307_v61, %v5594_v10  ;;  %v3721_v61 = vld [vmem:[%s4896_s10 + $0x30] sm:$0xff] }
 0x2cb   : > { %v2944_v49 = vmul.f32 %v2932_v13, %v2729_v22  ;;  %v2421_v6 = vadd.f32 %v2384_v35, %v2105_v20  ;;  %v5546_v30 = vpop.eup %3631  ;;  %v2902_v21 = vmul.f32 %v2579_v40, %v2305_v32  ;;  %3635 = vpow2.f32 %v3271_v2  ;;  %v3720_v22 = vld [vmem:[%s4896_s10 + $0x18] sm:$0xff] }
 0x2cc   : > { %v2852_v63 = vmul.f32 %v5546_v30, %v5495_v24  ;;  %v2773_v35 = vor.u32 1.1754944e-38, %v2772_v45  ;;  %v2624_v20 = vsel %vm2621_vm15, %v2623_v46, %v2619_v11  ;;  %v2817_v2 = vand.u32 2147483648, %v5454_v23 }
 0x2cd   : > { %v2956_v4 = vadd.f32 %v3630_v42, %v2944_v49  ;;  %v2025_v57 = vpop.f32.mrf.mxu3  ;;  %v3274_v47 = vmul.f32 -1.442695, %v2421_v6  ;;  %v2814_v23 = vsel %vm5604_vm3, %v5493_v50, %v2810_v16  ;;  %v2390_v50 = vadd.f32 %v5529_v7, %v5357_v0 }
 0x2ce   : > { %v2026_v36 = vadd.f32 %v2025_v57, %v5565_v15  ;;  %v2774_v44 = vsel %vm2771_vm0, %v2773_v35, %v2769_v51  ;;  %v2853_v6 = vsub.f32 1.0, %v2852_v63  ;;  %vm2857_vm5 = vweird.f32 %v5546_v30 }
 0x2cf   : > { %2968 = vst [vmem:[%s5553_s30] sm:$0xff] %v2956_v4  ;;  %v5586_v42 = vpop.f32.mrf.mxu0  ;;  %v5599_v4 = vpop.permute.xlu1 %1939  ;;  %vm5628_vm7 = vmor %vm2856_vm6, %vm2857_vm5  ;;  %v5664_v7 = vadd.f32 %v5324_v56, %v5298_v29 }
 0x2d0   : > { %v3634_v12 = vpop.eup %3633  ;;  %v2914_v55 = vadd.f32 %v2902_v21, %v2026_v36  ;;  %v2107_v13 = vpop.f32.mrf.mxu1  ;;  %v2905_v21 = vmul.f32 %v2624_v20, %v2308_v31  ;;  %v2854_v46 = vmul.f32 %v5546_v30, %v2853_v6  ;;  %v2860_v6 = vand.u32 2147483647, %v5495_v24 }
 0x2d1   : > { %v2935_v40 = vsub.f32 %v3720_v22, %v3634_v12  ;;  %v2108_v49 = vadd.f32 %v2107_v13, %v5286_v28  ;;  %v3636_v9 = vpop.eup %3635  ;;  %v2393_v19 = vadd.f32 %v5586_v42, %v5364_v53 }
 0x2d2   : > { %3637 = vtanh.f32 %v2914_v55  ;;  %v5614_v13 = vadd.f32 1.0, %v3636_v9  ;;  %vm2861_vm8 = vcmp.eq.f32.partialorder %v2860_v6, 8.507059e+37 }
 0x2d3   : > { %v2947_v32 = vmul.f32 %v2935_v40, %v2774_v44  ;;  %3639 = vpow2.f32 %v3274_v47  ;;  %v2424_v45 = vadd.f32 %v2387_v58, %v2108_v49  ;;  %v2818_v47 = vor.u32 1.1754944e-38, %v2817_v2 }
 0x2d4   : > { %v2855_v49 = vadd.f32 %v5546_v30, %v2854_v46  ;;  %v2862_v44 = vand.u32 2147483648, %v5495_v24  ;;  %vm2511_vm10 = vweird.f32 %v5614_v13 }
 0x2d5   : > { %v2959_v18 = vadd.f32 %v3634_v12, %v2947_v32  ;;  %v3277_v57 = vmul.f32 -1.442695, %v2424_v45  ;;  %v2028_v11 = vpop.f32.mrf.mxu3  ;;  %v2819_v22 = vsel %vm2816_vm4, %v2818_v47, %v2814_v23 }
 0x2d6   : > { %v2029_v36 = vadd.f32 %v2028_v11, %v5599_v4  ;;  %v2859_v41 = vsel %vm5628_vm7, %v5546_v30, %v2855_v49  ;;  %v2863_v24 = vor.u32 1.1754944e-38, %v2862_v44  ;;  %v2049_v30 = vadd.f32 %v5321_v62, %v5284_v5 }
 0x2d7   : > { %2972 = vst [vmem:[%s5553_s30 + $0x18] sm:$0xff] %v2959_v18  ;;  %v2395_v63 = vpop.f32.mrf.mxu0  ;;  %3641 = vpow2.f32 %v3277_v57 }
 0x2d8   : > { %v3638_v51 = vpop.eup %3637  ;;  %v2917_v12 = vadd.f32 %v2905_v21, %v2029_v36  ;;  %v2110_v35 = vpop.f32.mrf.mxu1  ;;  %v3722_v36 = vld [vmem:[%s4896_s10 + $0x48] sm:$0xff]  ;;  %v2864_v47 = vsel %vm2861_vm8, %v2863_v24, %v2859_v41  ;;  %v5670_v41 = vadd.f32 %v5340_v59, %v5308_v39  ;;  %v2515_v59 = vand.u32 2147483647, %v5614_v13 }
 0x2d9   : > { %v3640_v55 = vpop.eup %3639  ;;  %v2938_v58 = vsub.f32 %v3721_v61, %v3638_v51  ;;  %v2111_v20 = vadd.f32 %v2110_v35, %v5296_v14 }
 0x2da   : > { %3643 = vtanh.f32 %v2917_v12  ;;  %v5623_v16 = vadd.f32 1.0, %v3640_v55  ;;  %vm5713_vm11 = vcmp.eq.f32.partialorder %v2515_v59, 8.507059e+37 }
 0x2db   : > { %v2950_v40 = vmul.f32 %v2938_v58, %v2819_v22  ;;  %3645 = vrcp.f32 %v5614_v13  ;;  %v2427_v45 = vadd.f32 %v2390_v50, %v2111_v20  ;;  %v2396_v50 = vadd.f32 %v2395_v63, %v5379_v37 }
 0x2dc   : > { %3647 = vrcp.f32 %v5623_v16  ;;  %v2052_v63 = vadd.f32 %v5338_v54, %v5276_v26  ;;  %v5685_v26 = vadd.f32 %v5369_v8, %v5296_v14  ;;  %v6204_v8 = vld [vmem:[#allocation2_spill] sm:$0xff]  ;;  %vm2556_vm14 = vweird.f32 %v5623_v16 }
 0x2dd   : > { %v2962_v32 = vadd.f32 %v3638_v51, %v2950_v40  ;;  %v2327_v31 = vpop.f32.mrf.mxu3  ;;  %v3642_v2 = vpop.eup %3641  ;;  %v3280_v46 = vmul.f32 -1.442695, %v2427_v45 }
 0x2de   : > { %v2328_v57 = vadd.f32 %v2327_v31, %v5319_v1  ;;  %v5644_v51 = vadd.f32 1.0, %v3642_v2 }
 0x2df   : > { %2975 = vst [vmem:[%s5553_s30 + $0x30] sm:$0xff] %v2962_v32  ;;  %v2398_v9 = vpop.f32.mrf.mxu0  ;;  %3649 = vpow2.f32 %v3280_v46 }
 0x2e0   : > { %v3644_v18 = vpop.eup %3643  ;;  %v2113_v11 = vpop.f32.mrf.mxu1  ;;  %v2417_v55 = vadd.f32 %v2328_v57, %v2049_v30  ;;  %3651 = vrcp.f32 %v5644_v51  ;;  %vm2601_vm1 = vweird.f32 %v5644_v51 }
 0x2e1   : > { %v2941_v21 = vsub.f32 %v3722_v36, %v3644_v18  ;;  %v2114_v23 = vadd.f32 %v2113_v11, %v5292_v3  ;;  %v5646_v12 = vpop.eup %3645  ;;  %v5674_v11 = vadd.f32 %v5350_v48, %v5286_v28  ;;  %v5691_v28 = vadd.f32 %v5371_v27, %v5314_v60 }
 0x2e2   : > { %v5648_v20 = vpop.eup %3647  ;;  %v2507_v22 = vmul.f32 %v5646_v12, %v5614_v13  ;;  %v3270_v5 = vmul.f32 -1.442695, %v2417_v55  ;;  %v5695_v48 = vadd.f32 %v5384_v38, %v5292_v3  ;;  %vm2512_vm9 = vweird.f32 %v5646_v12 }
 0x2e3   : > { %v2953_v1 = vmul.f32 %v2941_v21, %v2864_v47  ;;  %v2658_v35 = vadd.f32 %v2393_v19, %v2114_v23  ;;  %v2552_v49 = vmul.f32 %v5648_v20, %v5623_v16  ;;  %v6205_v21 = vld [vmem:[#allocation3_spill] sm:$0xff]  ;;  %v2517_v38 = vand.u32 2147483648, %v5614_v13  ;;  %vm5722_vm12 = vmor %vm2511_vm10, %vm2512_vm9 }
 0x2e4   : > { %v2508_v6 = vsub.f32 1.0, %v2507_v22  ;;  %v2399_v46 = vadd.f32 %v2398_v9, %v6205_v21  ;;  %v2560_v9 = vand.u32 2147483647, %v5623_v16  ;;  %v2562_v55 = vand.u32 2147483648, %v5623_v16 }
 0x2e5   : > { %v2965_v61 = vadd.f32 %v3644_v18, %v2953_v1  ;;  %v3283_v42 = vmul.f32 -1.442695, %v2658_v35  ;;  %v2330_v58 = vpop.f32.mrf.mxu3  ;;  %v3650_v32 = vpop.eup %3649  ;;  %v2553_v57 = vsub.f32 1.0, %v2552_v49  ;;  %vm2557_vm13 = vweird.f32 %v5648_v20 }
 0x2e6   : > { %v5660_v31 = vpop.eup %3651  ;;  %v2509_v19 = vmul.f32 %v5646_v12, %v2508_v6  ;;  %v2331_v54 = vadd.f32 %v2330_v58, %v5335_v43  ;;  %v5703_v43 = vadd.f32 %v6204_v8, %v5326_v52  ;;  %v2518_v49 = vor.u32 1.1754944e-38, %v2517_v38  ;;  %vm5738_vm15 = vmor %vm2556_vm14, %vm2557_vm13  ;;  %v6217_v38 = vld [vmem:[#allocation6_spill] sm:$0xff] }
 0x2e7   : > { %2978 = vst [vmem:[%s5553_s30 + $0x48] sm:$0xff] %v2965_v61  ;;  %3653 = vpow2.f32 %v3283_v42  ;;  %v5658_v44 = vpop.f32.mrf.mxu0  ;;  %v2597_v14 = vmul.f32 %v5660_v31, %v5644_v51  ;;  %v2554_v27 = vmul.f32 %v5648_v20, %v2553_v57  ;;  %vm5742_vm0 = vcmp.eq.f32.partialorder %v2560_v9, 8.507059e+37 }
 0x2e8   : > { %v2116_v62 = vpop.f32.mrf.mxu1  ;;  %3655 = vpow2.f32 %v3270_v5  ;;  %v2510_v3 = vadd.f32 %v5646_v12, %v2509_v19  ;;  %v2420_v47 = vadd.f32 %v2331_v54, %v2052_v63  ;;  %v2607_v19 = vand.u32 2147483648, %v5644_v51 }
 0x2e9   : > { %v2117_v40 = vadd.f32 %v2116_v62, %v5298_v29  ;;  %v5678_v29 = vadd.f32 %v5352_v33, %v5306_v17  ;;  %v5697_v33 = vadd.f32 1.0, %v3650_v32  ;;  %v2598_v61 = vsub.f32 1.0, %v2597_v14 }
 0x2ea   : > { %v2555_v62 = vadd.f32 %v5648_v20, %v2554_v27  ;;  %v3273_v6 = vmul.f32 -1.442695, %v2420_v47  ;;  %vm2602_vm3 = vweird.f32 %v5660_v31  ;;  %vm2970_vm10 = vcmask 523264  }
 0x2eb   : > { %v2661_v45 = vadd.f32 %v2396_v50, %v2117_v40  ;;  %v2514_v40 = vsel %vm5722_vm12, %v5646_v12, %v2510_v3  ;;  %v2563_v12 = vor.u32 1.1754944e-38, %v2562_v55  ;;  %v2599_v16 = vmul.f32 %v5660_v31, %v2598_v61  ;;  %vm5791_vm4 = vmor %vm2601_vm1, %vm2602_vm3 }
 0x2ec   : > { %v2559_v59 = vsel %vm5738_vm15, %v5648_v20, %v2555_v62  ;;  %v2519_v14 = vsel %vm5713_vm11, %v2518_v49, %v2514_v40  ;;  %v2652_v8 = vand.u32 2147483648, %v5697_v33  ;;  %vm2646_vm6 = vweird.f32 %v5697_v33 }
 0x2ed   : > { %v3654_v2 = vpop.eup %3653  ;;  %v3286_v18 = vmul.f32 -1.442695, %v2661_v45  ;;  %v2333_v24 = vpop.f32.mrf.mxu3  ;;  %v2605_v45 = vand.u32 2147483647, %v5644_v51  ;;  %v2600_v27 = vadd.f32 %v5660_v31, %v2599_v16 }
 0x2ee   : > { %v5680_v56 = vadd.f32 1.0, %v3654_v2  ;;  %v3656_v30 = vpop.eup %3655  ;;  %v2334_v32 = vadd.f32 %v2333_v24, %v5346_v25  ;;  %v6214_v25 = vld [vmem:[#allocation5_spill] sm:$0xff]  ;;  %v5783_v5 = vor.u32 1.1754944e-38, %v2652_v8 }
 0x2ef   : > { %3657 = vpow2.f32 %v3286_v18  ;;  %v5720_v58 = vadd.f32 1.0, %v3656_v30  ;;  %v2402_v24 = vadd.f32 %v5658_v44, %v6214_v25  ;;  %vm5765_vm2 = vcmp.eq.f32.partialorder %v2605_v45, 8.507059e+37 }
 0x2f0   : > { %v2119_v36 = vpop.f32.mrf.mxu1  ;;  %3659 = vrcp.f32 %v5680_v56  ;;  %v2608_v30 = vor.u32 1.1754944e-38, %v2607_v19  ;;  %v2757_v49 = vand.u32 2147483648, %v5680_v56  ;;  %v2604_v45 = vsel %vm5791_vm4, %v5660_v31, %v2600_v27 }
 0x2f1   : > { %v2120_v23 = vadd.f32 %v2119_v36, %v5308_v39  ;;  %3661 = vrcp.f32 %v5697_v33  ;;  %v2404_v39 = vpop.f32.mrf.mxu0  ;;  %vm2751_vm7 = vweird.f32 %v5680_v56  ;;  %vm2496_vm12 = vweird.f32 %v5720_v58 }
 0x2f2   : > { %v2405_v47 = vadd.f32 %v2404_v39, %v6217_v38 }
 0x2f3   : > { %v2664_v1 = vadd.f32 %v2399_v46, %v2120_v23  ;;  %v5771_v23 = vsel %vm5742_vm0, %v2563_v12, %v2559_v59  ;;  %v5820_v59 = vsel %vm5765_vm2, %v2608_v30, %v2604_v45 }
 0x2f4   : > { %v2898_v18 = vmul.f32 %v2519_v14, %v2405_v47 }
 0x2f5   : > { %v3658_v42 = vpop.eup %3657  ;;  %v3289_v22 = vmul.f32 -1.442695, %v2664_v1  ;;  %v2336_v13 = vpop.f32.mrf.mxu3 }
 0x2f6   : > { %v5728_v50 = vadd.f32 1.0, %v3658_v42  ;;  %v5736_v2 = vpop.eup %3659  ;;  %v2337_v1 = vadd.f32 %v2336_v13, %v5357_v0  ;;  %v2500_v13 = vand.u32 2147483647, %v5720_v58 }
 0x2f7   : > { %3663 = vpow2.f32 %v3289_v22  ;;  %v5755_v36 = vpop.eup %3661  ;;  %v2747_v44 = vmul.f32 %v5736_v2, %v5680_v56  ;;  %v2650_v22 = vand.u32 2147483647, %v5697_v33  ;;  %vm2752_vm8 = vweird.f32 %v5736_v2 }
 0x2f8   : > { %v2122_v63 = vpop.f32.mrf.mxu1  ;;  %3665 = vrcp.f32 %v5720_v58  ;;  %v2642_v9 = vmul.f32 %v5755_v36, %v5697_v33  ;;  %v2426_v57 = vadd.f32 %v2337_v1, %v5685_v26  ;;  %vm2647_vm5 = vweird.f32 %v5755_v36  ;;  %vm5854_vm15 = vmor %vm2751_vm7, %vm2752_vm8 }
 0x2f9   : > { %v2123_v54 = vadd.f32 %v2122_v63, %v5306_v17  ;;  %3667 = vrcp.f32 %v5728_v50  ;;  %v2423_v17 = vadd.f32 %v2334_v32, %v5674_v11  ;;  %v2407_v61 = vpop.f32.mrf.mxu0  ;;  %v2748_v40 = vsub.f32 1.0, %v2747_v44  ;;  %v6220_v44 = vld [vmem:[#allocation8_spill] sm:$0xff]  ;;  %vm5873_vm0 = vmor %vm2646_vm6, %vm2647_vm5 }
 0x2fa   : > { %3669 = vpow2.f32 %v3273_v6  ;;  %v2502_v63 = vand.u32 2147483648, %v5720_v58  ;;  %v2643_v16 = vsub.f32 1.0, %v2642_v9  ;;  %v3279_v8 = vmul.f32 -1.442695, %v2426_v57 }
 0x2fb   : > { %v2667_v46 = vadd.f32 %v2402_v24, %v2123_v54  ;;  %v3276_v39 = vmul.f32 -1.442695, %v2423_v17  ;;  %v2749_v31 = vmul.f32 %v5736_v2, %v2748_v40  ;;  %v2408_v17 = vadd.f32 %v2407_v61, %v6220_v44 }
 0x2fc   : > { %vm5837_vm11 = vcmp.eq.f32.partialorder %v2650_v22, 8.507059e+37  ;;  %vm2796_vm14 = vweird.f32 %v5728_v50  ;;  %vm5894_vm2 = vcmp.eq.f32.partialorder %v2500_v13, 8.507059e+37 }
 0x2fd   : > { %v3664_v3 = vpop.eup %3663  ;;  %v3292_v11 = vmul.f32 -1.442695, %v2667_v46  ;;  %v2339_v35 = vpop.f32.mrf.mxu3  ;;  %v2758_v46 = vor.u32 1.1754944e-38, %v2757_v49  ;;  %v2750_v9 = vadd.f32 %v5736_v2, %v2749_v31  ;;  %v2901_v49 = vmul.f32 %v5771_v23, %v2408_v17 }
 0x2fe   : > { %v5779_v55 = vadd.f32 1.0, %v3664_v3  ;;  %v2340_v42 = vadd.f32 %v2339_v35, %v5364_v53  ;;  %v5785_v62 = vpop.eup %3665  ;;  %v2644_v3 = vmul.f32 %v5755_v36, %v2643_v16  ;;  %v2800_v16 = vand.u32 2147483647, %v5728_v50 }
 0x2ff   : > { %3671 = vpow2.f32 %v3292_v11  ;;  %v5796_v53 = vpop.eup %3667  ;;  %v2492_v24 = vmul.f32 %v5785_v62, %v5720_v58  ;;  %vm2497_vm13 = vweird.f32 %v5785_v62 }
 0x300   : > { %v2657_v6 = vadd.f32 %v2340_v42, %v5695_v48  ;;  %v2125_v32 = vpop.f32.mrf.mxu1  ;;  %v3670_v51 = vpop.eup %3669  ;;  %3673 = vrcp.f32 %v5779_v55  ;;  %v2755_v48 = vand.u32 2147483647, %v5680_v56  ;;  %v2792_v54 = vmul.f32 %v5796_v53, %v5728_v50  ;;  %vm5915_vm4 = vmor %vm2496_vm12, %vm2497_vm13 }
 0x301   : > { %v2126_v12 = vadd.f32 %v2125_v32, %v5314_v60  ;;  %3675 = vpow2.f32 %v3276_v39  ;;  %v5816_v60 = vadd.f32 1.0, %v3670_v51  ;;  %v2493_v11 = vsub.f32 1.0, %v2492_v24  ;;  %v2410_v61 = vpop.f32.mrf.mxu0 }
 0x302   : > { %v3282_v19 = vmul.f32 -1.442695, %v2657_v6  ;;  %v2793_v35 = vsub.f32 1.0, %v2792_v54  ;;  %vm5829_vm9 = vcmp.eq.f32.partialorder %v2755_v48, 8.507059e+37  ;;  %v5843_v39 = vor.u32 1.1754944e-38, %v2502_v63 }
 0x303   : > { %v2910_v26 = vadd.f32 %v2898_v18, %v2126_v12  ;;  %v2645_v32 = vadd.f32 %v5755_v36, %v2644_v3  ;;  %v2494_v23 = vmul.f32 %v5785_v62, %v2493_v11  ;;  %v2754_v51 = vsel %vm5854_vm15, %v5736_v2, %v2750_v9  ;;  %v3723_v2 = vld [vmem:[%s4896_s10 + $0x10] sm:$0xff] }
 0x304   : > { %3677 = vpow2.f32 %v3282_v19  ;;  %v2802_v56 = vand.u32 2147483648, %v5728_v50  ;;  %v2411_v31 = vadd.f32 %v2410_v61, %v5542_v34  ;;  %v2759_v33 = vsel %vm5829_vm9, %v2758_v46, %v2754_v51 }
 0x305   : > { %v3672_v14 = vpop.eup %3671  ;;  %v2342_v27 = vpop.f32.mrf.mxu3  ;;  %3679 = vtanh.f32 %v2910_v26  ;;  %v2649_v54 = vsel %vm5873_vm0, %v5755_v36, %v2645_v32  ;;  %v2495_v17 = vadd.f32 %v5785_v62, %v2494_v23  ;;  %vm2797_vm1 = vweird.f32 %v5796_v53 }
 0x306   : > { %v5824_v47 = vadd.f32 1.0, %v3672_v14  ;;  %v2343_v1 = vadd.f32 %v2342_v27, %v5379_v37  ;;  %v5833_v30 = vpop.eup %3673  ;;  %3681 = vrcp.f32 %v5816_v60  ;;  %vm5901_vm3 = vcmp.eq.f32.partialorder %v2800_v16, 8.507059e+37  ;;  %vm5924_vm5 = vmor %vm2796_vm14, %vm2797_vm1 }
 0x307   : > { %v3676_v0 = vpop.eup %3675  ;;  %3683 = vpow2.f32 %v3279_v8  ;;  %v2837_v63 = vmul.f32 %v5833_v30, %v5779_v55  ;;  %v2803_v46 = vor.u32 1.1754944e-38, %v2802_v56  ;;  %v2654_v13 = vsel %vm5837_vm11, %v5783_v5, %v2649_v54 }
 0x308   : > { %v2660_v42 = vadd.f32 %v2343_v1, %v5664_v7  ;;  %v2128_v40 = vpop.f32.mrf.mxu1  ;;  %3685 = vrcp.f32 %v5824_v47  ;;  %v5877_v48 = vadd.f32 1.0, %v3676_v0  ;;  %v2499_v58 = vsel %vm5915_vm4, %v5785_v62, %v2495_v17 }
 0x309   : > { %v2129_v6 = vadd.f32 %v2128_v40, %v5326_v52  ;;  %v2794_v52 = vmul.f32 %v5796_v53, %v2793_v35  ;;  %v2838_v3 = vsub.f32 1.0, %v2837_v63  ;;  %v2413_v5 = vpop.f32.mrf.mxu0  ;;  %vm2841_vm6 = vweird.f32 %v5779_v55 }
 0x30a   : > { %v3678_v7 = vpop.eup %3677  ;;  %v3285_v45 = vmul.f32 -1.442695, %v2660_v42  ;;  %v2904_v42 = vmul.f32 %v5820_v59, %v2411_v31  ;;  %v2847_v62 = vand.u32 2147483648, %v5779_v55  ;;  %v2414_v51 = vadd.f32 %v2413_v5, %v5594_v10  ;;  %v3725_v59 = vld [vmem:[%s4896_s10 + $0x40] sm:$0xff] }
 0x30b   : > { %v2913_v18 = vadd.f32 %v2901_v49, %v2129_v6  ;;  %v3680_v57 = vpop.eup %3679  ;;  %v5866_v12 = vadd.f32 1.0, %v3678_v7  ;;  %v2795_v11 = vadd.f32 %v5796_v53, %v2794_v52  ;;  %v2839_v6 = vmul.f32 %v5833_v30, %v2838_v3  ;;  %v3724_v52 = vld [vmem:[%s4896_s10 + $0x28] sm:$0xff] }
 0x30c   : > { %3687 = vpow2.f32 %v3285_v45  ;;  %v2934_v24 = vsub.f32 %v3723_v2, %v3680_v57  ;;  %v5884_v14 = vpop.eup %3681  ;;  %vm2842_vm8 = vweird.f32 %v5833_v30  ;;  %v2907_v3 = vmul.f32 %v2654_v13, %v2414_v51 }
 0x30d   : > { %v2345_v26 = vpop.f32.mrf.mxu3  ;;  %3689 = vtanh.f32 %v2913_v18  ;;  %v3684_v27 = vpop.eup %3683  ;;  %v2537_v49 = vmul.f32 %v5884_v14, %v5816_v60  ;;  %v2799_v50 = vsel %vm5924_vm5, %v5796_v53, %v2795_v11  ;;  %v2845_v18 = vand.u32 2147483647, %v5779_v55  ;;  %vm5971_vm9 = vmor %vm2841_vm6, %vm2842_vm8 }
 0x30e   : > { %v2346_v8 = vadd.f32 %v2345_v26, %v6205_v21  ;;  %v2946_v1 = vmul.f32 %v2934_v24, %v2759_v33  ;;  %v5898_v35 = vpop.eup %3685  ;;  %3691 = vrcp.f32 %v5866_v12  ;;  %v5945_v23 = vadd.f32 1.0, %v3684_v27 }
 0x30f   : > { %3693 = vrcp.f32 %v5877_v48  ;;  %v2882_v32 = vmul.f32 %v5898_v35, %v5824_v47  ;;  %v2804_v53 = vsel %vm5901_vm3, %v2803_v46, %v2799_v50  ;;  %v2538_v19 = vsub.f32 1.0, %v2537_v49 }
 0x310   : > { %v2663_v9 = vadd.f32 %v2346_v8, %v5670_v41  ;;  %v2131_v20 = vpop.f32.mrf.mxu1  ;;  %v2958_v61 = vadd.f32 %v3680_v57, %v2946_v1  ;;  %vm2542_vm7 = vweird.f32 %v5884_v14  ;;  %v2840_v31 = vadd.f32 %v5833_v30, %v2839_v6 }
 0x311   : > { %v2132_v40 = vadd.f32 %v2131_v20, %v5565_v15  ;;  %v2883_v2 = vsub.f32 1.0, %v2882_v32  ;;  %v2848_v26 = vor.u32 1.1754944e-38, %v2847_v62  ;;  %vm5975_vm11 = vcmp.eq.f32.partialorder %v2845_v18, 8.507059e+37 }
 0x312   : > { %v3688_v41 = vpop.eup %3687  ;;  %v3288_v37 = vmul.f32 -1.442695, %v2663_v9  ;;  %2971 = vst.msk [vmem:[%s5553_s30 + $0x10] sm:$0xff] %vm2970_vm10, %v2958_v61  ;;  %v2539_v36 = vmul.f32 %v5884_v14, %v2538_v19  ;;  %v2844_v55 = vsel %vm5971_vm9, %v5833_v30, %v2840_v31  ;;  %v2545_v13 = vand.u32 2147483647, %v5816_v60 }
 0x313   : > { %v2916_v7 = vadd.f32 %v2904_v42, %v2132_v40  ;;  %v3690_v22 = vpop.eup %3689  ;;  %v5943_v45 = vadd.f32 1.0, %v3688_v41  ;;  %v2884_v46 = vmul.f32 %v5898_v35, %v2883_v2  ;;  %v2547_v40 = vand.u32 2147483648, %v5816_v60 }
 0x314   : > { %3695 = vpow2.f32 %v3288_v37  ;;  %v2937_v63 = vsub.f32 %v3724_v52, %v3690_v22  ;;  %v5950_v56 = vpop.eup %3691  ;;  %v2892_v0 = vand.u32 2147483648, %v5824_v47  ;;  %v2890_v37 = vand.u32 2147483647, %v5824_v47 }
 0x315   : > { %v2348_v57 = vpop.f32.mrf.mxu3  ;;  %3697 = vtanh.f32 %v2916_v7  ;;  %v5958_v54 = vpop.eup %3693  ;;  %v2732_v17 = vmul.f32 %v5950_v56, %v5866_v12  ;;  %v2849_v49 = vsel %vm5975_vm11, %v2848_v26, %v2844_v55  ;;  %v2540_v32 = vadd.f32 %v5884_v14, %v2539_v36 }
 0x316   : > { %v2349_v16 = vadd.f32 %v2348_v57, %v6214_v25  ;;  %v2949_v24 = vmul.f32 %v2937_v63, %v2804_v53  ;;  %3699 = vrcp.f32 %v5943_v45  ;;  %v2504_v25 = vsel %vm5894_vm2, %v5843_v39, %v2499_v58  ;;  %v6253_v57 = vld [vmem:[#allocation4_spill] sm:$0xff] }
 0x317   : > { %3701 = vrcp.f32 %v5945_v23  ;;  %v2582_v20 = vmul.f32 %v5958_v54, %v5877_v48  ;;  %v2733_v41 = vsub.f32 1.0, %v2732_v17  ;;  %v2885_v7 = vadd.f32 %v5898_v35, %v2884_v46  ;;  %v3726_v17 = vld [vmem:[%s4896_s10 + $0x58] sm:$0xff] }
 0x318   : > { %v2666_v33 = vadd.f32 %v2349_v16, %v5678_v29  ;;  %v2134_v8 = vpop.f32.mrf.mxu1  ;;  %v2961_v27 = vadd.f32 %v3690_v22, %v2949_v24  ;;  %vm2887_vm12 = vweird.f32 %v5898_v35  ;;  %vm2541_vm13 = vweird.f32 %v5816_v60 }
 0x319   : > { %v2135_v1 = vadd.f32 %v2134_v8, %v5599_v4  ;;  %v2583_v22 = vsub.f32 1.0, %v2582_v20  ;;  %vm6007_vm14 = vcmp.eq.f32.partialorder %v2545_v13, 8.507059e+37  ;;  %vm2886_vm15 = vweird.f32 %v5824_v47  ;;  %vm6017_vm0 = vmor %vm2541_vm13, %vm2542_vm7 }
 0x31a   : > { %v3696_v11 = vpop.eup %3695  ;;  %v3291_v39 = vmul.f32 -1.442695, %v2666_v33  ;;  %2974 = vst.msk [vmem:[%s5553_s30 + $0x28] sm:$0xff] %vm2970_vm10, %v2961_v27  ;;  %vm6021_vm1 = vmor %vm2886_vm15, %vm2887_vm12  ;;  %vm6025_vm2 = vcmp.eq.f32.partialorder %v2890_v37, 8.507059e+37  ;;  %v2893_v47 = vor.u32 1.1754944e-38, %v2892_v0  ;;  %v2544_v2 = vsel %vm6017_vm0, %v5884_v14, %v2540_v32 }
 0x31b   : > { %v2919_v9 = vadd.f32 %v2907_v3, %v2135_v1  ;;  %v3698_v61 = vpop.eup %3697  ;;  %v5988_v42 = vadd.f32 1.0, %v3696_v11  ;;  %vm2736_vm3 = vweird.f32 %v5866_v12  ;;  %v2889_v24 = vsel %vm6021_vm1, %v5898_v35, %v2885_v7 }
 0x31c   : > { %3703 = vpow2.f32 %v3291_v39  ;;  %v2940_v5 = vsub.f32 %v3725_v59, %v3698_v61  ;;  %v5995_v58 = vpop.eup %3699  ;;  %v2548_v31 = vor.u32 1.1754944e-38, %v2547_v40  ;;  %v2584_v26 = vmul.f32 %v5958_v54, %v2583_v22 }
 0x31d   : > { %v2351_v30 = vpop.f32.mrf.mxu3  ;;  %3705 = vtanh.f32 %v2919_v9  ;;  %v6003_v62 = vpop.eup %3701  ;;  %v2777_v51 = vmul.f32 %v5995_v58, %v5943_v45  ;;  %v2742_v8 = vand.u32 2147483648, %v5866_v12  ;;  %vm2737_vm4 = vweird.f32 %v5950_v56 }
 0x31e   : > { %v2352_v6 = vadd.f32 %v2351_v30, %v6217_v38  ;;  %v2952_v50 = vmul.f32 %v2940_v5, %v2849_v49  ;;  %3707 = vrcp.f32 %v5988_v42  ;;  %v2734_v38 = vmul.f32 %v5950_v56, %v2733_v41  ;;  %vm6063_vm7 = vmor %vm2736_vm3, %vm2737_vm4  ;;  %v3727_v30 = vld [vmem:[%s4896_s10 + $0x8] sm:$0xff] }
 0x31f   : > { %v2778_v14 = vsub.f32 1.0, %v2777_v51  ;;  %v2894_v11 = vsel %vm6025_vm2, %v2893_v47, %v2889_v24  ;;  %v2740_v21 = vand.u32 2147483647, %v5866_v12  ;;  %v2549_v39 = vsel %vm6007_vm14, %v2548_v31, %v2544_v2 }
 0x320   : > { %v2897_v52 = vmul.f32 %v2504_v25, %v2352_v6  ;;  %v2964_v18 = vadd.f32 %v3698_v61, %v2952_v50  ;;  %v2735_v3 = vadd.f32 %v5950_v56, %v2734_v38  ;;  %v2585_v46 = vadd.f32 %v5958_v54, %v2584_v26 }
 0x321   : > { %vm2586_vm5 = vweird.f32 %v5877_v48  ;;  %vm2587_vm6 = vweird.f32 %v5958_v54  ;;  %v2592_v9 = vand.u32 2147483648, %v5877_v48  ;;  %v2779_v61 = vmul.f32 %v5995_v58, %v2778_v14 }
 0x322   : > { %v3704_v53 = vpop.eup %3703  ;;  %v2909_v19 = vadd.f32 %v2897_v52, %v5691_v28  ;;  %2977 = vst.msk [vmem:[%s5553_s30 + $0x40] sm:$0xff] %vm2970_vm10, %v2964_v18  ;;  %v2627_v28 = vmul.f32 %v6003_v62, %v5945_v23  ;;  %v2739_v12 = vsel %vm6063_vm7, %v5950_v56, %v2735_v3  ;;  %v2743_v41 = vor.u32 1.1754944e-38, %v2742_v8  ;;  %vm6076_vm8 = vmor %vm2586_vm5, %vm2587_vm6 }
 0x323   : > { %v3706_v33 = vpop.eup %3705  ;;  %v6041_v25 = vadd.f32 1.0, %v3704_v53  ;;  %v2590_v37 = vand.u32 2147483647, %v5877_v48  ;;  %vm2741_vm9 = vcmp.eq.f32.partialorder %v2740_v21, 8.507059e+37  ;;  %v2589_v6 = vsel %vm6076_vm8, %v5958_v54, %v2585_v46 }
 0x324   : > { %3709 = vtanh.f32 %v2909_v19  ;;  %v2943_v27 = vsub.f32 %v3726_v17, %v3706_v33  ;;  %v6048_v1 = vpop.eup %3707  ;;  %v2628_v20 = vsub.f32 1.0, %v2627_v28  ;;  %vm2782_vm11 = vweird.f32 %v5995_v58 }
 0x325   : > { %v2354_v35 = vpop.f32.mrf.mxu3  ;;  %3711 = vrcp.f32 %v6041_v25  ;;  %v2822_v13 = vmul.f32 %v6048_v1, %v5988_v42  ;;  %v2744_v56 = vsel %vm2741_vm9, %v2743_v41, %v2739_v12  ;;  %v2780_v7 = vadd.f32 %v5995_v58, %v2779_v61 }
 0x326   : > { %v2355_v29 = vadd.f32 %v2354_v35, %v6220_v44  ;;  %v2955_v36 = vmul.f32 %v2943_v27, %v2894_v11  ;;  %v2593_v22 = vor.u32 1.1754944e-38, %v2592_v9  ;;  %v2787_v63 = vand.u32 2147483648, %v5943_v45 }
 0x327   : > { %v2823_v32 = vsub.f32 1.0, %v2822_v13  ;;  %vm2781_vm12 = vweird.f32 %v5943_v45  ;;  %v2785_v51 = vand.u32 2147483647, %v5943_v45  ;;  %v2079_v53 = vadd.f32 %v6253_v57, %v5565_v15  ;;  %v3729_v13 = vld [vmem:[%s4896_s10 + $0x38] sm:$0xff] }
 0x328   : > { %v2900_v44 = vmul.f32 %v2549_v39, %v2355_v29  ;;  %v2967_v40 = vadd.f32 %v3706_v33, %v2955_v36  ;;  %vm6100_vm13 = vmor %vm2781_vm12, %vm2782_vm11  ;;  %vm2632_vm14 = vweird.f32 %v6003_v62  ;;  %v2637_v19 = vand.u32 2147483648, %v5945_v23  ;;  %v3728_v33 = vld [vmem:[%s4896_s10 + $0x20] sm:$0xff] }
 0x329   : > { %v2824_v47 = vmul.f32 %v6048_v1, %v2823_v32  ;;  %v2784_v15 = vsel %vm6100_vm13, %v5995_v58, %v2780_v7  ;;  %v2788_v24 = vor.u32 1.1754944e-38, %v2787_v63  ;;  %vm2631_vm15 = vweird.f32 %v5945_v23 }
 0x32a   : > { %v3710_v0 = vpop.eup %3709  ;;  %v2912_v59 = vadd.f32 %v2900_v44, %v5703_v43  ;;  %2980 = vst.msk [vmem:[%s5553_s30 + $0x58] sm:$0xff] %vm2970_vm10, %v2967_v40  ;;  %v2629_v43 = vmul.f32 %v6003_v62, %v2628_v20  ;;  %vm2591_vm10 = vcmp.eq.f32.partialorder %v2590_v37, 8.507059e+37  ;;  %v2635_v26 = vand.u32 2147483647, %v5945_v23  ;;  %vm6117_vm1 = vmor %vm2631_vm15, %vm2632_vm14 }
 0x32b   : > { %v2933_v49 = vsub.f32 %v3727_v30, %v3710_v0  ;;  %v6090_v52 = vpop.eup %3711  ;;  %v2594_v18 = vsel %vm2591_vm10, %v2593_v22, %v2589_v6  ;;  %vm2786_vm0 = vcmp.eq.f32.partialorder %v2785_v51, 8.507059e+37  ;;  %vm2827_vm2 = vweird.f32 %v6048_v1  ;;  %v3730_v30 = vld [vmem:[%s4896_s10 + $0x50] sm:$0xff] }
 0x32c   : > { %3713 = vtanh.f32 %v2912_v59  ;;  %v2867_v45 = vmul.f32 %v6090_v52, %v6041_v25  ;;  %v2789_v14 = vsel %vm2786_vm0, %v2788_v24, %v2784_v15  ;;  %v2825_v23 = vadd.f32 %v6048_v1, %v2824_v47 }
 0x32d   : > { %v2945_v50 = vmul.f32 %v2933_v49, %v2744_v56  ;;  %v2357_v48 = vpop.f32.mrf.mxu3  ;;  %v2638_v35 = vor.u32 1.1754944e-38, %v2637_v19  ;;  %v2832_v11 = vand.u32 2147483648, %v5988_v42  ;;  %vm2636_vm3 = vcmp.eq.f32.partialorder %v2635_v26, 8.507059e+37 }
 0x32e   : > { %v2358_v38 = vadd.f32 %v2357_v48, %v5542_v34  ;;  %v2630_v34 = vadd.f32 %v6003_v62, %v2629_v43  ;;  %v2868_v17 = vsub.f32 1.0, %v2867_v45  ;;  %vm2826_vm4 = vweird.f32 %v5988_v42 }
 0x32f   : > { %v2957_v54 = vadd.f32 %v3710_v0, %v2945_v50  ;;  %v2830_v39 = vand.u32 2147483647, %v5988_v42  ;;  %vm2828_vm5 = vmor %vm2826_vm4, %vm2827_vm2  ;;  %v2833_v20 = vor.u32 1.1754944e-38, %v2832_v11  ;;  %vm2872_vm7 = vweird.f32 %v6090_v52 }
 0x330   : > { %v2903_v16 = vmul.f32 %v2594_v18, %v2358_v38  ;;  %v2634_v58 = vsel %vm6117_vm1, %v6003_v62, %v2630_v34  ;;  %v6258_v62 = vld [vmem:[#allocation7_spill] sm:$0xff]  ;;  %v2869_v44 = vmul.f32 %v6090_v52, %v2868_v17  ;;  %v2877_v0 = vand.u32 2147483648, %v6041_v25 }
 0x331   : > { %2969 = vst [vmem:[%s5553_s30 + $0x8] sm:$0xff] %v2957_v54  ;;  %v2639_v36 = vsel %vm2636_vm3, %v2638_v35, %v2634_v58  ;;  %v2082_v46 = vadd.f32 %v6258_v62, %v5599_v4  ;;  %vm2831_vm6 = vcmp.eq.f32.partialorder %v2830_v39, 8.507059e+37  ;;  %vm2871_vm8 = vweird.f32 %v6041_v25 }
 0x332   : > { %v3714_v2 = vpop.eup %3713  ;;  %v2915_v31 = vadd.f32 %v2903_v16, %v2079_v53  ;;  %v2870_v12 = vadd.f32 %v6090_v52, %v2869_v44  ;;  %v2875_v41 = vand.u32 2147483647, %v6041_v25  ;;  %vm2873_vm9 = vmor %vm2871_vm8, %vm2872_vm7  ;;  %v2878_v37 = vor.u32 1.1754944e-38, %v2877_v0 }
 0x333   : > { %v2936_v8 = vsub.f32 %v3728_v33, %v3714_v2 }
 0x334   : > { %3715 = vtanh.f32 %v2915_v31  ;;  %v2874_v59 = vsel %vm2873_vm9, %v6090_v52, %v2870_v12  ;;  %vm2876_vm11 = vcmp.eq.f32.partialorder %v2875_v41, 8.507059e+37 }
 0x335   : > { %v2948_v27 = vmul.f32 %v2936_v8, %v2789_v14  ;;  %v2360_v3 = vpop.f32.mrf.mxu3  ;;  %v2879_v6 = vsel %vm2876_vm11, %v2878_v37, %v2874_v59 }
 0x336   : > { %v2361_v21 = vadd.f32 %v2360_v3, %v5594_v10  ;;  %v2829_v10 = vsel %vm2828_vm5, %v6048_v1, %v2825_v23 }
 0x337   : > { %v2960_v29 = vadd.f32 %v3714_v2, %v2948_v27  ;;  %v2834_v40 = vsel %vm2831_vm6, %v2833_v20, %v2829_v10 }
 0x338   : > { %v2906_v55 = vmul.f32 %v2639_v36, %v2361_v21 }
 0x339   : > { %2973 = vst [vmem:[%s5553_s30 + $0x20] sm:$0xff] %v2960_v29 }
 0x33a   : > { %v3716_v9 = vpop.eup %3715  ;;  %v2918_v61 = vadd.f32 %v2906_v55, %v2082_v46 }
 0x33b   : > { %v2939_v42 = vsub.f32 %v3729_v13, %v3716_v9 }
 0x33c   : > { %3717 = vtanh.f32 %v2918_v61 }
 0x33d   : > { %v2951_v4 = vmul.f32 %v2939_v42, %v2834_v40 }
 0x33f   : > { %v2963_v1 = vadd.f32 %v3716_v9, %v2951_v4 }
 0x341   : > { %2976 = vst [vmem:[%s5553_s30 + $0x38] sm:$0xff] %v2963_v1 }
 0x342   : > { %v3718_v5 = vpop.eup %3717 }
 0x343   : > { %v2942_v49 = vsub.f32 %v3730_v30, %v3718_v5 }
 0x345   : > { %v2954_v56 = vmul.f32 %v2942_v49, %v2879_v6 }
 0x347   : > { %v2966_v43 = vadd.f32 %v3718_v5, %v2954_v56 }
 0x349   : > { %2979 = vst [vmem:[%s5553_s30 + $0x50] sm:$0xff] %v2966_v43 }
 0x34a PF: > { %s18_s27 = sadd.s32 1, %s3737_s27  }
 0x34b   : > { %p15_p4 = scmp.ge.s32.totalorder %s18_s27, 4  }
 0x34d   :  { %17 = sbr.rel (!%p15_p4) target bundleno = 1 (0x1), region = 93 }

// kernel: rim_block_forward.31
= control target key start
LH: loop header
LB: loop body
LE: loop exit
PB: predicated region body
PF: predicated region fallthrough
CT: control target
= control target key end

     0   :  { %s1599_s12 = smov 0   ;;  %s1908_s0 = inlined_call_operand.vmem [shape: f32[2,32,342], index: 0, kind: input, shape index: {}]   ;;  %s1909_s1 = inlined_call_operand.vmem [shape: f32[2,8,288], index: 1, kind: input, shape index: {}]   ;;  %s1910_s2 = inlined_call_operand.vmem [shape: f32[9,8,32], index: 2, kind: input, shape index: {}]   ;;  %s1911_s3 = inlined_call_operand.vmem [shape: f32[2,8,288], index: 3, kind: output, shape index: {}]  }
   0x1 LB: > { %s1260_s13 = sadd.s32 4294967295, %s1569_s12   ;;  %p1264_p0 = scmp.ge.s32.totalorder %s1569_s12, 1  ;;  %s1569_s12 = sphi %s1599_s12, %s13_s12  }
   0x2   : > { %p147_p1 = scmp.lt.s32.totalorder %s1569_s12, 3 }
   0x4   : > { %p148_p2 = pnand %p1264_p0, %p147_p1 }
   0x5   : > { %p176_p3 = scmp.lt.s32.totalorder (!%p148_p2), %s1260_s13, 1  ;;  %s1571_s18 = smov (!%p148_p2), 127  }
   0x6   : > { %151 = sbr.rel (%p148_p2) target bundleno = 393 (0x189), region = 32  ;;  %s1572_s19 = smov (!%p148_p2), 126  }
   0x7   : > { %s1573_s20 = smov (!%p148_p2), 110   ;;  %s1574_s21 = smov (!%p148_p2), 109  }
   0x8   : > { %s1575_s22 = smov (!%p148_p2), 108   ;;  %s1576_s23 = smov (!%p148_p2), 92  }
   0x9   : > { %s1577_s24 = smov (!%p148_p2), 91   ;;  %s1578_s25 = smov (!%p148_p2), 90  }
   0xb   : > { %s1913_s13 = smov (!%p176_p3, %s1260_s13), 1  ;;  %vm312_vm0 = vcmask 1039360   ;;  %v206_v42 = vld [vmem:[%s1910_s2] sm:$0xff]  ;;  %vm207_vm1 = vcmask 261120   ;;  %v1271_v62 = vld [vmem:[%s1910_s2 + $0x8] sm:$0xff]  ;;  %vm425_vm2 = vcmask 1031168  }
   0xc   : > { %s1305_s14 = smul.u32 96, %s1913_s13  ;;  %vm538_vm3 = vcmask 900096   ;;  %vm651_vm4 = vcmask 891904   ;;  %vm764_vm5 = vcmask 883712   ;;  %vm877_vm6 = vcmask 752640  }
   0xd   : > { %vm990_vm7 = vcmask 744448   ;;  %vm1103_vm8 = vcmask 736256  }
   0xe   : > { %s180_s17 = scalar_lea.vmem %s1908_s0, %s1305_s14 }
   0xf   : > { %v1613_v0 = vld [vmem:[%s180_s17 + $0x20] sm:$0xff]  ;;  %v1615_v1 = vld [vmem:[%s180_s17 + $0x28] sm:$0xff]  ;;  %v1637_v9 = vld [vmem:[%s180_s17 + $0x30] sm:$0xff] }
  0x10   : > { %v1617_v2 = vld [vmem:[%s180_s17] sm:$0xff]  ;;  %v1621_v3 = vpack.i.bf16 %v1615_v1, %v1613_v0  ;;  %v1623_v4 = vld [vmem:[%s180_s17 + $0x8] sm:$0xff]  ;;  %v1640_v10 = vld [vmem:[%s180_s17 + $0x38] sm:$0xff] }
  0x11   : > { %v1625_v5 = vld [vmem:[%s180_s17 + $0x40] sm:$0xff]  ;;  %v1627_v6 = vld [vmem:[%s180_s17 + $0x48] sm:$0xff]  ;;  %v1631_v7 = vpack.i.bf16 %v1623_v4, %v1617_v2  ;;  %v204_v11 = vld [vmem:[%s180_s17 + $0x50] sm:$0xff]  ;;  %v1649_v15 = vpack.i.bf16 %v1640_v10, %v1637_v9  ;;  %v1398_v22 = vpack.i.bf16 %v1623_v4, %v1615_v1 }
  0x12   : > { %v1343_v8 = vpack.i.bf16 %v1627_v6, %v1625_v5  ;;  %223 = vmatpush.msra.mxu0 %v1627_v6  ;;  %1334 = vrot.lane.b32.xlu1 %v1621_v3, %s1571_s18  ;;  %v1642_v12 = vld [vmem:[%s180_s17 + $0x10] sm:$0xff]  ;;  %v1644_v13 = vld [vmem:[%s180_s17 + $0x18] sm:$0xff]  ;;  %v1383_v19 = vpack.i.bf16 %v204_v11, %v1617_v2  ;;  %v1393_v20 = vpack.i.bf16 %v1613_v0, %v1625_v5 }
  0x13   : > { %1324 = vrot.lane.b32.xlu0 %v1631_v7, %s1571_s18  ;;  %v205_v14 = vld [vmem:[%s180_s17 + $0x58] sm:$0xff]  ;;  %243 = vmatpush.msra.mxu1 %v204_v11  ;;  %v1328_v16 = vpack.i.bf16 %v1644_v13, %v1642_v12  ;;  %v1403_v21 = vpack.i.bf16 %v1627_v6, %v1642_v12  ;;  %v1408_v23 = vpack.i.bf16 %v1644_v13, %v1637_v9 }
  0x14   : > { %1344 = vrot.lane.b32.xlu2 %v1343_v8, %s1571_s18  ;;  %224 = vmatpush.msra.mxu0 %v1637_v9  ;;  %v1348_v17 = vpack.i.bf16 %v205_v14, %v204_v11  ;;  %v1388_v18 = vpack.i.bf16 %v1640_v10, %v205_v14  ;;  %v1418_v24 = vpack.i.bf16 %v1627_v6, %v1615_v1 }
  0x15   : > { %263 = vmatpush.msra.mxu2 %v205_v14  ;;  %244 = vmatpush.msra.mxu1 %v1640_v10  ;;  %v1413_v25 = vpack.i.bf16 %v1625_v5, %v205_v14  ;;  %v1423_v26 = vpack.i.bf16 %v1642_v12, %v204_v11  ;;  %v1428_v27 = vpack.i.bf16 %v204_v11, %v1627_v6 }
  0x16   : > { %225 = vmatpush.msra.mxu0 %v1644_v13  ;;  %v1448_v28 = vpack.i.bf16 %v1613_v0, %v1644_v13  ;;  %v1498_v29 = vpack.i.bf16 %v1642_v12, %v1615_v1  ;;  %v1508_v31 = vpack.i.bf16 %v1625_v5, %v1640_v10  ;;  %v1523_v35 = vpack.i.bf16 %v1637_v9, %v1627_v6 }
  0x17   : > { %264 = vmatpush.msra.mxu2 %v1625_v5  ;;  %245 = vmatpush.msra.mxu1 %v1613_v0  ;;  %v1518_v38 = vpack.i.bf16 %v1642_v12, %v1623_v4  ;;  %v1533_v43 = vpack.i.bf16 %v1617_v2, %v1644_v13 }
  0x18   : > { %226 = vmatpush.msra.mxu0 %v1617_v2 }
  0x19   : > { %265 = vmatpush.msra.mxu2 %v1615_v1  ;;  %246 = vmatpush.msra.mxu1 %v1623_v4 }
  0x1a   : > { %1339 = vrot.lane.b32.xlu1 %v1649_v15, %s1571_s18  ;;  %1268 = vmatmul.msk.f32.vlgmr.msra.gmra.mxu0 %vm207_vm1, %v206_v42 }
  0x1b   : > { %1329 = vrot.lane.b32.xlu0 %v1328_v16, %s1571_s18  ;;  %266 = vmatpush.msra.mxu2 %v1642_v12 }
  0x1c   : > { %1349 = vrot.lane.b32.xlu2 %v1348_v17, %s1571_s18  ;;  %1270 = vmatmul.msk.f32.vlgmr.msra.gmra.mxu2 %vm207_vm1, %v206_v42 }
  0x1d   : > { %1269 = vmatmul.msk.f32.vlgmr.msra.gmra.mxu1 %vm207_vm1, %v206_v42 }
  0x22   : > { %1359 = vrot.lane.b32.xlu1 %v1328_v16, %s1572_s19 }
  0x23   : > { %1354 = vrot.lane.b32.xlu0 %v1631_v7, %s1572_s19 }
  0x24   : > { %1364 = vrot.lane.b32.xlu2 %v1621_v3, %s1572_s19 }
  0x2a   : > { %1374 = vrot.lane.b32.xlu1 %v1343_v8, %s1572_s19 }
  0x2b   : > { %1369 = vrot.lane.b32.xlu0 %v1649_v15, %s1572_s19 }
  0x2c   : > { %1379 = vrot.lane.b32.xlu2 %v1348_v17, %s1572_s19  ;;  %s1306_s19 = smul.u32 24, %s1913_s13 }
  0x32   : > { %1389 = vrot.lane.b32.xlu1 %v1388_v18, %s1573_s20 }
  0x33   : > { %1384 = vrot.lane.b32.xlu0 %v1383_v19, %s1573_s20 }
  0x34   : > { %1394 = vrot.lane.b32.xlu2 %v1393_v20, %s1573_s20 }
  0x3a   : > { %1404 = vrot.lane.b32.xlu1 %v1403_v21, %s1573_s20 }
  0x3b   : > { %1399 = vrot.lane.b32.xlu0 %v1398_v22, %s1573_s20 }
  0x3c   : > { %1409 = vrot.lane.b32.xlu2 %v1408_v23, %s1573_s20 }
  0x42   : > { %1419 = vrot.lane.b32.xlu1 %v1418_v24, %s1574_s21 }
  0x43   : > { %1414 = vrot.lane.b32.xlu0 %v1413_v25, %s1574_s21 }
  0x44   : > { %1424 = vrot.lane.b32.xlu2 %v1423_v26, %s1574_s21 }
  0x4a   : > { %1434 = vrot.lane.b32.xlu1 %v1649_v15, %s1574_s21 }
  0x4b   : > { %1429 = vrot.lane.b32.xlu0 %v1428_v27, %s1575_s22 }
  0x4c   : > { %1439 = vrot.lane.b32.xlu2 %v1649_v15, %s1575_s22 }
  0x52   : > { %1449 = vrot.lane.b32.xlu1 %v1448_v28, %s1574_s21 }
  0x53   : > { %1444 = vrot.lane.b32.xlu0 %v1428_v27, %s1576_s23 }
  0x54   : > { %1454 = vrot.lane.b32.xlu2 %v1448_v28, %s1575_s22 }
  0x5a   : > { %1464 = vrot.lane.b32.xlu1 %v1631_v7, %s1574_s21 }
  0x5b   : > { %1459 = vrot.lane.b32.xlu0 %v1649_v15, %s1576_s23 }
  0x5c   : > { %1469 = vrot.lane.b32.xlu2 %v1631_v7, %s1575_s22 }
  0x62   : > { %1479 = vrot.lane.b32.xlu1 %v1413_v25, %s1575_s22 }
  0x63   : > { %1474 = vrot.lane.b32.xlu0 %v1448_v28, %s1576_s23 }
  0x64   : > { %1484 = vrot.lane.b32.xlu2 %v1631_v7, %s1576_s23 }
  0x6a   : > { %1494 = vrot.lane.b32.xlu1 %v1348_v17, %s1577_s24 }
  0x6b   : > { %1489 = vrot.lane.b32.xlu0 %v1413_v25, %s1576_s23 }
  0x6c   : > { %1499 = vrot.lane.b32.xlu2 %v1498_v29, %s1575_s22  ;;  %s185_s22 = scalar_lea.vmem %s1909_s1, %s1306_s19 }
  0x6e   : > { %v1345_v30 = vpop.permute.xlu2 %1344 }
  0x6f   : > { %v1347_v32 = vunpack.i.h.bf16 %v1345_v30  ;;  %v1346_v37 = vunpack.i.l.bf16 %v1345_v30 }
  0x72   : > { %1509 = vrot.lane.b32.xlu1 %v1508_v31, %s1577_s24 }
  0x73   : > { %1504 = vrot.lane.b32.xlu0 %v1498_v29, %s1576_s23 }
  0x74   : > { %1514 = vrot.lane.b32.xlu2 %v1621_v3, %s1577_s24 }
  0x76   : > { %v1350_v33 = vpop.permute.xlu2 %1349 }
  0x77   : > { %v1351_v34 = vunpack.i.l.bf16 %v1350_v33  ;;  %v1352_v36 = vunpack.i.h.bf16 %v1350_v33 }
  0x79   : > { %388 = vmatpush.msrb.mxu1 %v1352_v36  ;;  %v319_v39 = vsel %vm312_vm0, %v1347_v32, %v1351_v34  ;;  %v320_v40 = vsel %vm312_vm0, %v1351_v34, %v1352_v36 }
  0x7a   : > { %348 = vmatpush.msra.mxu3 %v319_v39  ;;  %368 = vmatpush.msrb.mxu0 %v320_v40 }
  0x7b   : > { %1524 = vrot.lane.b32.xlu1 %v1523_v35, %s1577_s24  ;;  %389 = vmatpush.msrb.mxu1 %v1346_v37 }
  0x7c   : > { %1519 = vrot.lane.b32.xlu0 %v1518_v38, %s1577_s24  ;;  %1529 = vrot.lane.b32.xlu2 %v1413_v25, %s1578_s25  ;;  %v1275_v25 = vld [vmem:[%s1910_s2 + $0x10] sm:$0xff] }
  0x7e   : > { %v1704_v41 = vpop.permute.xlu2 %1364 }
  0x7f   : > { %v1367_v11 = vunpack.i.h.bf16 %v1704_v41  ;;  %v1366_v14 = vunpack.i.l.bf16 %v1704_v41 }
  0x81   : > { %v429_v23 = vsel %vm425_vm2, %v1366_v14, %v1367_v11 }
  0x83   : > { %1539 = vrot.lane.b32.xlu1 %v1418_v24, %s1578_s25 }
  0x84   : > { %1534 = vrot.lane.b32.xlu0 %v1533_v43, %s1577_s24  ;;  %1544 = vrot.lane.b32.xlu2 %v1423_v26, %s1578_s25  ;;  %v1335_v44 = vpop.permute.xlu1 %1334 }
  0x85   : > { %v1325_v45 = vpop.permute.xlu0 %1324  ;;  %v1337_v47 = vunpack.i.h.bf16 %v1335_v44  ;;  %v1336_v49 = vunpack.i.l.bf16 %v1335_v44 }
  0x86   : > { %v1380_v46 = vpop.permute.xlu2 %1379  ;;  %v1327_v58 = vunpack.i.h.bf16 %v1325_v45  ;;  %v1326_v59 = vunpack.i.l.bf16 %v1325_v45 }
  0x87   : > { %390 = vmatpush.msrb.mxu1 %v1337_v47  ;;  %v1382_v54 = vunpack.i.h.bf16 %v1380_v46  ;;  %v1381_v55 = vunpack.i.l.bf16 %v1380_v46  ;;  %v316_v0 = vsel %vm312_vm0, %v1336_v49, %v1337_v47 }
  0x88   : > { %v313_v2 = vsel %vm312_vm0, %v1326_v59, %v1327_v58 }
  0x89   : > { %v433_v1 = vsel %vm425_vm2, %v1381_v55, %v1382_v54 }
  0x8b   : > { %1554 = vrot.lane.b32.xlu1 %v1448_v28, %s1578_s25 }
  0x8c   : > { %1549 = vrot.lane.b32.xlu0 %v1649_v15, %s1578_s25  ;;  %1559 = vrot.lane.b32.xlu2 %v1631_v7, %s1578_s25  ;;  %v1340_v48 = vpop.permute.xlu1 %1339  ;;  %s190_s25 = scalar_lea.vmem %s1911_s3, %s1306_s19 }
  0x8d   : > { %v1342_v50 = vunpack.i.h.bf16 %v1340_v48  ;;  %v1341_v51 = vunpack.i.l.bf16 %v1340_v48  ;;  %v1330_v52 = vpop.permute.xlu0 %1329 }
  0x8e   : > { %v1717_v53 = vpop.permute.xlu2 %1394  ;;  %v1332_v56 = vunpack.i.h.bf16 %v1330_v52  ;;  %v1331_v57 = vunpack.i.l.bf16 %v1330_v52 }
  0x8f   : > { %v317_v60 = vsel %vm312_vm0, %v1341_v51, %v1342_v50  ;;  %v318_v61 = vsel %vm312_vm0, %v1342_v50, %v1346_v37  ;;  %v1396_v26 = vunpack.i.l.bf16 %v1717_v53  ;;  %v1397_v41 = vunpack.i.h.bf16 %v1717_v53 }
  0x90   : > { %391 = vmatpush.msrb.mxu1 %v1331_v57  ;;  %349 = vmatpush.msra.mxu3 %v317_v60  ;;  %v315_v63 = vsel %vm312_vm0, %v1332_v56, %v1336_v49  ;;  %v314_v4 = vsel %vm312_vm0, %v1327_v58, %v1331_v57  ;;  %v1279_v49 = vld [vmem:[%s1910_s2 + $0x18] sm:$0xff] }
  0x91   : > { %369 = vmatpush.msrb.mxu0 %v318_v61  ;;  %1274 = vmatmul.msk.f32.vlgmr.msrb.gmra.mxu1 %vm207_vm1, %v1271_v62 }
  0x92   : > { %350 = vmatpush.msra.mxu3 %v315_v63 }
  0x93   : > { %370 = vmatpush.msrb.mxu0 %v316_v0 }
  0x94   : > { %v1360_v3 = vpop.permute.xlu1 %1359  ;;  %351 = vmatpush.msra.mxu3 %v313_v2 }
  0x95   : > { %v1355_v5 = vpop.permute.xlu0 %1354  ;;  %371 = vmatpush.msrb.mxu0 %v314_v4  ;;  %1272 = vmatmul.msk.f32.vlgmr.msra.gmra.mxu3 %vm207_vm1, %v1271_v62  ;;  %v1362_v15 = vunpack.i.h.bf16 %v1360_v3  ;;  %v1361_v17 = vunpack.i.l.bf16 %v1360_v3  ;;  %v1283_v4 = vld [vmem:[%s1910_s2 + $0x20] sm:$0xff] }
  0x96   : > { %481 = vmatpush.msrb.mxu3 %v433_v1  ;;  %v1731_v6 = vpop.permute.xlu2 %1409  ;;  %1273 = vmatmul.msk.f32.vlgmr.msrb.gmra.mxu0 %vm207_vm1, %v1271_v62  ;;  %v1357_v18 = vunpack.i.h.bf16 %v1355_v5  ;;  %v1356_v20 = vunpack.i.l.bf16 %v1355_v5 }
  0x97   : > { %501 = vmatpush.msra.mxu0 %v1382_v54  ;;  %v428_v24 = vsel %vm425_vm2, %v1362_v15, %v1366_v14  ;;  %v1411_v38 = vunpack.i.l.bf16 %v1731_v6  ;;  %v1412_v45 = vunpack.i.h.bf16 %v1731_v6 }
  0x98   : > { %v427_v28 = vsel %vm425_vm2, %v1357_v18, %v1361_v17  ;;  %v426_v32 = vsel %vm425_vm2, %v1356_v20, %v1357_v18 }
  0x99   : > { %v541_v52 = vsel %vm538_vm3, %v1412_v45, %v1397_v41 }
  0x9c   : > { %v1375_v7 = vpop.permute.xlu1 %1374 }
  0x9d   : > { %v1377_v8 = vunpack.i.h.bf16 %v1375_v7  ;;  %v1376_v9 = vunpack.i.l.bf16 %v1375_v7  ;;  %v1370_v10 = vpop.permute.xlu0 %1369 }
  0x9e   : > { %v1372_v12 = vunpack.i.h.bf16 %v1370_v10  ;;  %v1371_v13 = vunpack.i.l.bf16 %v1370_v10  ;;  %v1738_v21 = vpop.permute.xlu2 %1424 }
  0x9f   : > { %502 = vmatpush.msra.mxu0 %v1376_v9  ;;  %v432_v16 = vsel %vm425_vm2, %v1377_v8, %v1381_v55  ;;  %v1426_v53 = vunpack.i.l.bf16 %v1738_v21  ;;  %v1427_v0 = vunpack.i.h.bf16 %v1738_v21 }
  0xa0   : > { %461 = vmatpush.msrb.mxu2 %v432_v16  ;;  %v431_v19 = vsel %vm425_vm2, %v1372_v12, %v1376_v9  ;;  %v430_v22 = vsel %vm425_vm2, %v1371_v13, %v1372_v12 }
  0xa1   : > { %482 = vmatpush.msrb.mxu3 %v431_v19  ;;  %503 = vmatpush.msra.mxu0 %v1367_v11 }
  0xa2   : > { %462 = vmatpush.msrb.mxu2 %v430_v22 }
  0xa3   : > { %483 = vmatpush.msrb.mxu3 %v429_v23  ;;  %504 = vmatpush.msra.mxu0 %v1361_v17 }
  0xa4   : > { %v1390_v27 = vpop.permute.xlu1 %1389  ;;  %463 = vmatpush.msrb.mxu2 %v428_v24  ;;  %1278 = vmatmul.msk.f32.vlgmr.msra.gmra.mxu0 %vm207_vm1, %v1275_v25 }
  0xa5   : > { %v1392_v29 = vunpack.i.h.bf16 %v1390_v27  ;;  %v1391_v30 = vunpack.i.l.bf16 %v1390_v27  ;;  %v1385_v31 = vpop.permute.xlu0 %1384  ;;  %484 = vmatpush.msrb.mxu3 %v427_v28  ;;  %v1287_v27 = vld [vmem:[%s1910_s2 + $0x28] sm:$0xff] }
  0xa6   : > { %v1387_v33 = vunpack.i.h.bf16 %v1385_v31  ;;  %464 = vmatpush.msrb.mxu2 %v426_v32  ;;  %1277 = vmatmul.msk.f32.vlgmr.msrb.gmra.mxu3 %vm207_vm1, %v1275_v25  ;;  %v1754_v36 = vpop.permute.xlu2 %1439  ;;  %v1386_v51 = vunpack.i.l.bf16 %v1385_v31 }
  0xa7   : > { %614 = vmatpush.msra.mxu3 %v1391_v30  ;;  %1276 = vmatmul.msk.f32.vlgmr.msrb.gmra.mxu2 %vm207_vm1, %v1275_v25  ;;  %v544_v35 = vsel %vm538_vm3, %v1392_v29, %v1396_v26  ;;  %v543_v48 = vsel %vm538_vm3, %v1411_v38, %v1392_v29  ;;  %v1442_v1 = vunpack.i.h.bf16 %v1754_v36  ;;  %v1441_v2 = vunpack.i.l.bf16 %v1754_v36 }
  0xa8   : > { %v546_v34 = vsel %vm538_vm3, %v1387_v33, %v1391_v30 }
  0xa9   : > { %594 = vmatpush.msra.mxu2 %v546_v34  ;;  %615 = vmatpush.msra.mxu3 %v1396_v26  ;;  %v769_v18 = vsel %vm764_vm5, %v1441_v2, %v1442_v1 }
  0xab   : > { %595 = vmatpush.msra.mxu2 %v544_v35 }
  0xac   : > { %v1405_v37 = vpop.permute.xlu1 %1404 }
  0xad   : > { %v1407_v39 = vunpack.i.h.bf16 %v1405_v37  ;;  %v1400_v40 = vpop.permute.xlu0 %1399  ;;  %v1406_v42 = vunpack.i.l.bf16 %v1405_v37 }
  0xae   : > { %v1402_v43 = vunpack.i.h.bf16 %v1400_v40  ;;  %v1401_v44 = vunpack.i.l.bf16 %v1400_v40  ;;  %v1770_v55 = vpop.permute.xlu2 %1454 }
  0xaf   : > { %v545_v46 = vsel %vm538_vm3, %v1407_v39, %v1387_v33  ;;  %v1457_v8 = vunpack.i.h.bf16 %v1770_v55  ;;  %v1456_v9 = vunpack.i.l.bf16 %v1770_v55 }
  0xb0   : > { %616 = vmatpush.msra.mxu3 %v1401_v44  ;;  %574 = vmatpush.msra.mxu1 %v545_v46  ;;  %v542_v47 = vsel %vm538_vm3, %v1397_v41, %v1401_v44  ;;  %v540_v50 = vsel %vm538_vm3, %v1402_v43, %v1406_v42  ;;  %v539_v58 = vsel %vm538_vm3, %v1386_v51, %v1402_v43 }
  0xb1   : > { %596 = vmatpush.msra.mxu2 %v542_v47  ;;  %v767_v19 = vsel %vm764_vm5, %v1456_v9, %v1457_v8 }
  0xb2   : > { %617 = vmatpush.msra.mxu3 %v1406_v42  ;;  %575 = vmatpush.msra.mxu1 %v543_v48 }
  0xb3   : > { %597 = vmatpush.msra.mxu2 %v540_v50  ;;  %1282 = vmatmul.msk.f32.vlgmr.msra.gmra.mxu3 %vm207_vm1, %v1279_v49 }
  0xb4   : > { %v1420_v54 = vpop.permute.xlu1 %1419  ;;  %576 = vmatpush.msra.mxu1 %v541_v52  ;;  %1281 = vmatmul.msk.f32.vlgmr.msra.gmra.mxu2 %vm207_vm1, %v1279_v49 }
  0xb5   : > { %v1422_v56 = vunpack.i.h.bf16 %v1420_v54  ;;  %v1415_v57 = vpop.permute.xlu0 %1414  ;;  %v1421_v63 = vunpack.i.l.bf16 %v1420_v54 }
  0xb6   : > { %v1416_v59 = vunpack.i.l.bf16 %v1415_v57  ;;  %577 = vmatpush.msra.mxu1 %v539_v58  ;;  %v1417_v61 = vunpack.i.h.bf16 %v1415_v57  ;;  %v1788_v12 = vpop.permute.xlu2 %1469  ;;  %v1291_v58 = vld [vmem:[%s1910_s2 + $0x30] sm:$0xff] }
  0xb7   : > { %v658_v60 = vsel %vm651_vm4, %v1422_v56, %v1426_v53  ;;  %1280 = vmatmul.msk.f32.vlgmr.msra.gmra.mxu1 %vm207_vm1, %v1279_v49  ;;  %v1472_v15 = vunpack.i.h.bf16 %v1788_v12  ;;  %v1471_v16 = vunpack.i.l.bf16 %v1788_v12 }
  0xb8   : > { %727 = vmatpush.msrb.mxu2 %v1416_v59  ;;  %v659_v62 = vsel %vm651_vm4, %v1426_v53, %v1416_v59  ;;  %687 = vmatpush.msrb.mxu0 %v658_v60 }
  0xb9   : > { %707 = vmatpush.msrb.mxu1 %v659_v62  ;;  %v765_v21 = vsel %vm764_vm5, %v1471_v16, %v1472_v15 }
  0xba   : > { %728 = vmatpush.msrb.mxu2 %v1417_v61 }
  0xbc   : > { %729 = vmatpush.msrb.mxu2 %v1421_v63  ;;  %v1435_v3 = vpop.permute.xlu1 %1434 }
  0xbd   : > { %v1437_v5 = vunpack.i.h.bf16 %v1435_v3  ;;  %v1436_v6 = vunpack.i.l.bf16 %v1435_v3  ;;  %v1782_v7 = vpop.permute.xlu0 %1429 }
  0xbe   : > { %v1432_v10 = vunpack.i.h.bf16 %v1782_v7  ;;  %v1431_v11 = vunpack.i.l.bf16 %v1782_v7  ;;  %730 = vmatpush.msrb.mxu2 %v1427_v0  ;;  %v1818_v31 = vpop.permute.xlu2 %1484 }
  0xbf   : > { %v657_v13 = vsel %vm651_vm4, %v1437_v5, %v1417_v61  ;;  %v656_v14 = vsel %vm651_vm4, %v1436_v6, %v1437_v5  ;;  %1286 = vmatmul.msk.f32.vlgmr.msrb.gmra.mxu2 %vm207_vm1, %v1283_v4  ;;  %v1487_v42 = vunpack.i.h.bf16 %v1818_v31  ;;  %v1486_v43 = vunpack.i.l.bf16 %v1818_v31 }
  0xc0   : > { %708 = vmatpush.msrb.mxu1 %v657_v13  ;;  %v771_v17 = vsel %vm764_vm5, %v1431_v11, %v1432_v10  ;;  %688 = vmatpush.msrb.mxu0 %v656_v14 }
  0xc1   : > { %800 = vmatpush.msrb.mxu3 %v771_v17  ;;  %v878_v54 = vsel %vm877_vm6, %v1486_v43, %v1487_v42 }
  0xc3   : > { %801 = vmatpush.msrb.mxu3 %v769_v18 }
  0xc4   : > { %v1450_v20 = vpop.permute.xlu1 %1449 }
  0xc5   : > { %v1452_v22 = vunpack.i.h.bf16 %v1450_v20  ;;  %v1451_v23 = vunpack.i.l.bf16 %v1450_v20  ;;  %v1805_v24 = vpop.permute.xlu0 %1444  ;;  %802 = vmatpush.msrb.mxu3 %v767_v19 }
  0xc6   : > { %v1447_v25 = vunpack.i.h.bf16 %v1805_v24  ;;  %v1446_v26 = vunpack.i.l.bf16 %v1805_v24  ;;  %v1500_v44 = vpop.permute.xlu2 %1499 }
  0xc7   : > { %v655_v28 = vsel %vm651_vm4, %v1452_v22, %v1421_v63  ;;  %v654_v29 = vsel %vm651_vm4, %v1451_v23, %v1452_v22  ;;  %803 = vmatpush.msrb.mxu3 %v765_v21  ;;  %v1501_v51 = vunpack.i.l.bf16 %v1500_v44  ;;  %v1502_v56 = vunpack.i.h.bf16 %v1500_v44 }
  0xc8   : > { %709 = vmatpush.msrb.mxu1 %v655_v28  ;;  %v884_v30 = vsel %vm877_vm6, %v1446_v26, %v1447_v25  ;;  %689 = vmatpush.msrb.mxu0 %v654_v29  ;;  %v1295_v26 = vld [vmem:[%s1910_s2 + $0x38] sm:$0xff] }
  0xc9   : > { %913 = vmatpush.msra.mxu2 %v884_v30  ;;  %1288 = vmatmul.msk.f32.vlgmr.msrb.gmra.mxu3 %vm207_vm1, %v1287_v27  ;;  %v768_v59 = vsel %vm764_vm5, %v1457_v8, %v1501_v51  ;;  %v766_v63 = vsel %vm764_vm5, %v1472_v15, %v1502_v56 }
  0xcc   : > { %v1465_v32 = vpop.permute.xlu1 %1464 }
  0xcd   : > { %v1467_v33 = vunpack.i.h.bf16 %v1465_v32  ;;  %v1466_v34 = vunpack.i.l.bf16 %v1465_v32  ;;  %v1460_v35 = vpop.permute.xlu0 %1459 }
  0xce   : > { %v1462_v37 = vunpack.i.h.bf16 %v1460_v35  ;;  %v1461_v38 = vunpack.i.l.bf16 %v1460_v35  ;;  %v1845_v55 = vpop.permute.xlu2 %1514 }
  0xcf   : > { %v653_v39 = vsel %vm651_vm4, %v1467_v33, %v1427_v0  ;;  %v652_v40 = vsel %vm651_vm4, %v1466_v34, %v1467_v33  ;;  %v1517_v5 = vunpack.i.h.bf16 %v1845_v55  ;;  %v1516_v6 = vunpack.i.l.bf16 %v1845_v55 }
  0xd0   : > { %710 = vmatpush.msrb.mxu1 %v653_v39  ;;  %v882_v41 = vsel %vm877_vm6, %v1461_v38, %v1462_v37  ;;  %690 = vmatpush.msrb.mxu0 %v652_v40 }
  0xd1   : > { %914 = vmatpush.msra.mxu2 %v882_v41  ;;  %1284 = vmatmul.msk.f32.vlgmr.msrb.gmra.mxu0 %vm207_vm1, %v1283_v4  ;;  %v994_v14 = vsel %vm990_vm7, %v1516_v6, %v1517_v5  ;;  %v1299_v41 = vld [vmem:[%s1910_s2 + $0x40] sm:$0xff] }
  0xd2   : > { %1285 = vmatmul.msk.f32.vlgmr.msrb.gmra.mxu1 %vm207_vm1, %v1283_v4 }
  0xd4   : > { %v1480_v45 = vpop.permute.xlu1 %1479 }
  0xd5   : > { %v1482_v46 = vunpack.i.h.bf16 %v1480_v45  ;;  %v1481_v47 = vunpack.i.l.bf16 %v1480_v45  ;;  %v1475_v48 = vpop.permute.xlu0 %1474 }
  0xd6   : > { %v1477_v49 = vunpack.i.h.bf16 %v1475_v48  ;;  %v1476_v50 = vunpack.i.l.bf16 %v1475_v48  ;;  %v1858_v15 = vpop.permute.xlu2 %1529 }
  0xd7   : > { %840 = vmatpush.msra.mxu1 %v1481_v47  ;;  %v772_v52 = vsel %vm764_vm5, %v1432_v10, %v1481_v47  ;;  %v770_v57 = vsel %vm764_vm5, %v1442_v1, %v1482_v46  ;;  %v1531_v24 = vunpack.i.l.bf16 %v1858_v15  ;;  %v1532_v28 = vunpack.i.h.bf16 %v1858_v15 }
  0xd8   : > { %820 = vmatpush.msra.mxu0 %v772_v52  ;;  %v880_v53 = vsel %vm877_vm6, %v1476_v50, %v1477_v49 }
  0xd9   : > { %915 = vmatpush.msra.mxu2 %v880_v53  ;;  %841 = vmatpush.msra.mxu1 %v1482_v46 }
  0xda   : > { %821 = vmatpush.msra.mxu0 %v770_v57 }
  0xdb   : > { %916 = vmatpush.msra.mxu2 %v878_v54  ;;  %842 = vmatpush.msra.mxu1 %v1501_v51 }
  0xdc   : > { %v1495_v60 = vpop.permute.xlu1 %1494  ;;  %822 = vmatpush.msra.mxu0 %v768_v59  ;;  %1292 = vmatmul.msk.f32.vlgmr.msra.gmra.mxu2 %vm207_vm1, %v1291_v58 }
  0xdd   : > { %v1497_v61 = vunpack.i.h.bf16 %v1495_v60  ;;  %v1496_v36 = vunpack.i.l.bf16 %v1495_v60  ;;  %v1490_v62 = vpop.permute.xlu0 %1489  ;;  %843 = vmatpush.msra.mxu1 %v1502_v56 }
  0xde   : > { %v1492_v0 = vunpack.i.h.bf16 %v1490_v62  ;;  %v1491_v1 = vunpack.i.l.bf16 %v1490_v62  ;;  %823 = vmatpush.msra.mxu0 %v766_v63  ;;  %1290 = vmatmul.msk.f32.vlgmr.msra.gmra.mxu1 %vm207_vm1, %v1287_v27  ;;  %v1545_v30 = vpop.permute.xlu2 %1544  ;;  %v248_v63 = vpop.f32.mrf.mxu1 }
  0xdf   : > { %1289 = vmatmul.msk.f32.vlgmr.msra.gmra.mxu0 %vm207_vm1, %v1287_v27  ;;  %v998_v2 = vsel %vm990_vm7, %v1496_v36, %v1497_v61  ;;  %v1547_v32 = vunpack.i.h.bf16 %v1545_v30  ;;  %v1546_v33 = vunpack.i.l.bf16 %v1545_v30 }
  0xe0   : > { %953 = vmatpush.msrb.mxu0 %v1491_v1  ;;  %v885_v3 = vsel %vm877_vm6, %v1447_v25, %v1491_v1  ;;  %1046 = vmatpush.msrb.mxu2 %v998_v2  ;;  %v883_v4 = vsel %vm877_vm6, %v1462_v37, %v1492_v0 }
  0xe1   : > { %933 = vmatpush.msra.mxu3 %v885_v3  ;;  %v1111_v44 = vsel %vm1103_vm8, %v1546_v33, %v1531_v24 }
  0xe2   : > { %954 = vmatpush.msrb.mxu0 %v1492_v0 }
  0xe3   : > { %934 = vmatpush.msra.mxu3 %v883_v4 }
  0xe4   : > { %v1510_v7 = vpop.permute.xlu1 %1509 }
  0xe5   : > { %v1512_v8 = vunpack.i.h.bf16 %v1510_v7  ;;  %v1511_v9 = vunpack.i.l.bf16 %v1510_v7  ;;  %v1505_v10 = vpop.permute.xlu0 %1504  ;;  %v193_v7 = vld [vmem:[%s185_s22 + $0x10] sm:$0xff] }
  0xe6   : > { %v1507_v11 = vunpack.i.h.bf16 %v1505_v10  ;;  %v1506_v12 = vunpack.i.l.bf16 %v1505_v10  ;;  %v1560_v46 = vpop.permute.xlu2 %1559  ;;  %v191_v10 = vld [vmem:[%s185_s22] sm:$0xff] }
  0xe7   : > { %v996_v13 = vsel %vm990_vm7, %v1511_v9, %v1512_v8  ;;  %v1562_v53 = vunpack.i.h.bf16 %v1560_v46 }
  0xe8   : > { %955 = vmatpush.msrb.mxu0 %v1506_v12  ;;  %v881_v16 = vsel %vm877_vm6, %v1477_v49, %v1506_v12  ;;  %1047 = vmatpush.msrb.mxu2 %v996_v13  ;;  %v879_v17 = vsel %vm877_vm6, %v1487_v42, %v1507_v11  ;;  %v1561_v49 = vunpack.i.l.bf16 %v1560_v46  ;;  %v192_v12 = vld [vmem:[%s185_s22 + $0x8] sm:$0xff] }
  0xe9   : > { %935 = vmatpush.msra.mxu3 %v881_v16  ;;  %v1105_v60 = vsel %vm1103_vm8, %v1562_v53, %v1547_v32 }
  0xea   : > { %956 = vmatpush.msrb.mxu0 %v1507_v11  ;;  %1048 = vmatpush.msrb.mxu2 %v994_v14  ;;  %v1104_v59 = vsel %vm1103_vm8, %v1561_v49, %v1562_v53 }
  0xeb   : > { %936 = vmatpush.msra.mxu3 %v879_v17  ;;  %1294 = vmatmul.msk.f32.vlgmr.msrb.gmra.mxu0 %vm207_vm1, %v1291_v58  ;;  %v272_v17 = vadd.f32 %v248_v63, %v192_v12 }
  0xec   : > { %1293 = vmatmul.msk.f32.vlgmr.msra.gmra.mxu3 %vm207_vm1, %v1291_v58 }
  0xed   : > { %v1525_v18 = vpop.permute.xlu1 %1524  ;;  %1066 = vmatpush.msrb.mxu3 %v1497_v61  ;;  %v268_v61 = vpop.f32.mrf.mxu2 }
  0xee   : > { %v1527_v19 = vunpack.i.h.bf16 %v1525_v18  ;;  %v1526_v20 = vunpack.i.l.bf16 %v1525_v18  ;;  %v1520_v21 = vpop.permute.xlu0 %1519 }
  0xef   : > { %v1522_v22 = vunpack.i.h.bf16 %v1520_v21  ;;  %v1521_v23 = vunpack.i.l.bf16 %v1520_v21  ;;  %1067 = vmatpush.msrb.mxu3 %v1512_v8 }
  0xf0   : > { %v997_v25 = vsel %vm990_vm7, %v1526_v20, %v1496_v36  ;;  %v995_v29 = vsel %vm990_vm7, %v1527_v19, %v1511_v9  ;;  %v228_v36 = vpop.f32.mrf.mxu0  ;;  %v273_v9 = vadd.f32 %v268_v61, %v193_v7 }
  0xf1   : > { %1026 = vmatpush.msrb.mxu1 %v997_v25  ;;  %v992_v27 = vsel %vm990_vm7, %v1521_v23, %v1522_v22  ;;  %1068 = vmatpush.msrb.mxu3 %v1517_v5  ;;  %v271_v14 = vadd.f32 %v228_v36, %v191_v10 }
  0xf2   : > { %1049 = vmatpush.msrb.mxu2 %v992_v27 }
  0xf3   : > { %1297 = vmatmul.msk.f32.vlgmr.msrb.gmra.mxu2 %vm207_vm1, %v1295_v26  ;;  %1027 = vmatpush.msrb.mxu1 %v995_v29 }
  0xf4   : > { %1069 = vmatpush.msrb.mxu3 %v1522_v22  ;;  %1179 = vmatpush.msra.mxu2 %v1531_v24 }
  0xf5   : > { %1298 = vmatmul.msk.f32.vlgmr.msrb.gmra.mxu3 %vm207_vm1, %v1295_v26  ;;  %v1540_v31 = vpop.permute.xlu1 %1539 }
  0xf6   : > { %1180 = vmatpush.msra.mxu2 %v1532_v28  ;;  %v1542_v34 = vunpack.i.h.bf16 %v1540_v31  ;;  %v1541_v35 = vunpack.i.l.bf16 %v1540_v31  ;;  %v1535_v37 = vpop.permute.xlu0 %1534 }
  0xf7   : > { %v1537_v38 = vunpack.i.h.bf16 %v1535_v37  ;;  %v1536_v39 = vunpack.i.l.bf16 %v1535_v37 }
  0xf8   : > { %1181 = vmatpush.msra.mxu2 %v1541_v35  ;;  %v1110_v40 = vsel %vm1103_vm8, %v1542_v34, %v1546_v33 }
  0xf9   : > { %v993_v42 = vsel %vm990_vm7, %v1536_v39, %v1516_v6  ;;  %1139 = vmatpush.msra.mxu0 %v1110_v40  ;;  %v991_v43 = vsel %vm990_vm7, %v1537_v38, %v1521_v23 }
  0xfa   : > { %1028 = vmatpush.msrb.mxu1 %v993_v42  ;;  %1182 = vmatpush.msra.mxu2 %v1547_v32 }
  0xfb   : > { %1302 = vmatmul.msk.f32.vlgmr.msra.gmra.mxu2 %vm207_vm1, %v1299_v41 }
  0xfc   : > { %1029 = vmatpush.msrb.mxu1 %v991_v43 }
  0xfd   : > { %1296 = vmatmul.msk.f32.vlgmr.msrb.gmra.mxu1 %vm207_vm1, %v1295_v26  ;;  %v1555_v45 = vpop.permute.xlu1 %1554 }
  0xfe   : > { %1159 = vmatpush.msra.mxu1 %v1111_v44  ;;  %v1556_v47 = vunpack.i.l.bf16 %v1555_v45  ;;  %v1550_v48 = vpop.permute.xlu0 %1549  ;;  %v1557_v50 = vunpack.i.h.bf16 %v1555_v45 }
  0xff   : > { %v1552_v51 = vunpack.i.h.bf16 %v1550_v48  ;;  %v1551_v52 = vunpack.i.l.bf16 %v1550_v48 }
 0x100   : > { %v1106_v57 = vsel %vm1103_vm8, %v1556_v47, %v1557_v50  ;;  %v1107_v58 = vsel %vm1103_vm8, %v1557_v50, %v1541_v35 }
 0x101   : > { %v1108_v54 = vsel %vm1103_vm8, %v1551_v52, %v1552_v51  ;;  %v1109_v56 = vsel %vm1103_vm8, %v1552_v51, %v1532_v28 }
 0x102   : > { %1140 = vmatpush.msra.mxu0 %v1108_v54  ;;  %1160 = vmatpush.msra.mxu1 %v1109_v56 }
 0x104   : > { %1141 = vmatpush.msra.mxu0 %v1106_v57  ;;  %1161 = vmatpush.msra.mxu1 %v1107_v58 }
 0x106   : > { %1142 = vmatpush.msra.mxu0 %v1104_v59  ;;  %1162 = vmatpush.msra.mxu1 %v1105_v60 }
 0x107   : > { %1300 = vmatmul.msk.f32.vlgmr.msra.gmra.mxu0 %vm207_vm1, %v1299_v41  ;;  %1301 = vmatmul.msk.f32.vlgmr.msra.gmra.mxu1 %vm207_vm1, %v1299_v41 }
 0x10e   : > { %v393_v2 = vpop.f32.mrf.mxu1 }
 0x10f   : > { %v398_v15 = vadd.f32 %v393_v2, %v273_v9 }
 0x113   : > { %v373_v1 = vpop.f32.mrf.mxu0 }
 0x114   : > { %v397_v21 = vadd.f32 %v373_v1, %v272_v17 }
 0x118   : > { %v353_v62 = vpop.f32.mrf.mxu3 }
 0x119   : > { %v396_v18 = vadd.f32 %v353_v62, %v271_v14 }
 0x121   : > { %v506_v4 = vpop.f32.mrf.mxu0 }
 0x122   : > { %v511_v19 = vadd.f32 %v506_v4, %v398_v15 }
 0x129   : > { %v486_v55 = vpop.f32.mrf.mxu3 }
 0x12a   : > { %v466_v0 = vpop.f32.mrf.mxu2  ;;  %v510_v26 = vadd.f32 %v486_v55, %v397_v21 }
 0x12b   : > { %v509_v24 = vadd.f32 %v466_v0, %v396_v18 }
 0x134   : > { %v579_v6 = vpop.f32.mrf.mxu1 }
 0x135   : > { %v622_v28 = vadd.f32 %v579_v6, %v509_v24 }
 0x136   : > { %v619_v5 = vpop.f32.mrf.mxu3 }
 0x137   : > { %v599_v3 = vpop.f32.mrf.mxu2  ;;  %v624_v25 = vadd.f32 %v619_v5, %v511_v19 }
 0x138   : > { %v623_v31 = vadd.f32 %v599_v3, %v510_v26 }
 0x142   : > { %v732_v8 = vpop.f32.mrf.mxu2 }
 0x143   : > { %v737_v29 = vadd.f32 %v732_v8, %v624_v25 }
 0x14c   : > { %v805_v13 = vpop.f32.mrf.mxu3 }
 0x14e   : > { %v692_v11 = vpop.f32.mrf.mxu0 }
 0x14f   : > { %v712_v16 = vpop.f32.mrf.mxu1  ;;  %v735_v33 = vadd.f32 %v692_v11, %v622_v28 }
 0x150   : > { %v736_v37 = vadd.f32 %v712_v16, %v623_v31 }
 0x151   : > { %v848_v40 = vadd.f32 %v805_v13, %v735_v33 }
 0x15b   : > { %v845_v27 = vpop.f32.mrf.mxu1 }
 0x15c   : > { %v825_v22 = vpop.f32.mrf.mxu0  ;;  %v850_v34 = vadd.f32 %v845_v27, %v737_v29 }
 0x15d   : > { %v849_v43 = vadd.f32 %v825_v22, %v736_v37 }
 0x15f   : > { %v918_v20 = vpop.f32.mrf.mxu2 }
 0x160   : > { %v961_v45 = vadd.f32 %v918_v20, %v848_v40 }
 0x168   : > { %v958_v32 = vpop.f32.mrf.mxu0 }
 0x169   : > { %v963_v38 = vadd.f32 %v958_v32, %v850_v34 }
 0x16f   : > { %v938_v23 = vpop.f32.mrf.mxu3 }
 0x170   : > { %v962_v46 = vadd.f32 %v938_v23, %v849_v43 }
 0x176   : > { %v1051_v30 = vpop.f32.mrf.mxu2 }
 0x177   : > { %v1075_v47 = vadd.f32 %v1051_v30, %v962_v46 }
 0x178   : > { %v1071_v35 = vpop.f32.mrf.mxu3 }
 0x179   : > { %v1076_v41 = vadd.f32 %v1071_v35, %v963_v38 }
 0x17a   : > { %v1031_v39 = vpop.f32.mrf.mxu1 }
 0x17b   : > { %v1074_v48 = vadd.f32 %v1031_v39, %v961_v45 }
 0x17e   : > { %v1184_v42 = vpop.f32.mrf.mxu2 }
 0x17f   : > { %v1189_v44 = vadd.f32 %v1184_v42, %v1076_v41 }
 0x181   : > { %1192 = vst.msk [vmem:[%s190_s25 + $0x10] sm:$0xff] %vm207_vm1, %v1189_v44 }
 0x184   : > { %v1144_v49 = vpop.f32.mrf.mxu0  ;;  %v1164_v50 = vpop.f32.mrf.mxu1 }
 0x185   : > { %v1187_v51 = vadd.f32 %v1144_v49, %v1074_v48  ;;  %v1188_v52 = vadd.f32 %v1164_v50, %v1075_v47 }
 0x187   : > { %1190 = vst [vmem:[%s190_s25] sm:$0xff] %v1187_v51 }
 0x188   : > { %1191 = vst [vmem:[%s190_s25 + $0x8] sm:$0xff] %v1188_v52 }
 0x189 PF: > { %s13_s12 = sadd.s32 1, %s1569_s12  }
 0x18a   : > { %p10_p4 = scmp.ge.s32.totalorder %s13_s12, 4  }
 0x18c   :  { %12 = sbr.rel (!%p10_p4) target bundleno = 1 (0x1), region = 73 }

</bundles_post_ra>
